<compile_context>
chip_gen: v6e
topology: v6e:2x2x1
jax: 0.10.0
libtpu: 0.0.40
codegen_flags: <defaults>
</compile_context>

<pallas_src>
import functools

import jax
import jax.numpy as jnp
from jax.experimental import pallas as pl
from jax.experimental.pallas import tpu as pltpu

BN_EPS = 1e-5
LEAKY_SLOPE = 0.2
ACT_DTYPE = jnp.bfloat16          # inter-stage activation / matmul operand dtype
VMEM_LIMIT = 32 * 1024 * 1024


# ---------------------------------------------------------------------------
# Fused BasicBlock kernel:
#   conv3x3 (banded matmuls) -> BN batch stats -> BN affine + LeakyReLU
#   [-> final 1x1 conv] -> x2 nearest upsample -> dense store
# ---------------------------------------------------------------------------
def _block_kernel(x_ref, wm_ref, smat_ref, dmat_ref, gmat_ref, emat_ref,
                  gamma_ref, beta_ref, *rest, has_post):
    if has_post:
        wpost_ref, o_ref, zbuf = rest
    else:
        o_ref, zbuf = rest

    B = x_ref.shape[0]
    H = x_ref.shape[1]
    Nup = zbuf.shape[2]
    Cout = gmat_ref.shape[1]

    # ---- pass 1: conv3x3 as 3 banded matmuls (taps + width-x2 folded into wm)
    lane_sum = jnp.zeros((1, Nup), jnp.float32)
    lane_sqs = jnp.zeros((1, Nup), jnp.float32)
    for b in range(B):
        xb = x_ref[b]                                     # (H, W*Cin) bf16
        # Vertical halo via 0/1 shift matrices (zero rows at the edges).
        x_up = jnp.dot(smat_ref[0], xb,
                       preferred_element_type=jnp.float32).astype(xb.dtype)
        x_dn = jnp.dot(smat_ref[1], xb,
                       preferred_element_type=jnp.float32).astype(xb.dtype)
        z = jnp.dot(x_up, wm_ref[0], preferred_element_type=jnp.float32)
        z = z + jnp.dot(xb, wm_ref[1], preferred_element_type=jnp.float32)
        z = z + jnp.dot(x_dn, wm_ref[2], preferred_element_type=jnp.float32)
        zbuf[b] = z                                       # stays in VMEM scratch
        lane_sum = lane_sum + jnp.sum(z, axis=0, keepdims=True)
        lane_sqs = lane_sqs + jnp.sum(z * z, axis=0, keepdims=True)

    # ---- BatchNorm batch statistics (training mode, biased variance).
    # Width-duplicated lanes replicate every value the same number of times,
    # so mean/var over them equal the true per-channel statistics.
    count = float(B * H * (Nup // Cout))
    ch_sum = jnp.dot(lane_sum, gmat_ref[...], preferred_element_type=jnp.float32)
    ch_sqs = jnp.dot(lane_sqs, gmat_ref[...], preferred_element_type=jnp.float32)
    mean = ch_sum / count
    var = jnp.maximum(ch_sqs / count - mean * mean, 0.0)
    scale_c = gamma_ref[...] * jax.lax.rsqrt(var + BN_EPS)    # (1, Cout)
    shift_c = beta_ref[...] - mean * scale_c
    # Expand per-channel affine to the lane-merged (W*C) layout via 0/1 matmul.
    scale_l = jnp.dot(scale_c, emat_ref[...], preferred_element_type=jnp.float32)
    shift_l = jnp.dot(shift_c, emat_ref[...], preferred_element_type=jnp.float32)

    # ---- pass 2: affine + LeakyReLU (+ fused final 1x1 conv) + x2 upsample
    for b in range(B):
        z = zbuf[b] * scale_l + shift_l
        z = jnp.where(z > 0, z, LEAKY_SLOPE * z)
        zo = z.astype(ACT_DTYPE)
        if has_post:
            # Final 1x1 conv + width x2 nearest, folded into one banded matmul.
            zo = jnp.dot(zo, wpost_ref[...],
                         preferred_element_type=jnp.float32).astype(ACT_DTYPE)
        # Height x2 nearest via 0/1 row-duplication matmul -> one dense store.
        zd = jnp.dot(dmat_ref[...], zo, preferred_element_type=jnp.float32)
        o_ref[b] = zd.astype(o_ref.dtype)


# ---------------------------------------------------------------------------
# Weight / helper-matrix preprocessing (tiny XLA glue, runs on weights only)
# ---------------------------------------------------------------------------
def _band_matrix(w3, W, up_w):
    """(3,3,Cin,Cout) conv weights -> (3, W*Cin, u*W*Cout) banded matrices.

    mats[ky][xi*Cin+ci, (u*xo+r)*Cout+co] = w3[ky, xi-xo+1, ci, co] when
    |xi-xo| <= 1 else 0.  Horizontal zero-padding is implicit (band clipped at
    the edges); u=2 additionally folds the x2 nearest width upsample.
    """
    _, _, Cin, Cout = w3.shape
    u = 2 if up_w else 1
    xi = jnp.arange(W)[:, None]
    xo = jnp.arange(W)[None, :]
    d = xi - xo + 1
    valid = ((d >= 0) & (d <= 2)).astype(w3.dtype)
    dcl = jnp.clip(d, 0, 2)
    mats = []
    for ky in range(3):
        a = w3[ky]                                        # (3, Cin, Cout)
        t = a[dcl] * valid[:, :, None, None]              # (W, W, Cin, Cout)
        t = jnp.transpose(t, (0, 2, 1, 3))                # (xi, Cin, xo, Cout)
        t = jnp.broadcast_to(t[:, :, :, None, :], (W, Cin, W, u, Cout))
        mats.append(t.reshape(W * Cin, W * u * Cout))
    return jnp.stack(mats, axis=0)


def _post_matrix(wfin, W):
    """Final 1x1 conv fused with width x2 nearest: (W*Ci) -> (2*W*Co)."""
    Ci, Co = wfin.shape
    eye = jnp.eye(W, dtype=wfin.dtype)
    t = eye[:, None, :, None, None] * wfin[None, :, None, None, :]
    t = jnp.broadcast_to(t, (W, Ci, W, 2, Co))
    return t.reshape(W * Ci, W * 2 * Co)


def _group_mats(Nup, Cout):
    """0/1 matrices: reduce lane groups -> channels, and expand channels -> lanes."""
    l = jnp.arange(Nup)[:, None] % Cout
    c = jnp.arange(Cout)[None, :]
    g = (l == c).astype(jnp.float32)                      # (Nup, Cout)
    return g, jnp.transpose(g)                            # reduce, expand


def _shift_mats(H):
    """0/1 vertical shift matrices: row y of (S @ x) is x[y-1] / x[y+1] (0 at edges)."""
    y = jnp.arange(H)[:, None]
    j = jnp.arange(H)[None, :]
    s_up = (j == y - 1).astype(ACT_DTYPE)
    s_dn = (j == y + 1).astype(ACT_DTYPE)
    return jnp.stack([s_up, s_dn], axis=0)                # (2, H, H)


def _dup_mat(H):
    """0/1 row-duplication matrix for nearest x2 height upsample: (2H, H)."""
    r = jnp.arange(2 * H)[:, None] // 2
    y = jnp.arange(H)[None, :]
    return (r == y).astype(ACT_DTYPE)


def _whole_spec(shape):
    nd = len(shape)
    return pl.BlockSpec(shape, lambda i, _nd=nd: (0,) * _nd)


def _fused_block(x, wm, smat, dmat, gmat, emat, gamma, beta, wpost, out_dtype):
    """One pallas_call: conv3x3 + BN + LeakyReLU (+ final 1x1) + x2 upsample."""
    B, H, _ = x.shape
    Nup = wm.shape[-1]
    Nout = wpost.shape[-1] if wpost is not None else Nup
    has_post = wpost is not None

    inputs = [x, wm, smat, dmat, gmat, emat, gamma, beta]
    in_specs = [_whole_spec(a.shape) for a in inputs]
    if has_post:
        inputs.append(wpost)
        in_specs.append(_whole_spec(wpost.shape))

    return pl.pallas_call(
        functools.partial(_block_kernel, has_post=has_post),
        out_shape=jax.ShapeDtypeStruct((B, 2 * H, Nout), out_dtype),
        grid=(1,),
        in_specs=in_specs,
        out_specs=pl.BlockSpec((B, 2 * H, Nout), lambda i: (0, 0, 0)),
        scratch_shapes=[pltpu.VMEM((B, H, Nup), jnp.float32)],
        compiler_params=pltpu.CompilerParams(
            dimension_semantics=("arbitrary",),
            vmem_limit_bytes=VMEM_LIMIT),
    )(*inputs)


# ---------------------------------------------------------------------------
# Parameters (deterministic, synthetic)
# ---------------------------------------------------------------------------
def init_decoder_params(key, out_channels, latent_dim, input_dim, num_blocks=4):
    ks = jax.random.split(key, 2 + 3 * num_blocks)
    params = {
        # upblock conv1x1: latent_dim -> input_dim (bias=False in the module)
        "w_up": 0.1 * jax.random.normal(ks[0], (latent_dim, input_dim), jnp.float32),
        # final conv1x1: out_channels -> out_channels (bias=False in the module)
        "w_final": 0.1 * jax.random.normal(ks[1], (out_channels, out_channels),
                                           jnp.float32),
    }
    dims, c = [], input_dim
    for _ in range(num_blocks - 1):
        dims.append((c, c // 2))
        c //= 2
    dims.append((c, out_channels))
    blocks = []
    for i, (ci, co) in enumerate(dims):
        kw, kg, kb = ks[2 + 3 * i: 2 + 3 * (i + 1)]
        blocks.append(dict(
            # (ky, kx, cin, cout).  Conv bias omitted: exactly cancelled by the
            # training-mode BatchNorm mean subtraction.
            w=0.1 * jax.random.normal(kw, (3, 3, ci, co), jnp.float32),
            gamma=1.0 + 0.1 * jax.random.normal(kg, (co,), jnp.float32),
            beta=0.1 * jax.random.normal(kb, (co,), jnp.float32),
        ))
    params["blocks"] = blocks
    return params


# ---------------------------------------------------------------------------
# Full decoder forward (NCHW in / NCHW out)
# ---------------------------------------------------------------------------
def decoder_forward(x_nchw, params):
    B = x_nchw.shape[0]
    out_channels = params["w_final"].shape[1]

    # NCHW -> NHWC, x4 nearest repeat of the tiny latent (pure glue), then the
    # lane-dense merged (B, H, W*C) layout used by every kernel.
    x = jnp.transpose(x_nchw, (0, 2, 3, 1))
    x = jnp.repeat(jnp.repeat(x, 4, axis=1), 4, axis=2).astype(ACT_DTYPE)
    _, H, W, Cin = x.shape
    x = x.reshape(B, H, W * Cin)

    blocks = params["blocks"]
    nb = len(blocks)
    for i, blk in enumerate(blocks):
        w3 = blk["w"]
        if i == 0:
            # Fold the upblock 1x1 conv into block-0's 3x3 weights (both linear,
            # no nonlinearity in between -> exact).
            w3 = jnp.einsum("ld,yxdc->yxlc", params["w_up"], w3)
        Cout = w3.shape[-1]
        last = (i == nb - 1)

        wm = _band_matrix(w3, W, up_w=not last).astype(ACT_DTYPE)
        Nup = wm.shape[-1]
        gmat, emat = _group_mats(Nup, Cout)
        smat = _shift_mats(H)
        dmat = _dup_mat(H)
        wpost = _post_matrix(params["w_final"], W).astype(ACT_DTYPE) if last else None
        gamma = blk["gamma"].reshape(1, Cout).astype(jnp.float32)
        beta = blk["beta"].reshape(1, Cout).astype(jnp.float32)

        x = _fused_block(x, wm, smat, dmat, gmat, emat, gamma, beta, wpost,
                         out_dtype=jnp.float32 if last else ACT_DTYPE)
        H, W = 2 * H, 2 * W
        Cin = out_channels if last else Cout

    x = x.reshape(B, H, W, Cin)                # free split of the merged lanes
    return jnp.transpose(x, (0, 3, 1, 2))      # NHWC -> NCHW


if __name__ == "__main__":
    key = jax.random.PRNGKey(0)
    kx, kp = jax.random.split(key)

    B, latent_dim, input_dim, out_channels = 2, 8, 32, 3
    Hlat = Wlat = 2
    num_blocks = 4

    x = jax.random.normal(kx, (B, latent_dim, Hlat, Wlat), jnp.float32)
    params = init_decoder_params(kp, out_channels, latent_dim, input_dim,
                                 num_blocks=num_blocks)

    fwd = jax.jit(decoder_forward)
    out = jax.block_until_ready(fwd(x, params))

    expected_shape = (B, out_channels,
                      Hlat * 4 * (2 ** num_blocks),
                      Wlat * 4 * (2 ** num_blocks))
    assert out.shape == expected_shape, (out.shape, expected_shape)
    assert bool(jnp.all(jnp.isfinite(out)))
    print("KERNEL_OK")
</pallas_src>

<mosaic_0001>
module attributes {stable_mosaic.version = 11 : i64} {
  func.func @_block_kernel(%arg0: i32, %arg1: memref<2x8x64xbf16, #tpu.memory_space<vmem>>, %arg2: memref<3x64x256xbf16, #tpu.memory_space<vmem>>, %arg3: memref<2x8x8xbf16, #tpu.memory_space<vmem>>, %arg4: memref<16x8xbf16, #tpu.memory_space<vmem>>, %arg5: memref<256x16xf32, #tpu.memory_space<vmem>>, %arg6: memref<16x256xf32, #tpu.memory_space<vmem>>, %arg7: memref<1x16xf32, #tpu.memory_space<vmem>>, %arg8: memref<1x16xf32, #tpu.memory_space<vmem>>, %arg9: memref<2x16x256xbf16, #tpu.memory_space<vmem>>, %arg10: memref<2x8x256xf32, #tpu.memory_space<vmem>>) attributes {dimension_semantics = [#tpu.dimension_semantics<arbitrary>], iteration_bounds = array<i64: 1>, scalar_prefetch = 0 : i64, scratch_operands = 1 : i64, tpu.core_type = #tpu.core_type<tc>, window_params = [{pipeline_mode = #tpu.pipeline_mode<synchronous>, transform_indices = @transform_0, window_bounds = array<i64: 2, 8, 64>}, {pipeline_mode = #tpu.pipeline_mode<synchronous>, transform_indices = @transform_1, window_bounds = array<i64: 3, 64, 256>}, {pipeline_mode = #tpu.pipeline_mode<synchronous>, transform_indices = @transform_2, window_bounds = array<i64: 2, 8, 8>}, {pipeline_mode = #tpu.pipeline_mode<synchronous>, transform_indices = @transform_3, window_bounds = array<i64: 16, 8>}, {pipeline_mode = #tpu.pipeline_mode<synchronous>, transform_indices = @transform_4, window_bounds = array<i64: 256, 16>}, {pipeline_mode = #tpu.pipeline_mode<synchronous>, transform_indices = @transform_5, window_bounds = array<i64: 16, 256>}, {pipeline_mode = #tpu.pipeline_mode<synchronous>, transform_indices = @transform_6, window_bounds = array<i64: 1, 16>}, {pipeline_mode = #tpu.pipeline_mode<synchronous>, transform_indices = @transform_7, window_bounds = array<i64: 1, 16>}, {pipeline_mode = #tpu.pipeline_mode<synchronous>, transform_indices = @transform_8, window_bounds = array<i64: 2, 16, 256>}]} {
    %cst = arith.constant 0.000000e+00 : f32
    %0 = vector.broadcast %cst : f32 to vector<1x256xf32>
    %cst_0 = arith.constant 0.000000e+00 : f32
    %1 = vector.broadcast %cst_0 : f32 to vector<1x256xf32>
    %c0 = arith.constant 0 : index
    %c0_1 = arith.constant 0 : index
    %c0_2 = arith.constant 0 : index
    %2 = vector.load %arg1[%c0, %c0_1, %c0_2] : memref<2x8x64xbf16, #tpu.memory_space<vmem>>, vector<1x8x64xbf16>
    %3 = vector.shape_cast %2 : vector<1x8x64xbf16> to vector<8x64xbf16>
    %c0_3 = arith.constant 0 : index
    %c0_4 = arith.constant 0 : index
    %c0_5 = arith.constant 0 : index
    %4 = vector.load %arg3[%c0_3, %c0_4, %c0_5] : memref<2x8x8xbf16, #tpu.memory_space<vmem>>, vector<1x8x8xbf16>
    %5 = vector.shape_cast %4 : vector<1x8x8xbf16> to vector<8x8xbf16>
    %cst_6 = arith.constant dense<0.000000e+00> : vector<8x64xf32>
    %6 = tpu.matmul %5, %3, %cst_6 {dimension_numbers = #tpu.dot_dimension_numbers<[1], [0], [0], [1], [0, 0, 1, 1], [], []>} : vector<8x8xbf16>, vector<8x64xbf16>, vector<8x64xf32> -> vector<8x64xf32>
    %7 = arith.truncf %6 : vector<8x64xf32> to vector<8x64xbf16>
    %c1 = arith.constant 1 : index
    %c0_7 = arith.constant 0 : index
    %c0_8 = arith.constant 0 : index
    %8 = vector.load %arg3[%c1, %c0_7, %c0_8] : memref<2x8x8xbf16, #tpu.memory_space<vmem>>, vector<1x8x8xbf16>
    %9 = vector.shape_cast %8 : vector<1x8x8xbf16> to vector<8x8xbf16>
    %cst_9 = arith.constant dense<0.000000e+00> : vector<8x64xf32>
    %10 = tpu.matmul %9, %3, %cst_9 {dimension_numbers = #tpu.dot_dimension_numbers<[1], [0], [0], [1], [0, 0, 1, 1], [], []>} : vector<8x8xbf16>, vector<8x64xbf16>, vector<8x64xf32> -> vector<8x64xf32>
    %11 = arith.truncf %10 : vector<8x64xf32> to vector<8x64xbf16>
    %c0_10 = arith.constant 0 : index
    %c0_11 = arith.constant 0 : index
    %c0_12 = arith.constant 0 : index
    %12 = vector.load %arg2[%c0_10, %c0_11, %c0_12] : memref<3x64x256xbf16, #tpu.memory_space<vmem>>, vector<1x64x256xbf16>
    %13 = vector.shape_cast %12 : vector<1x64x256xbf16> to vector<64x256xbf16>
    %cst_13 = arith.constant dense<0.000000e+00> : vector<8x256xf32>
    %14 = tpu.matmul %7, %13, %cst_13 {dimension_numbers = #tpu.dot_dimension_numbers<[1], [0], [0], [1], [0, 0, 1, 1], [], []>} : vector<8x64xbf16>, vector<64x256xbf16>, vector<8x256xf32> -> vector<8x256xf32>
    %c1_14 = arith.constant 1 : index
    %c0_15 = arith.constant 0 : index
    %c0_16 = arith.constant 0 : index
    %15 = vector.load %arg2[%c1_14, %c0_15, %c0_16] : memref<3x64x256xbf16, #tpu.memory_space<vmem>>, vector<1x64x256xbf16>
    %16 = vector.shape_cast %15 : vector<1x64x256xbf16> to vector<64x256xbf16>
    %cst_17 = arith.constant dense<0.000000e+00> : vector<8x256xf32>
    %17 = tpu.matmul %3, %16, %cst_17 {dimension_numbers = #tpu.dot_dimension_numbers<[1], [0], [0], [1], [0, 0, 1, 1], [], []>} : vector<8x64xbf16>, vector<64x256xbf16>, vector<8x256xf32> -> vector<8x256xf32>
    %18 = arith.addf %14, %17 : vector<8x256xf32>
    %c2 = arith.constant 2 : index
    %c0_18 = arith.constant 0 : index
    %c0_19 = arith.constant 0 : index
    %19 = vector.load %arg2[%c2, %c0_18, %c0_19] : memref<3x64x256xbf16, #tpu.memory_space<vmem>>, vector<1x64x256xbf16>
    %20 = vector.shape_cast %19 : vector<1x64x256xbf16> to vector<64x256xbf16>
    %cst_20 = arith.constant dense<0.000000e+00> : vector<8x256xf32>
    %21 = tpu.matmul %11, %20, %cst_20 {dimension_numbers = #tpu.dot_dimension_numbers<[1], [0], [0], [1], [0, 0, 1, 1], [], []>} : vector<8x64xbf16>, vector<64x256xbf16>, vector<8x256xf32> -> vector<8x256xf32>
    %22 = arith.addf %18, %21 : vector<8x256xf32>
    %c0_21 = arith.constant 0 : index
    %c0_22 = arith.constant 0 : index
    %c0_23 = arith.constant 0 : index
    %23 = vector.load %arg10[%c0_21, %c0_22, %c0_23] : memref<2x8x256xf32, #tpu.memory_space<vmem>>, vector<1x8x256xf32>
    %24 = vector.shape_cast %23 : vector<1x8x256xf32> to vector<8x256xf32>
    %25 = vector.shape_cast %22 : vector<8x256xf32> to vector<1x8x256xf32>
    tpu.vector_store %arg10[%c0_21, %c0_22, %c0_23], %25 {strides = array<i32>} : memref<2x8x256xf32, #tpu.memory_space<vmem>>, vector<1x8x256xf32>,
    %cst_24 = arith.constant dense<0.000000e+00> : vector<256xf32>
    %26 = vector.multi_reduction <add>, %22, %cst_24 [0] : vector<8x256xf32> to vector<256xf32>
    %27 = vector.shape_cast %26 : vector<256xf32> to vector<1x256xf32>
    %28 = arith.addf %0, %27 : vector<1x256xf32>
    %29 = arith.mulf %22, %22 : vector<8x256xf32>
    %cst_25 = arith.constant dense<0.000000e+00> : vector<256xf32>
    %30 = vector.multi_reduction <add>, %29, %cst_25 [0] : vector<8x256xf32> to vector<256xf32>
    %31 = vector.shape_cast %30 : vector<256xf32> to vector<1x256xf32>
    %32 = arith.addf %1, %31 : vector<1x256xf32>
    %c1_26 = arith.constant 1 : index
    %c0_27 = arith.constant 0 : index
    %c0_28 = arith.constant 0 : index
    %33 = vector.load %arg1[%c1_26, %c0_27, %c0_28] : memref<2x8x64xbf16, #tpu.memory_space<vmem>>, vector<1x8x64xbf16>
    %34 = vector.shape_cast %33 : vector<1x8x64xbf16> to vector<8x64xbf16>
    %c0_29 = arith.constant 0 : index
    %c0_30 = arith.constant 0 : index
    %c0_31 = arith.constant 0 : index
    %35 = vector.load %arg3[%c0_29, %c0_30, %c0_31] : memref<2x8x8xbf16, #tpu.memory_space<vmem>>, vector<1x8x8xbf16>
    %36 = vector.shape_cast %35 : vector<1x8x8xbf16> to vector<8x8xbf16>
    %cst_32 = arith.constant dense<0.000000e+00> : vector<8x64xf32>
    %37 = tpu.matmul %36, %34, %cst_32 {dimension_numbers = #tpu.dot_dimension_numbers<[1], [0], [0], [1], [0, 0, 1, 1], [], []>} : vector<8x8xbf16>, vector<8x64xbf16>, vector<8x64xf32> -> vector<8x64xf32>
    %38 = arith.truncf %37 : vector<8x64xf32> to vector<8x64xbf16>
    %c1_33 = arith.constant 1 : index
    %c0_34 = arith.constant 0 : index
    %c0_35 = arith.constant 0 : index
    %39 = vector.load %arg3[%c1_33, %c0_34, %c0_35] : memref<2x8x8xbf16, #tpu.memory_space<vmem>>, vector<1x8x8xbf16>
    %40 = vector.shape_cast %39 : vector<1x8x8xbf16> to vector<8x8xbf16>
    %cst_36 = arith.constant dense<0.000000e+00> : vector<8x64xf32>
    %41 = tpu.matmul %40, %34, %cst_36 {dimension_numbers = #tpu.dot_dimension_numbers<[1], [0], [0], [1], [0, 0, 1, 1], [], []>} : vector<8x8xbf16>, vector<8x64xbf16>, vector<8x64xf32> -> vector<8x64xf32>
    %42 = arith.truncf %41 : vector<8x64xf32> to vector<8x64xbf16>
    %c0_37 = arith.constant 0 : index
    %c0_38 = arith.constant 0 : index
    %c0_39 = arith.constant 0 : index
    %43 = vector.load %arg2[%c0_37, %c0_38, %c0_39] : memref<3x64x256xbf16, #tpu.memory_space<vmem>>, vector<1x64x256xbf16>
    %44 = vector.shape_cast %43 : vector<1x64x256xbf16> to vector<64x256xbf16>
    %cst_40 = arith.constant dense<0.000000e+00> : vector<8x256xf32>
    %45 = tpu.matmul %38, %44, %cst_40 {dimension_numbers = #tpu.dot_dimension_numbers<[1], [0], [0], [1], [0, 0, 1, 1], [], []>} : vector<8x64xbf16>, vector<64x256xbf16>, vector<8x256xf32> -> vector<8x256xf32>
    %c1_41 = arith.constant 1 : index
    %c0_42 = arith.constant 0 : index
    %c0_43 = arith.constant 0 : index
    %46 = vector.load %arg2[%c1_41, %c0_42, %c0_43] : memref<3x64x256xbf16, #tpu.memory_space<vmem>>, vector<1x64x256xbf16>
    %47 = vector.shape_cast %46 : vector<1x64x256xbf16> to vector<64x256xbf16>
    %cst_44 = arith.constant dense<0.000000e+00> : vector<8x256xf32>
    %48 = tpu.matmul %34, %47, %cst_44 {dimension_numbers = #tpu.dot_dimension_numbers<[1], [0], [0], [1], [0, 0, 1, 1], [], []>} : vector<8x64xbf16>, vector<64x256xbf16>, vector<8x256xf32> -> vector<8x256xf32>
    %49 = arith.addf %45, %48 : vector<8x256xf32>
    %c2_45 = arith.constant 2 : index
    %c0_46 = arith.constant 0 : index
    %c0_47 = arith.constant 0 : index
    %50 = vector.load %arg2[%c2_45, %c0_46, %c0_47] : memref<3x64x256xbf16, #tpu.memory_space<vmem>>, vector<1x64x256xbf16>
    %51 = vector.shape_cast %50 : vector<1x64x256xbf16> to vector<64x256xbf16>
    %cst_48 = arith.constant dense<0.000000e+00> : vector<8x256xf32>
    %52 = tpu.matmul %42, %51, %cst_48 {dimension_numbers = #tpu.dot_dimension_numbers<[1], [0], [0], [1], [0, 0, 1, 1], [], []>} : vector<8x64xbf16>, vector<64x256xbf16>, vector<8x256xf32> -> vector<8x256xf32>
    %53 = arith.addf %49, %52 : vector<8x256xf32>
    %c1_49 = arith.constant 1 : index
    %c0_50 = arith.constant 0 : index
    %c0_51 = arith.constant 0 : index
    %54 = vector.load %arg10[%c1_49, %c0_50, %c0_51] : memref<2x8x256xf32, #tpu.memory_space<vmem>>, vector<1x8x256xf32>
    %55 = vector.shape_cast %54 : vector<1x8x256xf32> to vector<8x256xf32>
    %56 = vector.shape_cast %53 : vector<8x256xf32> to vector<1x8x256xf32>
    tpu.vector_store %arg10[%c1_49, %c0_50, %c0_51], %56 {strides = array<i32>} : memref<2x8x256xf32, #tpu.memory_space<vmem>>, vector<1x8x256xf32>,
    %cst_52 = arith.constant dense<0.000000e+00> : vector<256xf32>
    %57 = vector.multi_reduction <add>, %53, %cst_52 [0] : vector<8x256xf32> to vector<256xf32>
    %58 = vector.shape_cast %57 : vector<256xf32> to vector<1x256xf32>
    %59 = arith.addf %28, %58 : vector<1x256xf32>
    %60 = arith.mulf %53, %53 : vector<8x256xf32>
    %cst_53 = arith.constant dense<0.000000e+00> : vector<256xf32>
    %61 = vector.multi_reduction <add>, %60, %cst_53 [0] : vector<8x256xf32> to vector<256xf32>
    %62 = vector.shape_cast %61 : vector<256xf32> to vector<1x256xf32>
    %63 = arith.addf %32, %62 : vector<1x256xf32>
    %c0_54 = arith.constant 0 : index
    %c0_55 = arith.constant 0 : index
    %64 = vector.load %arg5[%c0_54, %c0_55] : memref<256x16xf32, #tpu.memory_space<vmem>>, vector<256x16xf32>
    %cst_56 = arith.constant dense<0.000000e+00> : vector<1x16xf32>
    %65 = tpu.matmul %59, %64, %cst_56 {dimension_numbers = #tpu.dot_dimension_numbers<[1], [0], [0], [1], [0, 0, 1, 1], [], []>} : vector<1x256xf32>, vector<256x16xf32>, vector<1x16xf32> -> vector<1x16xf32>
    %c0_57 = arith.constant 0 : index
    %c0_58 = arith.constant 0 : index
    %66 = vector.load %arg5[%c0_57, %c0_58] : memref<256x16xf32, #tpu.memory_space<vmem>>, vector<256x16xf32>
    %cst_59 = arith.constant dense<0.000000e+00> : vector<1x16xf32>
    %67 = tpu.matmul %63, %66, %cst_59 {dimension_numbers = #tpu.dot_dimension_numbers<[1], [0], [0], [1], [0, 0, 1, 1], [], []>} : vector<1x256xf32>, vector<256x16xf32>, vector<1x16xf32> -> vector<1x16xf32>
    %cst_60 = arith.constant 2.560000e+02 : f32
    %68 = vector.broadcast %cst_60 : f32 to vector<1x16xf32>
    %69 = arith.divf %65, %68 : vector<1x16xf32>
    %cst_61 = arith.constant 2.560000e+02 : f32
    %70 = vector.broadcast %cst_61 : f32 to vector<1x16xf32>
    %71 = arith.divf %67, %70 : vector<1x16xf32>
    %72 = arith.mulf %69, %69 : vector<1x16xf32>
    %73 = arith.subf %71, %72 : vector<1x16xf32>
    %cst_62 = arith.constant 0.000000e+00 : f32
    %74 = vector.broadcast %cst_62 : f32 to vector<1x16xf32>
    %75 = arith.maximumf %73, %74 : vector<1x16xf32>
    %c0_63 = arith.constant 0 : index
    %c0_64 = arith.constant 0 : index
    %76 = vector.load %arg7[%c0_63, %c0_64] : memref<1x16xf32, #tpu.memory_space<vmem>>, vector<1x16xf32>
    %cst_65 = arith.constant 9.99999974E-6 : f32
    %77 = vector.broadcast %cst_65 : f32 to vector<1x16xf32>
    %78 = arith.addf %75, %77 : vector<1x16xf32>
    %79 = math.rsqrt %78 : vector<1x16xf32>
    %80 = arith.mulf %76, %79 : vector<1x16xf32>
    %c0_66 = arith.constant 0 : index
    %c0_67 = arith.constant 0 : index
    %81 = vector.load %arg8[%c0_66, %c0_67] : memref<1x16xf32, #tpu.memory_space<vmem>>, vector<1x16xf32>
    %82 = arith.mulf %69, %80 : vector<1x16xf32>
    %83 = arith.subf %81, %82 : vector<1x16xf32>
    %c0_68 = arith.constant 0 : index
    %c0_69 = arith.constant 0 : index
    %84 = vector.load %arg6[%c0_68, %c0_69] : memref<16x256xf32, #tpu.memory_space<vmem>>, vector<16x256xf32>
    %cst_70 = arith.constant dense<0.000000e+00> : vector<1x256xf32>
    %85 = tpu.matmul %80, %84, %cst_70 {dimension_numbers = #tpu.dot_dimension_numbers<[1], [0], [0], [1], [0, 0, 1, 1], [], []>} : vector<1x16xf32>, vector<16x256xf32>, vector<1x256xf32> -> vector<1x256xf32>
    %c0_71 = arith.constant 0 : index
    %c0_72 = arith.constant 0 : index
    %86 = vector.load %arg6[%c0_71, %c0_72] : memref<16x256xf32, #tpu.memory_space<vmem>>, vector<16x256xf32>
    %cst_73 = arith.constant dense<0.000000e+00> : vector<1x256xf32>
    %87 = tpu.matmul %83, %86, %cst_73 {dimension_numbers = #tpu.dot_dimension_numbers<[1], [0], [0], [1], [0, 0, 1, 1], [], []>} : vector<1x16xf32>, vector<16x256xf32>, vector<1x256xf32> -> vector<1x256xf32>
    %c0_74 = arith.constant 0 : index
    %c0_75 = arith.constant 0 : index
    %c0_76 = arith.constant 0 : index
    %88 = vector.load %arg10[%c0_74, %c0_75, %c0_76] : memref<2x8x256xf32, #tpu.memory_space<vmem>>, vector<1x8x256xf32>
    %89 = vector.shape_cast %88 : vector<1x8x256xf32> to vector<8x256xf32>
    %90 = vector.broadcast %85 : vector<1x256xf32> to vector<8x256xf32>
    %91 = arith.mulf %89, %90 : vector<8x256xf32>
    %92 = vector.broadcast %87 : vector<1x256xf32> to vector<8x256xf32>
    %93 = arith.addf %91, %92 : vector<8x256xf32>
    %cst_77 = arith.constant 0.000000e+00 : f32
    %94 = vector.broadcast %cst_77 : f32 to vector<8x256xf32>
    %95 = arith.cmpf ogt, %93, %94 : vector<8x256xf32>
    %cst_78 = arith.constant 2.000000e-01 : f32
    %96 = vector.broadcast %cst_78 : f32 to vector<8x256xf32>
    %97 = arith.mulf %96, %93 : vector<8x256xf32>
    %98 = arith.select %95, %93, %97 : vector<8x256xi1>, vector<8x256xf32>
    %99 = arith.truncf %98 : vector<8x256xf32> to vector<8x256xbf16>
    %c0_79 = arith.constant 0 : index
    %c0_80 = arith.constant 0 : index
    %100 = vector.load %arg4[%c0_79, %c0_80] : memref<16x8xbf16, #tpu.memory_space<vmem>>, vector<16x8xbf16>
    %cst_81 = arith.constant dense<0.000000e+00> : vector<16x256xf32>
    %101 = tpu.matmul %100, %99, %cst_81 {dimension_numbers = #tpu.dot_dimension_numbers<[1], [0], [0], [1], [0, 0, 1, 1], [], []>} : vector<16x8xbf16>, vector<8x256xbf16>, vector<16x256xf32> -> vector<16x256xf32>
    %102 = arith.truncf %101 : vector<16x256xf32> to vector<16x256xbf16>
    %c0_82 = arith.constant 0 : index
    %c0_83 = arith.constant 0 : index
    %c0_84 = arith.constant 0 : index
    %103 = vector.load %arg9[%c0_82, %c0_83, %c0_84] : memref<2x16x256xbf16, #tpu.memory_space<vmem>>, vector<1x16x256xbf16>
    %104 = vector.shape_cast %103 : vector<1x16x256xbf16> to vector<16x256xbf16>
    %105 = vector.shape_cast %102 : vector<16x256xbf16> to vector<1x16x256xbf16>
    tpu.vector_store %arg9[%c0_82, %c0_83, %c0_84], %105 {strides = array<i32>} : memref<2x16x256xbf16, #tpu.memory_space<vmem>>, vector<1x16x256xbf16>,
    %c1_85 = arith.constant 1 : index
    %c0_86 = arith.constant 0 : index
    %c0_87 = arith.constant 0 : index
    %106 = vector.load %arg10[%c1_85, %c0_86, %c0_87] : memref<2x8x256xf32, #tpu.memory_space<vmem>>, vector<1x8x256xf32>
    %107 = vector.shape_cast %106 : vector<1x8x256xf32> to vector<8x256xf32>
    %108 = vector.broadcast %85 : vector<1x256xf32> to vector<8x256xf32>
    %109 = arith.mulf %107, %108 : vector<8x256xf32>
    %110 = vector.broadcast %87 : vector<1x256xf32> to vector<8x256xf32>
    %111 = arith.addf %109, %110 : vector<8x256xf32>
    %cst_88 = arith.constant 0.000000e+00 : f32
    %112 = vector.broadcast %cst_88 : f32 to vector<8x256xf32>
    %113 = arith.cmpf ogt, %111, %112 : vector<8x256xf32>
    %cst_89 = arith.constant 2.000000e-01 : f32
    %114 = vector.broadcast %cst_89 : f32 to vector<8x256xf32>
    %115 = arith.mulf %114, %111 : vector<8x256xf32>
    %116 = arith.select %113, %111, %115 : vector<8x256xi1>, vector<8x256xf32>
    %117 = arith.truncf %116 : vector<8x256xf32> to vector<8x256xbf16>
    %c0_90 = arith.constant 0 : index
    %c0_91 = arith.constant 0 : index
    %118 = vector.load %arg4[%c0_90, %c0_91] : memref<16x8xbf16, #tpu.memory_space<vmem>>, vector<16x8xbf16>
    %cst_92 = arith.constant dense<0.000000e+00> : vector<16x256xf32>
    %119 = tpu.matmul %118, %117, %cst_92 {dimension_numbers = #tpu.dot_dimension_numbers<[1], [0], [0], [1], [0, 0, 1, 1], [], []>} : vector<16x8xbf16>, vector<8x256xbf16>, vector<16x256xf32> -> vector<16x256xf32>
    %120 = arith.truncf %119 : vector<16x256xf32> to vector<16x256xbf16>
    %c1_93 = arith.constant 1 : index
    %c0_94 = arith.constant 0 : index
    %c0_95 = arith.constant 0 : index
    %121 = vector.load %arg9[%c1_93, %c0_94, %c0_95] : memref<2x16x256xbf16, #tpu.memory_space<vmem>>, vector<1x16x256xbf16>
    %122 = vector.shape_cast %121 : vector<1x16x256xbf16> to vector<16x256xbf16>
    %123 = vector.shape_cast %120 : vector<16x256xbf16> to vector<1x16x256xbf16>
    tpu.vector_store %arg9[%c1_93, %c0_94, %c0_95], %123 {strides = array<i32>} : memref<2x16x256xbf16, #tpu.memory_space<vmem>>, vector<1x16x256xbf16>,
    return
  }
  func.func @transform_0(%arg0: i32) -> (i32, i32, i32) {
    %c0_i32 = arith.constant 0 : i32
    %c0_i32_0 = arith.constant 0 : i32
    %c0_i32_1 = arith.constant 0 : i32
    %c0_i32_2 = arith.constant 0 : i32
    return %c0_i32, %c0_i32_0, %c0_i32_1 : i32, i32, i32
  }
  func.func @transform_1(%arg0: i32) -> (i32, i32, i32) {
    %c0_i32 = arith.constant 0 : i32
    %c0_i32_0 = arith.constant 0 : i32
    %c0_i32_1 = arith.constant 0 : i32
    %c0_i32_2 = arith.constant 0 : i32
    return %c0_i32, %c0_i32_0, %c0_i32_1 : i32, i32, i32
  }
  func.func @transform_2(%arg0: i32) -> (i32, i32, i32) {
    %c0_i32 = arith.constant 0 : i32
    %c0_i32_0 = arith.constant 0 : i32
    %c0_i32_1 = arith.constant 0 : i32
    %c0_i32_2 = arith.constant 0 : i32
    return %c0_i32, %c0_i32_0, %c0_i32_1 : i32, i32, i32
  }
  func.func @transform_3(%arg0: i32) -> (i32, i32) {
    %c0_i32 = arith.constant 0 : i32
    %c0_i32_0 = arith.constant 0 : i32
    %c0_i32_1 = arith.constant 0 : i32
    return %c0_i32, %c0_i32_0 : i32, i32
  }
  func.func @transform_4(%arg0: i32) -> (i32, i32) {
    %c0_i32 = arith.constant 0 : i32
    %c0_i32_0 = arith.constant 0 : i32
    %c0_i32_1 = arith.constant 0 : i32
    return %c0_i32, %c0_i32_0 : i32, i32
  }
  func.func @transform_5(%arg0: i32) -> (i32, i32) {
    %c0_i32 = arith.constant 0 : i32
    %c0_i32_0 = arith.constant 0 : i32
    %c0_i32_1 = arith.constant 0 : i32
    return %c0_i32, %c0_i32_0 : i32, i32
  }
  func.func @transform_6(%arg0: i32) -> (i32, i32) {
    %c0_i32 = arith.constant 0 : i32
    %c0_i32_0 = arith.constant 0 : i32
    %c0_i32_1 = arith.constant 0 : i32
    return %c0_i32, %c0_i32_0 : i32, i32
  }
  func.func @transform_7(%arg0: i32) -> (i32, i32) {
    %c0_i32 = arith.constant 0 : i32
    %c0_i32_0 = arith.constant 0 : i32
    %c0_i32_1 = arith.constant 0 : i32
    return %c0_i32, %c0_i32_0 : i32, i32
  }
  func.func @transform_8(%arg0: i32) -> (i32, i32, i32) {
    %c0_i32 = arith.constant 0 : i32
    %c0_i32_0 = arith.constant 0 : i32
    %c0_i32_1 = arith.constant 0 : i32
    %c0_i32_2 = arith.constant 0 : i32
    return %c0_i32, %c0_i32_0, %c0_i32_1 : i32, i32, i32
  }
}

module attributes {stable_mosaic.version = 11 : i64} {
  func.func @_block_kernel(%arg0: i32, %arg1: memref<2x16x256xbf16, #tpu.memory_space<vmem>>, %arg2: memref<3x256x256xbf16, #tpu.memory_space<vmem>>, %arg3: memref<2x16x16xbf16, #tpu.memory_space<vmem>>, %arg4: memref<32x16xbf16, #tpu.memory_space<vmem>>, %arg5: memref<256x8xf32, #tpu.memory_space<vmem>>, %arg6: memref<8x256xf32, #tpu.memory_space<vmem>>, %arg7: memref<1x8xf32, #tpu.memory_space<vmem>>, %arg8: memref<1x8xf32, #tpu.memory_space<vmem>>, %arg9: memref<2x32x256xbf16, #tpu.memory_space<vmem>>, %arg10: memref<2x16x256xf32, #tpu.memory_space<vmem>>) attributes {dimension_semantics = [#tpu.dimension_semantics<arbitrary>], iteration_bounds = array<i64: 1>, scalar_prefetch = 0 : i64, scratch_operands = 1 : i64, tpu.core_type = #tpu.core_type<tc>, window_params = [{pipeline_mode = #tpu.pipeline_mode<synchronous>, transform_indices = @transform_0, window_bounds = array<i64: 2, 16, 256>}, {pipeline_mode = #tpu.pipeline_mode<synchronous>, transform_indices = @transform_1, window_bounds = array<i64: 3, 256, 256>}, {pipeline_mode = #tpu.pipeline_mode<synchronous>, transform_indices = @transform_2, window_bounds = array<i64: 2, 16, 16>}, {pipeline_mode = #tpu.pipeline_mode<synchronous>, transform_indices = @transform_3, window_bounds = array<i64: 32, 16>}, {pipeline_mode = #tpu.pipeline_mode<synchronous>, transform_indices = @transform_4, window_bounds = array<i64: 256, 8>}, {pipeline_mode = #tpu.pipeline_mode<synchronous>, transform_indices = @transform_5, window_bounds = array<i64: 8, 256>}, {pipeline_mode = #tpu.pipeline_mode<synchronous>, transform_indices = @transform_6, window_bounds = array<i64: 1, 8>}, {pipeline_mode = #tpu.pipeline_mode<synchronous>, transform_indices = @transform_7, window_bounds = array<i64: 1, 8>}, {pipeline_mode = #tpu.pipeline_mode<synchronous>, transform_indices = @transform_8, window_bounds = array<i64: 2, 32, 256>}]} {
    %cst = arith.constant 0.000000e+00 : f32
    %0 = vector.broadcast %cst : f32 to vector<1x256xf32>
    %cst_0 = arith.constant 0.000000e+00 : f32
    %1 = vector.broadcast %cst_0 : f32 to vector<1x256xf32>
    %c0 = arith.constant 0 : index
    %c0_1 = arith.constant 0 : index
    %c0_2 = arith.constant 0 : index
    %2 = vector.load %arg1[%c0, %c0_1, %c0_2] : memref<2x16x256xbf16, #tpu.memory_space<vmem>>, vector<1x16x256xbf16>
    %3 = vector.shape_cast %2 : vector<1x16x256xbf16> to vector<16x256xbf16>
    %c0_3 = arith.constant 0 : index
    %c0_4 = arith.constant 0 : index
    %c0_5 = arith.constant 0 : index
    %4 = vector.load %arg3[%c0_3, %c0_4, %c0_5] : memref<2x16x16xbf16, #tpu.memory_space<vmem>>, vector<1x16x16xbf16>
    %5 = vector.shape_cast %4 : vector<1x16x16xbf16> to vector<16x16xbf16>
    %cst_6 = arith.constant dense<0.000000e+00> : vector<16x256xf32>
    %6 = tpu.matmul %5, %3, %cst_6 {dimension_numbers = #tpu.dot_dimension_numbers<[1], [0], [0], [1], [0, 0, 1, 1], [], []>} : vector<16x16xbf16>, vector<16x256xbf16>, vector<16x256xf32> -> vector<16x256xf32>
    %7 = arith.truncf %6 : vector<16x256xf32> to vector<16x256xbf16>
    %c1 = arith.constant 1 : index
    %c0_7 = arith.constant 0 : index
    %c0_8 = arith.constant 0 : index
    %8 = vector.load %arg3[%c1, %c0_7, %c0_8] : memref<2x16x16xbf16, #tpu.memory_space<vmem>>, vector<1x16x16xbf16>
    %9 = vector.shape_cast %8 : vector<1x16x16xbf16> to vector<16x16xbf16>
    %cst_9 = arith.constant dense<0.000000e+00> : vector<16x256xf32>
    %10 = tpu.matmul %9, %3, %cst_9 {dimension_numbers = #tpu.dot_dimension_numbers<[1], [0], [0], [1], [0, 0, 1, 1], [], []>} : vector<16x16xbf16>, vector<16x256xbf16>, vector<16x256xf32> -> vector<16x256xf32>
    %11 = arith.truncf %10 : vector<16x256xf32> to vector<16x256xbf16>
    %c0_10 = arith.constant 0 : index
    %c0_11 = arith.constant 0 : index
    %c0_12 = arith.constant 0 : index
    %12 = vector.load %arg2[%c0_10, %c0_11, %c0_12] : memref<3x256x256xbf16, #tpu.memory_space<vmem>>, vector<1x256x256xbf16>
    %13 = vector.shape_cast %12 : vector<1x256x256xbf16> to vector<256x256xbf16>
    %cst_13 = arith.constant dense<0.000000e+00> : vector<16x256xf32>
    %14 = tpu.matmul %7, %13, %cst_13 {dimension_numbers = #tpu.dot_dimension_numbers<[1], [0], [0], [1], [0, 0, 1, 1], [], []>} : vector<16x256xbf16>, vector<256x256xbf16>, vector<16x256xf32> -> vector<16x256xf32>
    %c1_14 = arith.constant 1 : index
    %c0_15 = arith.constant 0 : index
    %c0_16 = arith.constant 0 : index
    %15 = vector.load %arg2[%c1_14, %c0_15, %c0_16] : memref<3x256x256xbf16, #tpu.memory_space<vmem>>, vector<1x256x256xbf16>
    %16 = vector.shape_cast %15 : vector<1x256x256xbf16> to vector<256x256xbf16>
    %cst_17 = arith.constant dense<0.000000e+00> : vector<16x256xf32>
    %17 = tpu.matmul %3, %16, %cst_17 {dimension_numbers = #tpu.dot_dimension_numbers<[1], [0], [0], [1], [0, 0, 1, 1], [], []>} : vector<16x256xbf16>, vector<256x256xbf16>, vector<16x256xf32> -> vector<16x256xf32>
    %18 = arith.addf %14, %17 : vector<16x256xf32>
    %c2 = arith.constant 2 : index
    %c0_18 = arith.constant 0 : index
    %c0_19 = arith.constant 0 : index
    %19 = vector.load %arg2[%c2, %c0_18, %c0_19] : memref<3x256x256xbf16, #tpu.memory_space<vmem>>, vector<1x256x256xbf16>
    %20 = vector.shape_cast %19 : vector<1x256x256xbf16> to vector<256x256xbf16>
    %cst_20 = arith.constant dense<0.000000e+00> : vector<16x256xf32>
    %21 = tpu.matmul %11, %20, %cst_20 {dimension_numbers = #tpu.dot_dimension_numbers<[1], [0], [0], [1], [0, 0, 1, 1], [], []>} : vector<16x256xbf16>, vector<256x256xbf16>, vector<16x256xf32> -> vector<16x256xf32>
    %22 = arith.addf %18, %21 : vector<16x256xf32>
    %c0_21 = arith.constant 0 : index
    %c0_22 = arith.constant 0 : index
    %c0_23 = arith.constant 0 : index
    %23 = vector.load %arg10[%c0_21, %c0_22, %c0_23] : memref<2x16x256xf32, #tpu.memory_space<vmem>>, vector<1x16x256xf32>
    %24 = vector.shape_cast %23 : vector<1x16x256xf32> to vector<16x256xf32>
    %25 = vector.shape_cast %22 : vector<16x256xf32> to vector<1x16x256xf32>
    tpu.vector_store %arg10[%c0_21, %c0_22, %c0_23], %25 {strides = array<i32>} : memref<2x16x256xf32, #tpu.memory_space<vmem>>, vector<1x16x256xf32>,
    %cst_24 = arith.constant dense<0.000000e+00> : vector<256xf32>
    %26 = vector.multi_reduction <add>, %22, %cst_24 [0] : vector<16x256xf32> to vector<256xf32>
    %27 = vector.shape_cast %26 : vector<256xf32> to vector<1x256xf32>
    %28 = arith.addf %0, %27 : vector<1x256xf32>
    %29 = arith.mulf %22, %22 : vector<16x256xf32>
    %cst_25 = arith.constant dense<0.000000e+00> : vector<256xf32>
    %30 = vector.multi_reduction <add>, %29, %cst_25 [0] : vector<16x256xf32> to vector<256xf32>
    %31 = vector.shape_cast %30 : vector<256xf32> to vector<1x256xf32>
    %32 = arith.addf %1, %31 : vector<1x256xf32>
    %c1_26 = arith.constant 1 : index
    %c0_27 = arith.constant 0 : index
    %c0_28 = arith.constant 0 : index
    %33 = vector.load %arg1[%c1_26, %c0_27, %c0_28] : memref<2x16x256xbf16, #tpu.memory_space<vmem>>, vector<1x16x256xbf16>
    %34 = vector.shape_cast %33 : vector<1x16x256xbf16> to vector<16x256xbf16>
    %c0_29 = arith.constant 0 : index
    %c0_30 = arith.constant 0 : index
    %c0_31 = arith.constant 0 : index
    %35 = vector.load %arg3[%c0_29, %c0_30, %c0_31] : memref<2x16x16xbf16, #tpu.memory_space<vmem>>, vector<1x16x16xbf16>
    %36 = vector.shape_cast %35 : vector<1x16x16xbf16> to vector<16x16xbf16>
    %cst_32 = arith.constant dense<0.000000e+00> : vector<16x256xf32>
    %37 = tpu.matmul %36, %34, %cst_32 {dimension_numbers = #tpu.dot_dimension_numbers<[1], [0], [0], [1], [0, 0, 1, 1], [], []>} : vector<16x16xbf16>, vector<16x256xbf16>, vector<16x256xf32> -> vector<16x256xf32>
    %38 = arith.truncf %37 : vector<16x256xf32> to vector<16x256xbf16>
    %c1_33 = arith.constant 1 : index
    %c0_34 = arith.constant 0 : index
    %c0_35 = arith.constant 0 : index
    %39 = vector.load %arg3[%c1_33, %c0_34, %c0_35] : memref<2x16x16xbf16, #tpu.memory_space<vmem>>, vector<1x16x16xbf16>
    %40 = vector.shape_cast %39 : vector<1x16x16xbf16> to vector<16x16xbf16>
    %cst_36 = arith.constant dense<0.000000e+00> : vector<16x256xf32>
    %41 = tpu.matmul %40, %34, %cst_36 {dimension_numbers = #tpu.dot_dimension_numbers<[1], [0], [0], [1], [0, 0, 1, 1], [], []>} : vector<16x16xbf16>, vector<16x256xbf16>, vector<16x256xf32> -> vector<16x256xf32>
    %42 = arith.truncf %41 : vector<16x256xf32> to vector<16x256xbf16>
    %c0_37 = arith.constant 0 : index
    %c0_38 = arith.constant 0 : index
    %c0_39 = arith.constant 0 : index
    %43 = vector.load %arg2[%c0_37, %c0_38, %c0_39] : memref<3x256x256xbf16, #tpu.memory_space<vmem>>, vector<1x256x256xbf16>
    %44 = vector.shape_cast %43 : vector<1x256x256xbf16> to vector<256x256xbf16>
    %cst_40 = arith.constant dense<0.000000e+00> : vector<16x256xf32>
    %45 = tpu.matmul %38, %44, %cst_40 {dimension_numbers = #tpu.dot_dimension_numbers<[1], [0], [0], [1], [0, 0, 1, 1], [], []>} : vector<16x256xbf16>, vector<256x256xbf16>, vector<16x256xf32> -> vector<16x256xf32>
    %c1_41 = arith.constant 1 : index
    %c0_42 = arith.constant 0 : index
    %c0_43 = arith.constant 0 : index
    %46 = vector.load %arg2[%c1_41, %c0_42, %c0_43] : memref<3x256x256xbf16, #tpu.memory_space<vmem>>, vector<1x256x256xbf16>
    %47 = vector.shape_cast %46 : vector<1x256x256xbf16> to vector<256x256xbf16>
    %cst_44 = arith.constant dense<0.000000e+00> : vector<16x256xf32>
    %48 = tpu.matmul %34, %47, %cst_44 {dimension_numbers = #tpu.dot_dimension_numbers<[1], [0], [0], [1], [0, 0, 1, 1], [], []>} : vector<16x256xbf16>, vector<256x256xbf16>, vector<16x256xf32> -> vector<16x256xf32>
    %49 = arith.addf %45, %48 : vector<16x256xf32>
    %c2_45 = arith.constant 2 : index
    %c0_46 = arith.constant 0 : index
    %c0_47 = arith.constant 0 : index
    %50 = vector.load %arg2[%c2_45, %c0_46, %c0_47] : memref<3x256x256xbf16, #tpu.memory_space<vmem>>, vector<1x256x256xbf16>
    %51 = vector.shape_cast %50 : vector<1x256x256xbf16> to vector<256x256xbf16>
    %cst_48 = arith.constant dense<0.000000e+00> : vector<16x256xf32>
    %52 = tpu.matmul %42, %51, %cst_48 {dimension_numbers = #tpu.dot_dimension_numbers<[1], [0], [0], [1], [0, 0, 1, 1], [], []>} : vector<16x256xbf16>, vector<256x256xbf16>, vector<16x256xf32> -> vector<16x256xf32>
    %53 = arith.addf %49, %52 : vector<16x256xf32>
    %c1_49 = arith.constant 1 : index
    %c0_50 = arith.constant 0 : index
    %c0_51 = arith.constant 0 : index
    %54 = vector.load %arg10[%c1_49, %c0_50, %c0_51] : memref<2x16x256xf32, #tpu.memory_space<vmem>>, vector<1x16x256xf32>
    %55 = vector.shape_cast %54 : vector<1x16x256xf32> to vector<16x256xf32>
    %56 = vector.shape_cast %53 : vector<16x256xf32> to vector<1x16x256xf32>
    tpu.vector_store %arg10[%c1_49, %c0_50, %c0_51], %56 {strides = array<i32>} : memref<2x16x256xf32, #tpu.memory_space<vmem>>, vector<1x16x256xf32>,
    %cst_52 = arith.constant dense<0.000000e+00> : vector<256xf32>
    %57 = vector.multi_reduction <add>, %53, %cst_52 [0] : vector<16x256xf32> to vector<256xf32>
    %58 = vector.shape_cast %57 : vector<256xf32> to vector<1x256xf32>
    %59 = arith.addf %28, %58 : vector<1x256xf32>
    %60 = arith.mulf %53, %53 : vector<16x256xf32>
    %cst_53 = arith.constant dense<0.000000e+00> : vector<256xf32>
    %61 = vector.multi_reduction <add>, %60, %cst_53 [0] : vector<16x256xf32> to vector<256xf32>
    %62 = vector.shape_cast %61 : vector<256xf32> to vector<1x256xf32>
    %63 = arith.addf %32, %62 : vector<1x256xf32>
    %c0_54 = arith.constant 0 : index
    %c0_55 = arith.constant 0 : index
    %64 = vector.load %arg5[%c0_54, %c0_55] : memref<256x8xf32, #tpu.memory_space<vmem>>, vector<256x8xf32>
    %cst_56 = arith.constant dense<0.000000e+00> : vector<1x8xf32>
    %65 = tpu.matmul %59, %64, %cst_56 {dimension_numbers = #tpu.dot_dimension_numbers<[1], [0], [0], [1], [0, 0, 1, 1], [], []>} : vector<1x256xf32>, vector<256x8xf32>, vector<1x8xf32> -> vector<1x8xf32>
    %c0_57 = arith.constant 0 : index
    %c0_58 = arith.constant 0 : index
    %66 = vector.load %arg5[%c0_57, %c0_58] : memref<256x8xf32, #tpu.memory_space<vmem>>, vector<256x8xf32>
    %cst_59 = arith.constant dense<0.000000e+00> : vector<1x8xf32>
    %67 = tpu.matmul %63, %66, %cst_59 {dimension_numbers = #tpu.dot_dimension_numbers<[1], [0], [0], [1], [0, 0, 1, 1], [], []>} : vector<1x256xf32>, vector<256x8xf32>, vector<1x8xf32> -> vector<1x8xf32>
    %cst_60 = arith.constant 1.024000e+03 : f32
    %68 = vector.broadcast %cst_60 : f32 to vector<1x8xf32>
    %69 = arith.divf %65, %68 : vector<1x8xf32>
    %cst_61 = arith.constant 1.024000e+03 : f32
    %70 = vector.broadcast %cst_61 : f32 to vector<1x8xf32>
    %71 = arith.divf %67, %70 : vector<1x8xf32>
    %72 = arith.mulf %69, %69 : vector<1x8xf32>
    %73 = arith.subf %71, %72 : vector<1x8xf32>
    %cst_62 = arith.constant 0.000000e+00 : f32
    %74 = vector.broadcast %cst_62 : f32 to vector<1x8xf32>
    %75 = arith.maximumf %73, %74 : vector<1x8xf32>
    %c0_63 = arith.constant 0 : index
    %c0_64 = arith.constant 0 : index
    %76 = vector.load %arg7[%c0_63, %c0_64] : memref<1x8xf32, #tpu.memory_space<vmem>>, vector<1x8xf32>
    %cst_65 = arith.constant 9.99999974E-6 : f32
    %77 = vector.broadcast %cst_65 : f32 to vector<1x8xf32>
    %78 = arith.addf %75, %77 : vector<1x8xf32>
    %79 = math.rsqrt %78 : vector<1x8xf32>
    %80 = arith.mulf %76, %79 : vector<1x8xf32>
    %c0_66 = arith.constant 0 : index
    %c0_67 = arith.constant 0 : index
    %81 = vector.load %arg8[%c0_66, %c0_67] : memref<1x8xf32, #tpu.memory_space<vmem>>, vector<1x8xf32>
    %82 = arith.mulf %69, %80 : vector<1x8xf32>
    %83 = arith.subf %81, %82 : vector<1x8xf32>
    %c0_68 = arith.constant 0 : index
    %c0_69 = arith.constant 0 : index
    %84 = vector.load %arg6[%c0_68, %c0_69] : memref<8x256xf32, #tpu.memory_space<vmem>>, vector<8x256xf32>
    %cst_70 = arith.constant dense<0.000000e+00> : vector<1x256xf32>
    %85 = tpu.matmul %80, %84, %cst_70 {dimension_numbers = #tpu.dot_dimension_numbers<[1], [0], [0], [1], [0, 0, 1, 1], [], []>} : vector<1x8xf32>, vector<8x256xf32>, vector<1x256xf32> -> vector<1x256xf32>
    %c0_71 = arith.constant 0 : index
    %c0_72 = arith.constant 0 : index
    %86 = vector.load %arg6[%c0_71, %c0_72] : memref<8x256xf32, #tpu.memory_space<vmem>>, vector<8x256xf32>
    %cst_73 = arith.constant dense<0.000000e+00> : vector<1x256xf32>
    %87 = tpu.matmul %83, %86, %cst_73 {dimension_numbers = #tpu.dot_dimension_numbers<[1], [0], [0], [1], [0, 0, 1, 1], [], []>} : vector<1x8xf32>, vector<8x256xf32>, vector<1x256xf32> -> vector<1x256xf32>
    %c0_74 = arith.constant 0 : index
    %c0_75 = arith.constant 0 : index
    %c0_76 = arith.constant 0 : index
    %88 = vector.load %arg10[%c0_74, %c0_75, %c0_76] : memref<2x16x256xf32, #tpu.memory_space<vmem>>, vector<1x16x256xf32>
    %89 = vector.shape_cast %88 : vector<1x16x256xf32> to vector<16x256xf32>
    %90 = vector.broadcast %85 : vector<1x256xf32> to vector<16x256xf32>
    %91 = arith.mulf %89, %90 : vector<16x256xf32>
    %92 = vector.broadcast %87 : vector<1x256xf32> to vector<16x256xf32>
    %93 = arith.addf %91, %92 : vector<16x256xf32>
    %cst_77 = arith.constant 0.000000e+00 : f32
    %94 = vector.broadcast %cst_77 : f32 to vector<16x256xf32>
    %95 = arith.cmpf ogt, %93, %94 : vector<16x256xf32>
    %cst_78 = arith.constant 2.000000e-01 : f32
    %96 = vector.broadcast %cst_78 : f32 to vector<16x256xf32>
    %97 = arith.mulf %96, %93 : vector<16x256xf32>
    %98 = arith.select %95, %93, %97 : vector<16x256xi1>, vector<16x256xf32>
    %99 = arith.truncf %98 : vector<16x256xf32> to vector<16x256xbf16>
    %c0_79 = arith.constant 0 : index
    %c0_80 = arith.constant 0 : index
    %100 = vector.load %arg4[%c0_79, %c0_80] : memref<32x16xbf16, #tpu.memory_space<vmem>>, vector<32x16xbf16>
    %cst_81 = arith.constant dense<0.000000e+00> : vector<32x256xf32>
    %101 = tpu.matmul %100, %99, %cst_81 {dimension_numbers = #tpu.dot_dimension_numbers<[1], [0], [0], [1], [0, 0, 1, 1], [], []>} : vector<32x16xbf16>, vector<16x256xbf16>, vector<32x256xf32> -> vector<32x256xf32>
    %102 = arith.truncf %101 : vector<32x256xf32> to vector<32x256xbf16>
    %c0_82 = arith.constant 0 : index
    %c0_83 = arith.constant 0 : index
    %c0_84 = arith.constant 0 : index
    %103 = vector.load %arg9[%c0_82, %c0_83, %c0_84] : memref<2x32x256xbf16, #tpu.memory_space<vmem>>, vector<1x32x256xbf16>
    %104 = vector.shape_cast %103 : vector<1x32x256xbf16> to vector<32x256xbf16>
    %105 = vector.shape_cast %102 : vector<32x256xbf16> to vector<1x32x256xbf16>
    tpu.vector_store %arg9[%c0_82, %c0_83, %c0_84], %105 {strides = array<i32>} : memref<2x32x256xbf16, #tpu.memory_space<vmem>>, vector<1x32x256xbf16>,
    %c1_85 = arith.constant 1 : index
    %c0_86 = arith.constant 0 : index
    %c0_87 = arith.constant 0 : index
    %106 = vector.load %arg10[%c1_85, %c0_86, %c0_87] : memref<2x16x256xf32, #tpu.memory_space<vmem>>, vector<1x16x256xf32>
    %107 = vector.shape_cast %106 : vector<1x16x256xf32> to vector<16x256xf32>
    %108 = vector.broadcast %85 : vector<1x256xf32> to vector<16x256xf32>
    %109 = arith.mulf %107, %108 : vector<16x256xf32>
    %110 = vector.broadcast %87 : vector<1x256xf32> to vector<16x256xf32>
    %111 = arith.addf %109, %110 : vector<16x256xf32>
    %cst_88 = arith.constant 0.000000e+00 : f32
    %112 = vector.broadcast %cst_88 : f32 to vector<16x256xf32>
    %113 = arith.cmpf ogt, %111, %112 : vector<16x256xf32>
    %cst_89 = arith.constant 2.000000e-01 : f32
    %114 = vector.broadcast %cst_89 : f32 to vector<16x256xf32>
    %115 = arith.mulf %114, %111 : vector<16x256xf32>
    %116 = arith.select %113, %111, %115 : vector<16x256xi1>, vector<16x256xf32>
    %117 = arith.truncf %116 : vector<16x256xf32> to vector<16x256xbf16>
    %c0_90 = arith.constant 0 : index
    %c0_91 = arith.constant 0 : index
    %118 = vector.load %arg4[%c0_90, %c0_91] : memref<32x16xbf16, #tpu.memory_space<vmem>>, vector<32x16xbf16>
    %cst_92 = arith.constant dense<0.000000e+00> : vector<32x256xf32>
    %119 = tpu.matmul %118, %117, %cst_92 {dimension_numbers = #tpu.dot_dimension_numbers<[1], [0], [0], [1], [0, 0, 1, 1], [], []>} : vector<32x16xbf16>, vector<16x256xbf16>, vector<32x256xf32> -> vector<32x256xf32>
    %120 = arith.truncf %119 : vector<32x256xf32> to vector<32x256xbf16>
    %c1_93 = arith.constant 1 : index
    %c0_94 = arith.constant 0 : index
    %c0_95 = arith.constant 0 : index
    %121 = vector.load %arg9[%c1_93, %c0_94, %c0_95] : memref<2x32x256xbf16, #tpu.memory_space<vmem>>, vector<1x32x256xbf16>
    %122 = vector.shape_cast %121 : vector<1x32x256xbf16> to vector<32x256xbf16>
    %123 = vector.shape_cast %120 : vector<32x256xbf16> to vector<1x32x256xbf16>
    tpu.vector_store %arg9[%c1_93, %c0_94, %c0_95], %123 {strides = array<i32>} : memref<2x32x256xbf16, #tpu.memory_space<vmem>>, vector<1x32x256xbf16>,
    return
  }
  func.func @transform_0(%arg0: i32) -> (i32, i32, i32) {
    %c0_i32 = arith.constant 0 : i32
    %c0_i32_0 = arith.constant 0 : i32
    %c0_i32_1 = arith.constant 0 : i32
    %c0_i32_2 = arith.constant 0 : i32
    return %c0_i32, %c0_i32_0, %c0_i32_1 : i32, i32, i32
  }
  func.func @transform_1(%arg0: i32) -> (i32, i32, i32) {
    %c0_i32 = arith.constant 0 : i32
    %c0_i32_0 = arith.constant 0 : i32
    %c0_i32_1 = arith.constant 0 : i32
    %c0_i32_2 = arith.constant 0 : i32
    return %c0_i32, %c0_i32_0, %c0_i32_1 : i32, i32, i32
  }
  func.func @transform_2(%arg0: i32) -> (i32, i32, i32) {
    %c0_i32 = arith.constant 0 : i32
    %c0_i32_0 = arith.constant 0 : i32
    %c0_i32_1 = arith.constant 0 : i32
    %c0_i32_2 = arith.constant 0 : i32
    return %c0_i32, %c0_i32_0, %c0_i32_1 : i32, i32, i32
  }
  func.func @transform_3(%arg0: i32) -> (i32, i32) {
    %c0_i32 = arith.constant 0 : i32
    %c0_i32_0 = arith.constant 0 : i32
    %c0_i32_1 = arith.constant 0 : i32
    return %c0_i32, %c0_i32_0 : i32, i32
  }
  func.func @transform_4(%arg0: i32) -> (i32, i32) {
    %c0_i32 = arith.constant 0 : i32
    %c0_i32_0 = arith.constant 0 : i32
    %c0_i32_1 = arith.constant 0 : i32
    return %c0_i32, %c0_i32_0 : i32, i32
  }
  func.func @transform_5(%arg0: i32) -> (i32, i32) {
    %c0_i32 = arith.constant 0 : i32
    %c0_i32_0 = arith.constant 0 : i32
    %c0_i32_1 = arith.constant 0 : i32
    return %c0_i32, %c0_i32_0 : i32, i32
  }
  func.func @transform_6(%arg0: i32) -> (i32, i32) {
    %c0_i32 = arith.constant 0 : i32
    %c0_i32_0 = arith.constant 0 : i32
    %c0_i32_1 = arith.constant 0 : i32
    return %c0_i32, %c0_i32_0 : i32, i32
  }
  func.func @transform_7(%arg0: i32) -> (i32, i32) {
    %c0_i32 = arith.constant 0 : i32
    %c0_i32_0 = arith.constant 0 : i32
    %c0_i32_1 = arith.constant 0 : i32
    return %c0_i32, %c0_i32_0 : i32, i32
  }
  func.func @transform_8(%arg0: i32) -> (i32, i32, i32) {
    %c0_i32 = arith.constant 0 : i32
    %c0_i32_0 = arith.constant 0 : i32
    %c0_i32_1 = arith.constant 0 : i32
    %c0_i32_2 = arith.constant 0 : i32
    return %c0_i32, %c0_i32_0, %c0_i32_1 : i32, i32, i32
  }
}

module attributes {stable_mosaic.version = 11 : i64} {
  func.func @_block_kernel(%arg0: i32, %arg1: memref<2x32x256xbf16, #tpu.memory_space<vmem>>, %arg2: memref<3x256x256xbf16, #tpu.memory_space<vmem>>, %arg3: memref<2x32x32xbf16, #tpu.memory_space<vmem>>, %arg4: memref<64x32xbf16, #tpu.memory_space<vmem>>, %arg5: memref<256x4xf32, #tpu.memory_space<vmem>>, %arg6: memref<4x256xf32, #tpu.memory_space<vmem>>, %arg7: memref<1x4xf32, #tpu.memory_space<vmem>>, %arg8: memref<1x4xf32, #tpu.memory_space<vmem>>, %arg9: memref<2x64x256xbf16, #tpu.memory_space<vmem>>, %arg10: memref<2x32x256xf32, #tpu.memory_space<vmem>>) attributes {dimension_semantics = [#tpu.dimension_semantics<arbitrary>], iteration_bounds = array<i64: 1>, scalar_prefetch = 0 : i64, scratch_operands = 1 : i64, tpu.core_type = #tpu.core_type<tc>, window_params = [{pipeline_mode = #tpu.pipeline_mode<synchronous>, transform_indices = @transform_0, window_bounds = array<i64: 2, 32, 256>}, {pipeline_mode = #tpu.pipeline_mode<synchronous>, transform_indices = @transform_1, window_bounds = array<i64: 3, 256, 256>}, {pipeline_mode = #tpu.pipeline_mode<synchronous>, transform_indices = @transform_2, window_bounds = array<i64: 2, 32, 32>}, {pipeline_mode = #tpu.pipeline_mode<synchronous>, transform_indices = @transform_3, window_bounds = array<i64: 64, 32>}, {pipeline_mode = #tpu.pipeline_mode<synchronous>, transform_indices = @transform_4, window_bounds = array<i64: 256, 4>}, {pipeline_mode = #tpu.pipeline_mode<synchronous>, transform_indices = @transform_5, window_bounds = array<i64: 4, 256>}, {pipeline_mode = #tpu.pipeline_mode<synchronous>, transform_indices = @transform_6, window_bounds = array<i64: 1, 4>}, {pipeline_mode = #tpu.pipeline_mode<synchronous>, transform_indices = @transform_7, window_bounds = array<i64: 1, 4>}, {pipeline_mode = #tpu.pipeline_mode<synchronous>, transform_indices = @transform_8, window_bounds = array<i64: 2, 64, 256>}]} {
    %cst = arith.constant 0.000000e+00 : f32
    %0 = vector.broadcast %cst : f32 to vector<1x256xf32>
    %cst_0 = arith.constant 0.000000e+00 : f32
    %1 = vector.broadcast %cst_0 : f32 to vector<1x256xf32>
    %c0 = arith.constant 0 : index
    %c0_1 = arith.constant 0 : index
    %c0_2 = arith.constant 0 : index
    %2 = vector.load %arg1[%c0, %c0_1, %c0_2] : memref<2x32x256xbf16, #tpu.memory_space<vmem>>, vector<1x32x256xbf16>
    %3 = vector.shape_cast %2 : vector<1x32x256xbf16> to vector<32x256xbf16>
    %c0_3 = arith.constant 0 : index
    %c0_4 = arith.constant 0 : index
    %c0_5 = arith.constant 0 : index
    %4 = vector.load %arg3[%c0_3, %c0_4, %c0_5] : memref<2x32x32xbf16, #tpu.memory_space<vmem>>, vector<1x32x32xbf16>
    %5 = vector.shape_cast %4 : vector<1x32x32xbf16> to vector<32x32xbf16>
    %cst_6 = arith.constant dense<0.000000e+00> : vector<32x256xf32>
    %6 = tpu.matmul %5, %3, %cst_6 {dimension_numbers = #tpu.dot_dimension_numbers<[1], [0], [0], [1], [0, 0, 1, 1], [], []>} : vector<32x32xbf16>, vector<32x256xbf16>, vector<32x256xf32> -> vector<32x256xf32>
    %7 = arith.truncf %6 : vector<32x256xf32> to vector<32x256xbf16>
    %c1 = arith.constant 1 : index
    %c0_7 = arith.constant 0 : index
    %c0_8 = arith.constant 0 : index
    %8 = vector.load %arg3[%c1, %c0_7, %c0_8] : memref<2x32x32xbf16, #tpu.memory_space<vmem>>, vector<1x32x32xbf16>
    %9 = vector.shape_cast %8 : vector<1x32x32xbf16> to vector<32x32xbf16>
    %cst_9 = arith.constant dense<0.000000e+00> : vector<32x256xf32>
    %10 = tpu.matmul %9, %3, %cst_9 {dimension_numbers = #tpu.dot_dimension_numbers<[1], [0], [0], [1], [0, 0, 1, 1], [], []>} : vector<32x32xbf16>, vector<32x256xbf16>, vector<32x256xf32> -> vector<32x256xf32>
    %11 = arith.truncf %10 : vector<32x256xf32> to vector<32x256xbf16>
    %c0_10 = arith.constant 0 : index
    %c0_11 = arith.constant 0 : index
    %c0_12 = arith.constant 0 : index
    %12 = vector.load %arg2[%c0_10, %c0_11, %c0_12] : memref<3x256x256xbf16, #tpu.memory_space<vmem>>, vector<1x256x256xbf16>
    %13 = vector.shape_cast %12 : vector<1x256x256xbf16> to vector<256x256xbf16>
    %cst_13 = arith.constant dense<0.000000e+00> : vector<32x256xf32>
    %14 = tpu.matmul %7, %13, %cst_13 {dimension_numbers = #tpu.dot_dimension_numbers<[1], [0], [0], [1], [0, 0, 1, 1], [], []>} : vector<32x256xbf16>, vector<256x256xbf16>, vector<32x256xf32> -> vector<32x256xf32>
    %c1_14 = arith.constant 1 : index
    %c0_15 = arith.constant 0 : index
    %c0_16 = arith.constant 0 : index
    %15 = vector.load %arg2[%c1_14, %c0_15, %c0_16] : memref<3x256x256xbf16, #tpu.memory_space<vmem>>, vector<1x256x256xbf16>
    %16 = vector.shape_cast %15 : vector<1x256x256xbf16> to vector<256x256xbf16>
    %cst_17 = arith.constant dense<0.000000e+00> : vector<32x256xf32>
    %17 = tpu.matmul %3, %16, %cst_17 {dimension_numbers = #tpu.dot_dimension_numbers<[1], [0], [0], [1], [0, 0, 1, 1], [], []>} : vector<32x256xbf16>, vector<256x256xbf16>, vector<32x256xf32> -> vector<32x256xf32>
    %18 = arith.addf %14, %17 : vector<32x256xf32>
    %c2 = arith.constant 2 : index
    %c0_18 = arith.constant 0 : index
    %c0_19 = arith.constant 0 : index
    %19 = vector.load %arg2[%c2, %c0_18, %c0_19] : memref<3x256x256xbf16, #tpu.memory_space<vmem>>, vector<1x256x256xbf16>
    %20 = vector.shape_cast %19 : vector<1x256x256xbf16> to vector<256x256xbf16>
    %cst_20 = arith.constant dense<0.000000e+00> : vector<32x256xf32>
    %21 = tpu.matmul %11, %20, %cst_20 {dimension_numbers = #tpu.dot_dimension_numbers<[1], [0], [0], [1], [0, 0, 1, 1], [], []>} : vector<32x256xbf16>, vector<256x256xbf16>, vector<32x256xf32> -> vector<32x256xf32>
    %22 = arith.addf %18, %21 : vector<32x256xf32>
    %c0_21 = arith.constant 0 : index
    %c0_22 = arith.constant 0 : index
    %c0_23 = arith.constant 0 : index
    %23 = vector.load %arg10[%c0_21, %c0_22, %c0_23] : memref<2x32x256xf32, #tpu.memory_space<vmem>>, vector<1x32x256xf32>
    %24 = vector.shape_cast %23 : vector<1x32x256xf32> to vector<32x256xf32>
    %25 = vector.shape_cast %22 : vector<32x256xf32> to vector<1x32x256xf32>
    tpu.vector_store %arg10[%c0_21, %c0_22, %c0_23], %25 {strides = array<i32>} : memref<2x32x256xf32, #tpu.memory_space<vmem>>, vector<1x32x256xf32>,
    %cst_24 = arith.constant dense<0.000000e+00> : vector<256xf32>
    %26 = vector.multi_reduction <add>, %22, %cst_24 [0] : vector<32x256xf32> to vector<256xf32>
    %27 = vector.shape_cast %26 : vector<256xf32> to vector<1x256xf32>
    %28 = arith.addf %0, %27 : vector<1x256xf32>
    %29 = arith.mulf %22, %22 : vector<32x256xf32>
    %cst_25 = arith.constant dense<0.000000e+00> : vector<256xf32>
    %30 = vector.multi_reduction <add>, %29, %cst_25 [0] : vector<32x256xf32> to vector<256xf32>
    %31 = vector.shape_cast %30 : vector<256xf32> to vector<1x256xf32>
    %32 = arith.addf %1, %31 : vector<1x256xf32>
    %c1_26 = arith.constant 1 : index
    %c0_27 = arith.constant 0 : index
    %c0_28 = arith.constant 0 : index
    %33 = vector.load %arg1[%c1_26, %c0_27, %c0_28] : memref<2x32x256xbf16, #tpu.memory_space<vmem>>, vector<1x32x256xbf16>
    %34 = vector.shape_cast %33 : vector<1x32x256xbf16> to vector<32x256xbf16>
    %c0_29 = arith.constant 0 : index
    %c0_30 = arith.constant 0 : index
    %c0_31 = arith.constant 0 : index
    %35 = vector.load %arg3[%c0_29, %c0_30, %c0_31] : memref<2x32x32xbf16, #tpu.memory_space<vmem>>, vector<1x32x32xbf16>
    %36 = vector.shape_cast %35 : vector<1x32x32xbf16> to vector<32x32xbf16>
    %cst_32 = arith.constant dense<0.000000e+00> : vector<32x256xf32>
    %37 = tpu.matmul %36, %34, %cst_32 {dimension_numbers = #tpu.dot_dimension_numbers<[1], [0], [0], [1], [0, 0, 1, 1], [], []>} : vector<32x32xbf16>, vector<32x256xbf16>, vector<32x256xf32> -> vector<32x256xf32>
    %38 = arith.truncf %37 : vector<32x256xf32> to vector<32x256xbf16>
    %c1_33 = arith.constant 1 : index
    %c0_34 = arith.constant 0 : index
    %c0_35 = arith.constant 0 : index
    %39 = vector.load %arg3[%c1_33, %c0_34, %c0_35] : memref<2x32x32xbf16, #tpu.memory_space<vmem>>, vector<1x32x32xbf16>
    %40 = vector.shape_cast %39 : vector<1x32x32xbf16> to vector<32x32xbf16>
    %cst_36 = arith.constant dense<0.000000e+00> : vector<32x256xf32>
    %41 = tpu.matmul %40, %34, %cst_36 {dimension_numbers = #tpu.dot_dimension_numbers<[1], [0], [0], [1], [0, 0, 1, 1], [], []>} : vector<32x32xbf16>, vector<32x256xbf16>, vector<32x256xf32> -> vector<32x256xf32>
    %42 = arith.truncf %41 : vector<32x256xf32> to vector<32x256xbf16>
    %c0_37 = arith.constant 0 : index
    %c0_38 = arith.constant 0 : index
    %c0_39 = arith.constant 0 : index
    %43 = vector.load %arg2[%c0_37, %c0_38, %c0_39] : memref<3x256x256xbf16, #tpu.memory_space<vmem>>, vector<1x256x256xbf16>
    %44 = vector.shape_cast %43 : vector<1x256x256xbf16> to vector<256x256xbf16>
    %cst_40 = arith.constant dense<0.000000e+00> : vector<32x256xf32>
    %45 = tpu.matmul %38, %44, %cst_40 {dimension_numbers = #tpu.dot_dimension_numbers<[1], [0], [0], [1], [0, 0, 1, 1], [], []>} : vector<32x256xbf16>, vector<256x256xbf16>, vector<32x256xf32> -> vector<32x256xf32>
    %c1_41 = arith.constant 1 : index
    %c0_42 = arith.constant 0 : index
    %c0_43 = arith.constant 0 : index
    %46 = vector.load %arg2[%c1_41, %c0_42, %c0_43] : memref<3x256x256xbf16, #tpu.memory_space<vmem>>, vector<1x256x256xbf16>
    %47 = vector.shape_cast %46 : vector<1x256x256xbf16> to vector<256x256xbf16>
    %cst_44 = arith.constant dense<0.000000e+00> : vector<32x256xf32>
    %48 = tpu.matmul %34, %47, %cst_44 {dimension_numbers = #tpu.dot_dimension_numbers<[1], [0], [0], [1], [0, 0, 1, 1], [], []>} : vector<32x256xbf16>, vector<256x256xbf16>, vector<32x256xf32> -> vector<32x256xf32>
    %49 = arith.addf %45, %48 : vector<32x256xf32>
    %c2_45 = arith.constant 2 : index
    %c0_46 = arith.constant 0 : index
    %c0_47 = arith.constant 0 : index
    %50 = vector.load %arg2[%c2_45, %c0_46, %c0_47] : memref<3x256x256xbf16, #tpu.memory_space<vmem>>, vector<1x256x256xbf16>
    %51 = vector.shape_cast %50 : vector<1x256x256xbf16> to vector<256x256xbf16>
    %cst_48 = arith.constant dense<0.000000e+00> : vector<32x256xf32>
    %52 = tpu.matmul %42, %51, %cst_48 {dimension_numbers = #tpu.dot_dimension_numbers<[1], [0], [0], [1], [0, 0, 1, 1], [], []>} : vector<32x256xbf16>, vector<256x256xbf16>, vector<32x256xf32> -> vector<32x256xf32>
    %53 = arith.addf %49, %52 : vector<32x256xf32>
    %c1_49 = arith.constant 1 : index
    %c0_50 = arith.constant 0 : index
    %c0_51 = arith.constant 0 : index
    %54 = vector.load %arg10[%c1_49, %c0_50, %c0_51] : memref<2x32x256xf32, #tpu.memory_space<vmem>>, vector<1x32x256xf32>
    %55 = vector.shape_cast %54 : vector<1x32x256xf32> to vector<32x256xf32>
    %56 = vector.shape_cast %53 : vector<32x256xf32> to vector<1x32x256xf32>
    tpu.vector_store %arg10[%c1_49, %c0_50, %c0_51], %56 {strides = array<i32>} : memref<2x32x256xf32, #tpu.memory_space<vmem>>, vector<1x32x256xf32>,
    %cst_52 = arith.constant dense<0.000000e+00> : vector<256xf32>
    %57 = vector.multi_reduction <add>, %53, %cst_52 [0] : vector<32x256xf32> to vector<256xf32>
    %58 = vector.shape_cast %57 : vector<256xf32> to vector<1x256xf32>
    %59 = arith.addf %28, %58 : vector<1x256xf32>
    %60 = arith.mulf %53, %53 : vector<32x256xf32>
    %cst_53 = arith.constant dense<0.000000e+00> : vector<256xf32>
    %61 = vector.multi_reduction <add>, %60, %cst_53 [0] : vector<32x256xf32> to vector<256xf32>
    %62 = vector.shape_cast %61 : vector<256xf32> to vector<1x256xf32>
    %63 = arith.addf %32, %62 : vector<1x256xf32>
    %c0_54 = arith.constant 0 : index
    %c0_55 = arith.constant 0 : index
    %64 = vector.load %arg5[%c0_54, %c0_55] : memref<256x4xf32, #tpu.memory_space<vmem>>, vector<256x4xf32>
    %cst_56 = arith.constant dense<0.000000e+00> : vector<1x4xf32>
    %65 = tpu.matmul %59, %64, %cst_56 {dimension_numbers = #tpu.dot_dimension_numbers<[1], [0], [0], [1], [0, 0, 1, 1], [], []>} : vector<1x256xf32>, vector<256x4xf32>, vector<1x4xf32> -> vector<1x4xf32>
    %c0_57 = arith.constant 0 : index
    %c0_58 = arith.constant 0 : index
    %66 = vector.load %arg5[%c0_57, %c0_58] : memref<256x4xf32, #tpu.memory_space<vmem>>, vector<256x4xf32>
    %cst_59 = arith.constant dense<0.000000e+00> : vector<1x4xf32>
    %67 = tpu.matmul %63, %66, %cst_59 {dimension_numbers = #tpu.dot_dimension_numbers<[1], [0], [0], [1], [0, 0, 1, 1], [], []>} : vector<1x256xf32>, vector<256x4xf32>, vector<1x4xf32> -> vector<1x4xf32>
    %cst_60 = arith.constant 4.096000e+03 : f32
    %68 = vector.broadcast %cst_60 : f32 to vector<1x4xf32>
    %69 = arith.divf %65, %68 : vector<1x4xf32>
    %cst_61 = arith.constant 4.096000e+03 : f32
    %70 = vector.broadcast %cst_61 : f32 to vector<1x4xf32>
    %71 = arith.divf %67, %70 : vector<1x4xf32>
    %72 = arith.mulf %69, %69 : vector<1x4xf32>
    %73 = arith.subf %71, %72 : vector<1x4xf32>
    %cst_62 = arith.constant 0.000000e+00 : f32
    %74 = vector.broadcast %cst_62 : f32 to vector<1x4xf32>
    %75 = arith.maximumf %73, %74 : vector<1x4xf32>
    %c0_63 = arith.constant 0 : index
    %c0_64 = arith.constant 0 : index
    %76 = vector.load %arg7[%c0_63, %c0_64] : memref<1x4xf32, #tpu.memory_space<vmem>>, vector<1x4xf32>
    %cst_65 = arith.constant 9.99999974E-6 : f32
    %77 = vector.broadcast %cst_65 : f32 to vector<1x4xf32>
    %78 = arith.addf %75, %77 : vector<1x4xf32>
    %79 = math.rsqrt %78 : vector<1x4xf32>
    %80 = arith.mulf %76, %79 : vector<1x4xf32>
    %c0_66 = arith.constant 0 : index
    %c0_67 = arith.constant 0 : index
    %81 = vector.load %arg8[%c0_66, %c0_67] : memref<1x4xf32, #tpu.memory_space<vmem>>, vector<1x4xf32>
    %82 = arith.mulf %69, %80 : vector<1x4xf32>
    %83 = arith.subf %81, %82 : vector<1x4xf32>
    %c0_68 = arith.constant 0 : index
    %c0_69 = arith.constant 0 : index
    %84 = vector.load %arg6[%c0_68, %c0_69] : memref<4x256xf32, #tpu.memory_space<vmem>>, vector<4x256xf32>
    %cst_70 = arith.constant dense<0.000000e+00> : vector<1x256xf32>
    %85 = tpu.matmul %80, %84, %cst_70 {dimension_numbers = #tpu.dot_dimension_numbers<[1], [0], [0], [1], [0, 0, 1, 1], [], []>} : vector<1x4xf32>, vector<4x256xf32>, vector<1x256xf32> -> vector<1x256xf32>
    %c0_71 = arith.constant 0 : index
    %c0_72 = arith.constant 0 : index
    %86 = vector.load %arg6[%c0_71, %c0_72] : memref<4x256xf32, #tpu.memory_space<vmem>>, vector<4x256xf32>
    %cst_73 = arith.constant dense<0.000000e+00> : vector<1x256xf32>
    %87 = tpu.matmul %83, %86, %cst_73 {dimension_numbers = #tpu.dot_dimension_numbers<[1], [0], [0], [1], [0, 0, 1, 1], [], []>} : vector<1x4xf32>, vector<4x256xf32>, vector<1x256xf32> -> vector<1x256xf32>
    %c0_74 = arith.constant 0 : index
    %c0_75 = arith.constant 0 : index
    %c0_76 = arith.constant 0 : index
    %88 = vector.load %arg10[%c0_74, %c0_75, %c0_76] : memref<2x32x256xf32, #tpu.memory_space<vmem>>, vector<1x32x256xf32>
    %89 = vector.shape_cast %88 : vector<1x32x256xf32> to vector<32x256xf32>
    %90 = vector.broadcast %85 : vector<1x256xf32> to vector<32x256xf32>
    %91 = arith.mulf %89, %90 : vector<32x256xf32>
    %92 = vector.broadcast %87 : vector<1x256xf32> to vector<32x256xf32>
    %93 = arith.addf %91, %92 : vector<32x256xf32>
    %cst_77 = arith.constant 0.000000e+00 : f32
    %94 = vector.broadcast %cst_77 : f32 to vector<32x256xf32>
    %95 = arith.cmpf ogt, %93, %94 : vector<32x256xf32>
    %cst_78 = arith.constant 2.000000e-01 : f32
    %96 = vector.broadcast %cst_78 : f32 to vector<32x256xf32>
    %97 = arith.mulf %96, %93 : vector<32x256xf32>
    %98 = arith.select %95, %93, %97 : vector<32x256xi1>, vector<32x256xf32>
    %99 = arith.truncf %98 : vector<32x256xf32> to vector<32x256xbf16>
    %c0_79 = arith.constant 0 : index
    %c0_80 = arith.constant 0 : index
    %100 = vector.load %arg4[%c0_79, %c0_80] : memref<64x32xbf16, #tpu.memory_space<vmem>>, vector<64x32xbf16>
    %cst_81 = arith.constant dense<0.000000e+00> : vector<64x256xf32>
    %101 = tpu.matmul %100, %99, %cst_81 {dimension_numbers = #tpu.dot_dimension_numbers<[1], [0], [0], [1], [0, 0, 1, 1], [], []>} : vector<64x32xbf16>, vector<32x256xbf16>, vector<64x256xf32> -> vector<64x256xf32>
    %102 = arith.truncf %101 : vector<64x256xf32> to vector<64x256xbf16>
    %c0_82 = arith.constant 0 : index
    %c0_83 = arith.constant 0 : index
    %c0_84 = arith.constant 0 : index
    %103 = vector.load %arg9[%c0_82, %c0_83, %c0_84] : memref<2x64x256xbf16, #tpu.memory_space<vmem>>, vector<1x64x256xbf16>
    %104 = vector.shape_cast %103 : vector<1x64x256xbf16> to vector<64x256xbf16>
    %105 = vector.shape_cast %102 : vector<64x256xbf16> to vector<1x64x256xbf16>
    tpu.vector_store %arg9[%c0_82, %c0_83, %c0_84], %105 {strides = array<i32>} : memref<2x64x256xbf16, #tpu.memory_space<vmem>>, vector<1x64x256xbf16>,
    %c1_85 = arith.constant 1 : index
    %c0_86 = arith.constant 0 : index
    %c0_87 = arith.constant 0 : index
    %106 = vector.load %arg10[%c1_85, %c0_86, %c0_87] : memref<2x32x256xf32, #tpu.memory_space<vmem>>, vector<1x32x256xf32>
    %107 = vector.shape_cast %106 : vector<1x32x256xf32> to vector<32x256xf32>
    %108 = vector.broadcast %85 : vector<1x256xf32> to vector<32x256xf32>
    %109 = arith.mulf %107, %108 : vector<32x256xf32>
    %110 = vector.broadcast %87 : vector<1x256xf32> to vector<32x256xf32>
    %111 = arith.addf %109, %110 : vector<32x256xf32>
    %cst_88 = arith.constant 0.000000e+00 : f32
    %112 = vector.broadcast %cst_88 : f32 to vector<32x256xf32>
    %113 = arith.cmpf ogt, %111, %112 : vector<32x256xf32>
    %cst_89 = arith.constant 2.000000e-01 : f32
    %114 = vector.broadcast %cst_89 : f32 to vector<32x256xf32>
    %115 = arith.mulf %114, %111 : vector<32x256xf32>
    %116 = arith.select %113, %111, %115 : vector<32x256xi1>, vector<32x256xf32>
    %117 = arith.truncf %116 : vector<32x256xf32> to vector<32x256xbf16>
    %c0_90 = arith.constant 0 : index
    %c0_91 = arith.constant 0 : index
    %118 = vector.load %arg4[%c0_90, %c0_91] : memref<64x32xbf16, #tpu.memory_space<vmem>>, vector<64x32xbf16>
    %cst_92 = arith.constant dense<0.000000e+00> : vector<64x256xf32>
    %119 = tpu.matmul %118, %117, %cst_92 {dimension_numbers = #tpu.dot_dimension_numbers<[1], [0], [0], [1], [0, 0, 1, 1], [], []>} : vector<64x32xbf16>, vector<32x256xbf16>, vector<64x256xf32> -> vector<64x256xf32>
    %120 = arith.truncf %119 : vector<64x256xf32> to vector<64x256xbf16>
    %c1_93 = arith.constant 1 : index
    %c0_94 = arith.constant 0 : index
    %c0_95 = arith.constant 0 : index
    %121 = vector.load %arg9[%c1_93, %c0_94, %c0_95] : memref<2x64x256xbf16, #tpu.memory_space<vmem>>, vector<1x64x256xbf16>
    %122 = vector.shape_cast %121 : vector<1x64x256xbf16> to vector<64x256xbf16>
    %123 = vector.shape_cast %120 : vector<64x256xbf16> to vector<1x64x256xbf16>
    tpu.vector_store %arg9[%c1_93, %c0_94, %c0_95], %123 {strides = array<i32>} : memref<2x64x256xbf16, #tpu.memory_space<vmem>>, vector<1x64x256xbf16>,
    return
  }
  func.func @transform_0(%arg0: i32) -> (i32, i32, i32) {
    %c0_i32 = arith.constant 0 : i32
    %c0_i32_0 = arith.constant 0 : i32
    %c0_i32_1 = arith.constant 0 : i32
    %c0_i32_2 = arith.constant 0 : i32
    return %c0_i32, %c0_i32_0, %c0_i32_1 : i32, i32, i32
  }
  func.func @transform_1(%arg0: i32) -> (i32, i32, i32) {
    %c0_i32 = arith.constant 0 : i32
    %c0_i32_0 = arith.constant 0 : i32
    %c0_i32_1 = arith.constant 0 : i32
    %c0_i32_2 = arith.constant 0 : i32
    return %c0_i32, %c0_i32_0, %c0_i32_1 : i32, i32, i32
  }
  func.func @transform_2(%arg0: i32) -> (i32, i32, i32) {
    %c0_i32 = arith.constant 0 : i32
    %c0_i32_0 = arith.constant 0 : i32
    %c0_i32_1 = arith.constant 0 : i32
    %c0_i32_2 = arith.constant 0 : i32
    return %c0_i32, %c0_i32_0, %c0_i32_1 : i32, i32, i32
  }
  func.func @transform_3(%arg0: i32) -> (i32, i32) {
    %c0_i32 = arith.constant 0 : i32
    %c0_i32_0 = arith.constant 0 : i32
    %c0_i32_1 = arith.constant 0 : i32
    return %c0_i32, %c0_i32_0 : i32, i32
  }
  func.func @transform_4(%arg0: i32) -> (i32, i32) {
    %c0_i32 = arith.constant 0 : i32
    %c0_i32_0 = arith.constant 0 : i32
    %c0_i32_1 = arith.constant 0 : i32
    return %c0_i32, %c0_i32_0 : i32, i32
  }
  func.func @transform_5(%arg0: i32) -> (i32, i32) {
    %c0_i32 = arith.constant 0 : i32
    %c0_i32_0 = arith.constant 0 : i32
    %c0_i32_1 = arith.constant 0 : i32
    return %c0_i32, %c0_i32_0 : i32, i32
  }
  func.func @transform_6(%arg0: i32) -> (i32, i32) {
    %c0_i32 = arith.constant 0 : i32
    %c0_i32_0 = arith.constant 0 : i32
    %c0_i32_1 = arith.constant 0 : i32
    return %c0_i32, %c0_i32_0 : i32, i32
  }
  func.func @transform_7(%arg0: i32) -> (i32, i32) {
    %c0_i32 = arith.constant 0 : i32
    %c0_i32_0 = arith.constant 0 : i32
    %c0_i32_1 = arith.constant 0 : i32
    return %c0_i32, %c0_i32_0 : i32, i32
  }
  func.func @transform_8(%arg0: i32) -> (i32, i32, i32) {
    %c0_i32 = arith.constant 0 : i32
    %c0_i32_0 = arith.constant 0 : i32
    %c0_i32_1 = arith.constant 0 : i32
    %c0_i32_2 = arith.constant 0 : i32
    return %c0_i32, %c0_i32_0, %c0_i32_1 : i32, i32, i32
  }
}

module attributes {stable_mosaic.version = 11 : i64} {
  func.func @_block_kernel(%arg0: i32, %arg1: memref<2x64x256xbf16, #tpu.memory_space<vmem>>, %arg2: memref<3x256x192xbf16, #tpu.memory_space<vmem>>, %arg3: memref<2x64x64xbf16, #tpu.memory_space<vmem>>, %arg4: memref<128x64xbf16, #tpu.memory_space<vmem>>, %arg5: memref<192x3xf32, #tpu.memory_space<vmem>>, %arg6: memref<3x192xf32, #tpu.memory_space<vmem>>, %arg7: memref<1x3xf32, #tpu.memory_space<vmem>>, %arg8: memref<1x3xf32, #tpu.memory_space<vmem>>, %arg9: memref<192x384xbf16, #tpu.memory_space<vmem>>, %arg10: memref<2x128x384xf32, #tpu.memory_space<vmem>>, %arg11: memref<2x64x192xf32, #tpu.memory_space<vmem>>) attributes {dimension_semantics = [#tpu.dimension_semantics<arbitrary>], iteration_bounds = array<i64: 1>, scalar_prefetch = 0 : i64, scratch_operands = 1 : i64, tpu.core_type = #tpu.core_type<tc>, window_params = [{pipeline_mode = #tpu.pipeline_mode<synchronous>, transform_indices = @transform_0, window_bounds = array<i64: 2, 64, 256>}, {pipeline_mode = #tpu.pipeline_mode<synchronous>, transform_indices = @transform_1, window_bounds = array<i64: 3, 256, 192>}, {pipeline_mode = #tpu.pipeline_mode<synchronous>, transform_indices = @transform_2, window_bounds = array<i64: 2, 64, 64>}, {pipeline_mode = #tpu.pipeline_mode<synchronous>, transform_indices = @transform_3, window_bounds = array<i64: 128, 64>}, {pipeline_mode = #tpu.pipeline_mode<synchronous>, transform_indices = @transform_4, window_bounds = array<i64: 192, 3>}, {pipeline_mode = #tpu.pipeline_mode<synchronous>, transform_indices = @transform_5, window_bounds = array<i64: 3, 192>}, {pipeline_mode = #tpu.pipeline_mode<synchronous>, transform_indices = @transform_6, window_bounds = array<i64: 1, 3>}, {pipeline_mode = #tpu.pipeline_mode<synchronous>, transform_indices = @transform_7, window_bounds = array<i64: 1, 3>}, {pipeline_mode = #tpu.pipeline_mode<synchronous>, transform_indices = @transform_8, window_bounds = array<i64: 192, 384>}, {pipeline_mode = #tpu.pipeline_mode<synchronous>, transform_indices = @transform_9, window_bounds = array<i64: 2, 128, 384>}]} {
    %cst = arith.constant 0.000000e+00 : f32
    %0 = vector.broadcast %cst : f32 to vector<1x192xf32>
    %cst_0 = arith.constant 0.000000e+00 : f32
    %1 = vector.broadcast %cst_0 : f32 to vector<1x192xf32>
    %c0 = arith.constant 0 : index
    %c0_1 = arith.constant 0 : index
    %c0_2 = arith.constant 0 : index
    %2 = vector.load %arg1[%c0, %c0_1, %c0_2] : memref<2x64x256xbf16, #tpu.memory_space<vmem>>, vector<1x64x256xbf16>
    %3 = vector.shape_cast %2 : vector<1x64x256xbf16> to vector<64x256xbf16>
    %c0_3 = arith.constant 0 : index
    %c0_4 = arith.constant 0 : index
    %c0_5 = arith.constant 0 : index
    %4 = vector.load %arg3[%c0_3, %c0_4, %c0_5] : memref<2x64x64xbf16, #tpu.memory_space<vmem>>, vector<1x64x64xbf16>
    %5 = vector.shape_cast %4 : vector<1x64x64xbf16> to vector<64x64xbf16>
    %cst_6 = arith.constant dense<0.000000e+00> : vector<64x256xf32>
    %6 = tpu.matmul %5, %3, %cst_6 {dimension_numbers = #tpu.dot_dimension_numbers<[1], [0], [0], [1], [0, 0, 1, 1], [], []>} : vector<64x64xbf16>, vector<64x256xbf16>, vector<64x256xf32> -> vector<64x256xf32>
    %7 = arith.truncf %6 : vector<64x256xf32> to vector<64x256xbf16>
    %c1 = arith.constant 1 : index
    %c0_7 = arith.constant 0 : index
    %c0_8 = arith.constant 0 : index
    %8 = vector.load %arg3[%c1, %c0_7, %c0_8] : memref<2x64x64xbf16, #tpu.memory_space<vmem>>, vector<1x64x64xbf16>
    %9 = vector.shape_cast %8 : vector<1x64x64xbf16> to vector<64x64xbf16>
    %cst_9 = arith.constant dense<0.000000e+00> : vector<64x256xf32>
    %10 = tpu.matmul %9, %3, %cst_9 {dimension_numbers = #tpu.dot_dimension_numbers<[1], [0], [0], [1], [0, 0, 1, 1], [], []>} : vector<64x64xbf16>, vector<64x256xbf16>, vector<64x256xf32> -> vector<64x256xf32>
    %11 = arith.truncf %10 : vector<64x256xf32> to vector<64x256xbf16>
    %c0_10 = arith.constant 0 : index
    %c0_11 = arith.constant 0 : index
    %c0_12 = arith.constant 0 : index
    %12 = vector.load %arg2[%c0_10, %c0_11, %c0_12] : memref<3x256x192xbf16, #tpu.memory_space<vmem>>, vector<1x256x192xbf16>
    %13 = vector.shape_cast %12 : vector<1x256x192xbf16> to vector<256x192xbf16>
    %cst_13 = arith.constant dense<0.000000e+00> : vector<64x192xf32>
    %14 = tpu.matmul %7, %13, %cst_13 {dimension_numbers = #tpu.dot_dimension_numbers<[1], [0], [0], [1], [0, 0, 1, 1], [], []>} : vector<64x256xbf16>, vector<256x192xbf16>, vector<64x192xf32> -> vector<64x192xf32>
    %c1_14 = arith.constant 1 : index
    %c0_15 = arith.constant 0 : index
    %c0_16 = arith.constant 0 : index
    %15 = vector.load %arg2[%c1_14, %c0_15, %c0_16] : memref<3x256x192xbf16, #tpu.memory_space<vmem>>, vector<1x256x192xbf16>
    %16 = vector.shape_cast %15 : vector<1x256x192xbf16> to vector<256x192xbf16>
    %cst_17 = arith.constant dense<0.000000e+00> : vector<64x192xf32>
    %17 = tpu.matmul %3, %16, %cst_17 {dimension_numbers = #tpu.dot_dimension_numbers<[1], [0], [0], [1], [0, 0, 1, 1], [], []>} : vector<64x256xbf16>, vector<256x192xbf16>, vector<64x192xf32> -> vector<64x192xf32>
    %18 = arith.addf %14, %17 : vector<64x192xf32>
    %c2 = arith.constant 2 : index
    %c0_18 = arith.constant 0 : index
    %c0_19 = arith.constant 0 : index
    %19 = vector.load %arg2[%c2, %c0_18, %c0_19] : memref<3x256x192xbf16, #tpu.memory_space<vmem>>, vector<1x256x192xbf16>
    %20 = vector.shape_cast %19 : vector<1x256x192xbf16> to vector<256x192xbf16>
    %cst_20 = arith.constant dense<0.000000e+00> : vector<64x192xf32>
    %21 = tpu.matmul %11, %20, %cst_20 {dimension_numbers = #tpu.dot_dimension_numbers<[1], [0], [0], [1], [0, 0, 1, 1], [], []>} : vector<64x256xbf16>, vector<256x192xbf16>, vector<64x192xf32> -> vector<64x192xf32>
    %22 = arith.addf %18, %21 : vector<64x192xf32>
    %c0_21 = arith.constant 0 : index
    %c0_22 = arith.constant 0 : index
    %c0_23 = arith.constant 0 : index
    %23 = vector.load %arg11[%c0_21, %c0_22, %c0_23] : memref<2x64x192xf32, #tpu.memory_space<vmem>>, vector<1x64x192xf32>
    %24 = vector.shape_cast %23 : vector<1x64x192xf32> to vector<64x192xf32>
    %25 = vector.shape_cast %22 : vector<64x192xf32> to vector<1x64x192xf32>
    tpu.vector_store %arg11[%c0_21, %c0_22, %c0_23], %25 {strides = array<i32>} : memref<2x64x192xf32, #tpu.memory_space<vmem>>, vector<1x64x192xf32>,
    %cst_24 = arith.constant dense<0.000000e+00> : vector<192xf32>
    %26 = vector.multi_reduction <add>, %22, %cst_24 [0] : vector<64x192xf32> to vector<192xf32>
    %27 = vector.shape_cast %26 : vector<192xf32> to vector<1x192xf32>
    %28 = arith.addf %0, %27 : vector<1x192xf32>
    %29 = arith.mulf %22, %22 : vector<64x192xf32>
    %cst_25 = arith.constant dense<0.000000e+00> : vector<192xf32>
    %30 = vector.multi_reduction <add>, %29, %cst_25 [0] : vector<64x192xf32> to vector<192xf32>
    %31 = vector.shape_cast %30 : vector<192xf32> to vector<1x192xf32>
    %32 = arith.addf %1, %31 : vector<1x192xf32>
    %c1_26 = arith.constant 1 : index
    %c0_27 = arith.constant 0 : index
    %c0_28 = arith.constant 0 : index
    %33 = vector.load %arg1[%c1_26, %c0_27, %c0_28] : memref<2x64x256xbf16, #tpu.memory_space<vmem>>, vector<1x64x256xbf16>
    %34 = vector.shape_cast %33 : vector<1x64x256xbf16> to vector<64x256xbf16>
    %c0_29 = arith.constant 0 : index
    %c0_30 = arith.constant 0 : index
    %c0_31 = arith.constant 0 : index
    %35 = vector.load %arg3[%c0_29, %c0_30, %c0_31] : memref<2x64x64xbf16, #tpu.memory_space<vmem>>, vector<1x64x64xbf16>
    %36 = vector.shape_cast %35 : vector<1x64x64xbf16> to vector<64x64xbf16>
    %cst_32 = arith.constant dense<0.000000e+00> : vector<64x256xf32>
    %37 = tpu.matmul %36, %34, %cst_32 {dimension_numbers = #tpu.dot_dimension_numbers<[1], [0], [0], [1], [0, 0, 1, 1], [], []>} : vector<64x64xbf16>, vector<64x256xbf16>, vector<64x256xf32> -> vector<64x256xf32>
    %38 = arith.truncf %37 : vector<64x256xf32> to vector<64x256xbf16>
    %c1_33 = arith.constant 1 : index
    %c0_34 = arith.constant 0 : index
    %c0_35 = arith.constant 0 : index
    %39 = vector.load %arg3[%c1_33, %c0_34, %c0_35] : memref<2x64x64xbf16, #tpu.memory_space<vmem>>, vector<1x64x64xbf16>
    %40 = vector.shape_cast %39 : vector<1x64x64xbf16> to vector<64x64xbf16>
    %cst_36 = arith.constant dense<0.000000e+00> : vector<64x256xf32>
    %41 = tpu.matmul %40, %34, %cst_36 {dimension_numbers = #tpu.dot_dimension_numbers<[1], [0], [0], [1], [0, 0, 1, 1], [], []>} : vector<64x64xbf16>, vector<64x256xbf16>, vector<64x256xf32> -> vector<64x256xf32>
    %42 = arith.truncf %41 : vector<64x256xf32> to vector<64x256xbf16>
    %c0_37 = arith.constant 0 : index
    %c0_38 = arith.constant 0 : index
    %c0_39 = arith.constant 0 : index
    %43 = vector.load %arg2[%c0_37, %c0_38, %c0_39] : memref<3x256x192xbf16, #tpu.memory_space<vmem>>, vector<1x256x192xbf16>
    %44 = vector.shape_cast %43 : vector<1x256x192xbf16> to vector<256x192xbf16>
    %cst_40 = arith.constant dense<0.000000e+00> : vector<64x192xf32>
    %45 = tpu.matmul %38, %44, %cst_40 {dimension_numbers = #tpu.dot_dimension_numbers<[1], [0], [0], [1], [0, 0, 1, 1], [], []>} : vector<64x256xbf16>, vector<256x192xbf16>, vector<64x192xf32> -> vector<64x192xf32>
    %c1_41 = arith.constant 1 : index
    %c0_42 = arith.constant 0 : index
    %c0_43 = arith.constant 0 : index
    %46 = vector.load %arg2[%c1_41, %c0_42, %c0_43] : memref<3x256x192xbf16, #tpu.memory_space<vmem>>, vector<1x256x192xbf16>
    %47 = vector.shape_cast %46 : vector<1x256x192xbf16> to vector<256x192xbf16>
    %cst_44 = arith.constant dense<0.000000e+00> : vector<64x192xf32>
    %48 = tpu.matmul %34, %47, %cst_44 {dimension_numbers = #tpu.dot_dimension_numbers<[1], [0], [0], [1], [0, 0, 1, 1], [], []>} : vector<64x256xbf16>, vector<256x192xbf16>, vector<64x192xf32> -> vector<64x192xf32>
    %49 = arith.addf %45, %48 : vector<64x192xf32>
    %c2_45 = arith.constant 2 : index
    %c0_46 = arith.constant 0 : index
    %c0_47 = arith.constant 0 : index
    %50 = vector.load %arg2[%c2_45, %c0_46, %c0_47] : memref<3x256x192xbf16, #tpu.memory_space<vmem>>, vector<1x256x192xbf16>
    %51 = vector.shape_cast %50 : vector<1x256x192xbf16> to vector<256x192xbf16>
    %cst_48 = arith.constant dense<0.000000e+00> : vector<64x192xf32>
    %52 = tpu.matmul %42, %51, %cst_48 {dimension_numbers = #tpu.dot_dimension_numbers<[1], [0], [0], [1], [0, 0, 1, 1], [], []>} : vector<64x256xbf16>, vector<256x192xbf16>, vector<64x192xf32> -> vector<64x192xf32>
    %53 = arith.addf %49, %52 : vector<64x192xf32>
    %c1_49 = arith.constant 1 : index
    %c0_50 = arith.constant 0 : index
    %c0_51 = arith.constant 0 : index
    %54 = vector.load %arg11[%c1_49, %c0_50, %c0_51] : memref<2x64x192xf32, #tpu.memory_space<vmem>>, vector<1x64x192xf32>
    %55 = vector.shape_cast %54 : vector<1x64x192xf32> to vector<64x192xf32>
    %56 = vector.shape_cast %53 : vector<64x192xf32> to vector<1x64x192xf32>
    tpu.vector_store %arg11[%c1_49, %c0_50, %c0_51], %56 {strides = array<i32>} : memref<2x64x192xf32, #tpu.memory_space<vmem>>, vector<1x64x192xf32>,
    %cst_52 = arith.constant dense<0.000000e+00> : vector<192xf32>
    %57 = vector.multi_reduction <add>, %53, %cst_52 [0] : vector<64x192xf32> to vector<192xf32>
    %58 = vector.shape_cast %57 : vector<192xf32> to vector<1x192xf32>
    %59 = arith.addf %28, %58 : vector<1x192xf32>
    %60 = arith.mulf %53, %53 : vector<64x192xf32>
    %cst_53 = arith.constant dense<0.000000e+00> : vector<192xf32>
    %61 = vector.multi_reduction <add>, %60, %cst_53 [0] : vector<64x192xf32> to vector<192xf32>
    %62 = vector.shape_cast %61 : vector<192xf32> to vector<1x192xf32>
    %63 = arith.addf %32, %62 : vector<1x192xf32>
    %c0_54 = arith.constant 0 : index
    %c0_55 = arith.constant 0 : index
    %64 = vector.load %arg5[%c0_54, %c0_55] : memref<192x3xf32, #tpu.memory_space<vmem>>, vector<192x3xf32>
    %cst_56 = arith.constant dense<0.000000e+00> : vector<1x3xf32>
    %65 = tpu.matmul %59, %64, %cst_56 {dimension_numbers = #tpu.dot_dimension_numbers<[1], [0], [0], [1], [0, 0, 1, 1], [], []>} : vector<1x192xf32>, vector<192x3xf32>, vector<1x3xf32> -> vector<1x3xf32>
    %c0_57 = arith.constant 0 : index
    %c0_58 = arith.constant 0 : index
    %66 = vector.load %arg5[%c0_57, %c0_58] : memref<192x3xf32, #tpu.memory_space<vmem>>, vector<192x3xf32>
    %cst_59 = arith.constant dense<0.000000e+00> : vector<1x3xf32>
    %67 = tpu.matmul %63, %66, %cst_59 {dimension_numbers = #tpu.dot_dimension_numbers<[1], [0], [0], [1], [0, 0, 1, 1], [], []>} : vector<1x192xf32>, vector<192x3xf32>, vector<1x3xf32> -> vector<1x3xf32>
    %cst_60 = arith.constant 8.192000e+03 : f32
    %68 = vector.broadcast %cst_60 : f32 to vector<1x3xf32>
    %69 = arith.divf %65, %68 : vector<1x3xf32>
    %cst_61 = arith.constant 8.192000e+03 : f32
    %70 = vector.broadcast %cst_61 : f32 to vector<1x3xf32>
    %71 = arith.divf %67, %70 : vector<1x3xf32>
    %72 = arith.mulf %69, %69 : vector<1x3xf32>
    %73 = arith.subf %71, %72 : vector<1x3xf32>
    %cst_62 = arith.constant 0.000000e+00 : f32
    %74 = vector.broadcast %cst_62 : f32 to vector<1x3xf32>
    %75 = arith.maximumf %73, %74 : vector<1x3xf32>
    %c0_63 = arith.constant 0 : index
    %c0_64 = arith.constant 0 : index
    %76 = vector.load %arg7[%c0_63, %c0_64] : memref<1x3xf32, #tpu.memory_space<vmem>>, vector<1x3xf32>
    %cst_65 = arith.constant 9.99999974E-6 : f32
    %77 = vector.broadcast %cst_65 : f32 to vector<1x3xf32>
    %78 = arith.addf %75, %77 : vector<1x3xf32>
    %79 = math.rsqrt %78 : vector<1x3xf32>
    %80 = arith.mulf %76, %79 : vector<1x3xf32>
    %c0_66 = arith.constant 0 : index
    %c0_67 = arith.constant 0 : index
    %81 = vector.load %arg8[%c0_66, %c0_67] : memref<1x3xf32, #tpu.memory_space<vmem>>, vector<1x3xf32>
    %82 = arith.mulf %69, %80 : vector<1x3xf32>
    %83 = arith.subf %81, %82 : vector<1x3xf32>
    %c0_68 = arith.constant 0 : index
    %c0_69 = arith.constant 0 : index
    %84 = vector.load %arg6[%c0_68, %c0_69] : memref<3x192xf32, #tpu.memory_space<vmem>>, vector<3x192xf32>
    %cst_70 = arith.constant dense<0.000000e+00> : vector<1x192xf32>
    %85 = tpu.matmul %80, %84, %cst_70 {dimension_numbers = #tpu.dot_dimension_numbers<[1], [0], [0], [1], [0, 0, 1, 1], [], []>} : vector<1x3xf32>, vector<3x192xf32>, vector<1x192xf32> -> vector<1x192xf32>
    %c0_71 = arith.constant 0 : index
    %c0_72 = arith.constant 0 : index
    %86 = vector.load %arg6[%c0_71, %c0_72] : memref<3x192xf32, #tpu.memory_space<vmem>>, vector<3x192xf32>
    %cst_73 = arith.constant dense<0.000000e+00> : vector<1x192xf32>
    %87 = tpu.matmul %83, %86, %cst_73 {dimension_numbers = #tpu.dot_dimension_numbers<[1], [0], [0], [1], [0, 0, 1, 1], [], []>} : vector<1x3xf32>, vector<3x192xf32>, vector<1x192xf32> -> vector<1x192xf32>
    %c0_74 = arith.constant 0 : index
    %c0_75 = arith.constant 0 : index
    %c0_76 = arith.constant 0 : index
    %88 = vector.load %arg11[%c0_74, %c0_75, %c0_76] : memref<2x64x192xf32, #tpu.memory_space<vmem>>, vector<1x64x192xf32>
    %89 = vector.shape_cast %88 : vector<1x64x192xf32> to vector<64x192xf32>
    %90 = vector.broadcast %85 : vector<1x192xf32> to vector<64x192xf32>
    %91 = arith.mulf %89, %90 : vector<64x192xf32>
    %92 = vector.broadcast %87 : vector<1x192xf32> to vector<64x192xf32>
    %93 = arith.addf %91, %92 : vector<64x192xf32>
    %cst_77 = arith.constant 0.000000e+00 : f32
    %94 = vector.broadcast %cst_77 : f32 to vector<64x192xf32>
    %95 = arith.cmpf ogt, %93, %94 : vector<64x192xf32>
    %cst_78 = arith.constant 2.000000e-01 : f32
    %96 = vector.broadcast %cst_78 : f32 to vector<64x192xf32>
    %97 = arith.mulf %96, %93 : vector<64x192xf32>
    %98 = arith.select %95, %93, %97 : vector<64x192xi1>, vector<64x192xf32>
    %99 = arith.truncf %98 : vector<64x192xf32> to vector<64x192xbf16>
    %c0_79 = arith.constant 0 : index
    %c0_80 = arith.constant 0 : index
    %100 = vector.load %arg9[%c0_79, %c0_80] : memref<192x384xbf16, #tpu.memory_space<vmem>>, vector<192x384xbf16>
    %cst_81 = arith.constant dense<0.000000e+00> : vector<64x384xf32>
    %101 = tpu.matmul %99, %100, %cst_81 {dimension_numbers = #tpu.dot_dimension_numbers<[1], [0], [0], [1], [0, 0, 1, 1], [], []>} : vector<64x192xbf16>, vector<192x384xbf16>, vector<64x384xf32> -> vector<64x384xf32>
    %102 = arith.truncf %101 : vector<64x384xf32> to vector<64x384xbf16>
    %c0_82 = arith.constant 0 : index
    %c0_83 = arith.constant 0 : index
    %103 = vector.load %arg4[%c0_82, %c0_83] : memref<128x64xbf16, #tpu.memory_space<vmem>>, vector<128x64xbf16>
    %cst_84 = arith.constant dense<0.000000e+00> : vector<128x384xf32>
    %104 = tpu.matmul %103, %102, %cst_84 {dimension_numbers = #tpu.dot_dimension_numbers<[1], [0], [0], [1], [0, 0, 1, 1], [], []>} : vector<128x64xbf16>, vector<64x384xbf16>, vector<128x384xf32> -> vector<128x384xf32>
    %c0_85 = arith.constant 0 : index
    %c0_86 = arith.constant 0 : index
    %c0_87 = arith.constant 0 : index
    %105 = vector.load %arg10[%c0_85, %c0_86, %c0_87] : memref<2x128x384xf32, #tpu.memory_space<vmem>>, vector<1x128x384xf32>
    %106 = vector.shape_cast %105 : vector<1x128x384xf32> to vector<128x384xf32>
    %107 = vector.shape_cast %104 : vector<128x384xf32> to vector<1x128x384xf32>
    tpu.vector_store %arg10[%c0_85, %c0_86, %c0_87], %107 {strides = array<i32>} : memref<2x128x384xf32, #tpu.memory_space<vmem>>, vector<1x128x384xf32>,
    %c1_88 = arith.constant 1 : index
    %c0_89 = arith.constant 0 : index
    %c0_90 = arith.constant 0 : index
    %108 = vector.load %arg11[%c1_88, %c0_89, %c0_90] : memref<2x64x192xf32, #tpu.memory_space<vmem>>, vector<1x64x192xf32>
    %109 = vector.shape_cast %108 : vector<1x64x192xf32> to vector<64x192xf32>
    %110 = vector.broadcast %85 : vector<1x192xf32> to vector<64x192xf32>
    %111 = arith.mulf %109, %110 : vector<64x192xf32>
    %112 = vector.broadcast %87 : vector<1x192xf32> to vector<64x192xf32>
    %113 = arith.addf %111, %112 : vector<64x192xf32>
    %cst_91 = arith.constant 0.000000e+00 : f32
    %114 = vector.broadcast %cst_91 : f32 to vector<64x192xf32>
    %115 = arith.cmpf ogt, %113, %114 : vector<64x192xf32>
    %cst_92 = arith.constant 2.000000e-01 : f32
    %116 = vector.broadcast %cst_92 : f32 to vector<64x192xf32>
    %117 = arith.mulf %116, %113 : vector<64x192xf32>
    %118 = arith.select %115, %113, %117 : vector<64x192xi1>, vector<64x192xf32>
    %119 = arith.truncf %118 : vector<64x192xf32> to vector<64x192xbf16>
    %c0_93 = arith.constant 0 : index
    %c0_94 = arith.constant 0 : index
    %120 = vector.load %arg9[%c0_93, %c0_94] : memref<192x384xbf16, #tpu.memory_space<vmem>>, vector<192x384xbf16>
    %cst_95 = arith.constant dense<0.000000e+00> : vector<64x384xf32>
    %121 = tpu.matmul %119, %120, %cst_95 {dimension_numbers = #tpu.dot_dimension_numbers<[1], [0], [0], [1], [0, 0, 1, 1], [], []>} : vector<64x192xbf16>, vector<192x384xbf16>, vector<64x384xf32> -> vector<64x384xf32>
    %122 = arith.truncf %121 : vector<64x384xf32> to vector<64x384xbf16>
    %c0_96 = arith.constant 0 : index
    %c0_97 = arith.constant 0 : index
    %123 = vector.load %arg4[%c0_96, %c0_97] : memref<128x64xbf16, #tpu.memory_space<vmem>>, vector<128x64xbf16>
    %cst_98 = arith.constant dense<0.000000e+00> : vector<128x384xf32>
    %124 = tpu.matmul %123, %122, %cst_98 {dimension_numbers = #tpu.dot_dimension_numbers<[1], [0], [0], [1], [0, 0, 1, 1], [], []>} : vector<128x64xbf16>, vector<64x384xbf16>, vector<128x384xf32> -> vector<128x384xf32>
    %c1_99 = arith.constant 1 : index
    %c0_100 = arith.constant 0 : index
    %c0_101 = arith.constant 0 : index
    %125 = vector.load %arg10[%c1_99, %c0_100, %c0_101] : memref<2x128x384xf32, #tpu.memory_space<vmem>>, vector<1x128x384xf32>
    %126 = vector.shape_cast %125 : vector<1x128x384xf32> to vector<128x384xf32>
    %127 = vector.shape_cast %124 : vector<128x384xf32> to vector<1x128x384xf32>
    tpu.vector_store %arg10[%c1_99, %c0_100, %c0_101], %127 {strides = array<i32>} : memref<2x128x384xf32, #tpu.memory_space<vmem>>, vector<1x128x384xf32>,
    return
  }
  func.func @transform_0(%arg0: i32) -> (i32, i32, i32) {
    %c0_i32 = arith.constant 0 : i32
    %c0_i32_0 = arith.constant 0 : i32
    %c0_i32_1 = arith.constant 0 : i32
    %c0_i32_2 = arith.constant 0 : i32
    return %c0_i32, %c0_i32_0, %c0_i32_1 : i32, i32, i32
  }
  func.func @transform_1(%arg0: i32) -> (i32, i32, i32) {
    %c0_i32 = arith.constant 0 : i32
    %c0_i32_0 = arith.constant 0 : i32
    %c0_i32_1 = arith.constant 0 : i32
    %c0_i32_2 = arith.constant 0 : i32
    return %c0_i32, %c0_i32_0, %c0_i32_1 : i32, i32, i32
  }
  func.func @transform_2(%arg0: i32) -> (i32, i32, i32) {
    %c0_i32 = arith.constant 0 : i32
    %c0_i32_0 = arith.constant 0 : i32
    %c0_i32_1 = arith.constant 0 : i32
    %c0_i32_2 = arith.constant 0 : i32
    return %c0_i32, %c0_i32_0, %c0_i32_1 : i32, i32, i32
  }
  func.func @transform_3(%arg0: i32) -> (i32, i32) {
    %c0_i32 = arith.constant 0 : i32
    %c0_i32_0 = arith.constant 0 : i32
    %c0_i32_1 = arith.constant 0 : i32
    return %c0_i32, %c0_i32_0 : i32, i32
  }
  func.func @transform_4(%arg0: i32) -> (i32, i32) {
    %c0_i32 = arith.constant 0 : i32
    %c0_i32_0 = arith.constant 0 : i32
    %c0_i32_1 = arith.constant 0 : i32
    return %c0_i32, %c0_i32_0 : i32, i32
  }
  func.func @transform_5(%arg0: i32) -> (i32, i32) {
    %c0_i32 = arith.constant 0 : i32
    %c0_i32_0 = arith.constant 0 : i32
    %c0_i32_1 = arith.constant 0 : i32
    return %c0_i32, %c0_i32_0 : i32, i32
  }
  func.func @transform_6(%arg0: i32) -> (i32, i32) {
    %c0_i32 = arith.constant 0 : i32
    %c0_i32_0 = arith.constant 0 : i32
    %c0_i32_1 = arith.constant 0 : i32
    return %c0_i32, %c0_i32_0 : i32, i32
  }
  func.func @transform_7(%arg0: i32) -> (i32, i32) {
    %c0_i32 = arith.constant 0 : i32
    %c0_i32_0 = arith.constant 0 : i32
    %c0_i32_1 = arith.constant 0 : i32
    return %c0_i32, %c0_i32_0 : i32, i32
  }
  func.func @transform_8(%arg0: i32) -> (i32, i32) {
    %c0_i32 = arith.constant 0 : i32
    %c0_i32_0 = arith.constant 0 : i32
    %c0_i32_1 = arith.constant 0 : i32
    return %c0_i32, %c0_i32_0 : i32, i32
  }
  func.func @transform_9(%arg0: i32) -> (i32, i32, i32) {
    %c0_i32 = arith.constant 0 : i32
    %c0_i32_0 = arith.constant 0 : i32
    %c0_i32_1 = arith.constant 0 : i32
    %c0_i32_2 = arith.constant 0 : i32
    return %c0_i32, %c0_i32_0, %c0_i32_1 : i32, i32, i32
  }
}

</mosaic_0001>

<bundles_post_ra>
// kernel: decoder_forward.4
= control target key start
LH: loop header
LB: loop body
LE: loop exit
PB: predicated region body
PF: predicated region fallthrough
CT: control target
= control target key end

     0   :  { %vm36_vm0 = vcmask 1043456   ;;  %v1633_v0 = vmov 0.0   ;;  %vm1634_vm1 = vmmov 0   ;;  %vm32_vm2 = vcmask 64512   ;;  %s2033_s0 = inlined_call_operand.vmem [shape: bf16[2,8,64], index: 0, kind: input, shape index: {}]   ;;  %s2034_s2 = inlined_call_operand.vmem [shape: bf16[2,8,8], index: 2, kind: input, shape index: {}]   ;;  %s2035_s1 = inlined_call_operand.vmem [shape: bf16[3,64,256], index: 1, kind: input, shape index: {}]   ;;  %s2036_s4 = inlined_call_operand.vmem [shape: f32[256,16], index: 4, kind: input, shape index: {}]   ;;  %s2037_s5 = inlined_call_operand.vmem [shape: f32[16,256], index: 5, kind: input, shape index: {}]   ;;  %s2038_s6 = inlined_call_operand.vmem [shape: f32[1,16], index: 6, kind: input, shape index: {}]   ;;  %s2039_s7 = inlined_call_operand.vmem [shape: f32[1,16], index: 7, kind: input, shape index: {}]   ;;  %s2040_s3 = inlined_call_operand.vmem [shape: bf16[16,8], index: 3, kind: input, shape index: {}]   ;;  %s2041_s8 = inlined_call_operand.vmem [shape: bf16[2,16,256], index: 8, kind: output, shape index: {}]  }
   0x1   :  { %1566 = vmatprep.subr.bf16.mxu0 %v1633_v0  ;;  %v30_v1 = vld [vmem:[%s2033_s0] sm:$0xf]  ;;  %1572 = vmatprep.subr.bf16.mxu1 %v1633_v0  ;;  %v1378_v4 = vld [vmem:[%s2034_s2 + $0x4] sm:$0xf]  ;;  %v1700_v5 = vld [vmem:[%s2035_s1 + $0x70] ss:$8 sps:$4 sm:$0xff]  }
   0x2   :  { %v31_v2 = vld [vmem:[%s2034_s2] sm:$0xf]  ;;  %v38_v3 = vsel %vm36_vm0, %v30_v1, 0  ;;  %1568 = vmatprep.mubr.msk.bf16.mxu0 %vm1634_vm1, %v1633_v0  ;;  %1574 = vmatprep.mubr.msk.bf16.mxu1 %vm1634_vm1, %v1633_v0  ;;  %v1595_v6 = vld [vmem:[%s2035_s1 + $0x74] ss:$8 sps:$4 sm:$0xff]   ;;  %v1635_v10 = vmov 0  }
   0x3   :  { %1567 = vmatpush3.bf16.msra.mxu0 %v38_v3  ;;  %1573 = vmatpush3.bf16.msra.mxu1 %v38_v3  ;;  %v1708_v7 = vld [vmem:[%s2035_s1 + $0x64] ss:$8 sps:$4 sm:$0xff]   ;;  %v1716_v8 = vld [vmem:[%s2035_s1 + $0x60] ss:$8 sps:$4 sm:$0xff]   ;;  %v1721_v9 = vld [vmem:[%s2035_s1 + $0x54] ss:$8 sps:$4 sm:$0xff]  }
   0x4   :  { %195 = vmatprep.subr.bf16.mxu0 %v1595_v6  ;;  %v1728_v11 = vld [vmem:[%s2035_s1 + $0x30] ss:$8 sps:$4 sm:$0xff]   ;;  %v1733_v12 = vld [vmem:[%s2035_s1 + $0x34] ss:$8 sps:$4 sm:$0xff]   ;;  %v1747_v14 = vld [vmem:[%s2035_s1 + $0x20] ss:$8 sps:$4 sm:$0xff]  }
   0x5   :  { %v1739_v13 = vld [vmem:[%s2035_s1 + $0x50] ss:$8 sps:$4 sm:$0xff]   ;;  %279 = vmatprep.subr.bf16.mxu1 %v1733_v12  ;;  %v1752_v15 = vld [vmem:[%s2035_s1 + $0x24] ss:$8 sps:$4 sm:$0xff]   ;;  %v1764_v17 = vld [vmem:[%s2035_s1 + $0x14] ss:$8 sps:$4 sm:$0xff]  }
   0x6   :  { %1569 = vmatmul.mubr.msk.bf16.vlgmr.msra.gmra.mxu0 %vm32_vm2, %v31_v2  ;;  %1575 = vmatmul.mubr.msk.bf16.vlgmr.msra.gmra.mxu1 %vm32_vm2, %v1378_v4  ;;  %v1758_v16 = vld [vmem:[%s2035_s1 + $0x44] ss:$8 sps:$4 sm:$0xff]   ;;  %v1602_v18 = vld [vmem:[%s2035_s1 + $0x40] ss:$8 sps:$4 sm:$0xff]   ;;  %v1774_v19 = vld [vmem:[%s2035_s1 + $0x10] ss:$8 sps:$4 sm:$0xff]  }
   0x7   :  { %196 = vmatpush1.bf16.msra.mxu0 %v1700_v5  ;;  %219 = vmatprep.mubr.bf16.mxu0 %v1635_v10  ;;  %v1610_v20 = vld [vmem:[%s2035_s1 + $0xb4] ss:$8 sps:$4 sm:$0xff]   ;;  %v1784_v21 = vld [vmem:[%s2035_s1 + $0x4] ss:$8 sps:$4 sm:$0xff]   ;;  %v1608_v22 = vld [vmem:[%s2035_s1 + $0xb0] ss:$8 sps:$4 sm:$0xff]  }
   0x8   :  { %197 = vmatprep.subr.bf16.mxu0 %v1708_v7  ;;  %303 = vmatprep.mubr.bf16.mxu1 %v1635_v10  ;;  %vm184_vm3 = vcmask 523264   ;;  %v1793_v23 = vld [vmem:[%s2035_s1] ss:$8 sps:$4 sm:$0xff]   ;;  %v1616_v24 = vld [vmem:[%s2035_s1 + $0xa4] ss:$8 sps:$4 sm:$0xff]   ;;  %v875_v48 = vld [vmem:[%s2036_s4 + $0xf8] sm:$0xff] }
   0x9   :  { %280 = vmatpush1.bf16.msra.mxu1 %v1728_v11  ;;  %v1614_v25 = vld [vmem:[%s2035_s1 + $0xa0] ss:$8 sps:$4 sm:$0xff]   ;;  %v1622_v26 = vld [vmem:[%s2035_s1 + $0x94] ss:$8 sps:$4 sm:$0xff]   ;;  %v1620_v27 = vld [vmem:[%s2035_s1 + $0x90] ss:$8 sps:$4 sm:$0xff]  }
   0xa   :  { %281 = vmatprep.subr.bf16.mxu1 %v1752_v15  ;;  %v1628_v28 = vld [vmem:[%s2035_s1 + $0x84] ss:$8 sps:$4 sm:$0xff]   ;;  %v1626_v29 = vld [vmem:[%s2035_s1 + $0x80] ss:$8 sps:$4 sm:$0xff]   ;;  %v874_v2 = vld [vmem:[%s2036_s4 + $0xf0] sm:$0xff]  ;;  %vm1033_vm4 = vcmask 130048  }
   0xb   :  { %198 = vmatpush1.bf16.msra.mxu0 %v1716_v8  ;;  %v1423_v30 = vld [vmem:[%s2033_s0 + $0x4] sm:$0xf]  ;;  %v441_v42 = vld [vmem:[%s2034_s2] sm:$0xf]  ;;  %v858_v4 = vld [vmem:[%s2036_s4 + $0x70] sm:$0xff] }
   0xc   :  { %199 = vmatprep.subr.bf16.mxu0 %v1721_v9  ;;  %v446_v35 = vsel %vm36_vm0, %v1423_v30, 0  ;;  %v1425_v43 = vld [vmem:[%s2034_s2 + $0x4] sm:$0xf] }
   0xd   :  { %282 = vmatpush1.bf16.msra.mxu1 %v1747_v14 }
   0xe   :  { %283 = vmatprep.subr.bf16.mxu1 %v1764_v17 }
   0xf   :  { %200 = vmatpush1.bf16.msra.mxu0 %v1739_v13 }
  0x10   :  { %201 = vmatprep.subr.bf16.mxu0 %v1758_v16 }
  0x11   :  { %284 = vmatpush1.bf16.msra.mxu1 %v1774_v19 }
  0x12   :  { %285 = vmatprep.subr.bf16.mxu1 %v1784_v21 }
  0x13   :  { %202 = vmatpush1.bf16.msra.mxu0 %v1602_v18 }
  0x14   :  { %372 = vmatprep.subr.bf16.mxu0 %v1610_v20 }
  0x15   :  { %286 = vmatpush1.bf16.msra.mxu1 %v1793_v23 }
  0x16   :  { %1396 = vmatmul.mubr.msk.bf16.vlgmr.msra.gmra.mxu0 %vm184_vm3, %v30_v1  ;;  %1578 = vmatprep.subr.bf16.mxu1 %v1633_v0  ;;  %v859_v1 = vld [vmem:[%s2036_s4 + $0x78] sm:$0xff] }
  0x17   :  { %373 = vmatpush1.bf16.msra.mxu0 %v1608_v22  ;;  %396 = vmatprep.mubr.bf16.mxu0 %v1635_v10 }
  0x18   :  { %374 = vmatprep.subr.bf16.mxu0 %v1616_v24 }
  0x1b   :  { %375 = vmatpush1.bf16.msra.mxu0 %v1614_v25 }
  0x1c   :  { %376 = vmatprep.subr.bf16.mxu0 %v1622_v26 }
  0x1f   :  { %377 = vmatpush1.bf16.msra.mxu0 %v1620_v27 }
  0x20   :  { %378 = vmatprep.subr.bf16.mxu0 %v1628_v28 }
  0x23   :  { %379 = vmatpush1.bf16.msra.mxu0 %v1626_v29 }
  0x24   :  { %600 = vmatprep.subr.bf16.mxu0 %v1595_v6 }
  0xc6   :  { %v74_v31 = vpop.f32.mrf.mxu0  ;;  %v120_v32 = vpop.f32.mrf.mxu1 }
  0xc7   :  { %v80_v33 = vpack.c.bf16 %v74_v31, %v74_v31  ;;  %v126_v34 = vpack.c.bf16 %v120_v32, %v120_v32  ;;  %v850_v31 = vld [vmem:[%s2036_s4 + $0x30] sm:$0xff]  ;;  %v865_v32 = vld [vmem:[%s2036_s4 + $0xa8] sm:$0xff] }
  0xc8   :  { %v1570_v36 = vpop.f32.mrf.mxu0  ;;  %v1576_v37 = vpop.f32.mrf.mxu1 }
  0xc9   :  { %1405 = vmatmul.mubr.msk.bf16.vlgmr.msra.gmra.mxu1 %vm184_vm3, %v80_v33  ;;  %1422 = vmatmul.mubr.msk.bf16.vlgmr.msra.gmra.mxu0 %vm184_vm3, %v126_v34  ;;  %v849_v33 = vld [vmem:[%s2036_s4 + $0x28] sm:$0xff]  ;;  %v864_v34 = vld [vmem:[%s2036_s4 + $0xa0] sm:$0xff]  ;;  %v863_v36 = vld [vmem:[%s2036_s4 + $0x98] sm:$0xff] }
  0xca   :  { %v77_v38 = vpop.f32.mrf.mxu0  ;;  %1579 = vmatpush3.bf16.msra.mxu1 %v446_v35  ;;  %1580 = vmatprep.mubr.msk.bf16.mxu1 %vm1634_vm1, %v1633_v0  ;;  %v123_v39 = vpop.f32.mrf.mxu1  ;;  %v847_v37 = vld [vmem:[%s2036_s4 + $0x18] sm:$0xff] }
  0xcb   :  { %1584 = vmatprep.subr.bf16.mxu1 %v1633_v0  ;;  %601 = vmatpush1.bf16.msra.mxu0 %v1700_v5  ;;  %v862_v38 = vld [vmem:[%s2036_s4 + $0x90] sm:$0xff] }
  0xcc   :  { %v1571_v40 = vpop.f32.mrf.mxu0  ;;  %v1577_v41 = vpop.f32.mrf.mxu1  ;;  %602 = vmatprep.subr.bf16.mxu0 %v1708_v7  ;;  %624 = vmatprep.mubr.bf16.mxu0 %v1635_v10  ;;  %v846_v39 = vld [vmem:[%s2036_s4 + $0x10] sm:$0xff] }
  0xcd   :  { %v861_v40 = vld [vmem:[%s2036_s4 + $0x88] sm:$0xff] }
  0xce   :  { %v845_v41 = vld [vmem:[%s2036_s4 + $0x8] sm:$0xff] }
  0xcf   :  { %603 = vmatpush1.bf16.msra.mxu0 %v1716_v8 }
  0xd0   :  { %604 = vmatprep.subr.bf16.mxu0 %v1721_v9 }
  0xd1   :  { %1581 = vmatmul.mubr.msk.bf16.vlgmr.msra.gmra.mxu1 %vm32_vm2, %v441_v42  ;;  %v860_v42 = vld [vmem:[%s2036_s4 + $0x80] sm:$0xff] }
  0xd2   :  { %1585 = vmatpush3.bf16.msra.mxu1 %v446_v35  ;;  %1586 = vmatprep.mubr.msk.bf16.mxu1 %vm1634_vm1, %v1633_v0  ;;  %v848_v35 = vld [vmem:[%s2036_s4 + $0x20] sm:$0xff] }
  0xd3   :  { %605 = vmatpush1.bf16.msra.mxu0 %v1739_v13  ;;  %684 = vmatprep.subr.bf16.mxu1 %v1733_v12 }
  0xd4   :  { %606 = vmatprep.subr.bf16.mxu0 %v1758_v16  ;;  %v873_v16 = vld [vmem:[%s2036_s4 + $0xe8] sm:$0xff] }
  0xd6   :  { %v221_v44 = vpop.f32.mrf.mxu0 }
  0xd7   :  { %607 = vmatpush1.bf16.msra.mxu0 %v1602_v18  ;;  %v872_v18 = vld [vmem:[%s2036_s4 + $0xe0] sm:$0xff] }
  0xd8   :  { %v223_v45 = vpop.f32.mrf.mxu0  ;;  %776 = vmatprep.subr.bf16.mxu0 %v1610_v20  ;;  %v871_v20 = vld [vmem:[%s2036_s4 + $0xd8] sm:$0xff] }
  0xd9   :  { %1587 = vmatmul.mubr.msk.bf16.vlgmr.msra.gmra.mxu1 %vm32_vm2, %v1425_v43  ;;  %v844_v43 = vld [vmem:[%s2036_s4] sm:$0xff] }
  0xda   :  { %685 = vmatpush1.bf16.msra.mxu1 %v1728_v11  ;;  %v225_v46 = vpop.f32.mrf.mxu0  ;;  %1443 = vmatmul.mubr.msk.bf16.vlgmr.msra.gmra.mxu0 %vm184_vm3, %v1423_v30  ;;  %v866_v30 = vld [vmem:[%s2036_s4 + $0xb0] sm:$0xff] }
  0xdb   :  { %686 = vmatprep.subr.bf16.mxu1 %v1752_v15  ;;  %777 = vmatpush1.bf16.msra.mxu0 %v1608_v22  ;;  %v870_v22 = vld [vmem:[%s2036_s4 + $0xd0] sm:$0xff] }
  0xdc   :  { %v226_v47 = vpop.f32.mrf.mxu0  ;;  %778 = vmatprep.subr.bf16.mxu0 %v1616_v24  ;;  %708 = vmatprep.mubr.bf16.mxu1 %v1635_v10  ;;  %v869_v24 = vld [vmem:[%s2036_s4 + $0xc8] sm:$0xff] }
  0xdd   :  { %800 = vmatprep.mubr.bf16.mxu0 %v1635_v10 }
  0xde   :  { %687 = vmatpush1.bf16.msra.mxu1 %v1747_v14 }
  0xdf   :  { %688 = vmatprep.subr.bf16.mxu1 %v1764_v17  ;;  %779 = vmatpush1.bf16.msra.mxu0 %v1614_v25  ;;  %v857_v17 = vld [vmem:[%s2036_s4 + $0x68] sm:$0xff] }
  0xe0   :  { %780 = vmatprep.subr.bf16.mxu0 %v1622_v26  ;;  %v853_v25 = vld [vmem:[%s2036_s4 + $0x48] sm:$0xff]  ;;  %v868_v26 = vld [vmem:[%s2036_s4 + $0xc0] sm:$0xff] }
  0xe2   :  { %689 = vmatpush1.bf16.msra.mxu1 %v1774_v19  ;;  %v856_v19 = vld [vmem:[%s2036_s4 + $0x60] sm:$0xff] }
  0xe3   :  { %690 = vmatprep.subr.bf16.mxu1 %v1784_v21  ;;  %781 = vmatpush1.bf16.msra.mxu0 %v1620_v27  ;;  %v855_v21 = vld [vmem:[%s2036_s4 + $0x58] sm:$0xff]  ;;  %v852_v27 = vld [vmem:[%s2036_s4 + $0x40] sm:$0xff] }
  0xe4   :  { %782 = vmatprep.subr.bf16.mxu0 %v1628_v28  ;;  %v867_v28 = vld [vmem:[%s2036_s4 + $0xb8] sm:$0xff] }
  0xe6   :  { %691 = vmatpush1.bf16.msra.mxu1 %v1793_v23  ;;  %v854_v23 = vld [vmem:[%s2036_s4 + $0x50] sm:$0xff] }
  0xe7   :  { %783 = vmatpush1.bf16.msra.mxu0 %v1626_v29  ;;  %1496 = vmatprep.subr.mxu1 %v875_v48  ;;  %v851_v29 = vld [vmem:[%s2036_s4 + $0x38] sm:$0xff] }
  0xe8   :  { %1531 = vmatprep.subr.mxu0 %v875_v48 }
 0x189   :  { %v305_v49 = vpop.f32.mrf.mxu1  ;;  %v398_v50 = vpop.f32.mrf.mxu0 }
 0x18a   :  { %v306_v51 = vadd.f32 %v305_v49, %v221_v44 }
 0x18b   :  { %v307_v52 = vpop.f32.mrf.mxu1  ;;  %v400_v53 = vpop.f32.mrf.mxu0 }
 0x18c   :  { %v308_v54 = vadd.f32 %v307_v52, %v223_v45  ;;  %v1858_v55 = vadd.f32 %v398_v50, %v306_v51 }
 0x18d   :  { %v309_v56 = vpop.f32.mrf.mxu1  ;;  %v402_v57 = vpop.f32.mrf.mxu0 }
 0x18e   :  { %v1860_v58 = vadd.f32 %v400_v53, %v308_v54  ;;  %v423_v46 = vmul.f32 %v1858_v55, %v1858_v55  ;;  %v409_v49 = vrot.slane %v1858_v55, 4 }
 0x18f   :  { %v310_v59 = vpop.f32.mrf.mxu1  ;;  %v403_v60 = vpop.f32.mrf.mxu0 }
 0x190   :  { %v424_v44 = vmul.f32 %v1860_v58, %v1860_v58  ;;  %v415_v47 = vrot.slane %v1860_v58, 4  ;;  %v425_v52 = vrot.slane %v423_v46, 4  ;;  %v410_v57 = vadd.f32 %v409_v49, %v1858_v55 }
 0x191   :  { %v482_v61 = vpop.f32.mrf.mxu1 }
 0x192   :  { %v488_v62 = vpack.c.bf16 %v482_v61, %v482_v61  ;;  %v431_v50 = vrot.slane %v424_v44, 4  ;;  %v416_v53 = vadd.f32 %v415_v47, %v1860_v58 }
 0x193   :  { %v1582_v63 = vpop.f32.mrf.mxu1 }
 0x194   :  { %1452 = vmatmul.mubr.msk.bf16.vlgmr.msra.gmra.mxu1 %vm184_vm3, %v488_v62  ;;  %v432_v60 = vadd.f32 %v431_v50, %v424_v44  ;;  %v426_v63 = vadd.f32 %v425_v52, %v423_v46  ;;  %v1032_v52 = vld [vmem:[%s2037_s5 + $0x18] sm:$0xff] }
 0x195   :  { %v485_v3 = vpop.f32.mrf.mxu1  ;;  %1497 = vmatpush3.msra.mxu1 %v859_v1 }
 0x196   :  { %1498 = vmatprep.subr.mxu1 %v874_v2 }
 0x197   :  { %v1583_v5 = vpop.f32.mrf.mxu1  ;;  %1499 = vmatpush3.msra.mxu1 %v858_v4 }
 0x198   :  { %1500 = vmatprep.subr.mxu1 %v873_v16 }
 0x199   :  { %v527_v6 = vpop.f32.mrf.mxu1  ;;  %1501 = vmatpush3.msra.mxu1 %v857_v17 }
 0x19a   :  { %v533_v7 = vpack.c.bf16 %v527_v6, %v527_v6  ;;  %v1872_v8 = vpop.f32.mrf.mxu0  ;;  %1502 = vmatprep.subr.mxu1 %v872_v18  ;;  %v411_v6 = vrot.slane %v410_v57, 2 }
 0x19b   :  { %v1588_v9 = vpop.f32.mrf.mxu1  ;;  %1503 = vmatpush3.msra.mxu1 %v856_v19 }
 0x19c   :  { %1469 = vmatmul.mubr.msk.bf16.vlgmr.msra.gmra.mxu0 %vm184_vm3, %v533_v7  ;;  %v1875_v11 = vpop.f32.mrf.mxu0  ;;  %1504 = vmatprep.subr.mxu1 %v871_v20 }
 0x19d   :  { %v530_v12 = vpop.f32.mrf.mxu1  ;;  %1532 = vmatpush3.msra.mxu0 %v859_v1  ;;  %1505 = vmatpush3.msra.mxu1 %v855_v21 }
 0x19e   :  { %v630_v13 = vpop.f32.mrf.mxu0  ;;  %1533 = vmatprep.subr.mxu0 %v874_v2  ;;  %1506 = vmatprep.subr.mxu1 %v870_v22  ;;  %v417_v2 = vrot.slane %v416_v53, 2 }
 0x19f   :  { %v1589_v14 = vpop.f32.mrf.mxu1  ;;  %1534 = vmatpush3.msra.mxu0 %v858_v4  ;;  %1507 = vmatpush3.msra.mxu1 %v854_v23 }
 0x1a0   :  { %v631_v15 = vpop.f32.mrf.mxu0  ;;  %1535 = vmatprep.subr.mxu0 %v873_v16  ;;  %1508 = vmatprep.subr.mxu1 %v869_v24  ;;  %v427_v14 = vrot.slane %v426_v63, 2  ;;  %v418_v16 = vadd.f32 %v417_v2, %v416_v53  ;;  %v1031_v53 = vld [vmem:[%s2037_s5 + $0x10] sm:$0xff] }
 0x1a1   :  { %1536 = vmatpush3.msra.mxu0 %v857_v17  ;;  %1509 = vmatpush3.msra.mxu1 %v853_v25 }
 0x1a2   :  { %1537 = vmatprep.subr.mxu0 %v872_v18  ;;  %1510 = vmatprep.subr.mxu1 %v868_v26 }
 0x1a3   :  { %1538 = vmatpush3.msra.mxu0 %v856_v19  ;;  %1511 = vmatpush3.msra.mxu1 %v852_v27 }
 0x1a4   :  { %1539 = vmatprep.subr.mxu0 %v871_v20  ;;  %1512 = vmatprep.subr.mxu1 %v867_v28 }
 0x1a5   :  { %1540 = vmatpush3.msra.mxu0 %v855_v21  ;;  %1513 = vmatpush3.msra.mxu1 %v851_v29  ;;  %v412_v21 = vadd.f32 %v411_v6, %v410_v57 }
 0x1a6   :  { %1541 = vmatprep.subr.mxu0 %v870_v22  ;;  %1514 = vmatprep.subr.mxu1 %v866_v30 }
 0x1a7   :  { %1542 = vmatpush3.msra.mxu0 %v854_v23  ;;  %1515 = vmatpush3.msra.mxu1 %v850_v31 }
 0x1a8   :  { %1543 = vmatprep.subr.mxu0 %v869_v24  ;;  %1516 = vmatprep.subr.mxu1 %v865_v32 }
 0x1a9   :  { %1544 = vmatpush3.msra.mxu0 %v853_v25  ;;  %1517 = vmatpush3.msra.mxu1 %v849_v33 }
 0x1aa   :  { %1545 = vmatprep.subr.mxu0 %v868_v26  ;;  %1518 = vmatprep.subr.mxu1 %v864_v34 }
 0x1ab   :  { %1546 = vmatpush3.msra.mxu0 %v852_v27  ;;  %1519 = vmatpush3.msra.mxu1 %v848_v35  ;;  %v419_v27 = vrot.slane %v418_v16, 1 }
 0x1ac   :  { %1547 = vmatprep.subr.mxu0 %v867_v28  ;;  %1520 = vmatprep.subr.mxu1 %v863_v36  ;;  %v428_v28 = vadd.f32 %v427_v14, %v426_v63 }
 0x1ad   :  { %1548 = vmatpush3.msra.mxu0 %v851_v29  ;;  %1521 = vmatpush3.msra.mxu1 %v847_v37 }
 0x1ae   :  { %1549 = vmatprep.subr.mxu0 %v866_v30  ;;  %1522 = vmatprep.subr.mxu1 %v862_v38 }
 0x1af   :  { %1550 = vmatpush3.msra.mxu0 %v850_v31  ;;  %1523 = vmatpush3.msra.mxu1 %v846_v39 }
 0x1b0   :  { %1551 = vmatprep.subr.mxu0 %v865_v32  ;;  %1524 = vmatprep.subr.mxu1 %v861_v40 }
 0x1b1   :  { %1552 = vmatpush3.msra.mxu0 %v849_v33  ;;  %1525 = vmatpush3.msra.mxu1 %v845_v41  ;;  %v413_v33 = vrot.slane %v412_v21, 1 }
 0x1b2   :  { %1553 = vmatprep.subr.mxu0 %v864_v34  ;;  %1526 = vmatprep.subr.mxu1 %v860_v42 }
 0x1b3   :  { %1554 = vmatpush3.msra.mxu0 %v848_v35  ;;  %1527 = vmatpush3.msra.mxu1 %v844_v43 }
 0x1b4   :  { %1555 = vmatprep.subr.mxu0 %v863_v36  ;;  %1065 = vmatprep.subr.mxu1 %v1032_v52 }
 0x1b5   :  { %1556 = vmatpush3.msra.mxu0 %v847_v37 }
 0x1b6   :  { %1557 = vmatprep.subr.mxu0 %v862_v38 }
 0x1b7   :  { %1558 = vmatpush3.msra.mxu0 %v846_v39  ;;  %v429_v39 = vrot.slane %v428_v28, 1 }
 0x1b8   :  { %1559 = vmatprep.subr.mxu0 %v861_v40  ;;  %v420_v40 = vadd.f32 %v419_v27, %v418_v16  ;;  %v1184_v16 = vlaneseq }
 0x1b9   :  { %1560 = vmatpush3.msra.mxu0 %v845_v41  ;;  %v430_v49 = vadd.f32 %v429_v39, %v428_v28 }
 0x1ba   :  { %1561 = vmatprep.subr.mxu0 %v860_v42 }
 0x1bb   :  { %1562 = vmatpush3.msra.mxu0 %v844_v43  ;;  %v414_v43 = vadd.f32 %v413_v33, %v412_v21 }
 0x254   :  { %v710_v45 = vpop.f32.mrf.mxu1 }
 0x255   :  { %v711_v54 = vadd.f32 %v710_v45, %v1872_v8  ;;  %v433_v8 = vrot.slane %v432_v60, 2 }
 0x256   :  { %v712_v48 = vpop.f32.mrf.mxu1 }
 0x257   :  { %v713_v61 = vadd.f32 %v712_v48, %v1875_v11  ;;  %v434_v22 = vadd.f32 %v433_v8, %v432_v60 }
 0x258   :  { %v714_v51 = vpop.f32.mrf.mxu1 }
 0x259   :  { %v435_v35 = vrot.slane %v434_v22, 1 }
 0x25a   :  { %v715_v56 = vpop.f32.mrf.mxu1 }
 0x25b   :  { %v436_v46 = vadd.f32 %v435_v35, %v434_v22  ;;  %v1029_v56 = vld [vmem:[%s2037_s5] sm:$0xff] }
 0x25c   :  { %v802_v59 = vpop.f32.mrf.mxu0 }
 0x25d   :  { %v1971_v62 = vadd.f32 %v802_v59, %v711_v54  ;;  %v1030_v54 = vld [vmem:[%s2037_s5 + $0x8] sm:$0xff] }
 0x25e   :  { %v804_v1 = vpop.f32.mrf.mxu0 }
 0x25f   :  { %v814_v3 = vrot.slane %v1971_v62, 4  ;;  %v828_v4 = vmul.f32 %v1971_v62, %v1971_v62  ;;  %v1976_v5 = vadd.f32 %v804_v1, %v713_v61 }
 0x260   :  { %v806_v7 = vpop.f32.mrf.mxu0 }
 0x261   :  { %v815_v9 = vadd.f32 %v814_v3, %v1971_v62  ;;  %v830_v12 = vrot.slane %v828_v4, 4  ;;  %v820_v11 = vrot.slane %v1976_v5, 4  ;;  %v829_v13 = vmul.f32 %v1976_v5, %v1976_v5 }
 0x262   :  { %v807_v15 = vpop.f32.mrf.mxu0 }
 0x263   :  { %v816_v17 = vrot.slane %v815_v9, 2  ;;  %v831_v18 = vadd.f32 %v830_v12, %v828_v4  ;;  %v821_v19 = vadd.f32 %v820_v11, %v1976_v5  ;;  %v836_v20 = vrot.slane %v829_v13, 4 }
 0x265   :  { %v817_v23 = vadd.f32 %v816_v17, %v815_v9  ;;  %v832_v24 = vrot.slane %v831_v18, 2  ;;  %v822_v25 = vrot.slane %v821_v19, 2  ;;  %v837_v26 = vadd.f32 %v836_v20, %v829_v13  ;;  %v1022_v9 = vld [vmem:[%s2038_s6] sm:$0x1] }
 0x266   :  { %v1026_v13 = vld [vmem:[%s2039_s7] sm:$0x1]  ;;  %v1185_v17 = vshrl.u32 %v1184_v16, 7 }
 0x267   :  { %v823_v29 = vadd.f32 %v822_v25, %v821_v19  ;;  %v818_v30 = vrot.slane %v817_v23, 1  ;;  %v838_v31 = vrot.slane %v837_v26, 2  ;;  %v833_v32 = vadd.f32 %v832_v24, %v831_v18 }
 0x268   :  { %v1186_v18 = vsub.s32 0, %v1185_v17 }
 0x269   :  { %v824_v34 = vrot.slane %v823_v29, 1  ;;  %v839_v36 = vadd.f32 %v838_v31, %v837_v26  ;;  %v834_v37 = vrot.slane %v833_v32, 1  ;;  %v819_v38 = vadd.f32 %v818_v30, %v817_v23 }
 0x26b   :  { %v825_v41 = vadd.f32 %v824_v34, %v823_v29  ;;  %v840_v42 = vrot.slane %v839_v36, 1  ;;  %v835_v44 = vadd.f32 %v834_v37, %v833_v32  ;;  %v826_v48 = vadd.f32 %v819_v38, %v414_v43  ;;  %v1629_v43 = vld [vmem:[%s2040_s3] sm:$0xff]  }
 0x26d   :  { %v827_v45 = vadd.f32 %v825_v41, %v420_v40  ;;  %v841_v47 = vadd.f32 %v840_v42, %v839_v36  ;;  %v842_v51 = vadd.f32 %v835_v44, %v430_v49  ;;  %v1630_v44 = vld [vmem:[%s2040_s3] sm:$0xff]  }
 0x26f   :  { %940 = vmatprep.mubr.f32.mxu1 %v827_v45  ;;  %v843_v50 = vadd.f32 %v841_v47, %v436_v46 }
 0x270   :  { %941 = vmatmul.mubr.f32.vlgmr.msra.gmra.mxu1 %v826_v48 }
 0x271   :  { %1010 = vmatprep.mubr.f32.mxu0 %v843_v50  ;;  %1101 = vmatprep.mubr.f32.mxu1 %v1633_v0 }
 0x272   :  { %1011 = vmatmul.mubr.f32.vlgmr.msra.gmra.mxu0 %v842_v51  ;;  %1066 = vmatpush1.msra.mxu1 %v1031_v53 }
 0x273   :  { %1347 = vmatprep.mubr.bf16.mxu0 %v1635_v10  ;;  %1067 = vmatprep.subr.mxu1 %v1030_v54 }
 0x274   :  { %1068 = vmatpush1.msra.mxu1 %v1029_v56 }
 0x275   :  { %1139 = vmatprep.subr.mxu1 %v1032_v52 }
 0x330   :  { %v1528_v57 = vpop.f32.mrf.mxu1 }
 0x332   :  { %v1529_v59 = vpop.f32.mrf.mxu1  ;;  %v1563_v60 = vpop.f32.mrf.mxu0 }
 0x333   :  { %v1530_v61 = vadd.f32 %v1529_v59, %v1528_v57 }
 0x334   :  { %v1564_v63 = vpop.f32.mrf.mxu0 }
 0x335   :  { %v1017_v1 = vmul.f32 0.00390625, %v1530_v61  ;;  %v1565_v2 = vadd.f32 %v1564_v63, %v1563_v60 }
 0x337   :  { %v1019_v3 = vmul.f32 %v1017_v1, %v1017_v1  ;;  %v1018_v4 = vmul.f32 0.00390625, %v1565_v2 }
 0x339   :  { %v1020_v6 = vsub.f32 %v1018_v4, %v1019_v3 }
 0x33b   :  { %v1021_v7 = vmax.f32 %v1020_v6, 0.0 }
 0x33d   :  { %v1023_v8 = vadd.f32 1e-05, %v1021_v7 }
 0x33f   :  { %1631 = vrsqrt.f32 %v1023_v8 }
 0x34c   :  { %v1632_v12 = vpop.eup %1631 }
 0x34d   :  { %v1025_v11 = vmul.f32 %v1632_v12, %v1022_v9 }
 0x34f   :  { %1470 = vmatmul.mubr.msk.f32.vlgmr.msra.gmra.mxu1 %vm1033_vm4, %v1025_v11  ;;  %v1027_v14 = vmul.f32 %v1025_v11, %v1017_v1 }
 0x350   :  { %1140 = vmatpush1.msra.mxu1 %v1031_v53  ;;  %1175 = vmatprep.mubr.f32.mxu1 %v1633_v0 }
 0x351   :  { %1141 = vmatprep.subr.mxu1 %v1030_v54  ;;  %v1028_v15 = vsub.f32 %v1026_v13, %v1027_v14 }
 0x352   :  { %1142 = vmatpush1.msra.mxu1 %v1029_v56 }
 0x353   :  { %1471 = vmatmul.mubr.msk.f32.vlgmr.msra.gmra.mxu1 %vm1033_vm4, %v1028_v15 }
 0x354   :  { %1260 = vmatprep.mubr.bf16.mxu1 %v1635_v10 }
 0x40f   :  { %v1103_v19 = vpop.f32.mrf.mxu1 }
 0x410   :  { %v1187_v20 = vrot.slane %v1103_v19, %v1186_v18 }
 0x411   :  { %v1105_v21 = vpop.f32.mrf.mxu1 }
 0x412   :  { %v1191_v22 = vrot.slane %v1105_v21, %v1186_v18  ;;  %v1192_v24 = vmul.f32 %v1187_v20, %v1858_v55  ;;  %v1287_v25 = vmul.f32 %v1187_v20, %v1971_v62 }
 0x413   :  { %v1177_v23 = vpop.f32.mrf.mxu1 }
 0x414   :  { %v1197_v26 = vrot.slane %v1177_v23, %v1186_v18  ;;  %v1193_v30 = vmul.f32 %v1191_v22, %v1860_v58  ;;  %v1288_v10 = vmul.f32 %v1191_v22, %v1976_v5 }
 0x415   :  { %v1179_v0 = vpop.f32.mrf.mxu1 }
 0x416   :  { %v1202_v27 = vadd.f32 %v1197_v26, %v1192_v24  ;;  %v1289_v28 = vadd.f32 %v1287_v25, %v1197_v26  ;;  %v1201_v29 = vrot.slane %v1179_v0, %v1186_v18 }
 0x418   :  { %vm1204_vm5 = vcmp.gt.f32.partialorder %v1202_v27, 0.0  ;;  %v1206_v31 = vmul.f32 0.2, %v1202_v27  ;;  %vm1291_vm6 = vcmp.gt.f32.partialorder %v1289_v28, 0.0  ;;  %v1293_v32 = vmul.f32 0.2, %v1289_v28 }
 0x419   :  { %v1203_v33 = vadd.f32 %v1201_v29, %v1193_v30  ;;  %v1290_v34 = vadd.f32 %v1288_v10, %v1201_v29 }
 0x41a   :  { %v1208_v35 = vsel %vm1204_vm5, %v1202_v27, %v1206_v31  ;;  %v1295_v36 = vsel %vm1291_vm6, %v1289_v28, %v1293_v32 }
 0x41b   :  { %vm1205_vm7 = vcmp.gt.f32.partialorder %v1203_v33, 0.0  ;;  %v1207_v55 = vmul.f32 0.2, %v1203_v33  ;;  %vm1292_vm8 = vcmp.gt.f32.partialorder %v1290_v34, 0.0  ;;  %v1294_v62 = vmul.f32 0.2, %v1290_v34 }
 0x41c   :  { %v1210_v37 = vpack.c.bf16 %v1208_v35, %v1208_v35  ;;  %v1297_v38 = vpack.c.bf16 %v1295_v36, %v1295_v36 }
 0x41d   :  { %v1209_v39 = vsel %vm1205_vm7, %v1203_v33, %v1207_v55  ;;  %v1296_v40 = vsel %vm1292_vm8, %v1290_v34, %v1294_v62 }
 0x41e   :  { %v1211_v41 = vpack.c.bf16 %v1209_v39, %v1209_v39  ;;  %v1298_v58 = vpack.c.bf16 %v1296_v40, %v1296_v40  ;;  %v1223_v5 = vsel %vm36_vm0, %v1210_v37, 0  ;;  %v1310_v42 = vsel %vm36_vm0, %v1297_v38, 0 }
 0x420   :  { %1473 = vmatprep.subr.msk.bf16.mxu1 %vm36_vm0, %v1211_v41  ;;  %1478 = vmatprep.subr.msk.bf16.mxu0 %vm36_vm0, %v1298_v58 }
 0x421   :  { %1243 = vmatpush1.bf16.msra.mxu1 %v1223_v5  ;;  %1330 = vmatpush1.bf16.msra.mxu0 %v1310_v42 }
 0x424   :  { %1474 = vmatmul.mubr.msk.bf16.vlgmr.msra.gmra.mxu1 %vm32_vm2, %v1629_v43  ;;  %1479 = vmatmul.mubr.msk.bf16.vlgmr.msra.gmra.mxu0 %vm32_vm2, %v1630_v44 }
 0x4e4   :  { %v1262_v45 = vpop.f32.mrf.mxu1  ;;  %v1349_v46 = vpop.f32.mrf.mxu0 }
 0x4e6   :  { %v1264_v47 = vpop.f32.mrf.mxu1  ;;  %v1351_v48 = vpop.f32.mrf.mxu0 }
 0x4e7   :  { %v1484_v49 = vpack.c.bf16 %v1264_v47, %v1262_v45  ;;  %v1486_v50 = vpack.c.bf16 %v1351_v48, %v1349_v46 }
 0x4e8   :  { %v1266_v51 = vpop.f32.mrf.mxu1  ;;  %v1353_v52 = vpop.f32.mrf.mxu0 }
 0x4e9   :  { %1283 = vst [vmem:[%s2041_s8] sm:$0xff] %v1484_v49  ;;  %1482 = vst [vmem:[%s2041_s8 + $0x10] sm:$0xff] %v1486_v50 }
 0x4ea   :  { %v1268_v53 = vpop.f32.mrf.mxu1  ;;  %v1355_v54 = vpop.f32.mrf.mxu0 }
 0x4eb   :  { %v1485_v56 = vpack.c.bf16 %v1268_v53, %v1266_v51  ;;  %v1487_v57 = vpack.c.bf16 %v1355_v54, %v1353_v52 }
 0x4ed   :  { %1284 = vst [vmem:[%s2041_s8 + $0x8] sm:$0xff] %v1485_v56  ;;  %1483 = vst [vmem:[%s2041_s8 + $0x18] sm:$0xff] %v1487_v57 }

// kernel: decoder_forward.5
= control target key start
LH: loop header
LB: loop body
LE: loop exit
PB: predicated region body
PF: predicated region fallthrough
CT: control target
= control target key end

     0   :  { %v3977_v1 = vmov 0   ;;  %vm49_vm0 = vcmask 130048   ;;  %vm1965_vm1 = vcmask 64512   ;;  %s3968_s0 = inlined_call_operand.vmem [shape: bf16[2,16,256], index: 0, kind: input, shape index: {}]   ;;  %s3969_s2 = inlined_call_operand.vmem [shape: bf16[2,16,16], index: 2, kind: input, shape index: {}]   ;;  %s3970_s1 = inlined_call_operand.vmem [shape: bf16[3,256,256], index: 1, kind: input, shape index: {}]   ;;  %s3971_s4 = inlined_call_operand.vmem [shape: f32[256,8], index: 4, kind: input, shape index: {}]   ;;  %s3972_s5 = inlined_call_operand.vmem [shape: f32[8,256], index: 5, kind: input, shape index: {}]   ;;  %s3973_s6 = inlined_call_operand.vmem [shape: f32[1,8], index: 6, kind: input, shape index: {}]   ;;  %s3974_s7 = inlined_call_operand.vmem [shape: f32[1,8], index: 7, kind: input, shape index: {}]   ;;  %s3975_s3 = inlined_call_operand.vmem [shape: bf16[32,16], index: 3, kind: input, shape index: {}]   ;;  %s3976_s8 = inlined_call_operand.vmem [shape: bf16[2,32,256], index: 8, kind: output, shape index: {}]  }
   0x1   :  { %v2829_v0 = vld [vmem:[%s3968_s0 + $0x4] ss:$8 sps:$4 sm:$0xff]   ;;  %85 = vmatprep.mubr.bf16.mxu0 %v3977_v1  ;;  %141 = vmatprep.mubr.bf16.mxu1 %v3977_v1  ;;  %v3044_v2 = vld [vmem:[%s3968_s0] ss:$8 sps:$4 sm:$0xff]   ;;  %v3057_v5 = vld [vmem:[%s3970_s1 + $0x170] ss:$8 sps:$4 sm:$0xff]  }
   0x2   :  { %67 = vmatprep.subr.bf16.mxu0 %v2829_v0  ;;  %123 = vmatprep.subr.bf16.mxu1 %v2829_v0  ;;  %v2832_v3 = vld [vmem:[%s3969_s2] sm:$0xff]   ;;  %v2833_v4 = vld [vmem:[%s3969_s2 + $0x8] sm:$0xff]   ;;  %v3062_v6 = vld [vmem:[%s3970_s1 + $0x174] ss:$8 sps:$4 sm:$0xff]  }
   0x3   :  { %68 = vmatpush1.bf16.msra.mxu0 %v3044_v2  ;;  %124 = vmatpush1.bf16.msra.mxu1 %v3044_v2  ;;  %v3067_v7 = vld [vmem:[%s3970_s1 + $0x164] ss:$8 sps:$4 sm:$0xff]   ;;  %v3076_v8 = vld [vmem:[%s3970_s1 + $0x160] ss:$8 sps:$4 sm:$0xff]   ;;  %v3082_v9 = vld [vmem:[%s3970_s1 + $0x154] ss:$8 sps:$4 sm:$0xff]  }
   0x4   :  { %379 = vmatprep.subr.bf16.mxu0 %v3062_v6  ;;  %v3088_v10 = vld [vmem:[%s3970_s1 + $0x150] ss:$8 sps:$4 sm:$0xff]   ;;  %v3094_v11 = vld [vmem:[%s3970_s1 + $0x144] ss:$8 sps:$4 sm:$0xff]   ;;  %v3100_v12 = vld [vmem:[%s3970_s1 + $0x140] ss:$8 sps:$4 sm:$0xff]  }
   0x5   :  { %v3106_v13 = vld [vmem:[%s3970_s1 + $0x134] ss:$8 sps:$4 sm:$0xff]   ;;  %v3112_v14 = vld [vmem:[%s3970_s1 + $0x130] ss:$8 sps:$4 sm:$0xff]   ;;  %v3118_v15 = vld [vmem:[%s3970_s1 + $0x124] ss:$8 sps:$4 sm:$0xff]  }
   0x6   :  { %2392 = vmatmul.mubr.msk.bf16.vlgmr.msra.gmra.mxu0 %vm49_vm0, %v2832_v3  ;;  %2396 = vmatmul.mubr.msk.bf16.vlgmr.msra.gmra.mxu1 %vm49_vm0, %v2833_v4  ;;  %v3124_v16 = vld [vmem:[%s3970_s1 + $0x120] ss:$8 sps:$4 sm:$0xff]   ;;  %v3129_v17 = vld [vmem:[%s3970_s1 + $0x114] ss:$8 sps:$4 sm:$0xff]   ;;  %v3135_v18 = vld [vmem:[%s3970_s1 + $0x70] ss:$8 sps:$4 sm:$0xff]  }
   0x7   :  { %411 = vmatprep.mubr.bf16.mxu0 %v2829_v0  ;;  %380 = vmatpush1.bf16.msra.mxu0 %v3057_v5  ;;  %v3140_v19 = vld [vmem:[%s3970_s1 + $0x74] ss:$8 sps:$4 sm:$0xff]   ;;  %v3145_v20 = vld [vmem:[%s3970_s1 + $0x110] ss:$8 sps:$4 sm:$0xff]   ;;  %v3153_v21 = vld [vmem:[%s3970_s1 + $0x60] ss:$8 sps:$4 sm:$0xff]  }
   0x8   :  { %381 = vmatprep.subr.bf16.mxu0 %v3067_v7  ;;  %582 = vmatprep.subr.bf16.mxu1 %v3140_v19  ;;  %v3158_v22 = vld [vmem:[%s3970_s1 + $0x64] ss:$8 sps:$4 sm:$0xff]   ;;  %v3170_v24 = vld [vmem:[%s3970_s1 + $0x54] ss:$8 sps:$4 sm:$0xff]   ;;  %v3176_v25 = vld [vmem:[%s3970_s1 + $0x100] ss:$8 sps:$4 sm:$0xff]  }
   0x9   :  { %583 = vmatpush1.bf16.msra.mxu1 %v3135_v18  ;;  %v3164_v23 = vld [vmem:[%s3970_s1 + $0x104] ss:$8 sps:$4 sm:$0xff]   ;;  %v3182_v26 = vld [vmem:[%s3970_s1 + $0x50] ss:$8 sps:$4 sm:$0xff]   ;;  %v3188_v27 = vld [vmem:[%s3970_s1 + $0x1f4] ss:$8 sps:$4 sm:$0xff]  }
   0xa   :  { %584 = vmatprep.subr.bf16.mxu1 %v3158_v22  ;;  %v3194_v28 = vld [vmem:[%s3970_s1 + $0x44] ss:$8 sps:$4 sm:$0xff]   ;;  %v3200_v29 = vld [vmem:[%s3970_s1 + $0x1f0] ss:$8 sps:$4 sm:$0xff]   ;;  %v3206_v30 = vld [vmem:[%s3970_s1 + $0x40] ss:$8 sps:$4 sm:$0xff]  }
   0xb   :  { %382 = vmatpush1.bf16.msra.mxu0 %v3076_v8  ;;  %v3212_v31 = vld [vmem:[%s3970_s1 + $0x1e4] ss:$8 sps:$4 sm:$0xff]   ;;  %v3218_v32 = vld [vmem:[%s3970_s1 + $0x34] ss:$8 sps:$4 sm:$0xff]   ;;  %v3224_v33 = vld [vmem:[%s3970_s1 + $0x1e0] ss:$8 sps:$4 sm:$0xff]  }
   0xc   :  { %383 = vmatprep.subr.bf16.mxu0 %v3082_v9  ;;  %v3230_v34 = vld [vmem:[%s3970_s1 + $0x30] ss:$8 sps:$4 sm:$0xff]   ;;  %v3236_v35 = vld [vmem:[%s3970_s1 + $0x1d4] ss:$8 sps:$4 sm:$0xff]   ;;  %v3242_v36 = vld [vmem:[%s3970_s1 + $0x24] ss:$8 sps:$4 sm:$0xff]  }
   0xd   :  { %585 = vmatpush1.bf16.msra.mxu1 %v3153_v21  ;;  %v3248_v37 = vld [vmem:[%s3970_s1 + $0x1d0] ss:$8 sps:$4 sm:$0xff]   ;;  %v3254_v38 = vld [vmem:[%s3970_s1 + $0x20] ss:$8 sps:$4 sm:$0xff]   ;;  %v3260_v39 = vld [vmem:[%s3970_s1 + $0x1c4] ss:$8 sps:$4 sm:$0xff]  }
   0xe   :  { %586 = vmatprep.subr.bf16.mxu1 %v3170_v24  ;;  %4025 = vst [vmem:[#allocation3_spill] sm:$0xff] %v3248_v37  ;;  %4026 = vst [vmem:[#allocation4_spill] sm:$0xff] %v3260_v39  ;;  %v3266_v40 = vld [vmem:[%s3970_s1 + $0x14] ss:$8 sps:$4 sm:$0xff]   ;;  %v3272_v41 = vld [vmem:[%s3970_s1 + $0x1c0] ss:$8 sps:$4 sm:$0xff]  }
   0xf   :  { %384 = vmatpush1.bf16.msra.mxu0 %v3088_v10  ;;  %4027 = vst [vmem:[#allocation5_spill] sm:$0xff] %v3272_v41  ;;  %v3278_v42 = vld [vmem:[%s3970_s1 + $0x10] ss:$8 sps:$4 sm:$0xff]   ;;  %v3284_v43 = vld [vmem:[%s3970_s1 + $0x1b4] ss:$8 sps:$4 sm:$0xff]  }
  0x10   :  { %385 = vmatprep.subr.bf16.mxu0 %v3094_v11  ;;  %4028 = vst [vmem:[#allocation6_spill] sm:$0xff] %v3284_v43  ;;  %v3290_v44 = vld [vmem:[%s3970_s1 + $0x4] ss:$8 sps:$4 sm:$0xff]   ;;  %v3296_v45 = vld [vmem:[%s3970_s1 + $0x1b0] ss:$8 sps:$4 sm:$0xff]  }
  0x11   :  { %587 = vmatpush1.bf16.msra.mxu1 %v3182_v26  ;;  %4029 = vst [vmem:[#allocation7_spill] sm:$0xff] %v3296_v45  ;;  %v3302_v46 = vld [vmem:[%s3970_s1] ss:$8 sps:$4 sm:$0xff]   ;;  %v3308_v47 = vld [vmem:[%s3970_s1 + $0x1a4] ss:$8 sps:$4 sm:$0xff]  }
  0x12   :  { %588 = vmatprep.subr.bf16.mxu1 %v3194_v28  ;;  %4030 = vst [vmem:[#allocation8_spill] sm:$0xff] %v3308_v47  ;;  %v3314_v48 = vld [vmem:[%s3970_s1 + $0xf4] ss:$8 sps:$4 sm:$0xff]   ;;  %v3320_v49 = vld [vmem:[%s3970_s1 + $0x1a0] ss:$8 sps:$4 sm:$0xff]  }
  0x13   :  { %386 = vmatpush1.bf16.msra.mxu0 %v3100_v12  ;;  %4031 = vst [vmem:[#allocation9_spill] sm:$0xff] %v3320_v49  ;;  %v3326_v50 = vld [vmem:[%s3970_s1 + $0xf0] ss:$8 sps:$4 sm:$0xff]   ;;  %v3332_v51 = vld [vmem:[%s3970_s1 + $0x194] ss:$8 sps:$4 sm:$0xff]  }
  0x14   :  { %387 = vmatprep.subr.bf16.mxu0 %v3106_v13  ;;  %4032 = vst [vmem:[#allocation10_spill] sm:$0xff] %v3332_v51  ;;  %v3338_v52 = vld [vmem:[%s3970_s1 + $0xe4] ss:$8 sps:$4 sm:$0xff]   ;;  %v3343_v53 = vld [vmem:[%s3970_s1 + $0x190] ss:$8 sps:$4 sm:$0xff]  }
  0x15   :  { %589 = vmatpush1.bf16.msra.mxu1 %v3206_v30  ;;  %4033 = vst [vmem:[#allocation11_spill] sm:$0xff] %v3343_v53  ;;  %v3348_v54 = vld [vmem:[%s3970_s1 + $0x184] ss:$8 sps:$4 sm:$0xff]   ;;  %v3355_v55 = vld [vmem:[%s3970_s1 + $0xe0] ss:$8 sps:$4 sm:$0xff]  }
  0x16   :  { %590 = vmatprep.subr.bf16.mxu1 %v3218_v32  ;;  %4034 = vst [vmem:[#allocation12_spill] sm:$0xff] %v3348_v54  ;;  %v3360_v56 = vld [vmem:[%s3970_s1 + $0xd4] ss:$8 sps:$4 sm:$0xff]   ;;  %v3367_v57 = vld [vmem:[%s3970_s1 + $0x180] ss:$8 sps:$4 sm:$0xff]  }
  0x17   :  { %388 = vmatpush1.bf16.msra.mxu0 %v3112_v14  ;;  %4035 = vst [vmem:[#allocation13_spill] sm:$0xff] %v3367_v57  ;;  %v3372_v58 = vld [vmem:[%s3970_s1 + $0xd0] ss:$8 sps:$4 sm:$0xff]   ;;  %v3377_v59 = vld [vmem:[%s3970_s1 + $0x274] ss:$8 sps:$4 sm:$0xff]  }
  0x18   :  { %389 = vmatprep.subr.bf16.mxu0 %v3118_v15  ;;  %4036 = vst [vmem:[#allocation14_spill] sm:$0xff] %v3377_v59  ;;  %v3382_v60 = vld [vmem:[%s3970_s1 + $0xc4] ss:$8 sps:$4 sm:$0xff]   ;;  %v3392_v61 = vld [vmem:[%s3970_s1 + $0x270] ss:$8 sps:$4 sm:$0xff]  }
  0x19   :  { %591 = vmatpush1.bf16.msra.mxu1 %v3230_v34  ;;  %4037 = vst [vmem:[#allocation15_spill] sm:$0xff] %v3392_v61  ;;  %v3398_v62 = vld [vmem:[%s3970_s1 + $0xc0] ss:$8 sps:$4 sm:$0xff]   ;;  %v3404_v63 = vld [vmem:[%s3970_s1 + $0x264] ss:$8 sps:$4 sm:$0xff]  }
  0x1a   :  { %592 = vmatprep.subr.bf16.mxu1 %v3242_v36  ;;  %4038 = vst [vmem:[#allocation16_spill] sm:$0xff] %v3404_v63  ;;  %v3410_v0 = vld [vmem:[%s3970_s1 + $0xb4] ss:$8 sps:$4 sm:$0xff]   ;;  %v3417_v3 = vld [vmem:[%s3970_s1 + $0x260] ss:$8 sps:$4 sm:$0xff]  }
  0x1b   :  { %390 = vmatpush1.bf16.msra.mxu0 %v3124_v16  ;;  %4039 = vst [vmem:[#allocation17_spill] sm:$0xff] %v3417_v3  ;;  %v3423_v4 = vld [vmem:[%s3970_s1 + $0xb0] ss:$8 sps:$4 sm:$0xff]   ;;  %v3435_v1 = vld [vmem:[%s3970_s1 + $0xa4] ss:$8 sps:$4 sm:$0xff]  }
  0x1c   :  { %391 = vmatprep.subr.bf16.mxu0 %v3129_v17 }
  0x1d   :  { %593 = vmatpush1.bf16.msra.mxu1 %v3254_v38 }
  0x1e   :  { %594 = vmatprep.subr.bf16.mxu1 %v3266_v40 }
  0x1f   :  { %392 = vmatpush1.bf16.msra.mxu0 %v3145_v20 }
  0x20   :  { %393 = vmatprep.subr.bf16.mxu0 %v3164_v23 }
  0x21   :  { %595 = vmatpush1.bf16.msra.mxu1 %v3278_v42 }
  0x22   :  { %596 = vmatprep.subr.bf16.mxu1 %v3290_v44 }
  0x23   :  { %394 = vmatpush1.bf16.msra.mxu0 %v3176_v25 }
  0x24   :  { %395 = vmatprep.subr.bf16.mxu0 %v3188_v27 }
  0x25   :  { %597 = vmatpush1.bf16.msra.mxu1 %v3302_v46 }
  0x26   :  { %598 = vmatprep.subr.bf16.mxu1 %v3314_v48 }
  0x27   :  { %396 = vmatpush2.bf16.msra.mxu0 %v3200_v29 }
  0x28   :  { %397 = vmatprep.subr.bf16.mxu0 %v3212_v31 }
  0x29   :  { %599 = vmatpush2.bf16.msra.mxu1 %v3326_v50 }
  0x2a   :  { %600 = vmatprep.subr.bf16.mxu1 %v3338_v52 }
  0x2b   :  { %398 = vmatpush2.bf16.msra.mxu0 %v3224_v33 }
  0x2c   :  { %399 = vmatprep.subr.bf16.mxu0 %v3236_v35 }
  0x2d   :  { %601 = vmatpush2.bf16.msra.mxu1 %v3355_v55 }
  0x2e   :  { %602 = vmatprep.subr.bf16.mxu1 %v3360_v56 }
  0x2f   :  { %400 = vmatpush2.bf16.msra.mxu0 %v3248_v37 }
  0x30   :  { %401 = vmatprep.subr.bf16.mxu0 %v3260_v39 }
  0x31   :  { %603 = vmatpush2.bf16.msra.mxu1 %v3372_v58 }
  0x32   :  { %604 = vmatprep.subr.bf16.mxu1 %v3382_v60 }
  0x33   :  { %402 = vmatpush2.bf16.msra.mxu0 %v3272_v41 }
  0x34   :  { %403 = vmatprep.subr.bf16.mxu0 %v3284_v43 }
  0x35   :  { %605 = vmatpush2.bf16.msra.mxu1 %v3398_v62 }
  0x36   :  { %606 = vmatprep.subr.bf16.mxu1 %v3410_v0 }
  0x37   :  { %404 = vmatpush2.bf16.msra.mxu0 %v3296_v45 }
  0x38   :  { %405 = vmatprep.subr.bf16.mxu0 %v3308_v47  ;;  %v3539_v47 = vld [vmem:[%s3970_s1 + $0x200] ss:$8 sps:$4 sm:$0xff]  }
  0x39   :  { %607 = vmatpush2.bf16.msra.mxu1 %v3423_v4  ;;  %4055 = vst [vmem:[#allocation33_spill] sm:$0xff] %v3539_v47 }
  0x3a   :  { %608 = vmatprep.subr.bf16.mxu1 %v3435_v1 }
  0x3b   :  { %406 = vmatpush2.bf16.msra.mxu0 %v3320_v49  ;;  %v3513_v49 = vld [vmem:[%s3970_s1 + $0x220] ss:$8 sps:$4 sm:$0xff]  }
  0x3c   :  { %407 = vmatprep.subr.bf16.mxu0 %v3332_v51  ;;  %v3501_v51 = vld [vmem:[%s3970_s1 + $0x224] ss:$8 sps:$4 sm:$0xff]   ;;  %4051 = vst [vmem:[#allocation29_spill] sm:$0xff] %v3513_v49 }
  0x3d   :  { %4050 = vst [vmem:[#allocation28_spill] sm:$0xff] %v3501_v51 }
  0x3f   :  { %408 = vmatpush2.bf16.msra.mxu0 %v3343_v53  ;;  %v3489_v53 = vld [vmem:[%s3970_s1 + $0x230] ss:$8 sps:$4 sm:$0xff]  }
  0x40   :  { %409 = vmatprep.subr.bf16.mxu0 %v3348_v54  ;;  %v3477_v54 = vld [vmem:[%s3970_s1 + $0x234] ss:$8 sps:$4 sm:$0xff]   ;;  %4048 = vst [vmem:[#allocation26_spill] sm:$0xff] %v3489_v53 }
  0x41   :  { %4046 = vst [vmem:[#allocation24_spill] sm:$0xff] %v3477_v54 }
  0x43   :  { %410 = vmatpush2.bf16.msra.mxu0 %v3367_v57  ;;  %v3465_v57 = vld [vmem:[%s3970_s1 + $0x240] ss:$8 sps:$4 sm:$0xff]  }
  0x44   :  { %818 = vmatprep.subr.bf16.mxu0 %v3377_v59  ;;  %v3453_v59 = vld [vmem:[%s3970_s1 + $0x244] ss:$8 sps:$4 sm:$0xff]   ;;  %4044 = vst [vmem:[#allocation22_spill] sm:$0xff] %v3465_v57 }
  0x45   :  { %4042 = vst [vmem:[#allocation20_spill] sm:$0xff] %v3453_v59 }
  0x46   :  { %412 = vmatmul.mubr.bf16.vlgmr.msra.gmra.mxu0 %v3044_v2  ;;  %v3429_v2 = vld [vmem:[%s3970_s1 + $0x254] ss:$8 sps:$4 sm:$0xff]  }
  0x47   :  { %819 = vmatpush1.bf16.msra.mxu0 %v3392_v61  ;;  %4040 = vst [vmem:[#allocation18_spill] sm:$0xff] %v3429_v2  ;;  %v3441_v61 = vld [vmem:[%s3970_s1 + $0x250] ss:$8 sps:$4 sm:$0xff]  }
  0x48   :  { %820 = vmatprep.subr.bf16.mxu0 %v3404_v63  ;;  %4041 = vst [vmem:[#allocation19_spill] sm:$0xff] %v3441_v61  ;;  %v3447_v63 = vld [vmem:[%s3970_s1 + $0xa0] ss:$8 sps:$4 sm:$0xff]  }
  0x49   :  { %609 = vmatpush2.bf16.msra.mxu1 %v3447_v63 }
  0x4b   :  { %821 = vmatpush1.bf16.msra.mxu0 %v3417_v3  ;;  %v3459_v3 = vld [vmem:[%s3970_s1 + $0x94] ss:$8 sps:$4 sm:$0xff]  }
  0x4c   :  { %822 = vmatprep.subr.bf16.mxu0 %v3429_v2  ;;  %4043 = vst [vmem:[#allocation21_spill] sm:$0xff] %v3459_v3  ;;  %v3471_v2 = vld [vmem:[%s3970_s1 + $0x90] ss:$8 sps:$4 sm:$0xff]   ;;  %610 = vmatprep.subr.bf16.mxu1 %v3459_v3 }
  0x4d   :  { %4045 = vst [vmem:[#allocation23_spill] sm:$0xff] %v3471_v2  ;;  %611 = vmatpush2.bf16.msra.mxu1 %v3471_v2  ;;  %v3643_v3 = vld [vmem:[%s3968_s0 + $0x10] ss:$8 sps:$4 sm:$0xff]  }
  0x4f   :  { %823 = vmatpush1.bf16.msra.mxu0 %v3441_v61  ;;  %v3483_v61 = vld [vmem:[%s3970_s1 + $0x84] ss:$8 sps:$4 sm:$0xff]  }
  0x50   :  { %824 = vmatprep.subr.bf16.mxu0 %v3453_v59  ;;  %4047 = vst [vmem:[#allocation25_spill] sm:$0xff] %v3483_v61  ;;  %v3495_v59 = vld [vmem:[%s3970_s1 + $0x80] ss:$8 sps:$4 sm:$0xff]   ;;  %612 = vmatprep.subr.bf16.mxu1 %v3483_v61 }
  0x51   :  { %4049 = vst [vmem:[#allocation27_spill] sm:$0xff] %v3495_v59  ;;  %613 = vmatpush2.bf16.msra.mxu1 %v3495_v59 }
  0x53   :  { %825 = vmatpush1.bf16.msra.mxu0 %v3465_v57  ;;  %v3507_v57 = vld [vmem:[%s3968_s0 + $0x14] ss:$8 sps:$4 sm:$0xff]  }
  0x54   :  { %826 = vmatprep.subr.bf16.mxu0 %v3477_v54  ;;  %v3520_v54 = vld [vmem:[%s3970_s1 + $0x214] ss:$8 sps:$4 sm:$0xff]   ;;  %942 = vmatprep.subr.bf16.mxu1 %v3507_v57 }
  0x55   :  { %4052 = vst [vmem:[#allocation30_spill] sm:$0xff] %v3520_v54 }
  0x57   :  { %827 = vmatpush1.bf16.msra.mxu0 %v3489_v53  ;;  %v3527_v53 = vld [vmem:[%s3970_s1 + $0x210] ss:$8 sps:$4 sm:$0xff]  }
  0x58   :  { %828 = vmatprep.subr.bf16.mxu0 %v3501_v51  ;;  %4053 = vst [vmem:[#allocation31_spill] sm:$0xff] %v3527_v53  ;;  %v3533_v51 = vld [vmem:[%s3970_s1 + $0x204] ss:$8 sps:$4 sm:$0xff]  }
  0x59   :  { %4054 = vst [vmem:[#allocation32_spill] sm:$0xff] %v3533_v51 }
  0x5b   :  { %829 = vmatpush1.bf16.msra.mxu0 %v3513_v49  ;;  %v3545_v49 = vld [vmem:[%s3970_s1 + $0x2f4] ss:$8 sps:$4 sm:$0xff]  }
  0x5c   :  { %830 = vmatprep.subr.bf16.mxu0 %v3520_v54  ;;  %4056 = vst [vmem:[#allocation34_spill] sm:$0xff] %v3545_v49  ;;  %v3551_v54 = vld [vmem:[%s3970_s1 + $0x2f0] ss:$8 sps:$4 sm:$0xff]  }
  0x5d   :  { %4057 = vst [vmem:[#allocation35_spill] sm:$0xff] %v3551_v54 }
  0x5f   :  { %831 = vmatpush1.bf16.msra.mxu0 %v3527_v53  ;;  %v3557_v53 = vld [vmem:[%s3970_s1 + $0x2e4] ss:$8 sps:$4 sm:$0xff]  }
  0x60   :  { %832 = vmatprep.subr.bf16.mxu0 %v3533_v51  ;;  %4058 = vst [vmem:[#allocation36_spill] sm:$0xff] %v3557_v53  ;;  %v3563_v51 = vld [vmem:[%s3970_s1 + $0x2e0] ss:$8 sps:$4 sm:$0xff]  }
  0x61   :  { %4059 = vst [vmem:[#allocation37_spill] sm:$0xff] %v3563_v51 }
  0x63   :  { %833 = vmatpush1.bf16.msra.mxu0 %v3539_v47  ;;  %v3569_v47 = vld [vmem:[%s3970_s1 + $0x2d4] ss:$8 sps:$4 sm:$0xff]  }
  0x64   :  { %834 = vmatprep.subr.bf16.mxu0 %v3545_v49  ;;  %4060 = vst [vmem:[#allocation38_spill] sm:$0xff] %v3569_v47  ;;  %v3575_v49 = vld [vmem:[%s3970_s1 + $0x2d0] ss:$8 sps:$4 sm:$0xff]  }
  0x65   :  { %4061 = vst [vmem:[#allocation39_spill] sm:$0xff] %v3575_v49 }
  0x67   :  { %835 = vmatpush2.bf16.msra.mxu0 %v3551_v54  ;;  %v3581_v54 = vld [vmem:[%s3970_s1 + $0x2c4] ss:$8 sps:$4 sm:$0xff]  }
  0x68   :  { %836 = vmatprep.subr.bf16.mxu0 %v3557_v53  ;;  %4062 = vst [vmem:[#allocation40_spill] sm:$0xff] %v3581_v54  ;;  %v3587_v53 = vld [vmem:[%s3970_s1 + $0x2c0] ss:$8 sps:$4 sm:$0xff]  }
  0x69   :  { %4063 = vst [vmem:[#allocation41_spill] sm:$0xff] %v3587_v53 }
  0x6b   :  { %837 = vmatpush2.bf16.msra.mxu0 %v3563_v51  ;;  %v3593_v51 = vld [vmem:[%s3970_s1 + $0x2b4] ss:$8 sps:$4 sm:$0xff]  }
  0x6c   :  { %838 = vmatprep.subr.bf16.mxu0 %v3569_v47  ;;  %4064 = vst [vmem:[#allocation42_spill] sm:$0xff] %v3593_v51  ;;  %v3599_v47 = vld [vmem:[%s3970_s1 + $0x2b0] ss:$8 sps:$4 sm:$0xff]  }
  0x6d   :  { %4065 = vst [vmem:[#allocation43_spill] sm:$0xff] %v3599_v47 }
  0x6f   :  { %839 = vmatpush2.bf16.msra.mxu0 %v3575_v49  ;;  %v3605_v49 = vld [vmem:[%s3970_s1 + $0x2a4] ss:$8 sps:$4 sm:$0xff]  }
  0x70   :  { %840 = vmatprep.subr.bf16.mxu0 %v3581_v54  ;;  %4066 = vst [vmem:[#allocation44_spill] sm:$0xff] %v3605_v49  ;;  %v3611_v54 = vld [vmem:[%s3970_s1 + $0x2a0] ss:$8 sps:$4 sm:$0xff]  }
  0x71   :  { %4067 = vst [vmem:[#allocation45_spill] sm:$0xff] %v3611_v54 }
  0x73   :  { %841 = vmatpush2.bf16.msra.mxu0 %v3587_v53  ;;  %v3617_v53 = vld [vmem:[%s3970_s1 + $0x294] ss:$8 sps:$4 sm:$0xff]  }
  0x74   :  { %842 = vmatprep.subr.bf16.mxu0 %v3593_v51  ;;  %4068 = vst [vmem:[#allocation46_spill] sm:$0xff] %v3617_v53  ;;  %v3623_v51 = vld [vmem:[%s3970_s1 + $0x290] ss:$8 sps:$4 sm:$0xff]  }
  0x75   :  { %4069 = vst [vmem:[#allocation47_spill] sm:$0xff] %v3623_v51 }
  0x77   :  { %843 = vmatpush2.bf16.msra.mxu0 %v3599_v47  ;;  %v3629_v47 = vld [vmem:[%s3970_s1 + $0x284] ss:$8 sps:$4 sm:$0xff]  }
  0x78   :  { %844 = vmatprep.subr.bf16.mxu0 %v3605_v49  ;;  %4070 = vst [vmem:[#allocation48_spill] sm:$0xff] %v3629_v47  ;;  %v3635_v49 = vld [vmem:[%s3970_s1 + $0x280] ss:$8 sps:$4 sm:$0xff]  }
  0x7b   :  { %845 = vmatpush2.bf16.msra.mxu0 %v3611_v54 }
  0x7c   :  { %846 = vmatprep.subr.bf16.mxu0 %v3617_v53 }
  0x7f   :  { %847 = vmatpush2.bf16.msra.mxu0 %v3623_v51 }
  0x80   :  { %848 = vmatprep.subr.bf16.mxu0 %v3629_v47 }
  0x83   :  { %849 = vmatpush2.bf16.msra.mxu0 %v3635_v49 }
  0x84   :  { %1455 = vmatprep.subr.bf16.mxu0 %v3140_v19  ;;  %v4071_v19 = vmov 0  }
  0xc6   :  { %v87_v54 = vpop.f32.mrf.mxu0  ;;  %v143_v53 = vpop.f32.mrf.mxu1 }
  0xc8   :  { %v89_v45 = vpop.f32.mrf.mxu0  ;;  %v145_v59 = vpop.f32.mrf.mxu1 }
  0xca   :  { %v91_v43 = vpop.f32.mrf.mxu0  ;;  %v147_v41 = vpop.f32.mrf.mxu1 }
  0xcb   :  { %v152_v2 = vpack.c.bf16 %v147_v41, %v143_v53  ;;  %v96_v47 = vpack.c.bf16 %v91_v43, %v87_v54  ;;  %v2981_v41 = vld [vmem:[%s3969_s2] sm:$0xff]   ;;  %v4117_v53 = vld [vmem:[#allocation48_spill] sm:$0xff] }
  0xcc   :  { %v93_v61 = vpop.f32.mrf.mxu0  ;;  %v149_v51 = vpop.f32.mrf.mxu1  ;;  %v4108_v43 = vld [vmem:[#allocation39_spill] sm:$0xff] }
  0xcd   :  { %v97_v39 = vpack.c.bf16 %v93_v61, %v89_v45  ;;  %v153_v37 = vpack.c.bf16 %v149_v51, %v145_v59  ;;  %v4110_v45 = vld [vmem:[#allocation41_spill] sm:$0xff]  ;;  %v4115_v51 = vld [vmem:[#allocation46_spill] sm:$0xff] }
  0xcf   :  { %614 = vmatprep.mubr.bf16.mxu1 %v97_v39  ;;  %850 = vmatprep.mubr.bf16.mxu0 %v153_v37  ;;  %v4103_v37 = vld [vmem:[#allocation34_spill] sm:$0xff]  ;;  %v4105_v39 = vld [vmem:[#allocation36_spill] sm:$0xff] }
  0xd0   :  { %615 = vmatmul.mubr.bf16.vlgmr.msra.gmra.mxu1 %v96_v47  ;;  %851 = vmatmul.mubr.bf16.vlgmr.msra.gmra.mxu0 %v152_v2  ;;  %v4112_v47 = vld [vmem:[#allocation43_spill] sm:$0xff] }
  0xd1   :  { %943 = vmatpush1.bf16.msra.mxu1 %v3643_v3  ;;  %960 = vmatprep.mubr.bf16.mxu1 %v4071_v19 }
  0xd2   :  { %997 = vmatprep.subr.bf16.mxu1 %v3507_v57  ;;  %1456 = vmatpush1.bf16.msra.mxu0 %v3135_v18  ;;  %v2982_v18 = vld [vmem:[%s3969_s2 + $0x8] sm:$0xff]  }
  0xd3   :  { %1457 = vmatprep.subr.bf16.mxu0 %v3158_v22  ;;  %v4088_v22 = vld [vmem:[#allocation15_spill] sm:$0xff] }
  0xd6   :  { %1458 = vmatpush1.bf16.msra.mxu0 %v3153_v21  ;;  %v4087_v21 = vld [vmem:[#allocation14_spill] sm:$0xff] }
  0xd7   :  { %1459 = vmatprep.subr.bf16.mxu0 %v3170_v24  ;;  %v4090_v24 = vld [vmem:[#allocation17_spill] sm:$0xff] }
  0xd8   :  { %2562 = vmatmul.mubr.msk.bf16.vlgmr.msra.gmra.mxu1 %vm49_vm0, %v2981_v41 }
  0xd9   :  { %998 = vmatpush1.bf16.msra.mxu1 %v3643_v3  ;;  %1015 = vmatprep.mubr.bf16.mxu1 %v4071_v19 }
  0xda   :  { %1252 = vmatprep.subr.bf16.mxu1 %v3062_v6  ;;  %1460 = vmatpush1.bf16.msra.mxu0 %v3182_v26  ;;  %v4073_v6 = vld [vmem:[#allocation3_spill] sm:$0xff] }
  0xdb   :  { %1461 = vmatprep.subr.bf16.mxu0 %v3194_v28  ;;  %v4092_v26 = vld [vmem:[#allocation19_spill] sm:$0xff]  ;;  %v4094_v28 = vld [vmem:[#allocation22_spill] sm:$0xff] }
  0xde   :  { %1462 = vmatpush1.bf16.msra.mxu0 %v3206_v30  ;;  %v4096_v30 = vld [vmem:[#allocation26_spill] sm:$0xff] }
  0xdf   :  { %1463 = vmatprep.subr.bf16.mxu0 %v3218_v32  ;;  %v4098_v32 = vld [vmem:[#allocation29_spill] sm:$0xff] }
  0xe0   :  { %2566 = vmatmul.mubr.msk.bf16.vlgmr.msra.gmra.mxu1 %vm49_vm0, %v2982_v18  ;;  %v1809_v18 = vld [vmem:[%s3971_s4 + $0xf8] sm:$0xff] }
  0xe1   :  { %1253 = vmatpush1.bf16.msra.mxu1 %v3057_v5  ;;  %1284 = vmatprep.mubr.bf16.mxu1 %v3507_v57  ;;  %v4072_v5 = vld [vmem:[#allocation21_spill] sm:$0xff] }
  0xe2   :  { %1254 = vmatprep.subr.bf16.mxu1 %v3067_v7  ;;  %1464 = vmatpush1.bf16.msra.mxu0 %v3230_v34  ;;  %v4074_v7 = vld [vmem:[#allocation4_spill] sm:$0xff]  ;;  %v4100_v34 = vld [vmem:[#allocation31_spill] sm:$0xff] }
  0xe3   :  { %1465 = vmatprep.subr.bf16.mxu0 %v3242_v36  ;;  %v4102_v36 = vld [vmem:[#allocation33_spill] sm:$0xff] }
  0xe5   :  { %1255 = vmatpush1.bf16.msra.mxu1 %v3076_v8  ;;  %v4075_v8 = vld [vmem:[#allocation23_spill] sm:$0xff] }
  0xe6   :  { %1256 = vmatprep.subr.bf16.mxu1 %v3082_v9  ;;  %1466 = vmatpush1.bf16.msra.mxu0 %v3254_v38  ;;  %v4076_v9 = vld [vmem:[#allocation25_spill] sm:$0xff]  ;;  %v4104_v38 = vld [vmem:[#allocation35_spill] sm:$0xff] }
  0xe7   :  { %1467 = vmatprep.subr.bf16.mxu0 %v3266_v40  ;;  %v4106_v40 = vld [vmem:[#allocation37_spill] sm:$0xff] }
  0xe9   :  { %1257 = vmatpush1.bf16.msra.mxu1 %v3088_v10  ;;  %v4077_v10 = vld [vmem:[#allocation5_spill] sm:$0xff] }
  0xea   :  { %1258 = vmatprep.subr.bf16.mxu1 %v3094_v11  ;;  %1468 = vmatpush1.bf16.msra.mxu0 %v3278_v42  ;;  %v4078_v11 = vld [vmem:[#allocation6_spill] sm:$0xff] }
  0xeb   :  { %1469 = vmatprep.subr.bf16.mxu0 %v3290_v44  ;;  %v4107_v42 = vld [vmem:[#allocation38_spill] sm:$0xff]  ;;  %v4109_v44 = vld [vmem:[#allocation40_spill] sm:$0xff] }
  0xed   :  { %1259 = vmatpush1.bf16.msra.mxu1 %v3100_v12  ;;  %v4080_v12 = vld [vmem:[#allocation7_spill] sm:$0xff] }
  0xee   :  { %1260 = vmatprep.subr.bf16.mxu1 %v3106_v13  ;;  %1470 = vmatpush1.bf16.msra.mxu0 %v3302_v46  ;;  %v4081_v13 = vld [vmem:[#allocation8_spill] sm:$0xff]  ;;  %v4111_v46 = vld [vmem:[#allocation42_spill] sm:$0xff] }
  0xef   :  { %1471 = vmatprep.subr.bf16.mxu0 %v3314_v48  ;;  %v4113_v48 = vld [vmem:[#allocation44_spill] sm:$0xff] }
  0xf1   :  { %1261 = vmatpush1.bf16.msra.mxu1 %v3112_v14  ;;  %v4082_v14 = vld [vmem:[#allocation9_spill] sm:$0xff] }
  0xf2   :  { %1262 = vmatprep.subr.bf16.mxu1 %v3118_v15  ;;  %1472 = vmatpush2.bf16.msra.mxu0 %v3326_v50  ;;  %v4083_v15 = vld [vmem:[#allocation10_spill] sm:$0xff]  ;;  %v4114_v50 = vld [vmem:[#allocation45_spill] sm:$0xff] }
  0xf3   :  { %1473 = vmatprep.subr.bf16.mxu0 %v3338_v52  ;;  %v4116_v52 = vld [vmem:[#allocation47_spill] sm:$0xff] }
  0xf5   :  { %1263 = vmatpush1.bf16.msra.mxu1 %v3124_v16  ;;  %v4084_v16 = vld [vmem:[#allocation11_spill] sm:$0xff] }
  0xf6   :  { %1264 = vmatprep.subr.bf16.mxu1 %v3129_v17  ;;  %1474 = vmatpush2.bf16.msra.mxu0 %v3355_v55  ;;  %v4085_v17 = vld [vmem:[#allocation12_spill] sm:$0xff] }
  0xf7   :  { %1475 = vmatprep.subr.bf16.mxu0 %v3360_v56 }
  0xf9   :  { %1265 = vmatpush1.bf16.msra.mxu1 %v3145_v20  ;;  %v4086_v20 = vld [vmem:[#allocation13_spill] sm:$0xff] }
  0xfa   :  { %1266 = vmatprep.subr.bf16.mxu1 %v3164_v23  ;;  %1476 = vmatpush2.bf16.msra.mxu0 %v3372_v58  ;;  %v4089_v23 = vld [vmem:[#allocation16_spill] sm:$0xff] }
  0xfb   :  { %1477 = vmatprep.subr.bf16.mxu0 %v3382_v60 }
  0xfd   :  { %1267 = vmatpush1.bf16.msra.mxu1 %v3176_v25  ;;  %v4091_v25 = vld [vmem:[#allocation18_spill] sm:$0xff] }
  0xfe   :  { %1268 = vmatprep.subr.bf16.mxu1 %v3188_v27  ;;  %1478 = vmatpush2.bf16.msra.mxu0 %v3398_v62  ;;  %v4093_v27 = vld [vmem:[#allocation20_spill] sm:$0xff] }
  0xff   :  { %1479 = vmatprep.subr.bf16.mxu0 %v3410_v0 }
 0x101   :  { %1269 = vmatpush2.bf16.msra.mxu1 %v3200_v29  ;;  %v4095_v29 = vld [vmem:[#allocation24_spill] sm:$0xff] }
 0x102   :  { %1270 = vmatprep.subr.bf16.mxu1 %v3212_v31  ;;  %1480 = vmatpush2.bf16.msra.mxu0 %v3423_v4  ;;  %v4097_v31 = vld [vmem:[#allocation28_spill] sm:$0xff] }
 0x103   :  { %1481 = vmatprep.subr.bf16.mxu0 %v3435_v1  ;;  %v4079_v1 = vld [vmem:[#allocation27_spill] sm:$0xff] }
 0x105   :  { %1271 = vmatpush2.bf16.msra.mxu1 %v3224_v33  ;;  %v4099_v33 = vld [vmem:[#allocation30_spill] sm:$0xff] }
 0x106   :  { %1272 = vmatprep.subr.bf16.mxu1 %v3236_v35  ;;  %1482 = vmatpush2.bf16.msra.mxu0 %v3447_v63  ;;  %v4101_v35 = vld [vmem:[#allocation32_spill] sm:$0xff] }
 0x107   :  { %1483 = vmatprep.subr.bf16.mxu0 %v4072_v5  ;;  %v1793_v5 = vld [vmem:[%s3971_s4 + $0x78] sm:$0xff] }
 0x109   :  { %1273 = vmatpush2.bf16.msra.mxu1 %v4073_v6  ;;  %v1808_v6 = vld [vmem:[%s3971_s4 + $0xf0] sm:$0xff] }
 0x10a   :  { %1274 = vmatprep.subr.bf16.mxu1 %v4074_v7  ;;  %1484 = vmatpush2.bf16.msra.mxu0 %v4075_v8  ;;  %v1792_v7 = vld [vmem:[%s3971_s4 + $0x70] sm:$0xff]  ;;  %v1807_v8 = vld [vmem:[%s3971_s4 + $0xe8] sm:$0xff] }
 0x10b   :  { %1485 = vmatprep.subr.bf16.mxu0 %v4076_v9  ;;  %v1791_v9 = vld [vmem:[%s3971_s4 + $0x68] sm:$0xff] }
 0x10d   :  { %1275 = vmatpush2.bf16.msra.mxu1 %v4077_v10  ;;  %v1806_v10 = vld [vmem:[%s3971_s4 + $0xe0] sm:$0xff] }
 0x10e   :  { %1276 = vmatprep.subr.bf16.mxu1 %v4078_v11  ;;  %1486 = vmatpush2.bf16.msra.mxu0 %v4079_v1  ;;  %v1790_v11 = vld [vmem:[%s3971_s4 + $0x60] sm:$0xff]  ;;  %v1805_v1 = vld [vmem:[%s3971_s4 + $0xd8] sm:$0xff] }
 0x10f   :  { %2757 = vmatprep.subr.mxu0 %v1809_v18 }
 0x111   :  { %1277 = vmatpush2.bf16.msra.mxu1 %v4080_v12  ;;  %v1789_v12 = vld [vmem:[%s3971_s4 + $0x58] sm:$0xff] }
 0x112   :  { %1278 = vmatprep.subr.bf16.mxu1 %v4081_v13  ;;  %v1804_v13 = vld [vmem:[%s3971_s4 + $0xd0] sm:$0xff] }
 0x115   :  { %1279 = vmatpush2.bf16.msra.mxu1 %v4082_v14  ;;  %v1788_v14 = vld [vmem:[%s3971_s4 + $0x50] sm:$0xff] }
 0x116   :  { %1280 = vmatprep.subr.bf16.mxu1 %v4083_v15  ;;  %v1803_v15 = vld [vmem:[%s3971_s4 + $0xc8] sm:$0xff] }
 0x119   :  { %1281 = vmatpush2.bf16.msra.mxu1 %v4084_v16  ;;  %v1787_v16 = vld [vmem:[%s3971_s4 + $0x48] sm:$0xff] }
 0x11a   :  { %1282 = vmatprep.subr.bf16.mxu1 %v4085_v17  ;;  %v1802_v17 = vld [vmem:[%s3971_s4 + $0xc0] sm:$0xff] }
 0x11d   :  { %1283 = vmatpush2.bf16.msra.mxu1 %v4086_v20  ;;  %v1786_v20 = vld [vmem:[%s3971_s4 + $0x40] sm:$0xff] }
 0x11e   :  { %1690 = vmatprep.subr.bf16.mxu1 %v4087_v21  ;;  %v1801_v21 = vld [vmem:[%s3971_s4 + $0xb8] sm:$0xff] }
 0x120   :  { %1285 = vmatmul.mubr.bf16.vlgmr.msra.gmra.mxu1 %v3643_v3 }
 0x121   :  { %1691 = vmatpush1.bf16.msra.mxu1 %v4088_v22  ;;  %v1785_v22 = vld [vmem:[%s3971_s4 + $0x38] sm:$0xff] }
 0x122   :  { %1692 = vmatprep.subr.bf16.mxu1 %v4089_v23  ;;  %v1800_v23 = vld [vmem:[%s3971_s4 + $0xb0] sm:$0xff] }
 0x125   :  { %1693 = vmatpush1.bf16.msra.mxu1 %v4090_v24  ;;  %v1784_v24 = vld [vmem:[%s3971_s4 + $0x30] sm:$0xff] }
 0x126   :  { %1694 = vmatprep.subr.bf16.mxu1 %v4091_v25  ;;  %v1799_v25 = vld [vmem:[%s3971_s4 + $0xa8] sm:$0xff] }
 0x129   :  { %1695 = vmatpush1.bf16.msra.mxu1 %v4092_v26  ;;  %v1783_v26 = vld [vmem:[%s3971_s4 + $0x28] sm:$0xff] }
 0x12a   :  { %1696 = vmatprep.subr.bf16.mxu1 %v4093_v27  ;;  %v1798_v27 = vld [vmem:[%s3971_s4 + $0xa0] sm:$0xff] }
 0x12d   :  { %1697 = vmatpush1.bf16.msra.mxu1 %v4094_v28  ;;  %v1782_v28 = vld [vmem:[%s3971_s4 + $0x20] sm:$0xff] }
 0x12e   :  { %1698 = vmatprep.subr.bf16.mxu1 %v4095_v29  ;;  %v1797_v29 = vld [vmem:[%s3971_s4 + $0x98] sm:$0xff] }
 0x131   :  { %1699 = vmatpush1.bf16.msra.mxu1 %v4096_v30  ;;  %v1781_v30 = vld [vmem:[%s3971_s4 + $0x18] sm:$0xff] }
 0x132   :  { %1700 = vmatprep.subr.bf16.mxu1 %v4097_v31  ;;  %v1796_v31 = vld [vmem:[%s3971_s4 + $0x90] sm:$0xff] }
 0x135   :  { %1701 = vmatpush1.bf16.msra.mxu1 %v4098_v32  ;;  %v1780_v32 = vld [vmem:[%s3971_s4 + $0x10] sm:$0xff] }
 0x136   :  { %1702 = vmatprep.subr.bf16.mxu1 %v4099_v33  ;;  %v1795_v33 = vld [vmem:[%s3971_s4 + $0x88] sm:$0xff] }
 0x139   :  { %1703 = vmatpush1.bf16.msra.mxu1 %v4100_v34  ;;  %v1779_v34 = vld [vmem:[%s3971_s4 + $0x8] sm:$0xff] }
 0x13a   :  { %1704 = vmatprep.subr.bf16.mxu1 %v4101_v35  ;;  %v1794_v35 = vld [vmem:[%s3971_s4 + $0x80] sm:$0xff] }
 0x13d   :  { %1705 = vmatpush1.bf16.msra.mxu1 %v4102_v36  ;;  %v1778_v36 = vld [vmem:[%s3971_s4] sm:$0xff] }
 0x13e   :  { %1706 = vmatprep.subr.bf16.mxu1 %v4103_v37  ;;  %v413_v37 = vpop.f32.mrf.mxu0 }
 0x141   :  { %1707 = vmatpush2.bf16.msra.mxu1 %v4104_v38  ;;  %v415_v38 = vpop.f32.mrf.mxu0 }
 0x142   :  { %1708 = vmatprep.subr.bf16.mxu1 %v4105_v39 }
 0x143   :  { %v417_v39 = vpop.f32.mrf.mxu0 }
 0x145   :  { %1709 = vmatpush2.bf16.msra.mxu1 %v4106_v40  ;;  %v419_v40 = vpop.f32.mrf.mxu0 }
 0x146   :  { %1710 = vmatprep.subr.bf16.mxu1 %v4107_v42 }
 0x149   :  { %1711 = vmatpush2.bf16.msra.mxu1 %v4108_v43 }
 0x14a   :  { %1712 = vmatprep.subr.bf16.mxu1 %v4109_v44 }
 0x14d   :  { %1713 = vmatpush2.bf16.msra.mxu1 %v4110_v45 }
 0x14e   :  { %1714 = vmatprep.subr.bf16.mxu1 %v4111_v46 }
 0x151   :  { %1715 = vmatpush2.bf16.msra.mxu1 %v4112_v47 }
 0x152   :  { %1716 = vmatprep.subr.bf16.mxu1 %v4113_v48 }
 0x155   :  { %1717 = vmatpush2.bf16.msra.mxu1 %v4114_v50 }
 0x156   :  { %1718 = vmatprep.subr.bf16.mxu1 %v4115_v51 }
 0x159   :  { %1719 = vmatpush2.bf16.msra.mxu1 %v4116_v52 }
 0x15a   :  { %1720 = vmatprep.subr.bf16.mxu1 %v4117_v53 }
 0x15d   :  { %1721 = vmatpush2.bf16.msra.mxu1 %v3635_v49 }
 0x15e   :  { %2792 = vmatprep.subr.mxu1 %v1809_v18 }
 0x190   :  { %v3755_v54 = vpop.f32.mrf.mxu1  ;;  %v852_v42 = vpop.f32.mrf.mxu0 }
 0x191   :  { %v617_v51 = vadd.f32 %v3755_v54, %v413_v37 }
 0x192   :  { %v3757_v55 = vpop.f32.mrf.mxu1  ;;  %v854_v43 = vpop.f32.mrf.mxu0 }
 0x193   :  { %v619_v48 = vadd.f32 %v3757_v55, %v415_v38 }
 0x194   :  { %v3759_v56 = vpop.f32.mrf.mxu1  ;;  %v856_v44 = vpop.f32.mrf.mxu0 }
 0x195   :  { %v621_v50 = vadd.f32 %v3759_v56, %v417_v39 }
 0x196   :  { %v3761_v57 = vpop.f32.mrf.mxu1  ;;  %v858_v47 = vpop.f32.mrf.mxu0 }
 0x197   :  { %v623_v45 = vadd.f32 %v3761_v57, %v419_v40 }
 0x198   :  { %v962_v58 = vpop.f32.mrf.mxu1 }
 0x199   :  { %v3863_v52 = vadd.f32 %v858_v47, %v623_v45 }
 0x19a   :  { %v964_v59 = vpop.f32.mrf.mxu1 }
 0x19b   :  { %v888_v57 = vmul.f32 %v3863_v52, %v3863_v52 }
 0x19c   :  { %v966_v60 = vpop.f32.mrf.mxu1 }
 0x19d   :  { %v971_v0 = vpack.c.bf16 %v966_v60, %v962_v58  ;;  %v3865_v58 = vadd.f32 %v854_v43, %v619_v48 }
 0x19e   :  { %v968_v61 = vpop.f32.mrf.mxu1 }
 0x19f   :  { %v972_v62 = vpack.c.bf16 %v968_v61, %v964_v59  ;;  %v3867_v59 = vadd.f32 %v856_v44, %v621_v50  ;;  %v3869_v61 = vadd.f32 %v852_v42, %v617_v51  ;;  %v886_v55 = vmul.f32 %v3865_v58, %v3865_v58 }
 0x1a0   :  { %v1017_v63 = vpop.f32.mrf.mxu1  ;;  %v876_v56 = vadd.f32 %v3863_v52, %v3865_v58 }
 0x1a1   :  { %1487 = vmatprep.mubr.bf16.mxu0 %v972_v62  ;;  %v887_v54 = vmul.f32 %v3867_v59, %v3867_v59 }
 0x1a2   :  { %v1019_v3 = vpop.f32.mrf.mxu1  ;;  %1488 = vmatmul.mubr.bf16.vlgmr.msra.gmra.mxu0 %v971_v0  ;;  %v885_v0 = vmul.f32 %v3869_v61, %v3869_v61  ;;  %v877_v18 = vrot.slane %v876_v56, 4 }
 0x1a3   :  { %2758 = vmatpush3.msra.mxu0 %v1793_v5 }
 0x1a4   :  { %v1021_v4 = vpop.f32.mrf.mxu1  ;;  %2759 = vmatprep.subr.mxu0 %v1808_v6 }
 0x1a5   :  { %v1026_v41 = vpack.c.bf16 %v1021_v4, %v1017_v63  ;;  %2760 = vmatpush3.msra.mxu0 %v1792_v7  ;;  %v896_v4 = vadd.f32 %v888_v57, %v886_v55 }
 0x1a6   :  { %v1023_v49 = vpop.f32.mrf.mxu1  ;;  %2761 = vmatprep.subr.mxu0 %v1807_v8 }
 0x1a7   :  { %v1027_v2 = vpack.c.bf16 %v1023_v49, %v1019_v3  ;;  %2762 = vmatpush3.msra.mxu0 %v1791_v9  ;;  %v869_v3 = vadd.f32 %v3867_v59, %v3869_v61 }
 0x1a8   :  { %2763 = vmatprep.subr.mxu0 %v1806_v10 }
 0x1a9   :  { %1722 = vmatprep.mubr.bf16.mxu1 %v1027_v2  ;;  %2764 = vmatpush3.msra.mxu0 %v1790_v11 }
 0x1aa   :  { %1723 = vmatmul.mubr.bf16.vlgmr.msra.gmra.mxu1 %v1026_v41  ;;  %2765 = vmatprep.subr.mxu0 %v1805_v1  ;;  %v889_v41 = vadd.f32 %v887_v54, %v885_v0 }
 0x1ab   :  { %2793 = vmatpush3.msra.mxu1 %v1793_v5  ;;  %2766 = vmatpush3.msra.mxu0 %v1789_v12 }
 0x1ac   :  { %2794 = vmatprep.subr.mxu1 %v1808_v6  ;;  %2767 = vmatprep.subr.mxu0 %v1804_v13 }
 0x1ad   :  { %2795 = vmatpush3.msra.mxu1 %v1792_v7  ;;  %2768 = vmatpush3.msra.mxu0 %v1788_v14  ;;  %v870_v7 = vrot.slane %v869_v3, 4 }
 0x1ae   :  { %2796 = vmatprep.subr.mxu1 %v1807_v8  ;;  %2769 = vmatprep.subr.mxu0 %v1803_v15  ;;  %v897_v8 = vrot.slane %v896_v4, 4 }
 0x1af   :  { %2797 = vmatpush3.msra.mxu1 %v1791_v9  ;;  %2770 = vmatpush3.msra.mxu0 %v1787_v16 }
 0x1b0   :  { %2798 = vmatprep.subr.mxu1 %v1806_v10  ;;  %2771 = vmatprep.subr.mxu0 %v1802_v17 }
 0x1b1   :  { %2799 = vmatpush3.msra.mxu1 %v1790_v11  ;;  %2772 = vmatpush3.msra.mxu0 %v1786_v20 }
 0x1b2   :  { %2800 = vmatprep.subr.mxu1 %v1805_v1  ;;  %2773 = vmatprep.subr.mxu0 %v1801_v21 }
 0x1b3   :  { %2801 = vmatpush3.msra.mxu1 %v1789_v12  ;;  %2774 = vmatpush3.msra.mxu0 %v1785_v22 }
 0x1b4   :  { %2802 = vmatprep.subr.mxu1 %v1804_v13  ;;  %2775 = vmatprep.subr.mxu0 %v1800_v23  ;;  %v890_v13 = vrot.slane %v889_v41, 4 }
 0x1b5   :  { %2803 = vmatpush3.msra.mxu1 %v1788_v14  ;;  %2776 = vmatpush3.msra.mxu0 %v1784_v24  ;;  %v878_v14 = vadd.f32 %v877_v18, %v876_v56 }
 0x1b6   :  { %2804 = vmatprep.subr.mxu1 %v1803_v15  ;;  %2777 = vmatprep.subr.mxu0 %v1799_v25 }
 0x1b7   :  { %2805 = vmatpush3.msra.mxu1 %v1787_v16  ;;  %2778 = vmatpush3.msra.mxu0 %v1783_v26 }
 0x1b8   :  { %2806 = vmatprep.subr.mxu1 %v1802_v17  ;;  %2779 = vmatprep.subr.mxu0 %v1798_v27 }
 0x1b9   :  { %2807 = vmatpush3.msra.mxu1 %v1786_v20  ;;  %2780 = vmatpush3.msra.mxu0 %v1782_v28 }
 0x1ba   :  { %2808 = vmatprep.subr.mxu1 %v1801_v21  ;;  %2781 = vmatprep.subr.mxu0 %v1797_v29  ;;  %v871_v21 = vadd.f32 %v870_v7, %v869_v3 }
 0x1bb   :  { %2809 = vmatpush3.msra.mxu1 %v1785_v22  ;;  %2782 = vmatpush3.msra.mxu0 %v1781_v30  ;;  %v898_v22 = vadd.f32 %v897_v8, %v896_v4 }
 0x1bc   :  { %2810 = vmatprep.subr.mxu1 %v1800_v23  ;;  %2783 = vmatprep.subr.mxu0 %v1796_v31 }
 0x1bd   :  { %2811 = vmatpush3.msra.mxu1 %v1784_v24  ;;  %2784 = vmatpush3.msra.mxu0 %v1780_v32 }
 0x1be   :  { %2812 = vmatprep.subr.mxu1 %v1799_v25  ;;  %2785 = vmatprep.subr.mxu0 %v1795_v33 }
 0x1bf   :  { %2813 = vmatpush3.msra.mxu1 %v1783_v26  ;;  %2786 = vmatpush3.msra.mxu0 %v1779_v34 }
 0x1c0   :  { %2814 = vmatprep.subr.mxu1 %v1798_v27  ;;  %2787 = vmatprep.subr.mxu0 %v1794_v35 }
 0x1c1   :  { %2815 = vmatpush3.msra.mxu1 %v1782_v28  ;;  %2788 = vmatpush3.msra.mxu0 %v1778_v36  ;;  %v891_v28 = vadd.f32 %v890_v13, %v889_v41 }
 0x1c2   :  { %2816 = vmatprep.subr.mxu1 %v1797_v29  ;;  %v879_v29 = vrot.slane %v878_v14, 2 }
 0x1c3   :  { %2817 = vmatpush3.msra.mxu1 %v1781_v30  ;;  %v892_v42 = vrot.slane %v891_v28, 2 }
 0x1c4   :  { %2818 = vmatprep.subr.mxu1 %v1796_v31  ;;  %v880_v43 = vadd.f32 %v879_v29, %v878_v14 }
 0x1c5   :  { %2819 = vmatpush3.msra.mxu1 %v1780_v32 }
 0x1c6   :  { %2820 = vmatprep.subr.mxu1 %v1795_v33 }
 0x1c7   :  { %2821 = vmatpush3.msra.mxu1 %v1779_v34 }
 0x1c8   :  { %2822 = vmatprep.subr.mxu1 %v1794_v35  ;;  %v872_v35 = vrot.slane %v871_v21, 2 }
 0x1c9   :  { %2823 = vmatpush3.msra.mxu1 %v1778_v36  ;;  %v899_v36 = vrot.slane %v898_v22, 2 }
 0x1ca   :  { %v873_v48 = vadd.f32 %v872_v35, %v871_v21 }
 0x1cb   :  { %v900_v50 = vadd.f32 %v899_v36, %v898_v22  ;;  %v1964_v22 = vld [vmem:[%s3972_s5 + $0x8] sm:$0xff] }
 0x1cc   :  { %v874_v3 = vrot.slane %v873_v48, 1  ;;  %1999 = vmatprep.subr.mxu0 %v1964_v22 }
 0x1e0   :  { %v1286_v46 = vpop.f32.mrf.mxu1 }
 0x1e2   :  { %v1288_v53 = vpop.f32.mrf.mxu1 }
 0x1e4   :  { %v1290_v62 = vpop.f32.mrf.mxu1 }
 0x1e6   :  { %v1292_v49 = vpop.f32.mrf.mxu1 }
 0x262   :  { %v1489_v60 = vpop.f32.mrf.mxu0 }
 0x263   :  { %v1490_v6 = vadd.f32 %v1489_v60, %v1286_v46 }
 0x264   :  { %v1491_v63 = vpop.f32.mrf.mxu0 }
 0x265   :  { %v1492_v9 = vadd.f32 %v1491_v63, %v1288_v53  ;;  %v881_v63 = vrot.slane %v880_v43, 1 }
 0x266   :  { %v1493_v2 = vpop.f32.mrf.mxu0 }
 0x267   :  { %v1494_v1 = vadd.f32 %v1493_v2, %v1290_v62  ;;  %v893_v62 = vadd.f32 %v892_v42, %v891_v28  ;;  %v1960_v42 = vld [vmem:[%s3974_s7] sm:$0x1] }
 0x268   :  { %v1495_v10 = vpop.f32.mrf.mxu0 }
 0x269   :  { %v1496_v17 = vadd.f32 %v1495_v10, %v1292_v49  ;;  %v901_v49 = vrot.slane %v900_v50, 1 }
 0x26a   :  { %v1724_v5 = vpop.f32.mrf.mxu1 }
 0x26b   :  { %v3883_v12 = vadd.f32 %v1724_v5, %v1490_v6  ;;  %v894_v5 = vrot.slane %v893_v62, 1  ;;  %v882_v6 = vadd.f32 %v881_v63, %v880_v43 }
 0x26c   :  { %v1726_v11 = vpop.f32.mrf.mxu1 }
 0x26d   :  { %v3885_v15 = vadd.f32 %v1726_v11, %v1492_v9  ;;  %v1758_v24 = vmul.f32 %v3883_v12, %v3883_v12  ;;  %v875_v9 = vadd.f32 %v874_v3, %v873_v48 }
 0x26e   :  { %v1728_v16 = vpop.f32.mrf.mxu1 }
 0x26f   :  { %v3887_v20 = vadd.f32 %v1728_v16, %v1494_v1  ;;  %v1759_v30 = vmul.f32 %v3885_v15, %v3885_v15  ;;  %v902_v1 = vadd.f32 %v901_v49, %v900_v50  ;;  %v895_v16 = vadd.f32 %v894_v5, %v893_v62 }
 0x270   :  { %v1730_v23 = vpop.f32.mrf.mxu1 }
 0x271   :  { %v1742_v25 = vadd.f32 %v3887_v20, %v3883_v12  ;;  %v1760_v26 = vmul.f32 %v3887_v20, %v3887_v20  ;;  %v3895_v27 = vadd.f32 %v1730_v23, %v1496_v17  ;;  %v1963_v23 = vld [vmem:[%s3972_s5] sm:$0xff] }
 0x273   :  { %v1743_v31 = vrot.slane %v1742_v25, 4  ;;  %v1762_v32 = vadd.f32 %v1760_v26, %v1758_v24  ;;  %v1749_v33 = vadd.f32 %v3895_v27, %v3885_v15  ;;  %v1761_v34 = vmul.f32 %v3895_v27, %v3895_v27 }
 0x274   :  { %v2990_v24 = vmov 0.0  }
 0x275   :  { %v1744_v37 = vadd.f32 %v1743_v31, %v1742_v25  ;;  %v1763_v38 = vrot.slane %v1762_v32, 4  ;;  %v1750_v39 = vrot.slane %v1749_v33, 4  ;;  %v1769_v40 = vadd.f32 %v1761_v34, %v1759_v30 }
 0x277   :  { %v1745_v44 = vrot.slane %v1744_v37, 2  ;;  %v1764_v45 = vadd.f32 %v1763_v38, %v1762_v32  ;;  %v1751_v46 = vadd.f32 %v1750_v39, %v1749_v33  ;;  %v1770_v47 = vrot.slane %v1769_v40, 4  ;;  %v1956_v38 = vld [vmem:[%s3973_s6] sm:$0x1] }
 0x279   :  { %v1746_v51 = vadd.f32 %v1745_v44, %v1744_v37  ;;  %v1765_v53 = vrot.slane %v1764_v45, 2  ;;  %v1752_v60 = vrot.slane %v1751_v46, 2  ;;  %v1771_v57 = vadd.f32 %v1770_v47, %v1769_v40 }
 0x27b   :  { %v1747_v55 = vrot.slane %v1746_v51, 1  ;;  %v1766_v54 = vadd.f32 %v1765_v53, %v1764_v45  ;;  %v1753_v56 = vadd.f32 %v1752_v60, %v1751_v46  ;;  %v1772_v0 = vrot.slane %v1771_v57, 2 }
 0x27c   :  { %v2118_v45 = vlaneseq }
 0x27d   :  { %v1754_v4 = vrot.slane %v1753_v56, 1  ;;  %v1773_v2 = vadd.f32 %v1772_v0, %v1771_v57  ;;  %v1767_v41 = vrot.slane %v1766_v54, 1  ;;  %v1748_v18 = vadd.f32 %v1747_v55, %v1746_v51 }
 0x27e   :  { %v2119_v46 = vshrl.u32 %v2118_v45, 7 }
 0x27f   :  { %v1755_v7 = vadd.f32 %v1754_v4, %v1753_v56  ;;  %v1774_v8 = vrot.slane %v1773_v2, 1  ;;  %v1768_v10 = vadd.f32 %v1767_v41, %v1766_v54  ;;  %v1756_v14 = vadd.f32 %v1748_v18, %v875_v9 }
 0x280   :  { %v2120_v47 = vsub.s32 0, %v2119_v46 }
 0x281   :  { %v1757_v11 = vadd.f32 %v1755_v7, %v882_v6  ;;  %v1775_v13 = vadd.f32 %v1774_v8, %v1773_v2  ;;  %v1776_v21 = vadd.f32 %v1768_v10, %v895_v16 }
 0x283   :  { %1874 = vmatprep.mubr.f32.mxu0 %v1757_v11  ;;  %v1777_v17 = vadd.f32 %v1775_v13, %v902_v1 }
 0x284   :  { %1875 = vmatmul.mubr.f32.vlgmr.msra.gmra.mxu0 %v1756_v14 }
 0x285   :  { %1944 = vmatprep.mubr.f32.mxu1 %v1777_v17  ;;  %2033 = vmatprep.mubr.f32.mxu0 %v2990_v24 }
 0x286   :  { %1945 = vmatmul.mubr.f32.vlgmr.msra.gmra.mxu1 %v1776_v21  ;;  %2000 = vmatpush1.msra.mxu0 %v1963_v23 }
 0x287   :  { %2335 = vmatprep.mubr.bf16.mxu1 %v4071_v19  ;;  %2073 = vmatprep.subr.mxu0 %v1964_v22 }
 0x344   :  { %v2789_v25 = vpop.f32.mrf.mxu0 }
 0x346   :  { %v2790_v26 = vpop.f32.mrf.mxu0  ;;  %v2824_v28 = vpop.f32.mrf.mxu1 }
 0x347   :  { %v2791_v29 = vadd.f32 %v2790_v26, %v2789_v25  ;;  %v2983_v26 = vld [vmem:[%s3975_s3] sm:$0xff]  }
 0x348   :  { %v2825_v30 = vpop.f32.mrf.mxu1 }
 0x349   :  { %v1951_v31 = vmul.f32 0.0009765625, %v2791_v29  ;;  %v2826_v32 = vadd.f32 %v2825_v30, %v2824_v28  ;;  %v2984_v29 = vld [vmem:[%s3975_s3] sm:$0xff]   ;;  %v2985_v30 = vld [vmem:[%s3975_s3 + $0x8] sm:$0xff]  }
 0x34b   :  { %v1953_v33 = vmul.f32 %v1951_v31, %v1951_v31  ;;  %v1952_v34 = vmul.f32 0.0009765625, %v2826_v32 }
 0x34d   :  { %v1954_v35 = vsub.f32 %v1952_v34, %v1953_v33 }
 0x34f   :  { %v1955_v36 = vmax.f32 %v1954_v35, 0.0 }
 0x351   :  { %v1957_v37 = vadd.f32 1e-05, %v1955_v36 }
 0x353   :  { %2987 = vrsqrt.f32 %v1957_v37 }
 0x360   :  { %v2988_v39 = vpop.eup %2987 }
 0x361   :  { %v1959_v40 = vmul.f32 %v2988_v39, %v1956_v38 }
 0x363   :  { %2727 = vmatmul.mubr.msk.f32.vlgmr.msra.gmra.mxu0 %vm1965_vm1, %v1959_v40  ;;  %v1961_v43 = vmul.f32 %v1959_v40, %v1951_v31  ;;  %v2986_v31 = vld [vmem:[%s3975_s3 + $0x8] sm:$0xff]  }
 0x364   :  { %2074 = vmatpush1.msra.mxu0 %v1963_v23  ;;  %2107 = vmatprep.mubr.f32.mxu0 %v2990_v24 }
 0x365   :  { %v1962_v44 = vsub.f32 %v1960_v42, %v1961_v43 }
 0x367   :  { %2728 = vmatmul.mubr.msk.f32.vlgmr.msra.gmra.mxu0 %vm1965_vm1, %v1962_v44 }
 0x368   :  { %2208 = vmatprep.mubr.bf16.mxu0 %v4071_v19 }
 0x423   :  { %v2035_v48 = vpop.f32.mrf.mxu0 }
 0x424   :  { %v2121_v50 = vrot.slane %v2035_v48, %v2120_v47 }
 0x425   :  { %v2037_v51 = vpop.f32.mrf.mxu0 }
 0x426   :  { %v2125_v53 = vrot.slane %v2037_v51, %v2120_v47  ;;  %v2126_v57 = vmul.f32 %v2121_v50, %v3869_v61  ;;  %v2128_v62 = vmul.f32 %v2121_v50, %v3867_v59  ;;  %v2261_v63 = vmul.f32 %v2121_v50, %v3883_v12 }
 0x427   :  { %v2109_v60 = vpop.f32.mrf.mxu0  ;;  %v2263_v54 = vmul.f32 %v2121_v50, %v3887_v20 }
 0x428   :  { %v2133_v55 = vrot.slane %v2109_v60, %v2120_v47  ;;  %v2127_v56 = vmul.f32 %v2125_v53, %v3865_v58  ;;  %v2129_v3 = vmul.f32 %v2125_v53, %v3863_v52  ;;  %v2262_v41 = vmul.f32 %v2125_v53, %v3885_v15 }
 0x429   :  { %v2111_v0 = vpop.f32.mrf.mxu0  ;;  %v2264_v18 = vmul.f32 %v2125_v53, %v3895_v27 }
 0x42a   :  { %v2138_v4 = vadd.f32 %v2133_v55, %v2126_v57  ;;  %v2140_v49 = vadd.f32 %v2133_v55, %v2128_v62  ;;  %v2265_v2 = vadd.f32 %v2261_v63, %v2133_v55  ;;  %v2267_v61 = vadd.f32 %v2263_v54, %v2133_v55 }
 0x42b   :  { %v2137_v5 = vrot.slane %v2111_v0, %v2120_v47 }
 0x42c   :  { %vm2142_vm2 = vcmp.gt.f32.partialorder %v2138_v4, 0.0  ;;  %vm2144_vm3 = vcmp.gt.f32.partialorder %v2140_v49, 0.0  ;;  %v2146_v59 = vmul.f32 0.2, %v2138_v4  ;;  %v2148_v12 = vmul.f32 0.2, %v2140_v49 }
 0x42d   :  { %v2139_v6 = vadd.f32 %v2137_v5, %v2127_v56  ;;  %v2141_v20 = vadd.f32 %v2137_v5, %v2129_v3  ;;  %v2266_v7 = vadd.f32 %v2262_v41, %v2137_v5  ;;  %v2268_v58 = vadd.f32 %v2264_v18, %v2137_v5 }
 0x42e   :  { %v2150_v8 = vsel %vm2142_vm2, %v2138_v4, %v2146_v59  ;;  %v2152_v9 = vsel %vm2144_vm3, %v2140_v49, %v2148_v12  ;;  %vm2269_vm4 = vcmp.gt.f32.partialorder %v2265_v2, 0.0  ;;  %vm2271_vm9 = vcmp.gt.f32.partialorder %v2267_v61, 0.0 }
 0x42f   :  { %vm2143_vm5 = vcmp.gt.f32.partialorder %v2139_v6, 0.0  ;;  %vm2145_vm6 = vcmp.gt.f32.partialorder %v2141_v20, 0.0  ;;  %v2147_v52 = vmul.f32 0.2, %v2139_v6  ;;  %v2149_v10 = vmul.f32 0.2, %v2141_v20 }
 0x430   :  { %vm2270_vm7 = vcmp.gt.f32.partialorder %v2266_v7, 0.0  ;;  %vm2272_vm8 = vcmp.gt.f32.partialorder %v2268_v58, 0.0  ;;  %v2274_v15 = vmul.f32 0.2, %v2266_v7  ;;  %v2276_v27 = vmul.f32 0.2, %v2268_v58 }
 0x431   :  { %v2151_v11 = vsel %vm2143_vm5, %v2139_v6, %v2147_v52  ;;  %v2153_v1 = vsel %vm2145_vm6, %v2141_v20, %v2149_v10  ;;  %v2273_v13 = vmul.f32 0.2, %v2265_v2  ;;  %v2275_v21 = vmul.f32 0.2, %v2267_v61 }
 0x432   :  { %v2155_v14 = vpack.c.bf16 %v2153_v1, %v2151_v11  ;;  %v2278_v16 = vsel %vm2270_vm7, %v2266_v7, %v2274_v15  ;;  %v2280_v17 = vsel %vm2272_vm8, %v2268_v58, %v2276_v27  ;;  %v2154_v23 = vpack.c.bf16 %v2152_v9, %v2150_v8 }
 0x433   :  { %v2282_v22 = vpack.c.bf16 %v2280_v17, %v2278_v16  ;;  %v2277_v24 = vsel %vm2269_vm4, %v2265_v2, %v2273_v13  ;;  %v2279_v25 = vsel %vm2271_vm9, %v2267_v61, %v2275_v21 }
 0x434   :  { %2190 = vmatprep.subr.bf16.mxu0 %v2155_v14  ;;  %v2281_v28 = vpack.c.bf16 %v2279_v25, %v2277_v24 }
 0x435   :  { %2317 = vmatprep.subr.bf16.mxu1 %v2282_v22  ;;  %2191 = vmatpush1.bf16.msra.mxu0 %v2154_v23 }
 0x436   :  { %2318 = vmatpush1.bf16.msra.mxu1 %v2281_v28 }
 0x438   :  { %2731 = vmatmul.mubr.msk.bf16.vlgmr.msra.gmra.mxu0 %vm49_vm0, %v2983_v26 }
 0x439   :  { %2218 = vmatprep.mubr.bf16.mxu0 %v4071_v19  ;;  %2739 = vmatmul.mubr.msk.bf16.vlgmr.msra.gmra.mxu1 %vm49_vm0, %v2984_v29 }
 0x43a   :  { %2345 = vmatprep.mubr.bf16.mxu1 %v4071_v19 }
 0x440   :  { %2732 = vmatmul.mubr.msk.bf16.gmra.mxu0 %vm49_vm0, %v2985_v30 }
 0x441   :  { %2740 = vmatmul.mubr.msk.bf16.gmra.mxu1 %vm49_vm0, %v2986_v31 }
 0x4f8   :  { %v2210_v32 = vpop.f32.mrf.mxu0 }
 0x4f9   :  { %v2337_v33 = vpop.f32.mrf.mxu1 }
 0x4fa   :  { %v2212_v34 = vpop.f32.mrf.mxu0 }
 0x4fb   :  { %v2749_v35 = vpack.c.bf16 %v2212_v34, %v2210_v32  ;;  %v2339_v36 = vpop.f32.mrf.mxu1 }
 0x4fc   :  { %v2214_v37 = vpop.f32.mrf.mxu0  ;;  %v2753_v19 = vpack.c.bf16 %v2339_v36, %v2337_v33 }
 0x4fd   :  { %2253 = vst [vmem:[%s3976_s8] sm:$0xff] %v2749_v35  ;;  %v2341_v38 = vpop.f32.mrf.mxu1 }
 0x4fe   :  { %v2216_v39 = vpop.f32.mrf.mxu0  ;;  %2745 = vst [vmem:[%s3976_s8 + $0x20] sm:$0xff] %v2753_v19 }
 0x4ff   :  { %v2750_v40 = vpack.c.bf16 %v2216_v39, %v2214_v37  ;;  %v2343_v42 = vpop.f32.mrf.mxu1 }
 0x500   :  { %v2220_v43 = vpop.f32.mrf.mxu0  ;;  %v2754_v44 = vpack.c.bf16 %v2343_v42, %v2341_v38 }
 0x501   :  { %2254 = vst [vmem:[%s3976_s8 + $0x8] sm:$0xff] %v2750_v40  ;;  %v2347_v45 = vpop.f32.mrf.mxu1 }
 0x502   :  { %v2222_v46 = vpop.f32.mrf.mxu0  ;;  %2746 = vst [vmem:[%s3976_s8 + $0x28] sm:$0xff] %v2754_v44 }
 0x503   :  { %v2751_v47 = vpack.c.bf16 %v2222_v46, %v2220_v43  ;;  %v2349_v48 = vpop.f32.mrf.mxu1 }
 0x504   :  { %v2224_v50 = vpop.f32.mrf.mxu0  ;;  %v2755_v51 = vpack.c.bf16 %v2349_v48, %v2347_v45 }
 0x505   :  { %2255 = vst [vmem:[%s3976_s8 + $0x10] sm:$0xff] %v2751_v47  ;;  %v2351_v53 = vpop.f32.mrf.mxu1 }
 0x506   :  { %v2226_v60 = vpop.f32.mrf.mxu0  ;;  %2747 = vst [vmem:[%s3976_s8 + $0x30] sm:$0xff] %v2755_v51 }
 0x507   :  { %v2752_v57 = vpack.c.bf16 %v2226_v60, %v2224_v50  ;;  %v2353_v62 = vpop.f32.mrf.mxu1 }
 0x508   :  { %v2756_v63 = vpack.c.bf16 %v2353_v62, %v2351_v53 }
 0x509   :  { %2256 = vst [vmem:[%s3976_s8 + $0x18] sm:$0xff] %v2752_v57 }
 0x50a   :  { %2748 = vst [vmem:[%s3976_s8 + $0x38] sm:$0xff] %v2756_v63 }

// kernel: decoder_forward.6
= control target key start
LH: loop header
LB: loop body
LE: loop exit
PB: predicated region body
PF: predicated region fallthrough
CT: control target
= control target key end

     0   :  { %v4763_v1 = vmov 0   ;;  %vm68_vm0 = vcmask 261120   ;;  %vm2182_vm1 = vcmask 1043456   ;;  %vm2178_vm2 = vcmask 31744   ;;  %s4754_s0 = inlined_call_operand.vmem [shape: bf16[2,32,256], index: 0, kind: input, shape index: {}]   ;;  %s4755_s2 = inlined_call_operand.vmem [shape: bf16[2,32,32], index: 2, kind: input, shape index: {}]   ;;  %s4756_s1 = inlined_call_operand.vmem [shape: bf16[3,256,256], index: 1, kind: input, shape index: {}]   ;;  %s4757_s4 = inlined_call_operand.vmem [shape: f32[256,4], index: 4, kind: input, shape index: {}]   ;;  %s4758_s5 = inlined_call_operand.vmem [shape: f32[4,256], index: 5, kind: input, shape index: {}]   ;;  %s4759_s6 = inlined_call_operand.vmem [shape: f32[1,4], index: 6, kind: input, shape index: {}]   ;;  %s4760_s7 = inlined_call_operand.vmem [shape: f32[1,4], index: 7, kind: input, shape index: {}]   ;;  %s4761_s3 = inlined_call_operand.vmem [shape: bf16[64,32], index: 3, kind: input, shape index: {}]   ;;  %s4762_s8 = inlined_call_operand.vmem [shape: bf16[2,64,256], index: 8, kind: output, shape index: {}]  }
   0x1   :  { %v3510_v0 = vld [vmem:[%s4754_s0 + $0x14] ss:$8 sps:$4 sm:$0xff]   ;;  %107 = vmatprep.mubr.bf16.mxu0 %v4763_v1  ;;  %185 = vmatprep.mubr.bf16.mxu1 %v4763_v1  ;;  %v3517_v2 = vld [vmem:[%s4754_s0 + $0x10] ss:$8 sps:$4 sm:$0xff]   ;;  %v3288_v3 = vld [vmem:[%s4754_s0 + $0x4] ss:$8 sps:$4 sm:$0xff]  }
   0x2   :  { %87 = vmatprep.subr.bf16.mxu0 %v3510_v0  ;;  %165 = vmatprep.subr.bf16.mxu1 %v3510_v0  ;;  %v3529_v4 = vld [vmem:[%s4754_s0] ss:$8 sps:$4 sm:$0xff]   ;;  %v3292_v6 = vld [vmem:[%s4755_s2 + $0x10] sm:$0xff]   ;;  %v3553_v9 = vld [vmem:[%s4756_s1 + $0x164] ss:$8 sps:$4 sm:$0xff]  }
   0x3   :  { %88 = vmatpush1.bf16.msra.mxu0 %v3517_v2  ;;  %166 = vmatpush1.bf16.msra.mxu1 %v3517_v2  ;;  %v3291_v5 = vld [vmem:[%s4755_s2] sm:$0xff]   ;;  %v3542_v7 = vld [vmem:[%s4756_s1 + $0x174] ss:$8 sps:$4 sm:$0xff]   ;;  %v3547_v8 = vld [vmem:[%s4756_s1 + $0x170] ss:$8 sps:$4 sm:$0xff]  }
   0x4   :  { %89 = vmatprep.subr.bf16.mxu0 %v3288_v3  ;;  %167 = vmatprep.subr.bf16.mxu1 %v3288_v3  ;;  %v3563_v10 = vld [vmem:[%s4756_s1 + $0x160] ss:$8 sps:$4 sm:$0xff]   ;;  %v3569_v11 = vld [vmem:[%s4756_s1 + $0x154] ss:$8 sps:$4 sm:$0xff]   ;;  %v3581_v14 = vld [vmem:[%s4756_s1 + $0x150] ss:$8 sps:$4 sm:$0xff]  }
   0x5   :  { %v3293_v12 = vld [vmem:[%s4755_s2 + $0x8] sm:$0xff]   ;;  %v3294_v13 = vld [vmem:[%s4755_s2 + $0x18] sm:$0xff]  }
   0x6   :  { %v3587_v15 = vld [vmem:[%s4756_s1 + $0x144] ss:$8 sps:$4 sm:$0xff]   ;;  %v3595_v16 = vld [vmem:[%s4756_s1 + $0x140] ss:$8 sps:$4 sm:$0xff]   ;;  %v3601_v17 = vld [vmem:[%s4756_s1 + $0x134] ss:$8 sps:$4 sm:$0xff]  }
   0x7   :  { %90 = vmatpush1.bf16.msra.mxu0 %v3529_v4  ;;  %168 = vmatpush1.bf16.msra.mxu1 %v3529_v4  ;;  %v3607_v18 = vld [vmem:[%s4756_s1 + $0x130] ss:$8 sps:$4 sm:$0xff]   ;;  %v3613_v19 = vld [vmem:[%s4756_s1 + $0x124] ss:$8 sps:$4 sm:$0xff]   ;;  %v3618_v20 = vld [vmem:[%s4756_s1 + $0x120] ss:$8 sps:$4 sm:$0xff]  }
   0x8   :  { %435 = vmatprep.subr.bf16.mxu0 %v3542_v7  ;;  %v3623_v21 = vld [vmem:[%s4756_s1 + $0x114] ss:$8 sps:$4 sm:$0xff]   ;;  %v3629_v22 = vld [vmem:[%s4756_s1 + $0x70] ss:$8 sps:$4 sm:$0xff]   ;;  %v3646_v25 = vld [vmem:[%s4756_s1 + $0x64] ss:$8 sps:$4 sm:$0xff]  }
   0x9   :  { %v3635_v23 = vld [vmem:[%s4756_s1 + $0x74] ss:$8 sps:$4 sm:$0xff]   ;;  %v3640_v24 = vld [vmem:[%s4756_s1 + $0x110] ss:$8 sps:$4 sm:$0xff]   ;;  %v3653_v26 = vld [vmem:[%s4756_s1 + $0x60] ss:$8 sps:$4 sm:$0xff]  }
   0xa   :  { %2801 = vmatmul.mubr.msk.bf16.vlgmr.msra.gmra.mxu0 %vm68_vm0, %v3291_v5  ;;  %2809 = vmatmul.mubr.msk.bf16.vlgmr.msra.gmra.mxu1 %vm68_vm0, %v3292_v6  ;;  %v3659_v27 = vld [vmem:[%s4756_s1 + $0x104] ss:$8 sps:$4 sm:$0xff]   ;;  %v3665_v28 = vld [vmem:[%s4756_s1 + $0x54] ss:$8 sps:$4 sm:$0xff]   ;;  %v3670_v29 = vld [vmem:[%s4756_s1 + $0x100] ss:$8 sps:$4 sm:$0xff]  }
   0xb   :  { %117 = vmatprep.mubr.bf16.mxu0 %v4763_v1  ;;  %195 = vmatprep.mubr.bf16.mxu1 %v4763_v1  ;;  %v3675_v30 = vld [vmem:[%s4756_s1 + $0x1f4] ss:$8 sps:$4 sm:$0xff]   ;;  %v3682_v31 = vld [vmem:[%s4756_s1 + $0x50] ss:$8 sps:$4 sm:$0xff]   ;;  %v3689_v32 = vld [vmem:[%s4756_s1 + $0x44] ss:$8 sps:$4 sm:$0xff]  }
   0xc   :  { %436 = vmatpush1.bf16.msra.mxu0 %v3547_v8  ;;  %648 = vmatprep.subr.bf16.mxu1 %v3635_v23  ;;  %4828 = vst [vmem:[#allocation3_spill] sm:$0xff] %v3675_v30  ;;  %v3694_v33 = vld [vmem:[%s4756_s1 + $0x1f0] ss:$8 sps:$4 sm:$0xff]   ;;  %v3699_v34 = vld [vmem:[%s4756_s1 + $0x1e4] ss:$8 sps:$4 sm:$0xff]  }
   0xd   :  { %437 = vmatprep.subr.bf16.mxu0 %v3553_v9  ;;  %649 = vmatpush1.bf16.msra.mxu1 %v3629_v22  ;;  %4829 = vst [vmem:[#allocation4_spill] sm:$0xff] %v3694_v33  ;;  %4830 = vst [vmem:[#allocation5_spill] sm:$0xff] %v3699_v34  ;;  %v3706_v35 = vld [vmem:[%s4756_s1 + $0x40] ss:$8 sps:$4 sm:$0xff]   ;;  %v3713_v36 = vld [vmem:[%s4756_s1 + $0x34] ss:$8 sps:$4 sm:$0xff]  }
   0xe   :  { %650 = vmatprep.subr.bf16.mxu1 %v3646_v25  ;;  %v3718_v37 = vld [vmem:[%s4756_s1 + $0x1e0] ss:$8 sps:$4 sm:$0xff]   ;;  %v3723_v38 = vld [vmem:[%s4756_s1 + $0x1d4] ss:$8 sps:$4 sm:$0xff]   ;;  %v3730_v39 = vld [vmem:[%s4756_s1 + $0x30] ss:$8 sps:$4 sm:$0xff]  }
   0xf   :  { %4831 = vst [vmem:[#allocation6_spill] sm:$0xff] %v3718_v37  ;;  %4832 = vst [vmem:[#allocation7_spill] sm:$0xff] %v3723_v38  ;;  %v3737_v40 = vld [vmem:[%s4756_s1 + $0x24] ss:$8 sps:$4 sm:$0xff]   ;;  %v3742_v41 = vld [vmem:[%s4756_s1 + $0x1d0] ss:$8 sps:$4 sm:$0xff]  }
  0x10   :  { %438 = vmatpush1.bf16.msra.mxu0 %v3563_v10  ;;  %4833 = vst [vmem:[#allocation8_spill] sm:$0xff] %v3742_v41  ;;  %v3747_v42 = vld [vmem:[%s4756_s1 + $0x1c4] ss:$8 sps:$4 sm:$0xff]   ;;  %v3754_v43 = vld [vmem:[%s4756_s1 + $0x20] ss:$8 sps:$4 sm:$0xff]  }
  0x11   :  { %439 = vmatprep.subr.bf16.mxu0 %v3569_v11  ;;  %651 = vmatpush1.bf16.msra.mxu1 %v3653_v26  ;;  %4834 = vst [vmem:[#allocation9_spill] sm:$0xff] %v3747_v42  ;;  %v3761_v44 = vld [vmem:[%s4756_s1 + $0x14] ss:$8 sps:$4 sm:$0xff]   ;;  %v3766_v45 = vld [vmem:[%s4756_s1 + $0x1c0] ss:$8 sps:$4 sm:$0xff]  }
  0x12   :  { %2802 = vmatmul.mubr.msk.bf16.gmra.mxu0 %vm68_vm0, %v3293_v12  ;;  %2810 = vmatmul.mubr.msk.bf16.gmra.mxu1 %vm68_vm0, %v3294_v13  ;;  %4835 = vst [vmem:[#allocation10_spill] sm:$0xff] %v3766_v45  ;;  %v3771_v46 = vld [vmem:[%s4756_s1 + $0x1b4] ss:$8 sps:$4 sm:$0xff]   ;;  %v3778_v47 = vld [vmem:[%s4756_s1 + $0x10] ss:$8 sps:$4 sm:$0xff]  }
  0x13   :  { %467 = vmatprep.mubr.bf16.mxu0 %v3288_v3  ;;  %652 = vmatprep.subr.bf16.mxu1 %v3665_v28  ;;  %4836 = vst [vmem:[#allocation11_spill] sm:$0xff] %v3771_v46  ;;  %v3785_v48 = vld [vmem:[%s4756_s1 + $0x4] ss:$8 sps:$4 sm:$0xff]   ;;  %v3790_v49 = vld [vmem:[%s4756_s1 + $0x1b0] ss:$8 sps:$4 sm:$0xff]  }
  0x14   :  { %440 = vmatpush1.bf16.msra.mxu0 %v3581_v14  ;;  %4837 = vst [vmem:[#allocation12_spill] sm:$0xff] %v3790_v49  ;;  %v3795_v50 = vld [vmem:[%s4756_s1 + $0x1a4] ss:$8 sps:$4 sm:$0xff]   ;;  %v3802_v51 = vld [vmem:[%s4756_s1] ss:$8 sps:$4 sm:$0xff]  }
  0x15   :  { %441 = vmatprep.subr.bf16.mxu0 %v3587_v15  ;;  %653 = vmatpush1.bf16.msra.mxu1 %v3682_v31  ;;  %4838 = vst [vmem:[#allocation13_spill] sm:$0xff] %v3795_v50  ;;  %v3809_v52 = vld [vmem:[%s4756_s1 + $0xf4] ss:$8 sps:$4 sm:$0xff]   ;;  %v3814_v53 = vld [vmem:[%s4756_s1 + $0x1a0] ss:$8 sps:$4 sm:$0xff]  }
  0x16   :  { %654 = vmatprep.subr.bf16.mxu1 %v3689_v32  ;;  %4839 = vst [vmem:[#allocation14_spill] sm:$0xff] %v3814_v53  ;;  %v3819_v54 = vld [vmem:[%s4756_s1 + $0x194] ss:$8 sps:$4 sm:$0xff]   ;;  %v3826_v55 = vld [vmem:[%s4756_s1 + $0xf0] ss:$8 sps:$4 sm:$0xff]  }
  0x17   :  { %4840 = vst [vmem:[#allocation15_spill] sm:$0xff] %v3819_v54  ;;  %v3833_v56 = vld [vmem:[%s4756_s1 + $0xe4] ss:$8 sps:$4 sm:$0xff]   ;;  %v3838_v57 = vld [vmem:[%s4756_s1 + $0x190] ss:$8 sps:$4 sm:$0xff]  }
  0x18   :  { %442 = vmatpush1.bf16.msra.mxu0 %v3595_v16  ;;  %4841 = vst [vmem:[#allocation16_spill] sm:$0xff] %v3838_v57  ;;  %v3843_v58 = vld [vmem:[%s4756_s1 + $0x184] ss:$8 sps:$4 sm:$0xff]   ;;  %v3848_v59 = vld [vmem:[%s4756_s1 + $0xe0] ss:$8 sps:$4 sm:$0xff]  }
  0x19   :  { %443 = vmatprep.subr.bf16.mxu0 %v3601_v17  ;;  %655 = vmatpush1.bf16.msra.mxu1 %v3706_v35  ;;  %4842 = vst [vmem:[#allocation17_spill] sm:$0xff] %v3843_v58  ;;  %v3853_v60 = vld [vmem:[%s4756_s1 + $0xd4] ss:$8 sps:$4 sm:$0xff]   ;;  %v3862_v61 = vld [vmem:[%s4756_s1 + $0x180] ss:$8 sps:$4 sm:$0xff]  }
  0x1a   :  { %656 = vmatprep.subr.bf16.mxu1 %v3713_v36  ;;  %4843 = vst [vmem:[#allocation18_spill] sm:$0xff] %v3862_v61  ;;  %v3867_v62 = vld [vmem:[%s4756_s1 + $0xd0] ss:$8 sps:$4 sm:$0xff]   ;;  %v3872_v63 = vld [vmem:[%s4756_s1 + $0x274] ss:$8 sps:$4 sm:$0xff]  }
  0x1b   :  { %4844 = vst [vmem:[#allocation19_spill] sm:$0xff] %v3872_v63  ;;  %v3877_v3 = vld [vmem:[%s4756_s1 + $0xc4] ss:$8 sps:$4 sm:$0xff]   ;;  %v3887_v5 = vld [vmem:[%s4756_s1 + $0x270] ss:$8 sps:$4 sm:$0xff]  }
  0x1c   :  { %444 = vmatpush1.bf16.msra.mxu0 %v3607_v18  ;;  %4845 = vst [vmem:[#allocation20_spill] sm:$0xff] %v3887_v5  ;;  %v3893_v6 = vld [vmem:[%s4756_s1 + $0xc0] ss:$8 sps:$4 sm:$0xff]   ;;  %v3899_v12 = vld [vmem:[%s4756_s1 + $0x264] ss:$8 sps:$4 sm:$0xff]  }
  0x1d   :  { %445 = vmatprep.subr.bf16.mxu0 %v3613_v19  ;;  %657 = vmatpush1.bf16.msra.mxu1 %v3730_v39  ;;  %4846 = vst [vmem:[#allocation21_spill] sm:$0xff] %v3899_v12  ;;  %v3905_v13 = vld [vmem:[%s4756_s1 + $0xb4] ss:$8 sps:$4 sm:$0xff]   ;;  %v3912_v1 = vld [vmem:[%s4756_s1 + $0x260] ss:$8 sps:$4 sm:$0xff]  }
  0x1e   :  { %658 = vmatprep.subr.bf16.mxu1 %v3737_v40  ;;  %4847 = vst [vmem:[#allocation22_spill] sm:$0xff] %v3912_v1 }
  0x20   :  { %446 = vmatpush1.bf16.msra.mxu0 %v3618_v20 }
  0x21   :  { %447 = vmatprep.subr.bf16.mxu0 %v3623_v21  ;;  %659 = vmatpush1.bf16.msra.mxu1 %v3754_v43 }
  0x22   :  { %660 = vmatprep.subr.bf16.mxu1 %v3761_v44 }
  0x24   :  { %448 = vmatpush1.bf16.msra.mxu0 %v3640_v24 }
  0x25   :  { %449 = vmatprep.subr.bf16.mxu0 %v3659_v27  ;;  %661 = vmatpush1.bf16.msra.mxu1 %v3778_v47 }
  0x26   :  { %662 = vmatprep.subr.bf16.mxu1 %v3785_v48 }
  0x28   :  { %450 = vmatpush1.bf16.msra.mxu0 %v3670_v29 }
  0x29   :  { %451 = vmatprep.subr.bf16.mxu0 %v3675_v30  ;;  %663 = vmatpush1.bf16.msra.mxu1 %v3802_v51 }
  0x2a   :  { %664 = vmatprep.subr.bf16.mxu1 %v3809_v52 }
  0x2c   :  { %452 = vmatpush2.bf16.msra.mxu0 %v3694_v33  ;;  %v4140_v33 = vld [vmem:[%s4754_s0 + $0x30] ss:$8 sps:$4 sm:$0xff]  }
  0x2d   :  { %453 = vmatprep.subr.bf16.mxu0 %v3699_v34  ;;  %665 = vmatpush2.bf16.msra.mxu1 %v3826_v55 }
  0x2e   :  { %666 = vmatprep.subr.bf16.mxu1 %v3833_v56 }
  0x30   :  { %454 = vmatpush2.bf16.msra.mxu0 %v3718_v37 }
  0x31   :  { %455 = vmatprep.subr.bf16.mxu0 %v3723_v38  ;;  %667 = vmatpush2.bf16.msra.mxu1 %v3848_v59 }
  0x32   :  { %668 = vmatprep.subr.bf16.mxu1 %v3853_v60 }
  0x34   :  { %456 = vmatpush2.bf16.msra.mxu0 %v3742_v41 }
  0x35   :  { %457 = vmatprep.subr.bf16.mxu0 %v3747_v42  ;;  %669 = vmatpush2.bf16.msra.mxu1 %v3867_v62 }
  0x36   :  { %670 = vmatprep.subr.bf16.mxu1 %v3877_v3 }
  0x38   :  { %458 = vmatpush2.bf16.msra.mxu0 %v3766_v45 }
  0x39   :  { %459 = vmatprep.subr.bf16.mxu0 %v3771_v46  ;;  %671 = vmatpush2.bf16.msra.mxu1 %v3893_v6 }
  0x3a   :  { %672 = vmatprep.subr.bf16.mxu1 %v3905_v13 }
  0x3c   :  { %460 = vmatpush2.bf16.msra.mxu0 %v3790_v49 }
  0x3d   :  { %461 = vmatprep.subr.bf16.mxu0 %v3795_v50  ;;  %v4036_v50 = vld [vmem:[%s4756_s1 + $0x200] ss:$8 sps:$4 sm:$0xff]  }
  0x3e   :  { %4860 = vst [vmem:[#allocation35_spill] sm:$0xff] %v4036_v50 }
  0x40   :  { %462 = vmatpush2.bf16.msra.mxu0 %v3814_v53  ;;  %v4010_v53 = vld [vmem:[%s4756_s1 + $0x220] ss:$8 sps:$4 sm:$0xff]  }
  0x41   :  { %463 = vmatprep.subr.bf16.mxu0 %v3819_v54  ;;  %v3998_v54 = vld [vmem:[%s4756_s1 + $0x224] ss:$8 sps:$4 sm:$0xff]   ;;  %4856 = vst [vmem:[#allocation31_spill] sm:$0xff] %v4010_v53 }
  0x42   :  { %4855 = vst [vmem:[#allocation30_spill] sm:$0xff] %v3998_v54 }
  0x44   :  { %464 = vmatpush2.bf16.msra.mxu0 %v3838_v57  ;;  %v3986_v57 = vld [vmem:[%s4756_s1 + $0x230] ss:$8 sps:$4 sm:$0xff]  }
  0x45   :  { %465 = vmatprep.subr.bf16.mxu0 %v3843_v58  ;;  %v3968_v58 = vld [vmem:[%s4756_s1 + $0x90] ss:$8 sps:$4 sm:$0xff]   ;;  %4853 = vst [vmem:[#allocation28_spill] sm:$0xff] %v3986_v57 }
  0x48   :  { %466 = vmatpush2.bf16.msra.mxu0 %v3862_v61  ;;  %v3943_v61 = vld [vmem:[%s4756_s1 + $0xa0] ss:$8 sps:$4 sm:$0xff]  }
  0x49   :  { %894 = vmatprep.subr.bf16.mxu0 %v3872_v63  ;;  %v3918_v63 = vld [vmem:[%s4756_s1 + $0xb0] ss:$8 sps:$4 sm:$0xff]  }
  0x4a   :  { %673 = vmatpush2.bf16.msra.mxu1 %v3918_v63 }
  0x4b   :  { %468 = vmatmul.mubr.bf16.vlgmr.msra.gmra.mxu0 %v3529_v4  ;;  %v3924_v4 = vld [vmem:[%s4756_s1 + $0x254] ss:$8 sps:$4 sm:$0xff]  }
  0x4c   :  { %895 = vmatpush1.bf16.msra.mxu0 %v3887_v5  ;;  %4848 = vst [vmem:[#allocation23_spill] sm:$0xff] %v3924_v4  ;;  %v3930_v5 = vld [vmem:[%s4756_s1 + $0xa4] ss:$8 sps:$4 sm:$0xff]   ;;  %477 = vmatprep.mubr.bf16.mxu0 %v3510_v0 }
  0x4d   :  { %896 = vmatprep.subr.bf16.mxu0 %v3899_v12  ;;  %v3937_v12 = vld [vmem:[%s4756_s1 + $0x250] ss:$8 sps:$4 sm:$0xff]   ;;  %v3949_v0 = vld [vmem:[%s4756_s1 + $0x244] ss:$8 sps:$4 sm:$0xff]   ;;  %674 = vmatprep.subr.bf16.mxu1 %v3930_v5 }
  0x4e   :  { %4849 = vst [vmem:[#allocation24_spill] sm:$0xff] %v3937_v12  ;;  %4850 = vst [vmem:[#allocation25_spill] sm:$0xff] %v3949_v0  ;;  %675 = vmatpush2.bf16.msra.mxu1 %v3943_v61 }
  0x50   :  { %897 = vmatpush1.bf16.msra.mxu0 %v3912_v1  ;;  %v3955_v1 = vld [vmem:[%s4756_s1 + $0x94] ss:$8 sps:$4 sm:$0xff]  }
  0x51   :  { %898 = vmatprep.subr.bf16.mxu0 %v3924_v4  ;;  %v3962_v4 = vld [vmem:[%s4756_s1 + $0x240] ss:$8 sps:$4 sm:$0xff]   ;;  %676 = vmatprep.subr.bf16.mxu1 %v3955_v1 }
  0x52   :  { %4851 = vst [vmem:[#allocation26_spill] sm:$0xff] %v3962_v4  ;;  %677 = vmatpush2.bf16.msra.mxu1 %v3968_v58 }
  0x53   :  { %478 = vmatmul.mubr.bf16.gmra.mxu0 %v3517_v2  ;;  %v3974_v2 = vld [vmem:[%s4756_s1 + $0x234] ss:$8 sps:$4 sm:$0xff]  }
  0x54   :  { %899 = vmatpush1.bf16.msra.mxu0 %v3937_v12  ;;  %4852 = vst [vmem:[#allocation27_spill] sm:$0xff] %v3974_v2  ;;  %v3980_v12 = vld [vmem:[%s4756_s1 + $0x84] ss:$8 sps:$4 sm:$0xff]  }
  0x55   :  { %900 = vmatprep.subr.bf16.mxu0 %v3949_v0  ;;  %v3992_v0 = vld [vmem:[%s4756_s1 + $0x80] ss:$8 sps:$4 sm:$0xff]   ;;  %678 = vmatprep.subr.bf16.mxu1 %v3980_v12 }
  0x56   :  { %4854 = vst [vmem:[#allocation29_spill] sm:$0xff] %v3992_v0  ;;  %679 = vmatpush2.bf16.msra.mxu1 %v3992_v0 }
  0x58   :  { %901 = vmatpush1.bf16.msra.mxu0 %v3962_v4  ;;  %v4004_v4 = vld [vmem:[%s4754_s0 + $0x34] ss:$8 sps:$4 sm:$0xff]  }
  0x59   :  { %902 = vmatprep.subr.bf16.mxu0 %v3974_v2  ;;  %v4017_v2 = vld [vmem:[%s4756_s1 + $0x214] ss:$8 sps:$4 sm:$0xff]   ;;  %1068 = vmatprep.subr.bf16.mxu1 %v4004_v4 }
  0x5a   :  { %4857 = vst [vmem:[#allocation32_spill] sm:$0xff] %v4017_v2 }
  0x5c   :  { %903 = vmatpush1.bf16.msra.mxu0 %v3986_v57  ;;  %v4024_v57 = vld [vmem:[%s4756_s1 + $0x210] ss:$8 sps:$4 sm:$0xff]  }
  0x5d   :  { %904 = vmatprep.subr.bf16.mxu0 %v3998_v54  ;;  %4858 = vst [vmem:[#allocation33_spill] sm:$0xff] %v4024_v57  ;;  %v4030_v54 = vld [vmem:[%s4756_s1 + $0x204] ss:$8 sps:$4 sm:$0xff]  }
  0x5e   :  { %4859 = vst [vmem:[#allocation34_spill] sm:$0xff] %v4030_v54 }
  0x60   :  { %905 = vmatpush1.bf16.msra.mxu0 %v4010_v53  ;;  %v4042_v53 = vld [vmem:[%s4756_s1 + $0x2f4] ss:$8 sps:$4 sm:$0xff]  }
  0x61   :  { %906 = vmatprep.subr.bf16.mxu0 %v4017_v2  ;;  %4861 = vst [vmem:[#allocation36_spill] sm:$0xff] %v4042_v53  ;;  %v4048_v2 = vld [vmem:[%s4756_s1 + $0x2f0] ss:$8 sps:$4 sm:$0xff]  }
  0x62   :  { %4862 = vst [vmem:[#allocation37_spill] sm:$0xff] %v4048_v2 }
  0x64   :  { %907 = vmatpush1.bf16.msra.mxu0 %v4024_v57  ;;  %v4054_v57 = vld [vmem:[%s4756_s1 + $0x2e4] ss:$8 sps:$4 sm:$0xff]  }
  0x65   :  { %908 = vmatprep.subr.bf16.mxu0 %v4030_v54  ;;  %4863 = vst [vmem:[#allocation38_spill] sm:$0xff] %v4054_v57  ;;  %v4060_v54 = vld [vmem:[%s4756_s1 + $0x2e0] ss:$8 sps:$4 sm:$0xff]  }
  0x66   :  { %4864 = vst [vmem:[#allocation39_spill] sm:$0xff] %v4060_v54 }
  0x68   :  { %909 = vmatpush1.bf16.msra.mxu0 %v4036_v50  ;;  %v4066_v50 = vld [vmem:[%s4756_s1 + $0x2d4] ss:$8 sps:$4 sm:$0xff]  }
  0x69   :  { %910 = vmatprep.subr.bf16.mxu0 %v4042_v53  ;;  %4865 = vst [vmem:[#allocation40_spill] sm:$0xff] %v4066_v50  ;;  %v4072_v53 = vld [vmem:[%s4756_s1 + $0x2d0] ss:$8 sps:$4 sm:$0xff]  }
  0x6a   :  { %4866 = vst [vmem:[#allocation41_spill] sm:$0xff] %v4072_v53 }
  0x6c   :  { %911 = vmatpush2.bf16.msra.mxu0 %v4048_v2  ;;  %v4078_v2 = vld [vmem:[%s4756_s1 + $0x2c4] ss:$8 sps:$4 sm:$0xff]  }
  0x6d   :  { %912 = vmatprep.subr.bf16.mxu0 %v4054_v57  ;;  %4867 = vst [vmem:[#allocation42_spill] sm:$0xff] %v4078_v2  ;;  %v4084_v57 = vld [vmem:[%s4756_s1 + $0x2c0] ss:$8 sps:$4 sm:$0xff]  }
  0x6e   :  { %4868 = vst [vmem:[#allocation43_spill] sm:$0xff] %v4084_v57 }
  0x70   :  { %913 = vmatpush2.bf16.msra.mxu0 %v4060_v54  ;;  %v4090_v54 = vld [vmem:[%s4756_s1 + $0x2b4] ss:$8 sps:$4 sm:$0xff]  }
  0x71   :  { %914 = vmatprep.subr.bf16.mxu0 %v4066_v50  ;;  %4869 = vst [vmem:[#allocation44_spill] sm:$0xff] %v4090_v54  ;;  %v4096_v50 = vld [vmem:[%s4756_s1 + $0x2b0] ss:$8 sps:$4 sm:$0xff]  }
  0x72   :  { %4870 = vst [vmem:[#allocation45_spill] sm:$0xff] %v4096_v50 }
  0x74   :  { %915 = vmatpush2.bf16.msra.mxu0 %v4072_v53  ;;  %v4102_v53 = vld [vmem:[%s4756_s1 + $0x2a4] ss:$8 sps:$4 sm:$0xff]  }
  0x75   :  { %916 = vmatprep.subr.bf16.mxu0 %v4078_v2  ;;  %4871 = vst [vmem:[#allocation46_spill] sm:$0xff] %v4102_v53  ;;  %v4108_v2 = vld [vmem:[%s4756_s1 + $0x2a0] ss:$8 sps:$4 sm:$0xff]  }
  0x76   :  { %4872 = vst [vmem:[#allocation47_spill] sm:$0xff] %v4108_v2 }
  0x78   :  { %917 = vmatpush2.bf16.msra.mxu0 %v4084_v57  ;;  %v4114_v57 = vld [vmem:[%s4756_s1 + $0x294] ss:$8 sps:$4 sm:$0xff]  }
  0x79   :  { %918 = vmatprep.subr.bf16.mxu0 %v4090_v54  ;;  %4873 = vst [vmem:[#allocation48_spill] sm:$0xff] %v4114_v57  ;;  %v4120_v54 = vld [vmem:[%s4756_s1 + $0x290] ss:$8 sps:$4 sm:$0xff]  }
  0x7a   :  { %4874 = vst [vmem:[#allocation49_spill] sm:$0xff] %v4120_v54 }
  0x7c   :  { %919 = vmatpush2.bf16.msra.mxu0 %v4096_v50  ;;  %v4126_v50 = vld [vmem:[%s4756_s1 + $0x284] ss:$8 sps:$4 sm:$0xff]  }
  0x7d   :  { %920 = vmatprep.subr.bf16.mxu0 %v4102_v53  ;;  %4875 = vst [vmem:[#allocation50_spill] sm:$0xff] %v4126_v50  ;;  %v4132_v53 = vld [vmem:[%s4756_s1 + $0x280] ss:$8 sps:$4 sm:$0xff]  }
  0x7e   :  { %4876 = vst [vmem:[#allocation51_spill] sm:$0xff] %v4132_v53 }
  0x80   :  { %921 = vmatpush2.bf16.msra.mxu0 %v4108_v2 }
  0x81   :  { %922 = vmatprep.subr.bf16.mxu0 %v4114_v57 }
  0x84   :  { %923 = vmatpush2.bf16.msra.mxu0 %v4120_v54 }
  0x85   :  { %924 = vmatprep.subr.bf16.mxu0 %v4126_v50 }
  0x88   :  { %925 = vmatpush2.bf16.msra.mxu0 %v4132_v53 }
  0x89   :  { %1627 = vmatprep.subr.bf16.mxu0 %v3635_v23  ;;  %v4145_v23 = vld [vmem:[%s4754_s0 + $0x24] ss:$8 sps:$4 sm:$0xff]  }
  0xca   :  { %v109_v2 = vpop.f32.mrf.mxu0  ;;  %v187_v57 = vpop.f32.mrf.mxu1 }
  0xcc   :  { %v111_v49 = vpop.f32.mrf.mxu0  ;;  %v189_v46 = vpop.f32.mrf.mxu1 }
  0xce   :  { %v113_v45 = vpop.f32.mrf.mxu0  ;;  %v191_v42 = vpop.f32.mrf.mxu1 }
  0xcf   :  { %v206_v38 = vpack.c.bf16 %v191_v42, %v187_v57  ;;  %v128_v50 = vpack.c.bf16 %v113_v45, %v109_v2  ;;  %v4911_v57 = vld [vmem:[#allocation36_spill] sm:$0xff]  ;;  %v4925_v2 = vld [vmem:[#allocation50_spill] sm:$0xff] }
  0xd0   :  { %v115_v41 = vpop.f32.mrf.mxu0  ;;  %v193_v54 = vpop.f32.mrf.mxu1 }
  0xd1   :  { %v129_v37 = vpack.c.bf16 %v115_v41, %v111_v49  ;;  %v207_v34 = vpack.c.bf16 %v193_v54, %v189_v46  ;;  %v4151_v41 = vld [vmem:[%s4754_s0 + $0x20] ss:$8 sps:$4 sm:$0xff]  }
  0xd2   :  { %v119_v53 = vpop.f32.mrf.mxu0  ;;  %v197_v0 = vpop.f32.mrf.mxu1 }
  0xd3   :  { %680 = vmatprep.mubr.bf16.mxu1 %v129_v37  ;;  %926 = vmatprep.mubr.bf16.mxu0 %v207_v34 }
  0xd4   :  { %v121_v30 = vpop.f32.mrf.mxu0  ;;  %681 = vmatmul.mubr.bf16.vlgmr.msra.gmra.mxu1 %v128_v50  ;;  %v199_v42 = vpop.f32.mrf.mxu1  ;;  %927 = vmatmul.mubr.bf16.vlgmr.msra.gmra.mxu0 %v206_v38 }
  0xd5   :  { %1069 = vmatpush1.bf16.msra.mxu1 %v4140_v33  ;;  %1628 = vmatpush1.bf16.msra.mxu0 %v3629_v22  ;;  %v4877_v22 = vmov 0  }
  0xd6   :  { %v123_v45 = vpop.f32.mrf.mxu0  ;;  %v201_v46 = vpop.f32.mrf.mxu1  ;;  %1070 = vmatprep.subr.bf16.mxu1 %v4145_v23  ;;  %1629 = vmatprep.subr.bf16.mxu0 %v3646_v25  ;;  %v3445_v25 = vld [vmem:[%s4755_s2] sm:$0xff]  }
  0xd7   :  { %v208_v37 = vpack.c.bf16 %v201_v46, %v197_v0  ;;  %v130_v54 = vpack.c.bf16 %v123_v45, %v119_v53  ;;  %v4907_v53 = vld [vmem:[#allocation32_spill] sm:$0xff]  ;;  %v4924_v0 = vld [vmem:[#allocation49_spill] sm:$0xff] }
  0xd8   :  { %v125_v34 = vpop.f32.mrf.mxu0  ;;  %v203_v49 = vpop.f32.mrf.mxu1 }
  0xd9   :  { %v131_v50 = vpack.c.bf16 %v125_v34, %v121_v30  ;;  %v209_v38 = vpack.c.bf16 %v203_v49, %v199_v42  ;;  %1071 = vmatpush1.bf16.msra.mxu1 %v4151_v41  ;;  %1630 = vmatpush1.bf16.msra.mxu0 %v3653_v26  ;;  %v3446_v26 = vld [vmem:[%s4755_s2 + $0x8] sm:$0xff]   ;;  %v4894_v30 = vld [vmem:[#allocation18_spill] sm:$0xff] }
  0xda   :  { %1145 = vmatprep.subr.bf16.mxu1 %v4004_v4  ;;  %1631 = vmatprep.subr.bf16.mxu0 %v3665_v28  ;;  %v3447_v28 = vld [vmem:[%s4755_s2 + $0x10] sm:$0xff]  }
  0xdb   :  { %690 = vmatprep.mubr.bf16.mxu1 %v131_v50  ;;  %936 = vmatprep.mubr.bf16.mxu0 %v209_v38 }
  0xdc   :  { %691 = vmatmul.mubr.bf16.gmra.mxu1 %v130_v54  ;;  %937 = vmatmul.mubr.bf16.gmra.mxu0 %v208_v37 }
  0xdd   :  { %1088 = vmatprep.mubr.bf16.mxu1 %v4877_v22  ;;  %1632 = vmatpush1.bf16.msra.mxu0 %v3682_v31  ;;  %v4895_v31 = vld [vmem:[#allocation19_spill] sm:$0xff] }
  0xde   :  { %1633 = vmatprep.subr.bf16.mxu0 %v3689_v32  ;;  %v4896_v32 = vld [vmem:[#allocation20_spill] sm:$0xff] }
  0xe1   :  { %1634 = vmatpush1.bf16.msra.mxu0 %v3706_v35  ;;  %v4897_v35 = vld [vmem:[#allocation21_spill] sm:$0xff] }
  0xe2   :  { %1635 = vmatprep.subr.bf16.mxu0 %v3713_v36  ;;  %v4898_v36 = vld [vmem:[#allocation22_spill] sm:$0xff] }
  0xe4   :  { %2981 = vmatmul.mubr.msk.bf16.vlgmr.msra.gmra.mxu1 %vm68_vm0, %v3445_v25 }
  0xe5   :  { %1146 = vmatpush1.bf16.msra.mxu1 %v4140_v33  ;;  %1098 = vmatprep.mubr.bf16.mxu1 %v4877_v22 }
  0xe6   :  { %1147 = vmatprep.subr.bf16.mxu1 %v4145_v23  ;;  %1636 = vmatpush1.bf16.msra.mxu0 %v3730_v39  ;;  %v4899_v39 = vld [vmem:[#allocation23_spill] sm:$0xff] }
  0xe7   :  { %1637 = vmatprep.subr.bf16.mxu0 %v3737_v40  ;;  %v4900_v40 = vld [vmem:[#allocation24_spill] sm:$0xff] }
  0xe9   :  { %1148 = vmatpush1.bf16.msra.mxu1 %v4151_v41 }
  0xea   :  { %1414 = vmatprep.subr.bf16.mxu1 %v3542_v7  ;;  %1638 = vmatpush1.bf16.msra.mxu0 %v3754_v43  ;;  %v3448_v7 = vld [vmem:[%s4755_s2 + $0x18] sm:$0xff]   ;;  %v4901_v43 = vld [vmem:[#allocation25_spill] sm:$0xff] }
  0xeb   :  { %1639 = vmatprep.subr.bf16.mxu0 %v3761_v44  ;;  %v4902_v44 = vld [vmem:[#allocation26_spill] sm:$0xff] }
  0xec   :  { %2982 = vmatmul.mubr.msk.bf16.gmra.mxu1 %vm68_vm0, %v3446_v26 }
  0xed   :  { %1165 = vmatprep.mubr.bf16.mxu1 %v4877_v22 }
  0xee   :  { %1640 = vmatpush1.bf16.msra.mxu0 %v3778_v47  ;;  %v4903_v47 = vld [vmem:[#allocation27_spill] sm:$0xff] }
  0xef   :  { %1641 = vmatprep.subr.bf16.mxu0 %v3785_v48  ;;  %v4904_v48 = vld [vmem:[#allocation28_spill] sm:$0xff] }
  0xf2   :  { %1642 = vmatpush1.bf16.msra.mxu0 %v3802_v51  ;;  %v4905_v51 = vld [vmem:[#allocation30_spill] sm:$0xff] }
  0xf3   :  { %1643 = vmatprep.subr.bf16.mxu0 %v3809_v52  ;;  %v4906_v52 = vld [vmem:[#allocation31_spill] sm:$0xff] }
  0xf4   :  { %2989 = vmatmul.mubr.msk.bf16.vlgmr.msra.gmra.mxu1 %vm68_vm0, %v3447_v28 }
  0xf5   :  { %1175 = vmatprep.mubr.bf16.mxu1 %v4877_v22  ;;  %1415 = vmatpush1.bf16.msra.mxu1 %v3547_v8  ;;  %v4878_v8 = vld [vmem:[#allocation3_spill] sm:$0xff] }
  0xf6   :  { %1416 = vmatprep.subr.bf16.mxu1 %v3553_v9  ;;  %1644 = vmatpush2.bf16.msra.mxu0 %v3826_v55  ;;  %v4879_v9 = vld [vmem:[#allocation29_spill] sm:$0xff] }
  0xf7   :  { %1645 = vmatprep.subr.bf16.mxu0 %v3833_v56  ;;  %v4908_v55 = vld [vmem:[#allocation33_spill] sm:$0xff]  ;;  %v4909_v56 = vld [vmem:[#allocation34_spill] sm:$0xff] }
  0xf9   :  { %1417 = vmatpush1.bf16.msra.mxu1 %v3563_v10  ;;  %v4880_v10 = vld [vmem:[#allocation4_spill] sm:$0xff] }
  0xfa   :  { %1418 = vmatprep.subr.bf16.mxu1 %v3569_v11  ;;  %1646 = vmatpush2.bf16.msra.mxu0 %v3848_v59  ;;  %v4881_v11 = vld [vmem:[#allocation5_spill] sm:$0xff]  ;;  %v4913_v59 = vld [vmem:[#allocation38_spill] sm:$0xff] }
  0xfb   :  { %1647 = vmatprep.subr.bf16.mxu0 %v3853_v60  ;;  %v4914_v60 = vld [vmem:[#allocation39_spill] sm:$0xff] }
  0xfc   :  { %2990 = vmatmul.mubr.msk.bf16.gmra.mxu1 %vm68_vm0, %v3448_v7 }
  0xfd   :  { %1419 = vmatpush1.bf16.msra.mxu1 %v3581_v14  ;;  %1446 = vmatprep.mubr.bf16.mxu1 %v4145_v23  ;;  %v4882_v14 = vld [vmem:[#allocation6_spill] sm:$0xff]  ;;  %v4926_v23 = vld [vmem:[#allocation51_spill] sm:$0xff] }
  0xfe   :  { %1420 = vmatprep.subr.bf16.mxu1 %v3587_v15  ;;  %1648 = vmatpush2.bf16.msra.mxu0 %v3867_v62  ;;  %v4884_v15 = vld [vmem:[#allocation8_spill] sm:$0xff]  ;;  %v4916_v62 = vld [vmem:[#allocation41_spill] sm:$0xff] }
  0xff   :  { %1649 = vmatprep.subr.bf16.mxu0 %v3877_v3  ;;  %v4918_v3 = vld [vmem:[#allocation43_spill] sm:$0xff] }
 0x101   :  { %1421 = vmatpush1.bf16.msra.mxu1 %v3595_v16  ;;  %v4885_v16 = vld [vmem:[#allocation9_spill] sm:$0xff] }
 0x102   :  { %1422 = vmatprep.subr.bf16.mxu1 %v3601_v17  ;;  %1650 = vmatpush2.bf16.msra.mxu0 %v3893_v6  ;;  %v4886_v17 = vld [vmem:[#allocation10_spill] sm:$0xff]  ;;  %v4920_v6 = vld [vmem:[#allocation45_spill] sm:$0xff] }
 0x103   :  { %1651 = vmatprep.subr.bf16.mxu0 %v3905_v13  ;;  %v4922_v13 = vld [vmem:[#allocation47_spill] sm:$0xff] }
 0x105   :  { %1423 = vmatpush1.bf16.msra.mxu1 %v3607_v18  ;;  %v4887_v18 = vld [vmem:[#allocation11_spill] sm:$0xff] }
 0x106   :  { %1424 = vmatprep.subr.bf16.mxu1 %v3613_v19  ;;  %1652 = vmatpush2.bf16.msra.mxu0 %v3918_v63  ;;  %v4888_v19 = vld [vmem:[#allocation12_spill] sm:$0xff]  ;;  %v4917_v63 = vld [vmem:[#allocation42_spill] sm:$0xff] }
 0x107   :  { %1653 = vmatprep.subr.bf16.mxu0 %v3930_v5  ;;  %v4919_v5 = vld [vmem:[#allocation44_spill] sm:$0xff] }
 0x109   :  { %1425 = vmatpush1.bf16.msra.mxu1 %v3618_v20  ;;  %v4889_v20 = vld [vmem:[#allocation13_spill] sm:$0xff] }
 0x10a   :  { %1426 = vmatprep.subr.bf16.mxu1 %v3623_v21  ;;  %1654 = vmatpush2.bf16.msra.mxu0 %v3943_v61  ;;  %v4890_v21 = vld [vmem:[#allocation14_spill] sm:$0xff]  ;;  %v4915_v61 = vld [vmem:[#allocation40_spill] sm:$0xff] }
 0x10b   :  { %1655 = vmatprep.subr.bf16.mxu0 %v3955_v1  ;;  %v4883_v1 = vld [vmem:[#allocation7_spill] sm:$0xff] }
 0x10d   :  { %1427 = vmatpush1.bf16.msra.mxu1 %v3640_v24  ;;  %v4891_v24 = vld [vmem:[#allocation15_spill] sm:$0xff] }
 0x10e   :  { %1428 = vmatprep.subr.bf16.mxu1 %v3659_v27  ;;  %1656 = vmatpush2.bf16.msra.mxu0 %v3968_v58  ;;  %v4892_v27 = vld [vmem:[#allocation16_spill] sm:$0xff]  ;;  %v4912_v58 = vld [vmem:[#allocation37_spill] sm:$0xff] }
 0x10f   :  { %1657 = vmatprep.subr.bf16.mxu0 %v3980_v12  ;;  %v4921_v12 = vld [vmem:[#allocation46_spill] sm:$0xff] }
 0x111   :  { %1429 = vmatpush1.bf16.msra.mxu1 %v3670_v29  ;;  %v4893_v29 = vld [vmem:[#allocation17_spill] sm:$0xff] }
 0x112   :  { %1430 = vmatprep.subr.bf16.mxu1 %v4878_v8  ;;  %1658 = vmatpush2.bf16.msra.mxu0 %v4879_v9 }
 0x115   :  { %1431 = vmatpush2.bf16.msra.mxu1 %v4880_v10 }
 0x116   :  { %1432 = vmatprep.subr.bf16.mxu1 %v4881_v11 }
 0x119   :  { %1433 = vmatpush2.bf16.msra.mxu1 %v4882_v14 }
 0x11a   :  { %1434 = vmatprep.subr.bf16.mxu1 %v4883_v1 }
 0x11d   :  { %1435 = vmatpush2.bf16.msra.mxu1 %v4884_v15 }
 0x11e   :  { %1436 = vmatprep.subr.bf16.mxu1 %v4885_v16 }
 0x121   :  { %1437 = vmatpush2.bf16.msra.mxu1 %v4886_v17 }
 0x122   :  { %1438 = vmatprep.subr.bf16.mxu1 %v4887_v18 }
 0x125   :  { %1439 = vmatpush2.bf16.msra.mxu1 %v4888_v19 }
 0x126   :  { %1440 = vmatprep.subr.bf16.mxu1 %v4889_v20 }
 0x129   :  { %1441 = vmatpush2.bf16.msra.mxu1 %v4890_v21 }
 0x12a   :  { %1442 = vmatprep.subr.bf16.mxu1 %v4891_v24 }
 0x12d   :  { %1443 = vmatpush2.bf16.msra.mxu1 %v4892_v27 }
 0x12e   :  { %1444 = vmatprep.subr.bf16.mxu1 %v4893_v29 }
 0x131   :  { %1445 = vmatpush2.bf16.msra.mxu1 %v4894_v30 }
 0x132   :  { %1872 = vmatprep.subr.bf16.mxu1 %v4895_v31 }
 0x134   :  { %1447 = vmatmul.mubr.bf16.vlgmr.msra.gmra.mxu1 %v4151_v41 }
 0x135   :  { %1873 = vmatpush1.bf16.msra.mxu1 %v4896_v32  ;;  %1456 = vmatprep.mubr.bf16.mxu1 %v4004_v4  ;;  %v4923_v4 = vld [vmem:[#allocation48_spill] sm:$0xff]  ;;  %v4297_v32 = vld [vmem:[%s4757_s4 + $0xf8] sm:$0xff] }
 0x136   :  { %1874 = vmatprep.subr.bf16.mxu1 %v4897_v35  ;;  %3213 = vmatprep.subr.mxu0 %v4297_v32  ;;  %v4303_v35 = vld [vmem:[%s4757_s4 + $0x78] sm:$0xff] }
 0x139   :  { %1875 = vmatpush1.bf16.msra.mxu1 %v4898_v36  ;;  %v4309_v36 = vld [vmem:[%s4757_s4 + $0xf0] sm:$0xff] }
 0x13a   :  { %1876 = vmatprep.subr.bf16.mxu1 %v4899_v39  ;;  %v4315_v39 = vld [vmem:[%s4757_s4 + $0x70] sm:$0xff] }
 0x13c   :  { %1457 = vmatmul.mubr.bf16.gmra.mxu1 %v4140_v33  ;;  %v4910_v33 = vld [vmem:[#allocation35_spill] sm:$0xff] }
 0x13d   :  { %1877 = vmatpush1.bf16.msra.mxu1 %v4900_v40  ;;  %v4321_v40 = vld [vmem:[%s4757_s4 + $0xe8] sm:$0xff] }
 0x13e   :  { %1878 = vmatprep.subr.bf16.mxu1 %v4901_v43  ;;  %v4327_v43 = vld [vmem:[%s4757_s4 + $0x68] sm:$0xff] }
 0x141   :  { %1879 = vmatpush1.bf16.msra.mxu1 %v4902_v44  ;;  %v4333_v44 = vld [vmem:[%s4757_s4 + $0xe0] sm:$0xff] }
 0x142   :  { %1880 = vmatprep.subr.bf16.mxu1 %v4903_v47  ;;  %v4339_v47 = vld [vmem:[%s4757_s4 + $0x60] sm:$0xff] }
 0x145   :  { %1881 = vmatpush1.bf16.msra.mxu1 %v4904_v48  ;;  %v4345_v48 = vld [vmem:[%s4757_s4 + $0xd8] sm:$0xff] }
 0x146   :  { %1882 = vmatprep.subr.bf16.mxu1 %v4905_v51  ;;  %v4351_v51 = vld [vmem:[%s4757_s4 + $0x58] sm:$0xff] }
 0x149   :  { %1883 = vmatpush1.bf16.msra.mxu1 %v4906_v52  ;;  %v4357_v52 = vld [vmem:[%s4757_s4 + $0xd0] sm:$0xff] }
 0x14a   :  { %1884 = vmatprep.subr.bf16.mxu1 %v4907_v53  ;;  %v4363_v53 = vld [vmem:[%s4757_s4 + $0x50] sm:$0xff] }
 0x14d   :  { %1885 = vmatpush1.bf16.msra.mxu1 %v4908_v55  ;;  %v4369_v55 = vld [vmem:[%s4757_s4 + $0xc8] sm:$0xff] }
 0x14e   :  { %1886 = vmatprep.subr.bf16.mxu1 %v4909_v56  ;;  %v4375_v56 = vld [vmem:[%s4757_s4 + $0x48] sm:$0xff] }
 0x151   :  { %1887 = vmatpush1.bf16.msra.mxu1 %v4910_v33  ;;  %v4381_v33 = vld [vmem:[%s4757_s4 + $0xc0] sm:$0xff] }
 0x152   :  { %1888 = vmatprep.subr.bf16.mxu1 %v4911_v57  ;;  %v4387_v57 = vld [vmem:[%s4757_s4 + $0x40] sm:$0xff] }
 0x155   :  { %1889 = vmatpush2.bf16.msra.mxu1 %v4912_v58  ;;  %v4393_v58 = vld [vmem:[%s4757_s4 + $0xb8] sm:$0xff] }
 0x156   :  { %1890 = vmatprep.subr.bf16.mxu1 %v4913_v59  ;;  %v4399_v59 = vld [vmem:[%s4757_s4 + $0x38] sm:$0xff] }
 0x159   :  { %1891 = vmatpush2.bf16.msra.mxu1 %v4914_v60  ;;  %v4405_v60 = vld [vmem:[%s4757_s4 + $0xb0] sm:$0xff] }
 0x15a   :  { %1892 = vmatprep.subr.bf16.mxu1 %v4915_v61  ;;  %v4411_v61 = vld [vmem:[%s4757_s4 + $0x30] sm:$0xff] }
 0x15d   :  { %1893 = vmatpush2.bf16.msra.mxu1 %v4916_v62  ;;  %v4417_v62 = vld [vmem:[%s4757_s4 + $0xa8] sm:$0xff] }
 0x15e   :  { %1894 = vmatprep.subr.bf16.mxu1 %v4917_v63  ;;  %v4423_v63 = vld [vmem:[%s4757_s4 + $0x28] sm:$0xff] }
 0x15f   :  { %4927 = vst [vmem:[#allocation3_spill] sm:$0xff] %v4423_v63 }
 0x161   :  { %1895 = vmatpush2.bf16.msra.mxu1 %v4918_v3  ;;  %v4429_v3 = vld [vmem:[%s4757_s4 + $0xa0] sm:$0xff] }
 0x162   :  { %1896 = vmatprep.subr.bf16.mxu1 %v4919_v5  ;;  %4928 = vst [vmem:[#allocation29_spill] sm:$0xff] %v4429_v3  ;;  %v4435_v5 = vld [vmem:[%s4757_s4 + $0x20] sm:$0xff] }
 0x163   :  { %4929 = vst [vmem:[#allocation4_spill] sm:$0xff] %v4435_v5 }
 0x165   :  { %1897 = vmatpush2.bf16.msra.mxu1 %v4920_v6  ;;  %v4441_v6 = vld [vmem:[%s4757_s4 + $0x98] sm:$0xff] }
 0x166   :  { %1898 = vmatprep.subr.bf16.mxu1 %v4921_v12  ;;  %4930 = vst [vmem:[#allocation5_spill] sm:$0xff] %v4441_v6  ;;  %v4447_v12 = vld [vmem:[%s4757_s4 + $0x18] sm:$0xff] }
 0x167   :  { %4931 = vst [vmem:[#allocation6_spill] sm:$0xff] %v4447_v12 }
 0x169   :  { %1899 = vmatpush2.bf16.msra.mxu1 %v4922_v13  ;;  %v4453_v13 = vld [vmem:[%s4757_s4 + $0x90] sm:$0xff] }
 0x16a   :  { %1900 = vmatprep.subr.bf16.mxu1 %v4923_v4  ;;  %4932 = vst [vmem:[#allocation7_spill] sm:$0xff] %v4453_v13  ;;  %v4458_v4 = vld [vmem:[%s4757_s4 + $0x10] sm:$0xff] }
 0x16b   :  { %4933 = vst [vmem:[#allocation8_spill] sm:$0xff] %v4458_v4 }
 0x16d   :  { %1901 = vmatpush2.bf16.msra.mxu1 %v4924_v0  ;;  %v4463_v0 = vld [vmem:[%s4757_s4 + $0x88] sm:$0xff] }
 0x16e   :  { %1902 = vmatprep.subr.bf16.mxu1 %v4925_v2  ;;  %4934 = vst [vmem:[#allocation9_spill] sm:$0xff] %v4463_v0  ;;  %v4469_v2 = vld [vmem:[%s4757_s4 + $0x8] sm:$0xff] }
 0x16f   :  { %4935 = vst [vmem:[#allocation10_spill] sm:$0xff] %v4469_v2 }
 0x171   :  { %1903 = vmatpush2.bf16.msra.mxu1 %v4926_v23  ;;  %v4475_v23 = vld [vmem:[%s4757_s4 + $0x80] sm:$0xff] }
 0x172   :  { %4936 = vst [vmem:[#allocation11_spill] sm:$0xff] %v4475_v23 }
 0x194   :  { %v4278_v42 = vpop.f32.mrf.mxu1 }
 0x196   :  { %v4280_v41 = vpop.f32.mrf.mxu1 }
 0x198   :  { %v4282_v45 = vpop.f32.mrf.mxu1 }
 0x19a   :  { %v4284_v46 = vpop.f32.mrf.mxu1 }
 0x19c   :  { %v4286_v34 = vpop.f32.mrf.mxu1 }
 0x19e   :  { %v4288_v37 = vpop.f32.mrf.mxu1 }
 0x1a0   :  { %v4290_v49 = vpop.f32.mrf.mxu1 }
 0x1a2   :  { %v4292_v50 = vpop.f32.mrf.mxu1 }
 0x1a4   :  { %v1090_v38 = vpop.f32.mrf.mxu1 }
 0x1a6   :  { %v1092_v54 = vpop.f32.mrf.mxu1 }
 0x1a8   :  { %v1094_v25 = vpop.f32.mrf.mxu1 }
 0x1a9   :  { %v1109_v8 = vpack.c.bf16 %v1094_v25, %v1090_v38  ;;  %v4481_v38 = vld [vmem:[%s4757_s4] sm:$0xff] }
 0x1aa   :  { %v1096_v26 = vpop.f32.mrf.mxu1  ;;  %4937 = vst [vmem:[#allocation12_spill] sm:$0xff] %v4481_v38 }
 0x1ab   :  { %v1110_v28 = vpack.c.bf16 %v1096_v26, %v1092_v54  ;;  %v469_v54 = vpop.f32.mrf.mxu0 }
 0x1ac   :  { %v1100_v7 = vpop.f32.mrf.mxu1 }
 0x1ad   :  { %1659 = vmatprep.mubr.bf16.mxu0 %v1110_v28  ;;  %v471_v25 = vpop.f32.mrf.mxu0 }
 0x1ae   :  { %v1102_v9 = vpop.f32.mrf.mxu1  ;;  %1660 = vmatmul.mubr.bf16.vlgmr.msra.gmra.mxu0 %v1109_v8 }
 0x1af   :  { %3214 = vmatpush3.msra.mxu0 %v4303_v35  ;;  %v473_v26 = vpop.f32.mrf.mxu0 }
 0x1b0   :  { %v1104_v10 = vpop.f32.mrf.mxu1  ;;  %3215 = vmatprep.subr.mxu0 %v4309_v36 }
 0x1b1   :  { %v1111_v15 = vpack.c.bf16 %v1104_v10, %v1100_v7  ;;  %3216 = vmatpush3.msra.mxu0 %v4315_v39  ;;  %v475_v28 = vpop.f32.mrf.mxu0 }
 0x1b2   :  { %v1106_v11 = vpop.f32.mrf.mxu1  ;;  %3217 = vmatprep.subr.mxu0 %v4321_v40  ;;  %v689_v22 = vadd.f32 %v4284_v46, %v475_v28 }
 0x1b3   :  { %v1112_v14 = vpack.c.bf16 %v1106_v11, %v1102_v9  ;;  %3218 = vmatpush3.msra.mxu0 %v4327_v43  ;;  %v479_v7 = vpop.f32.mrf.mxu0 }
 0x1b4   :  { %v1167_v1 = vpop.f32.mrf.mxu1  ;;  %3219 = vmatprep.subr.mxu0 %v4333_v44 }
 0x1b5   :  { %1669 = vmatprep.mubr.bf16.mxu0 %v1112_v14  ;;  %3220 = vmatpush3.msra.mxu0 %v4339_v47  ;;  %v481_v8 = vpop.f32.mrf.mxu0 }
 0x1b6   :  { %v1169_v16 = vpop.f32.mrf.mxu1  ;;  %1670 = vmatmul.mubr.bf16.gmra.mxu0 %v1111_v15  ;;  %3221 = vmatprep.subr.mxu0 %v4345_v48 }
 0x1b7   :  { %3222 = vmatpush3.msra.mxu0 %v4351_v51  ;;  %v483_v9 = vpop.f32.mrf.mxu0 }
 0x1b8   :  { %v1171_v17 = vpop.f32.mrf.mxu1  ;;  %3223 = vmatprep.subr.mxu0 %v4357_v52 }
 0x1b9   :  { %v1186_v20 = vpack.c.bf16 %v1171_v17, %v1167_v1  ;;  %3224 = vmatpush3.msra.mxu0 %v4363_v53  ;;  %v485_v10 = vpop.f32.mrf.mxu0 }
 0x1ba   :  { %v1173_v18 = vpop.f32.mrf.mxu1  ;;  %3225 = vmatprep.subr.mxu0 %v4369_v55 }
 0x1bb   :  { %v1187_v19 = vpack.c.bf16 %v1173_v18, %v1169_v16  ;;  %3226 = vmatpush3.msra.mxu0 %v4375_v56  ;;  %v928_v11 = vpop.f32.mrf.mxu0 }
 0x1bc   :  { %v1177_v21 = vpop.f32.mrf.mxu1  ;;  %3227 = vmatprep.subr.mxu0 %v4381_v33 }
 0x1bd   :  { %1904 = vmatprep.mubr.bf16.mxu1 %v1187_v19  ;;  %3228 = vmatpush3.msra.mxu0 %v4387_v57  ;;  %v930_v14 = vpop.f32.mrf.mxu0 }
 0x1be   :  { %v1179_v24 = vpop.f32.mrf.mxu1  ;;  %1905 = vmatmul.mubr.bf16.vlgmr.msra.gmra.mxu1 %v1186_v20  ;;  %3229 = vmatprep.subr.mxu0 %v4393_v58 }
 0x1bf   :  { %3230 = vmatpush3.msra.mxu0 %v4399_v59  ;;  %v932_v1 = vpop.f32.mrf.mxu0 }
 0x1c0   :  { %v1181_v27 = vpop.f32.mrf.mxu1  ;;  %3231 = vmatprep.subr.mxu0 %v4405_v60 }
 0x1c1   :  { %v1188_v31 = vpack.c.bf16 %v1181_v27, %v1177_v21  ;;  %3232 = vmatpush3.msra.mxu0 %v4411_v61  ;;  %v934_v15 = vpop.f32.mrf.mxu0 }
 0x1c2   :  { %v1183_v29 = vpop.f32.mrf.mxu1  ;;  %3233 = vmatprep.subr.mxu0 %v4417_v62 }
 0x1c3   :  { %v1189_v30 = vpack.c.bf16 %v1183_v29, %v1179_v24  ;;  %3234 = vmatpush3.msra.mxu0 %v4423_v63  ;;  %v938_v16 = vpop.f32.mrf.mxu0  ;;  %v693_v63 = vadd.f32 %v4286_v34, %v479_v7 }
 0x1c4   :  { %3235 = vmatprep.subr.mxu0 %v4429_v3 }
 0x1c5   :  { %1914 = vmatprep.mubr.bf16.mxu1 %v1189_v30  ;;  %3236 = vmatpush3.msra.mxu0 %v4435_v5  ;;  %v940_v18 = vpop.f32.mrf.mxu0  ;;  %v683_v5 = vadd.f32 %v4278_v42, %v469_v54 }
 0x1c6   :  { %1915 = vmatmul.mubr.bf16.gmra.mxu1 %v1188_v31  ;;  %3237 = vmatprep.subr.mxu0 %v4441_v6 }
 0x1c7   :  { %3238 = vmatpush3.msra.mxu0 %v4447_v12  ;;  %v942_v20 = vpop.f32.mrf.mxu0  ;;  %v699_v12 = vadd.f32 %v4292_v50, %v485_v10 }
 0x1c8   :  { %3239 = vmatprep.subr.mxu0 %v4453_v13  ;;  %v4491_v13 = vadd.f32 %v934_v15, %v689_v22  ;;  %v697_v22 = vadd.f32 %v4290_v49, %v483_v9 }
 0x1c9   :  { %3240 = vmatpush3.msra.mxu0 %v4458_v4  ;;  %v944_v24 = vpop.f32.mrf.mxu0 }
 0x1ca   :  { %3241 = vmatprep.subr.mxu0 %v4463_v0  ;;  %v687_v0 = vadd.f32 %v4282_v45, %v473_v26  ;;  %4938 = vst [vmem:[#allocation13_spill] sm:$0xff] %v4491_v13  ;;  %v986_v45 = vmul.f32 %v4491_v13, %v4491_v13  ;;  %v4520_v26 = vadd.f32 %v942_v20, %v697_v22 }
 0x1cb   :  { %3242 = vmatpush3.msra.mxu0 %v4469_v2  ;;  %v695_v2 = vadd.f32 %v4288_v37, %v481_v8  ;;  %v4505_v37 = vadd.f32 %v944_v24, %v699_v12 }
 0x1cc   :  { %3243 = vmatprep.subr.mxu0 %v4475_v23  ;;  %v685_v23 = vadd.f32 %v4280_v41, %v471_v25  ;;  %v4500_v28 = vadd.f32 %v932_v1, %v687_v0  ;;  %v4507_v25 = vadd.f32 %v928_v11, %v683_v5 }
 0x1cd   :  { %3244 = vmatpush3.msra.mxu0 %v4481_v38  ;;  %v4498_v46 = vadd.f32 %v940_v18, %v695_v2  ;;  %v4513_v2 = vadd.f32 %v938_v16, %v693_v63  ;;  %v990_v7 = vmul.f32 %v4505_v37, %v4505_v37 }
 0x1ce   :  { %3248 = vmatprep.subr.mxu0 %v4297_v32  ;;  %v4495_v3 = vadd.f32 %v930_v14, %v685_v23  ;;  %v963_v49 = vadd.f32 %v4500_v28, %v4507_v25 }
 0x1cf   :  { %v988_v0 = vmul.f32 %v4498_v46, %v4498_v46 }
 0x1d0   :  { %v984_v42 = vmul.f32 %v4495_v3, %v4495_v3  ;;  %v972_v34 = vadd.f32 %v4491_v13, %v4495_v3  ;;  %v964_v63 = vadd.f32 %v963_v49, %v4513_v2 }
 0x1d2   :  { %v1000_v54 = vadd.f32 %v986_v45, %v984_v42  ;;  %v973_v5 = vadd.f32 %v972_v34, %v4498_v46  ;;  %v965_v16 = vadd.f32 %v964_v63, %v4520_v26 }
 0x1d4   :  { %v1001_v9 = vadd.f32 %v1000_v54, %v988_v0  ;;  %v974_v10 = vadd.f32 %v973_v5, %v4505_v37 }
 0x1d6   :  { %v1002_v18 = vadd.f32 %v1001_v9, %v990_v7  ;;  %v975_v13 = vrot.slane %v974_v10, 4 }
 0x1f4   :  { %v1448_v17 = vpop.f32.mrf.mxu1 }
 0x1f6   :  { %v1450_v19 = vpop.f32.mrf.mxu1 }
 0x1f8   :  { %v1452_v21 = vpop.f32.mrf.mxu1 }
 0x1fa   :  { %v1454_v27 = vpop.f32.mrf.mxu1 }
 0x1fc   :  { %v1458_v30 = vpop.f32.mrf.mxu1 }
 0x1fe   :  { %v1460_v38 = vpop.f32.mrf.mxu1 }
 0x200   :  { %v1462_v6 = vpop.f32.mrf.mxu1 }
 0x202   :  { %v1464_v50 = vpop.f32.mrf.mxu1 }
 0x26e   :  { %v1661_v29 = vpop.f32.mrf.mxu0 }
 0x26f   :  { %v1662_v20 = vadd.f32 %v1661_v29, %v1448_v17 }
 0x270   :  { %v1663_v31 = vpop.f32.mrf.mxu0 }
 0x271   :  { %v1664_v24 = vadd.f32 %v1663_v31, %v1450_v19 }
 0x272   :  { %v1665_v32 = vpop.f32.mrf.mxu0 }
 0x273   :  { %v1666_v14 = vadd.f32 %v1665_v32, %v1452_v21  ;;  %v1003_v32 = vrot.slane %v1002_v18, 4 }
 0x274   :  { %v1667_v4 = vpop.f32.mrf.mxu0 }
 0x275   :  { %v1668_v1 = vadd.f32 %v1667_v4, %v1454_v27  ;;  %v966_v27 = vrot.slane %v965_v16, 4 }
 0x276   :  { %v1671_v41 = vpop.f32.mrf.mxu0 }
 0x277   :  { %v1672_v22 = vadd.f32 %v1671_v41, %v1458_v30  ;;  %v976_v41 = vadd.f32 %v975_v13, %v974_v10  ;;  %v967_v9 = vadd.f32 %v966_v27, %v965_v16 }
 0x278   :  { %v1673_v12 = vpop.f32.mrf.mxu0 }
 0x279   :  { %v1674_v54 = vadd.f32 %v1673_v12, %v1460_v38 }
 0x27a   :  { %v1675_v15 = vpop.f32.mrf.mxu0 }
 0x27b   :  { %v1676_v31 = vadd.f32 %v1675_v15, %v1462_v6  ;;  %v977_v15 = vrot.slane %v976_v41, 2 }
 0x27c   :  { %v1677_v5 = vpop.f32.mrf.mxu0 }
 0x27d   :  { %v1678_v7 = vadd.f32 %v1677_v5, %v1464_v50 }
 0x27e   :  { %v1906_v23 = vpop.f32.mrf.mxu1 }
 0x27f   :  { %v4533_v21 = vadd.f32 %v1906_v23, %v1662_v20 }
 0x280   :  { %v1908_v8 = vpop.f32.mrf.mxu1 }
 0x281   :  { %v4531_v49 = vadd.f32 %v1908_v8, %v1664_v24 }
 0x282   :  { %v1910_v11 = vpop.f32.mrf.mxu1 }
 0x283   :  { %v4527_v42 = vadd.f32 %v1910_v11, %v1666_v14  ;;  %v1963_v38 = vmul.f32 %v4531_v49, %v4531_v49  ;;  %v1004_v11 = vadd.f32 %v1003_v32, %v1002_v18 }
 0x284   :  { %v1912_v45 = vpop.f32.mrf.mxu1 }
 0x285   :  { %v4529_v34 = vadd.f32 %v1912_v45, %v1668_v1  ;;  %v1942_v17 = vadd.f32 %v4527_v42, %v4533_v21  ;;  %v1005_v5 = vrot.slane %v1004_v11, 2 }
 0x286   :  { %v1916_v0 = vpop.f32.mrf.mxu1 }
 0x287   :  { %4939 = vst [vmem:[#allocation14_spill] sm:$0xff] %v4529_v34  ;;  %v4535_v4 = vadd.f32 %v1916_v0, %v1672_v22  ;;  %v1965_v29 = vmul.f32 %v4529_v34, %v4529_v34  ;;  %v1951_v12 = vadd.f32 %v4529_v34, %v4531_v49  ;;  %v968_v0 = vrot.slane %v967_v9, 2 }
 0x288   :  { %v1918_v19 = vpop.f32.mrf.mxu1 }
 0x289   :  { %v4541_v30 = vadd.f32 %v1918_v19, %v1674_v54  ;;  %v1943_v8 = vadd.f32 %v1942_v17, %v4535_v4  ;;  %v1979_v1 = vadd.f32 %v1965_v29, %v1963_v38  ;;  %v969_v17 = vadd.f32 %v968_v0, %v967_v9 }
 0x28a   :  { %v1920_v23 = vpop.f32.mrf.mxu1  ;;  %v985_v9 = vmul.f32 %v4500_v28, %v4500_v28  ;;  %v1966_v0 = vmul.f32 %v4535_v4, %v4535_v4 }
 0x28b   :  { %v1967_v6 = vmul.f32 %v4541_v30, %v4541_v30  ;;  %v4550_v63 = vadd.f32 %v1920_v23, %v1676_v31  ;;  %v1952_v13 = vadd.f32 %v1951_v12, %v4541_v30  ;;  %v978_v31 = vadd.f32 %v977_v15, %v976_v41 }
 0x28c   :  { %v1922_v14 = vpop.f32.mrf.mxu1  ;;  %v1006_v23 = vadd.f32 %v1005_v5, %v1004_v11  ;;  %v1962_v11 = vmul.f32 %v4533_v21, %v4533_v21 }
 0x28d   :  { %v1944_v50 = vadd.f32 %v1943_v8, %v4550_v63  ;;  %v4554_v10 = vadd.f32 %v1922_v14, %v1678_v7  ;;  %v1980_v24 = vadd.f32 %v1979_v1, %v1967_v6  ;;  %v979_v8 = vrot.slane %v978_v31, 1 }
 0x28e   :  { %v970_v1 = vrot.slane %v969_v17, 1  ;;  %v1007_v34 = vrot.slane %v1006_v23, 1 }
 0x28f   :  { %v1945_v45 = vrot.slane %v1944_v50, 4  ;;  %v1953_v20 = vadd.f32 %v1952_v13, %v4554_v10  ;;  %v1969_v22 = vmul.f32 %v4554_v10, %v4554_v10 }
 0x290   :  { %v971_v15 = vadd.f32 %v970_v1, %v969_v17  ;;  %v4950_v1 = vld [vmem:[#allocation12_spill] sm:$0xff] }
 0x291   :  { %v1946_v54 = vadd.f32 %v1945_v45, %v1944_v50  ;;  %v1954_v16 = vrot.slane %v1953_v20, 4  ;;  %v1981_v18 = vadd.f32 %v1980_v24, %v1969_v22  ;;  %v1964_v24 = vmul.f32 %v4527_v42, %v4527_v42 }
 0x293   :  { %v1947_v27 = vrot.slane %v1946_v54, 2  ;;  %v1955_v32 = vadd.f32 %v1954_v16, %v1953_v20  ;;  %v1982_v19 = vrot.slane %v1981_v18, 4  ;;  %v980_v20 = vadd.f32 %v979_v8, %v978_v31 }
 0x295   :  { %v1948_v29 = vadd.f32 %v1947_v27, %v1946_v54  ;;  %v1956_v7 = vrot.slane %v1955_v32, 2  ;;  %v1983_v38 = vadd.f32 %v1982_v19, %v1981_v18  ;;  %v983_v54 = vmul.f32 %v4507_v25, %v4507_v25 }
 0x296   :  { %v1008_v18 = vadd.f32 %v1007_v34, %v1006_v23  ;;  %v987_v27 = vmul.f32 %v4513_v2, %v4513_v2  ;;  %v1968_v19 = vmul.f32 %v4550_v63, %v4550_v63 }
 0x297   :  { %v1949_v12 = vrot.slane %v1948_v29, 1  ;;  %v1957_v6 = vadd.f32 %v1956_v7, %v1955_v32  ;;  %v1984_v14 = vrot.slane %v1983_v38, 2  ;;  %v1970_v32 = vadd.f32 %v1964_v24, %v1962_v11 }
 0x298   :  { %v989_v7 = vmul.f32 %v4520_v26, %v4520_v26  ;;  %v3461_v24 = vmov 0.0  }
 0x299   :  { %v1958_v13 = vrot.slane %v1957_v6, 1  ;;  %v1985_v50 = vadd.f32 %v1984_v14, %v1983_v38  ;;  %v1950_v45 = vadd.f32 %v1949_v12, %v1948_v29  ;;  %v991_v29 = vadd.f32 %v985_v9, %v983_v54  ;;  %2251 = vmatprep.mubr.f32.mxu1 %v3461_v24 }
 0x29a   :  { %v1971_v38 = vadd.f32 %v1970_v32, %v1966_v0  ;;  %v2168_v32 = vld [vmem:[%s4759_s6] sm:$0x1] }
 0x29b   :  { %v1959_v22 = vadd.f32 %v1958_v13, %v1957_v6  ;;  %v1986_v41 = vrot.slane %v1985_v50, 1  ;;  %v1960_v31 = vadd.f32 %v1950_v45, %v971_v15  ;;  %v992_v34 = vadd.f32 %v991_v29, %v987_v27 }
 0x29c   :  { %v1972_v23 = vadd.f32 %v1971_v38, %v1968_v19  ;;  %v4951_v13 = vmov 0   ;;  %v2340_v38 = vlaneseq }
 0x29d   :  { %v1961_v16 = vadd.f32 %v1959_v22, %v980_v20  ;;  %v1987_v5 = vadd.f32 %v1986_v41, %v1985_v50  ;;  %v993_v12 = vadd.f32 %v992_v34, %v989_v7  ;;  %v2175_v50 = vld [vmem:[%s4758_s5] sm:$0xff] }
 0x29e   :  { %v1973_v8 = vrot.slane %v1972_v23, 4  ;;  %v2177_v45 = vcombine.high %v2175_v50, %v2175_v50  ;;  %v2341_v34 = vshrl.u32 %v2340_v38, 7 }
 0x29f   :  { %2086 = vmatprep.mubr.f32.mxu0 %v1961_v16  ;;  %v1989_v17 = vadd.f32 %v1987_v5, %v1008_v18  ;;  %v994_v6 = vrot.slane %v993_v12, 4 }
 0x2a0   :  { %2087 = vmatmul.mubr.f32.vlgmr.msra.gmra.mxu0 %v1960_v31  ;;  %3151 = vmatprep.subr.msk.mxu1 %vm2182_vm1, %v2177_v45 }
 0x2a1   :  { %3249 = vmatpush3.msra.mxu0 %v4303_v35  ;;  %2156 = vmatprep.mubr.f32.mxu0 %v1989_v17  ;;  %v1974_v35 = vadd.f32 %v1973_v8, %v1972_v23  ;;  %v2172_v17 = vld [vmem:[%s4760_s7] sm:$0x1]  ;;  %v2342_v23 = vsub.s32 0, %v2341_v34 }
 0x2a2   :  { %3250 = vmatprep.subr.mxu0 %v4309_v36  ;;  %v995_v36 = vadd.f32 %v994_v6, %v993_v12  ;;  %3152 = vmatpush1.msk.msra.mxu1 %vm2182_vm1, %v2175_v50 }
 0x2a3   :  { %3251 = vmatpush3.msra.mxu0 %v4315_v39  ;;  %v1975_v39 = vrot.slane %v1974_v35, 2  ;;  %3154 = vmatprep.subr.msk.mxu1 %vm2182_vm1, %v2177_v45 }
 0x2a4   :  { %3252 = vmatprep.subr.mxu0 %v4321_v40  ;;  %v996_v40 = vrot.slane %v995_v36, 2 }
 0x2a5   :  { %3253 = vmatpush3.msra.mxu0 %v4327_v43  ;;  %v1976_v43 = vadd.f32 %v1975_v39, %v1974_v35 }
 0x2a6   :  { %3254 = vmatprep.subr.mxu0 %v4333_v44  ;;  %v997_v44 = vadd.f32 %v996_v40, %v995_v36 }
 0x2a7   :  { %3255 = vmatpush3.msra.mxu0 %v4339_v47  ;;  %v4940_v47 = vld [vmem:[#allocation3_spill] sm:$0xff] }
 0x2a8   :  { %3256 = vmatprep.subr.mxu0 %v4345_v48  ;;  %v4941_v48 = vld [vmem:[#allocation29_spill] sm:$0xff] }
 0x2a9   :  { %3257 = vmatpush3.msra.mxu0 %v4351_v51  ;;  %v1977_v51 = vrot.slane %v1976_v43, 1 }
 0x2aa   :  { %3258 = vmatprep.subr.mxu0 %v4357_v52  ;;  %v4942_v52 = vld [vmem:[#allocation4_spill] sm:$0xff] }
 0x2ab   :  { %3259 = vmatpush3.msra.mxu0 %v4363_v53  ;;  %v4943_v53 = vld [vmem:[#allocation5_spill] sm:$0xff] }
 0x2ac   :  { %3260 = vmatprep.subr.mxu0 %v4369_v55  ;;  %v998_v55 = vrot.slane %v997_v44, 1 }
 0x2ad   :  { %3261 = vmatpush3.msra.mxu0 %v4375_v56  ;;  %v4944_v56 = vld [vmem:[#allocation6_spill] sm:$0xff] }
 0x2ae   :  { %3262 = vmatprep.subr.mxu0 %v4381_v33  ;;  %v4945_v33 = vld [vmem:[#allocation7_spill] sm:$0xff] }
 0x2af   :  { %3263 = vmatpush3.msra.mxu0 %v4387_v57  ;;  %v1978_v57 = vadd.f32 %v1977_v51, %v1976_v43 }
 0x2b0   :  { %3264 = vmatprep.subr.mxu0 %v4393_v58  ;;  %v4946_v58 = vld [vmem:[#allocation8_spill] sm:$0xff] }
 0x2b1   :  { %3265 = vmatpush3.msra.mxu0 %v4399_v59  ;;  %v4947_v59 = vld [vmem:[#allocation9_spill] sm:$0xff] }
 0x2b2   :  { %3266 = vmatprep.subr.mxu0 %v4405_v60  ;;  %v999_v60 = vadd.f32 %v998_v55, %v997_v44  ;;  %v4952_v55 = vld [vmem:[#allocation13_spill] sm:$0xff] }
 0x2b3   :  { %3267 = vmatpush3.msra.mxu0 %v4411_v61  ;;  %v4948_v61 = vld [vmem:[#allocation10_spill] sm:$0xff] }
 0x2b4   :  { %3268 = vmatprep.subr.mxu0 %v4417_v62  ;;  %v4949_v62 = vld [vmem:[#allocation11_spill] sm:$0xff]  ;;  %v1988_v14 = vadd.f32 %v1978_v57, %v999_v60 }
 0x2b5   :  { %3269 = vmatpush3.msra.mxu0 %v4940_v47 }
 0x2b6   :  { %3270 = vmatprep.subr.mxu0 %v4941_v48 }
 0x2b7   :  { %3271 = vmatpush3.msra.mxu0 %v4942_v52 }
 0x2b8   :  { %3272 = vmatprep.subr.mxu0 %v4943_v53 }
 0x2b9   :  { %3273 = vmatpush3.msra.mxu0 %v4944_v56 }
 0x2ba   :  { %3274 = vmatprep.subr.mxu0 %v4945_v33 }
 0x2bb   :  { %3275 = vmatpush3.msra.mxu0 %v4946_v58  ;;  %v4953_v58 = vld [vmem:[#allocation14_spill] sm:$0xff] }
 0x2bc   :  { %3276 = vmatprep.subr.mxu0 %v4947_v59 }
 0x2bd   :  { %3277 = vmatpush3.msra.mxu0 %v4948_v61 }
 0x2be   :  { %3278 = vmatprep.subr.mxu0 %v4949_v62 }
 0x2bf   :  { %3279 = vmatpush3.msra.mxu0 %v4950_v1 }
 0x2c0   :  { %2157 = vmatmul.mubr.f32.vlgmr.msra.gmra.mxu0 %v1988_v14 }
 0x2c1   :  { %2693 = vmatprep.mubr.bf16.mxu0 %v4951_v13 }
 0x360   :  { %v3245_v20 = vpop.f32.mrf.mxu0 }
 0x362   :  { %v3246_v22 = vpop.f32.mrf.mxu0 }
 0x363   :  { %v3247_v41 = vadd.f32 %v3246_v22, %v3245_v20 }
 0x365   :  { %v2163_v15 = vmul.f32 0.00024414063, %v3247_v41 }
 0x367   :  { %v2165_v54 = vmul.f32 %v2163_v15, %v2163_v15 }
 0x380   :  { %v3280_v9 = vpop.f32.mrf.mxu0 }
 0x382   :  { %v3281_v11 = vpop.f32.mrf.mxu0 }
 0x383   :  { %v3282_v0 = vadd.f32 %v3281_v11, %v3280_v9 }
 0x385   :  { %v2164_v16 = vmul.f32 0.00024414063, %v3282_v0 }
 0x387   :  { %v2166_v18 = vsub.f32 %v2164_v16, %v2165_v54 }
 0x389   :  { %v2167_v5 = vmax.f32 %v2166_v18, 0.0 }
 0x38b   :  { %v2169_v27 = vadd.f32 1e-05, %v2167_v5 }
 0x38d   :  { %3458 = vrsqrt.f32 %v2169_v27 }
 0x39a   :  { %v3459_v19 = vpop.eup %3458 }
 0x39b   :  { %v2171_v31 = vmul.f32 %v3459_v19, %v2168_v32 }
 0x39d   :  { %3153 = vmatmul.mubr.msk.f32.vlgmr.msra.gmra.mxu1 %vm2178_vm2, %v2171_v31  ;;  %v2173_v29 = vmul.f32 %v2171_v31, %v2163_v15 }
 0x39e   :  { %3155 = vmatpush1.msk.msra.mxu1 %vm2182_vm1, %v2175_v50  ;;  %2325 = vmatprep.mubr.f32.mxu1 %v3461_v24 }
 0x39f   :  { %v2174_v7 = vsub.f32 %v2172_v17, %v2173_v29 }
 0x3a1   :  { %3156 = vmatmul.mubr.msk.f32.vlgmr.msra.gmra.mxu1 %vm2178_vm2, %v2174_v7 }
 0x3a2   :  { %2472 = vmatprep.mubr.bf16.mxu1 %v4951_v13 }
 0x45d   :  { %v2253_v12 = vpop.f32.mrf.mxu1 }
 0x45e   :  { %v4621_v8 = vrot.slane %v2253_v12, %v2342_v23 }
 0x45f   :  { %v2255_v6 = vpop.f32.mrf.mxu1 }
 0x460   :  { %v2347_v35 = vrot.slane %v2255_v6, %v2342_v23  ;;  %v2352_v36 = vmul.f32 %v4621_v8, %v4513_v2  ;;  %v2354_v39 = vmul.f32 %v4621_v8, %v4520_v26  ;;  %v2581_v40 = vmul.f32 %v4621_v8, %v4535_v4 }
 0x461   :  { %v2327_v43 = vpop.f32.mrf.mxu1  ;;  %v2583_v44 = vmul.f32 %v4621_v8, %v4550_v63  ;;  %v2348_v47 = vmul.f32 %v4621_v8, %v4507_v25  ;;  %v2350_v48 = vmul.f32 %v4621_v8, %v4500_v28  ;;  %v4637_v51 = vmul.f32 %v4621_v8, %v4533_v21 }
 0x462   :  { %v4639_v2 = vrot.slane %v2327_v43, %v2342_v23  ;;  %v2353_v26 = vmul.f32 %v2347_v35, %v4498_v46  ;;  %v2355_v4 = vmul.f32 %v2347_v35, %v4505_v37  ;;  %v2582_v52 = vmul.f32 %v2347_v35, %v4541_v30 }
 0x463   :  { %v2329_v53 = vpop.f32.mrf.mxu1  ;;  %v2584_v63 = vmul.f32 %v2347_v35, %v4554_v10  ;;  %v2349_v25 = vmul.f32 %v2347_v35, %v4495_v3  ;;  %v2351_v56 = vmul.f32 %v2347_v35, %v4952_v55  ;;  %v2578_v28 = vmul.f32 %v2347_v35, %v4531_v49 }
 0x464   :  { %v2363_v33 = vrot.slane %v2329_v53, %v2342_v23  ;;  %v2368_v21 = vadd.f32 %v4639_v2, %v2352_v36  ;;  %v2370_v57 = vadd.f32 %v4639_v2, %v2354_v39  ;;  %v2589_v46 = vadd.f32 %v2581_v40, %v4639_v2 }
 0x465   :  { %v2591_v37 = vadd.f32 %v2583_v44, %v4639_v2  ;;  %v2580_v30 = vmul.f32 %v2347_v35, %v4953_v58  ;;  %v2364_v59 = vadd.f32 %v4639_v2, %v2348_v47  ;;  %v4655_v10 = vadd.f32 %v4639_v2, %v2350_v48 }
 0x466   :  { %v2369_v3 = vadd.f32 %v2363_v33, %v2353_v26  ;;  %v2371_v60 = vadd.f32 %v2363_v33, %v2355_v4  ;;  %v2590_v61 = vadd.f32 %v2582_v52, %v2363_v33  ;;  %v2592_v49 = vadd.f32 %v2584_v63, %v2363_v33 }
 0x467   :  { %vm2376_vm3 = vcmp.gt.f32.partialorder %v2368_v21, 0.0  ;;  %vm2378_vm4 = vcmp.gt.f32.partialorder %v2370_v57, 0.0  ;;  %v2384_v62 = vmul.f32 0.2, %v2368_v21  ;;  %v2386_v14 = vmul.f32 0.2, %v2370_v57 }
 0x468   :  { %vm2377_vm5 = vcmp.gt.f32.partialorder %v2369_v3, 0.0  ;;  %vm2379_vm6 = vcmp.gt.f32.partialorder %v2371_v60, 0.0  ;;  %v2385_v1 = vmul.f32 0.2, %v2369_v3  ;;  %v2387_v50 = vmul.f32 0.2, %v2371_v60 }
 0x469   :  { %vm2598_vm7 = vcmp.gt.f32.partialorder %v2590_v61, 0.0  ;;  %vm2600_vm8 = vcmp.gt.f32.partialorder %v2592_v49, 0.0  ;;  %v2606_v24 = vmul.f32 0.2, %v2590_v61  ;;  %v2608_v45 = vmul.f32 0.2, %v2592_v49 }
 0x46a   :  { %v2393_v20 = vsel %vm2377_vm5, %v2369_v3, %v2385_v1  ;;  %v2395_v22 = vsel %vm2379_vm6, %v2371_v60, %v2387_v50  ;;  %v2392_v41 = vsel %vm2376_vm3, %v2368_v21, %v2384_v62  ;;  %v2394_v9 = vsel %vm2378_vm4, %v2370_v57, %v2386_v14  ;;  %v3454_v21 = vld [vmem:[%s4761_s3 + $0x10] sm:$0xff]  }
 0x46b   :  { %v2399_v15 = vpack.c.bf16 %v2395_v22, %v2393_v20  ;;  %v2614_v11 = vsel %vm2598_vm7, %v2590_v61, %v2606_v24  ;;  %v2616_v0 = vsel %vm2600_vm8, %v2592_v49, %v2608_v45  ;;  %v2398_v54 = vpack.c.bf16 %v2394_v9, %v2392_v41  ;;  %v3455_v57 = vld [vmem:[%s4761_s3 + $0x10] sm:$0xff]  }
 0x46c   :  { %v2620_v16 = vpack.c.bf16 %v2616_v0, %v2614_v11  ;;  %vm2597_vm9 = vcmp.gt.f32.partialorder %v2589_v46, 0.0  ;;  %vm2599_vm10 = vcmp.gt.f32.partialorder %v2591_v37, 0.0  ;;  %v2605_v18 = vmul.f32 0.2, %v2589_v46 }
 0x46d   :  { %2452 = vmatprep.subr.bf16.mxu1 %v2399_v15  ;;  %v2607_v5 = vmul.f32 0.2, %v2591_v37  ;;  %v2365_v27 = vadd.f32 %v2363_v33, %v2349_v25  ;;  %v2367_v32 = vadd.f32 %v2363_v33, %v2351_v56  ;;  %v2586_v19 = vadd.f32 %v2578_v28, %v2363_v33  ;;  %v3452_v28 = vld [vmem:[%s4761_s3 + $0x8] sm:$0xff]  }
 0x46e   :  { %2673 = vmatprep.subr.bf16.mxu0 %v2620_v16  ;;  %2453 = vmatpush1.bf16.msra.mxu1 %v2398_v54  ;;  %v2613_v31 = vsel %vm2597_vm9, %v2589_v46, %v2605_v18  ;;  %v2588_v17 = vadd.f32 %v2580_v30, %v2363_v33  ;;  %vm2372_vm11 = vcmp.gt.f32.partialorder %v2364_v59, 0.0  ;;  %vm2374_vm12 = vcmp.gt.f32.partialorder %v4655_v10, 0.0  ;;  %v3453_v33 = vld [vmem:[%s4761_s3 + $0x8] sm:$0xff]   ;;  %v3456_v46 = vld [vmem:[%s4761_s3 + $0x18] sm:$0xff]  }
 0x46f   :  { %v2615_v29 = vsel %vm2599_vm10, %v2591_v37, %v2607_v5  ;;  %vm2373_vm13 = vcmp.gt.f32.partialorder %v2365_v27, 0.0  ;;  %vm2375_vm14 = vcmp.gt.f32.partialorder %v2367_v32, 0.0  ;;  %v2381_v7 = vmul.f32 0.2, %v2365_v27  ;;  %v3457_v37 = vld [vmem:[%s4761_s3 + $0x18] sm:$0xff]  }
 0x470   :  { %v2619_v38 = vpack.c.bf16 %v2615_v29, %v2613_v31  ;;  %v2383_v34 = vmul.f32 0.2, %v2367_v32  ;;  %vm2594_vm15 = vcmp.gt.f32.partialorder %v2586_v19, 0.0  ;;  %vm2596_vm1 = vcmp.gt.f32.partialorder %v2588_v17, 0.0 }
 0x471   :  { %v2389_v23 = vsel %vm2373_vm13, %v2365_v27, %v2381_v7  ;;  %v2602_v12 = vmul.f32 0.2, %v2586_v19  ;;  %v2604_v6 = vmul.f32 0.2, %v2588_v17  ;;  %v2380_v35 = vmul.f32 0.2, %v2364_v59 }
 0x472   :  { %2674 = vmatpush1.bf16.msra.mxu0 %v2619_v38  ;;  %v2391_v36 = vsel %vm2375_vm14, %v2367_v32, %v2383_v34  ;;  %v2382_v39 = vmul.f32 0.2, %v4655_v10  ;;  %v2579_v40 = vmul.f32 %v4621_v8, %v4527_v42  ;;  %v2585_v43 = vadd.f32 %v4637_v51, %v4639_v2  ;;  %v3450_v8 = vld [vmem:[%s4761_s3] sm:$0xff]  }
 0x473   :  { %v2397_v44 = vpack.c.bf16 %v2391_v36, %v2389_v23  ;;  %v2610_v47 = vsel %vm2594_vm15, %v2586_v19, %v2602_v12  ;;  %v2612_v48 = vsel %vm2596_vm1, %v2588_v17, %v2604_v6  ;;  %v2388_v26 = vsel %vm2372_vm11, %v2364_v59, %v2380_v35 }
 0x474   :  { %v2618_v4 = vpack.c.bf16 %v2612_v48, %v2610_v47  ;;  %v2390_v52 = vsel %vm2374_vm12, %v4655_v10, %v2382_v39  ;;  %v2587_v53 = vadd.f32 %v2579_v40, %v4639_v2  ;;  %vm2593_vm2 = vcmp.gt.f32.partialorder %v2585_v43, 0.0  ;;  %v3451_v2 = vld [vmem:[%s4761_s3] sm:$0xff]  }
 0x475   :  { %2454 = vmatprep.subr.bf16.mxu1 %v2397_v44  ;;  %v2396_v63 = vpack.c.bf16 %v2390_v52, %v2388_v26  ;;  %v2601_v25 = vmul.f32 0.2, %v2585_v43 }
 0x476   :  { %2675 = vmatprep.subr.bf16.mxu0 %v2618_v4  ;;  %vm2595_vm3 = vcmp.gt.f32.partialorder %v2587_v53, 0.0  ;;  %v2603_v42 = vmul.f32 0.2, %v2587_v53 }
 0x477   :  { %2455 = vmatpush1.bf16.msra.mxu1 %v2396_v63  ;;  %v2609_v51 = vsel %vm2593_vm2, %v2585_v43, %v2601_v25 }
 0x478   :  { %v2611_v55 = vsel %vm2595_vm3, %v2587_v53, %v2603_v42 }
 0x479   :  { %v2617_v56 = vpack.c.bf16 %v2611_v55, %v2609_v51 }
 0x47a   :  { %3161 = vmatmul.mubr.msk.bf16.vlgmr.msra.gmra.mxu1 %vm68_vm0, %v3450_v8 }
 0x47b   :  { %2676 = vmatpush1.bf16.msra.mxu0 %v2617_v56  ;;  %2482 = vmatprep.mubr.bf16.mxu1 %v4951_v13 }
 0x47e   :  { %3177 = vmatmul.mubr.msk.bf16.vlgmr.msra.gmra.mxu0 %vm68_vm0, %v3451_v2 }
 0x47f   :  { %2703 = vmatprep.mubr.bf16.mxu0 %v4951_v13 }
 0x482   :  { %3162 = vmatmul.mubr.msk.bf16.gmra.mxu1 %vm68_vm0, %v3452_v28 }
 0x483   :  { %2492 = vmatprep.mubr.bf16.mxu1 %v4951_v13 }
 0x486   :  { %3178 = vmatmul.mubr.msk.bf16.gmra.mxu0 %vm68_vm0, %v3453_v33 }
 0x487   :  { %2713 = vmatprep.mubr.bf16.mxu0 %v4951_v13 }
 0x48a   :  { %3163 = vmatmul.mubr.msk.bf16.gmra.mxu1 %vm68_vm0, %v3454_v21 }
 0x48b   :  { %2502 = vmatprep.mubr.bf16.mxu1 %v4951_v13 }
 0x48e   :  { %3179 = vmatmul.mubr.msk.bf16.gmra.mxu0 %vm68_vm0, %v3455_v57 }
 0x48f   :  { %2723 = vmatprep.mubr.bf16.mxu0 %v4951_v13 }
 0x492   :  { %3164 = vmatmul.mubr.msk.bf16.gmra.mxu1 %vm68_vm0, %v3456_v46 }
 0x496   :  { %3180 = vmatmul.mubr.msk.bf16.gmra.mxu0 %vm68_vm0, %v3457_v37 }
 0x53a   :  { %v2474_v58 = vpop.f32.mrf.mxu1 }
 0x53c   :  { %v2476_v30 = vpop.f32.mrf.mxu1 }
 0x53d   :  { %v3197_v59 = vpack.c.bf16 %v2476_v30, %v2474_v58 }
 0x53e   :  { %v2695_v10 = vpop.f32.mrf.mxu0  ;;  %v2478_v3 = vpop.f32.mrf.mxu1 }
 0x53f   :  { %2561 = vst [vmem:[%s4762_s8] sm:$0xff] %v3197_v59 }
 0x540   :  { %v2697_v60 = vpop.f32.mrf.mxu0  ;;  %v2480_v61 = vpop.f32.mrf.mxu1 }
 0x541   :  { %v3205_v13 = vpack.c.bf16 %v2697_v60, %v2695_v10  ;;  %v3198_v49 = vpack.c.bf16 %v2480_v61, %v2478_v3 }
 0x542   :  { %v2699_v62 = vpop.f32.mrf.mxu0  ;;  %v2484_v14 = vpop.f32.mrf.mxu1 }
 0x543   :  { %3189 = vst [vmem:[%s4762_s8 + $0x40] sm:$0xff] %v3205_v13  ;;  %2562 = vst [vmem:[%s4762_s8 + $0x8] sm:$0xff] %v3198_v49 }
 0x544   :  { %v2701_v1 = vpop.f32.mrf.mxu0  ;;  %v2486_v50 = vpop.f32.mrf.mxu1 }
 0x545   :  { %v3206_v24 = vpack.c.bf16 %v2701_v1, %v2699_v62  ;;  %v3199_v45 = vpack.c.bf16 %v2486_v50, %v2484_v14 }
 0x546   :  { %v2705_v20 = vpop.f32.mrf.mxu0  ;;  %v2488_v22 = vpop.f32.mrf.mxu1 }
 0x547   :  { %3190 = vst [vmem:[%s4762_s8 + $0x48] sm:$0xff] %v3206_v24  ;;  %2563 = vst [vmem:[%s4762_s8 + $0x10] sm:$0xff] %v3199_v45 }
 0x548   :  { %v2707_v41 = vpop.f32.mrf.mxu0  ;;  %v2490_v9 = vpop.f32.mrf.mxu1 }
 0x549   :  { %v3207_v15 = vpack.c.bf16 %v2707_v41, %v2705_v20  ;;  %v3200_v11 = vpack.c.bf16 %v2490_v9, %v2488_v22 }
 0x54a   :  { %v2709_v0 = vpop.f32.mrf.mxu0  ;;  %v2494_v54 = vpop.f32.mrf.mxu1 }
 0x54b   :  { %3191 = vst [vmem:[%s4762_s8 + $0x50] sm:$0xff] %v3207_v15  ;;  %2564 = vst [vmem:[%s4762_s8 + $0x18] sm:$0xff] %v3200_v11 }
 0x54c   :  { %v2711_v16 = vpop.f32.mrf.mxu0  ;;  %v2496_v18 = vpop.f32.mrf.mxu1 }
 0x54d   :  { %v3208_v5 = vpack.c.bf16 %v2711_v16, %v2709_v0  ;;  %v3201_v27 = vpack.c.bf16 %v2496_v18, %v2494_v54 }
 0x54e   :  { %v2715_v32 = vpop.f32.mrf.mxu0  ;;  %v2498_v19 = vpop.f32.mrf.mxu1 }
 0x54f   :  { %3192 = vst [vmem:[%s4762_s8 + $0x58] sm:$0xff] %v3208_v5  ;;  %2565 = vst [vmem:[%s4762_s8 + $0x20] sm:$0xff] %v3201_v27 }
 0x550   :  { %v2717_v31 = vpop.f32.mrf.mxu0  ;;  %v2500_v17 = vpop.f32.mrf.mxu1 }
 0x551   :  { %v3209_v29 = vpack.c.bf16 %v2717_v31, %v2715_v32  ;;  %v3202_v7 = vpack.c.bf16 %v2500_v17, %v2498_v19 }
 0x552   :  { %v2719_v38 = vpop.f32.mrf.mxu0  ;;  %v2504_v34 = vpop.f32.mrf.mxu1 }
 0x553   :  { %3193 = vst [vmem:[%s4762_s8 + $0x60] sm:$0xff] %v3209_v29  ;;  %2566 = vst [vmem:[%s4762_s8 + $0x28] sm:$0xff] %v3202_v7 }
 0x554   :  { %v2721_v23 = vpop.f32.mrf.mxu0  ;;  %v2506_v12 = vpop.f32.mrf.mxu1 }
 0x555   :  { %v3210_v6 = vpack.c.bf16 %v2721_v23, %v2719_v38  ;;  %v3203_v35 = vpack.c.bf16 %v2506_v12, %v2504_v34 }
 0x556   :  { %v2725_v36 = vpop.f32.mrf.mxu0  ;;  %v2508_v39 = vpop.f32.mrf.mxu1 }
 0x557   :  { %3194 = vst [vmem:[%s4762_s8 + $0x68] sm:$0xff] %v3210_v6  ;;  %2567 = vst [vmem:[%s4762_s8 + $0x30] sm:$0xff] %v3203_v35 }
 0x558   :  { %v2727_v40 = vpop.f32.mrf.mxu0  ;;  %v2510_v43 = vpop.f32.mrf.mxu1 }
 0x559   :  { %v3211_v44 = vpack.c.bf16 %v2727_v40, %v2725_v36  ;;  %v3204_v47 = vpack.c.bf16 %v2510_v43, %v2508_v39 }
 0x55a   :  { %v2729_v48 = vpop.f32.mrf.mxu0 }
 0x55b   :  { %3195 = vst [vmem:[%s4762_s8 + $0x70] sm:$0xff] %v3211_v44  ;;  %2568 = vst [vmem:[%s4762_s8 + $0x38] sm:$0xff] %v3204_v47 }
 0x55c   :  { %v2731_v26 = vpop.f32.mrf.mxu0 }
 0x55d   :  { %v3212_v4 = vpack.c.bf16 %v2731_v26, %v2729_v48 }
 0x55f   :  { %3196 = vst [vmem:[%s4762_s8 + $0x78] sm:$0xff] %v3212_v4 }

// kernel: decoder_forward.7
= control target key start
LH: loop header
LB: loop body
LE: loop exit
PB: predicated region body
PF: predicated region fallthrough
CT: control target
= control target key end

     0   :  { %v7517_v1 = vmov 0   ;;  %vm109_vm0 = vcmask 523264   ;;  %vm2639_vm1 = vcmask 1042432   ;;  %vm2635_vm2 = vcmask 23552   ;;  %s7507_s0 = inlined_call_operand.vmem [shape: bf16[2,64,256], index: 0, kind: input, shape index: {}]   ;;  %s7508_s2 = inlined_call_operand.vmem [shape: bf16[2,64,64], index: 2, kind: input, shape index: {}]   ;;  %s7509_s1 = inlined_call_operand.vmem [shape: bf16[3,256,192], index: 1, kind: input, shape index: {}]   ;;  %s7510_s4 = inlined_call_operand.vmem [shape: f32[192,3], index: 4, kind: input, shape index: {}]   ;;  %s7511_s5 = inlined_call_operand.vmem [shape: f32[3,192], index: 5, kind: input, shape index: {}]   ;;  %s7512_s8 = inlined_call_operand.vmem [shape: bf16[192,384], index: 8, kind: input, shape index: {}]   ;;  %s7513_s6 = inlined_call_operand.vmem [shape: f32[1,3], index: 6, kind: input, shape index: {}]   ;;  %s7514_s7 = inlined_call_operand.vmem [shape: f32[1,3], index: 7, kind: input, shape index: {}]   ;;  %s7515_s3 = inlined_call_operand.vmem [shape: bf16[128,64], index: 3, kind: input, shape index: {}]   ;;  %s7516_s9 = inlined_call_operand.vmem [shape: f32[2,128,384], index: 9, kind: output, shape index: {}]  }
   0x1   :  { %v5539_v0 = vld [vmem:[%s7507_s0 + $0x34] ss:$8 sps:$4 sm:$0xff]   ;;  %154 = vmatprep.mubr.bf16.mxu0 %v7517_v1  ;;  %276 = vmatprep.mubr.bf16.mxu1 %v7517_v1  ;;  %v5546_v2 = vld [vmem:[%s7507_s0 + $0x30] ss:$8 sps:$4 sm:$0xff]   ;;  %v5553_v3 = vld [vmem:[%s7507_s0 + $0x24] ss:$8 sps:$4 sm:$0xff]  }
   0x2   :  { %130 = vmatprep.subr.bf16.mxu0 %v5539_v0  ;;  %252 = vmatprep.subr.bf16.mxu1 %v5539_v0  ;;  %v5560_v4 = vld [vmem:[%s7507_s0 + $0x20] ss:$8 sps:$4 sm:$0xff]   ;;  %v5567_v5 = vld [vmem:[%s7507_s0 + $0x14] ss:$8 sps:$4 sm:$0xff]   ;;  %v5574_v6 = vld [vmem:[%s7507_s0 + $0x10] ss:$8 sps:$4 sm:$0xff]  }
   0x3   :  { %131 = vmatpush1.bf16.msra.mxu0 %v5546_v2  ;;  %253 = vmatpush1.bf16.msra.mxu1 %v5546_v2  ;;  %v5581_v7 = vld [vmem:[%s7507_s0 + $0x4] ss:$8 sps:$4 sm:$0xff]   ;;  %v5588_v8 = vld [vmem:[%s7507_s0] ss:$8 sps:$4 sm:$0xff]   ;;  %v5601_v11 = vld [vmem:[%s7509_s1 + $0x174] ss:$8 sps:$4 sm:$0xff]  }
   0x4   :  { %132 = vmatprep.subr.bf16.mxu0 %v5553_v3  ;;  %254 = vmatprep.subr.bf16.mxu1 %v5553_v3  ;;  %v5176_v9 = vld [vmem:[%s7508_s2] sm:$0xff]   ;;  %v5608_v12 = vld [vmem:[%s7509_s1 + $0x170] ss:$8 sps:$4 sm:$0xff]   ;;  %v5630_v15 = vld [vmem:[%s7509_s1 + $0x154] ss:$8 sps:$4 sm:$0xff]  }
   0x5   :  { %v5177_v10 = vld [vmem:[%s7508_s2 + $0x20] sm:$0xff]   ;;  %v5178_v16 = vld [vmem:[%s7508_s2 + $0x8] sm:$0xff]   ;;  %v5642_v18 = vld [vmem:[%s7509_s1 + $0x150] ss:$8 sps:$4 sm:$0xff]  }
   0x6   :  { %v5614_v13 = vld [vmem:[%s7509_s1 + $0x164] ss:$8 sps:$4 sm:$0xff]   ;;  %v5624_v14 = vld [vmem:[%s7509_s1 + $0x160] ss:$8 sps:$4 sm:$0xff]   ;;  %v5664_v21 = vld [vmem:[%s7509_s1 + $0x134] ss:$8 sps:$4 sm:$0xff]  }
   0x7   :  { %133 = vmatpush1.bf16.msra.mxu0 %v5560_v4  ;;  %255 = vmatpush1.bf16.msra.mxu1 %v5560_v4  ;;  %v5179_v17 = vld [vmem:[%s7508_s2 + $0x28] sm:$0xff]   ;;  %v5180_v22 = vld [vmem:[%s7508_s2 + $0x10] sm:$0xff]   ;;  %v5182_v28 = vld [vmem:[%s7508_s2 + $0x18] sm:$0xff]  }
   0x8   :  { %134 = vmatprep.subr.bf16.mxu0 %v5567_v5  ;;  %256 = vmatprep.subr.bf16.mxu1 %v5567_v5  ;;  %v5648_v19 = vld [vmem:[%s7509_s1 + $0x144] ss:$8 sps:$4 sm:$0xff]   ;;  %v5658_v20 = vld [vmem:[%s7509_s1 + $0x140] ss:$8 sps:$4 sm:$0xff]   ;;  %v5181_v23 = vld [vmem:[%s7508_s2 + $0x30] sm:$0xff]  }
   0x9   :  { %v5676_v24 = vld [vmem:[%s7509_s1 + $0x130] ss:$8 sps:$4 sm:$0xff]   ;;  %v5682_v25 = vld [vmem:[%s7509_s1 + $0x124] ss:$8 sps:$4 sm:$0xff]   ;;  %v5696_v27 = vld [vmem:[%s7509_s1 + $0x74] ss:$8 sps:$4 sm:$0xff]  }
   0xa   :  { %v5691_v26 = vld [vmem:[%s7509_s1 + $0x70] ss:$8 sps:$4 sm:$0xff]   ;;  %v5705_v29 = vld [vmem:[%s7509_s1 + $0x120] ss:$8 sps:$4 sm:$0xff]   ;;  %v5711_v30 = vld [vmem:[%s7509_s1 + $0x114] ss:$8 sps:$4 sm:$0xff]  }
   0xb   :  { %135 = vmatpush1.bf16.msra.mxu0 %v5574_v6  ;;  %257 = vmatpush1.bf16.msra.mxu1 %v5574_v6  ;;  %v5183_v31 = vld [vmem:[%s7508_s2 + $0x38] sm:$0xff]   ;;  %v5721_v32 = vld [vmem:[%s7509_s1 + $0x64] ss:$8 sps:$4 sm:$0xff]   ;;  %v5731_v34 = vld [vmem:[%s7509_s1 + $0x60] ss:$8 sps:$4 sm:$0xff]  }
   0xc   :  { %136 = vmatprep.subr.bf16.mxu0 %v5581_v7  ;;  %258 = vmatprep.subr.bf16.mxu1 %v5581_v7  ;;  %v5726_v33 = vld [vmem:[%s7509_s1 + $0x110] ss:$8 sps:$4 sm:$0xff]   ;;  %v5737_v35 = vld [vmem:[%s7509_s1 + $0x104] ss:$8 sps:$4 sm:$0xff]   ;;  %v5744_v36 = vld [vmem:[%s7509_s1 + $0x54] ss:$8 sps:$4 sm:$0xff]  }
   0xd   :  { %v5751_v37 = vld [vmem:[%s7509_s1 + $0x100] ss:$8 sps:$4 sm:$0xff]   ;;  %v5758_v38 = vld [vmem:[%s7509_s1 + $0x50] ss:$8 sps:$4 sm:$0xff]   ;;  %v5765_v39 = vld [vmem:[%s7509_s1 + $0x44] ss:$8 sps:$4 sm:$0xff]  }
   0xe   :  { %v5771_v40 = vld [vmem:[%s7509_s1 + $0x1f4] ss:$8 sps:$4 sm:$0xff]   ;;  %v5776_v41 = vld [vmem:[%s7509_s1 + $0x1f0] ss:$8 sps:$4 sm:$0xff]   ;;  %v5782_v42 = vld [vmem:[%s7509_s1 + $0x40] ss:$8 sps:$4 sm:$0xff]  }
   0xf   :  { %137 = vmatpush1.bf16.msra.mxu0 %v5588_v8  ;;  %259 = vmatpush1.bf16.msra.mxu1 %v5588_v8  ;;  %v5789_v43 = vld [vmem:[%s7509_s1 + $0x34] ss:$8 sps:$4 sm:$0xff]   ;;  %v5795_v44 = vld [vmem:[%s7509_s1 + $0x1e4] ss:$8 sps:$4 sm:$0xff]   ;;  %v5800_v45 = vld [vmem:[%s7509_s1 + $0x1e0] ss:$8 sps:$4 sm:$0xff]  }
  0x10   :  { %550 = vmatprep.subr.bf16.mxu0 %v5601_v11  ;;  %783 = vmatprep.subr.bf16.mxu1 %v5696_v27  ;;  %v5806_v46 = vld [vmem:[%s7509_s1 + $0x30] ss:$8 sps:$4 sm:$0xff]   ;;  %v5813_v47 = vld [vmem:[%s7509_s1 + $0x24] ss:$8 sps:$4 sm:$0xff]   ;;  %v5819_v48 = vld [vmem:[%s7509_s1 + $0x1d4] ss:$8 sps:$4 sm:$0xff]  }
  0x11   :  { %v5824_v49 = vld [vmem:[%s7509_s1 + $0x1d0] ss:$8 sps:$4 sm:$0xff]   ;;  %v5830_v50 = vld [vmem:[%s7509_s1 + $0x20] ss:$8 sps:$4 sm:$0xff]   ;;  %v5837_v51 = vld [vmem:[%s7509_s1 + $0x14] ss:$8 sps:$4 sm:$0xff]  }
  0x12   :  { %4510 = vmatmul.mubr.msk.bf16.vlgmr.msra.gmra.mxu0 %vm109_vm0, %v5176_v9  ;;  %4526 = vmatmul.mubr.msk.bf16.vlgmr.msra.gmra.mxu1 %vm109_vm0, %v5177_v10  ;;  %v5843_v52 = vld [vmem:[%s7509_s1 + $0x1c4] ss:$8 sps:$4 sm:$0xff]   ;;  %v5848_v53 = vld [vmem:[%s7509_s1 + $0x1c0] ss:$8 sps:$4 sm:$0xff]   ;;  %v5854_v54 = vld [vmem:[%s7509_s1 + $0x10] ss:$8 sps:$4 sm:$0xff]  }
  0x13   :  { %164 = vmatprep.mubr.bf16.mxu0 %v7517_v1  ;;  %286 = vmatprep.mubr.bf16.mxu1 %v7517_v1  ;;  %v5861_v55 = vld [vmem:[%s7509_s1 + $0x4] ss:$8 sps:$4 sm:$0xff]   ;;  %v5867_v56 = vld [vmem:[%s7509_s1 + $0x1b4] ss:$8 sps:$4 sm:$0xff]   ;;  %v5872_v57 = vld [vmem:[%s7509_s1 + $0x1b0] ss:$8 sps:$4 sm:$0xff]  }
  0x14   :  { %551 = vmatpush1.bf16.msra.mxu0 %v5608_v12  ;;  %784 = vmatpush1.bf16.msra.mxu1 %v5691_v26  ;;  %7543 = vst [vmem:[#allocation3_spill] sm:$0xff] %v5861_v55  ;;  %v5878_v58 = vld [vmem:[%s7509_s1] ss:$8 sps:$4 sm:$0xff]   ;;  %v5885_v59 = vld [vmem:[%s7509_s1 + $0xf4] ss:$8 sps:$4 sm:$0xff]  }
  0x15   :  { %552 = vmatprep.subr.bf16.mxu0 %v5614_v13  ;;  %785 = vmatprep.subr.bf16.mxu1 %v5721_v32  ;;  %7544 = vst [vmem:[#allocation4_spill] sm:$0xff] %v5878_v58  ;;  %7545 = vst [vmem:[#allocation5_spill] sm:$0xff] %v5885_v59  ;;  %v5891_v60 = vld [vmem:[%s7509_s1 + $0x1a4] ss:$8 sps:$4 sm:$0xff]   ;;  %v5896_v61 = vld [vmem:[%s7509_s1 + $0x1a0] ss:$8 sps:$4 sm:$0xff]  }
  0x16   :  { %v5902_v62 = vld [vmem:[%s7509_s1 + $0xf0] ss:$8 sps:$4 sm:$0xff]   ;;  %v5909_v63 = vld [vmem:[%s7509_s1 + $0xe4] ss:$8 sps:$4 sm:$0xff]   ;;  %v5925_v10 = vld [vmem:[%s7509_s1 + $0xe0] ss:$8 sps:$4 sm:$0xff]  }
  0x17   :  { %7546 = vst [vmem:[#allocation6_spill] sm:$0xff] %v5902_v62  ;;  %7547 = vst [vmem:[#allocation7_spill] sm:$0xff] %v5909_v63  ;;  %v5920_v9 = vld [vmem:[%s7509_s1 + $0x190] ss:$8 sps:$4 sm:$0xff]  }
  0x18   :  { %553 = vmatpush1.bf16.msra.mxu0 %v5624_v14  ;;  %786 = vmatpush1.bf16.msra.mxu1 %v5731_v34  ;;  %7548 = vst [vmem:[#allocation8_spill] sm:$0xff] %v5925_v10 }
  0x19   :  { %554 = vmatprep.subr.bf16.mxu0 %v5630_v15  ;;  %787 = vmatprep.subr.bf16.mxu1 %v5744_v36 }
  0x1a   :  { %4511 = vmatmul.mubr.msk.bf16.gmra.mxu0 %vm109_vm0, %v5178_v16  ;;  %4527 = vmatmul.mubr.msk.bf16.gmra.mxu1 %vm109_vm0, %v5179_v17  ;;  %v5930_v16 = vld [vmem:[%s7509_s1 + $0xd4] ss:$8 sps:$4 sm:$0xff]   ;;  %v5935_v17 = vld [vmem:[%s7509_s1 + $0x184] ss:$8 sps:$4 sm:$0xff]  }
  0x1b   :  { %174 = vmatprep.mubr.bf16.mxu0 %v7517_v1  ;;  %296 = vmatprep.mubr.bf16.mxu1 %v7517_v1  ;;  %7549 = vst [vmem:[#allocation9_spill] sm:$0xff] %v5930_v16 }
  0x1c   :  { %555 = vmatpush1.bf16.msra.mxu0 %v5642_v18  ;;  %788 = vmatpush1.bf16.msra.mxu1 %v5758_v38 }
  0x1d   :  { %556 = vmatprep.subr.bf16.mxu0 %v5648_v19  ;;  %789 = vmatprep.subr.bf16.mxu1 %v5765_v39 }
  0x20   :  { %557 = vmatpush1.bf16.msra.mxu0 %v5658_v20  ;;  %790 = vmatpush1.bf16.msra.mxu1 %v5782_v42 }
  0x21   :  { %558 = vmatprep.subr.bf16.mxu0 %v5664_v21  ;;  %791 = vmatprep.subr.bf16.mxu1 %v5789_v43 }
  0x22   :  { %4512 = vmatmul.mubr.msk.bf16.gmra.mxu0 %vm109_vm0, %v5180_v22  ;;  %4528 = vmatmul.mubr.msk.bf16.gmra.mxu1 %vm109_vm0, %v5181_v23  ;;  %v5944_v22 = vld [vmem:[%s7509_s1 + $0xd0] ss:$8 sps:$4 sm:$0xff]   ;;  %v5949_v23 = vld [vmem:[%s7509_s1 + $0x180] ss:$8 sps:$4 sm:$0xff]  }
  0x23   :  { %184 = vmatprep.mubr.bf16.mxu0 %v7517_v1  ;;  %306 = vmatprep.mubr.bf16.mxu1 %v7517_v1  ;;  %7550 = vst [vmem:[#allocation10_spill] sm:$0xff] %v5944_v22  ;;  %v5966_v1 = vld [vmem:[%s7509_s1 + $0xc0] ss:$8 sps:$4 sm:$0xff]  }
  0x24   :  { %559 = vmatpush1.bf16.msra.mxu0 %v5676_v24  ;;  %792 = vmatpush1.bf16.msra.mxu1 %v5806_v46  ;;  %7552 = vst [vmem:[#allocation12_spill] sm:$0xff] %v5966_v1 }
  0x25   :  { %560 = vmatprep.subr.bf16.mxu0 %v5682_v25  ;;  %793 = vmatprep.subr.bf16.mxu1 %v5813_v47 }
  0x28   :  { %561 = vmatpush1.bf16.msra.mxu0 %v5705_v29  ;;  %794 = vmatpush1.bf16.msra.mxu1 %v5830_v50 }
  0x29   :  { %562 = vmatprep.subr.bf16.mxu0 %v5711_v30  ;;  %795 = vmatprep.subr.bf16.mxu1 %v5837_v51 }
  0x2a   :  { %4513 = vmatmul.mubr.msk.bf16.gmra.mxu0 %vm109_vm0, %v5182_v28  ;;  %4529 = vmatmul.mubr.msk.bf16.gmra.mxu1 %vm109_vm0, %v5183_v31  ;;  %v5954_v28 = vld [vmem:[%s7509_s1 + $0xc4] ss:$8 sps:$4 sm:$0xff]   ;;  %v5237_v31 = vld [vmem:[%s7509_s1 + $0x274] ss:$8 sps:$4 sm:$0xff]  }
  0x2b   :  { %582 = vmatprep.mubr.bf16.mxu0 %v5581_v7  ;;  %v5915_v7 = vld [vmem:[%s7509_s1 + $0x194] ss:$8 sps:$4 sm:$0xff]   ;;  %7551 = vst [vmem:[#allocation11_spill] sm:$0xff] %v5954_v28 }
  0x2c   :  { %563 = vmatpush1.bf16.msra.mxu0 %v5726_v33  ;;  %796 = vmatpush1.bf16.msra.mxu1 %v5854_v54 }
  0x2d   :  { %564 = vmatprep.subr.bf16.mxu0 %v5737_v35  ;;  %797 = vmatprep.subr.bf16.mxu1 %v5861_v55 }
  0x30   :  { %565 = vmatpush1.bf16.msra.mxu0 %v5751_v37  ;;  %798 = vmatpush1.bf16.msra.mxu1 %v5878_v58 }
  0x31   :  { %566 = vmatprep.subr.bf16.mxu0 %v5771_v40  ;;  %799 = vmatprep.subr.bf16.mxu1 %v5885_v59  ;;  %v5267_v59 = vld [vmem:[%s7509_s1 + $0x224] ss:$8 sps:$4 sm:$0xff]  }
  0x34   :  { %567 = vmatpush2.bf16.msra.mxu0 %v5776_v41  ;;  %800 = vmatpush2.bf16.msra.mxu1 %v5902_v62  ;;  %v5241_v62 = vld [vmem:[%s7509_s1 + $0x260] ss:$8 sps:$4 sm:$0xff]  }
  0x35   :  { %568 = vmatprep.subr.bf16.mxu0 %v5795_v44  ;;  %801 = vmatprep.subr.bf16.mxu1 %v5909_v63  ;;  %v5235_v63 = vld [vmem:[%s7509_s1 + $0x270] ss:$8 sps:$4 sm:$0xff]  }
  0x38   :  { %569 = vmatpush2.bf16.msra.mxu0 %v5800_v45  ;;  %802 = vmatpush2.bf16.msra.mxu1 %v5925_v10  ;;  %v5243_v10 = vld [vmem:[%s7509_s1 + $0x264] ss:$8 sps:$4 sm:$0xff]  }
  0x39   :  { %570 = vmatprep.subr.bf16.mxu0 %v5819_v48  ;;  %803 = vmatprep.subr.bf16.mxu1 %v5930_v16  ;;  %v5980_v16 = vld [vmem:[%s7509_s1 + $0xb4] ss:$8 sps:$4 sm:$0xff]  }
  0x3a   :  { %7553 = vst [vmem:[#allocation13_spill] sm:$0xff] %v5980_v16 }
  0x3c   :  { %571 = vmatpush2.bf16.msra.mxu0 %v5824_v49  ;;  %804 = vmatpush2.bf16.msra.mxu1 %v5944_v22  ;;  %v5990_v22 = vld [vmem:[%s7509_s1 + $0xb0] ss:$8 sps:$4 sm:$0xff]  }
  0x3d   :  { %572 = vmatprep.subr.bf16.mxu0 %v5843_v52  ;;  %805 = vmatprep.subr.bf16.mxu1 %v5954_v28  ;;  %7554 = vst [vmem:[#allocation14_spill] sm:$0xff] %v5990_v22  ;;  %v5249_v28 = vld [vmem:[%s7509_s1 + $0x254] ss:$8 sps:$4 sm:$0xff]  }
  0x40   :  { %573 = vmatpush2.bf16.msra.mxu0 %v5848_v53  ;;  %806 = vmatpush2.bf16.msra.mxu1 %v5966_v1  ;;  %v5253_v1 = vld [vmem:[%s7509_s1 + $0x240] ss:$8 sps:$4 sm:$0xff]  }
  0x41   :  { %574 = vmatprep.subr.bf16.mxu0 %v5867_v56  ;;  %807 = vmatprep.subr.bf16.mxu1 %v5980_v16  ;;  %v5316_v16 = vld [vmem:[%s7509_s1 + $0x90] ss:$8 sps:$4 sm:$0xff]  }
  0x44   :  { %575 = vmatpush2.bf16.msra.mxu0 %v5872_v57  ;;  %808 = vmatpush2.bf16.msra.mxu1 %v5990_v22  ;;  %v5324_v22 = vld [vmem:[%s7509_s1 + $0x84] ss:$8 sps:$4 sm:$0xff]  }
  0x45   :  { %576 = vmatprep.subr.bf16.mxu0 %v5891_v60 }
  0x48   :  { %577 = vmatpush2.bf16.msra.mxu0 %v5896_v61 }
  0x49   :  { %578 = vmatprep.subr.bf16.mxu0 %v5915_v7 }
  0x4c   :  { %579 = vmatpush2.bf16.msra.mxu0 %v5920_v9 }
  0x4d   :  { %580 = vmatprep.subr.bf16.mxu0 %v5935_v17 }
  0x50   :  { %581 = vmatpush2.bf16.msra.mxu0 %v5949_v23 }
  0x51   :  { %1049 = vmatprep.subr.bf16.mxu0 %v5237_v31  ;;  %v5312_v31 = vld [vmem:[%s7509_s1 + $0xa4] ss:$8 sps:$4 sm:$0xff]  }
  0x52   :  { %809 = vmatprep.subr.bf16.mxu1 %v5312_v31  ;;  %v5259_v31 = vld [vmem:[%s7509_s1 + $0x230] ss:$8 sps:$4 sm:$0xff]  }
  0x53   :  { %583 = vmatmul.mubr.bf16.vlgmr.msra.gmra.mxu0 %v5588_v8  ;;  %v5247_v8 = vld [vmem:[%s7509_s1 + $0x250] ss:$8 sps:$4 sm:$0xff]  }
  0x54   :  { %1050 = vmatpush1.bf16.msra.mxu0 %v5235_v63  ;;  %592 = vmatprep.mubr.bf16.mxu0 %v5567_v5  ;;  %v5255_v63 = vld [vmem:[%s7509_s1 + $0x244] ss:$8 sps:$4 sm:$0xff]   ;;  %v5310_v5 = vld [vmem:[%s7509_s1 + $0xa0] ss:$8 sps:$4 sm:$0xff]  }
  0x55   :  { %1051 = vmatprep.subr.bf16.mxu0 %v5243_v10  ;;  %v5318_v10 = vld [vmem:[%s7509_s1 + $0x94] ss:$8 sps:$4 sm:$0xff]   ;;  %810 = vmatpush2.bf16.msra.mxu1 %v5310_v5  ;;  %v5295_v5 = vld [vmem:[%s7509_s1 + $0x2d0] ss:$8 sps:$4 sm:$0xff]  }
  0x56   :  { %811 = vmatprep.subr.bf16.mxu1 %v5318_v10  ;;  %v5303_v10 = vld [vmem:[%s7509_s1 + $0x2c4] ss:$8 sps:$4 sm:$0xff]  }
  0x58   :  { %1052 = vmatpush1.bf16.msra.mxu0 %v5241_v62  ;;  %v5261_v62 = vld [vmem:[%s7509_s1 + $0x234] ss:$8 sps:$4 sm:$0xff]  }
  0x59   :  { %1053 = vmatprep.subr.bf16.mxu0 %v5249_v28  ;;  %v5322_v28 = vld [vmem:[%s7509_s1 + $0x80] ss:$8 sps:$4 sm:$0xff]   ;;  %812 = vmatpush2.bf16.msra.mxu1 %v5316_v16  ;;  %v6053_v16 = vld [vmem:[%s7507_s0 + $0x74] ss:$8 sps:$4 sm:$0xff]  }
  0x5a   :  { %813 = vmatprep.subr.bf16.mxu1 %v5324_v22  ;;  %v5283_v22 = vld [vmem:[%s7509_s1 + $0x2f0] ss:$8 sps:$4 sm:$0xff]  }
  0x5b   :  { %593 = vmatmul.mubr.bf16.gmra.mxu0 %v5574_v6  ;;  %v5273_v6 = vld [vmem:[%s7509_s1 + $0x214] ss:$8 sps:$4 sm:$0xff]  }
  0x5c   :  { %1054 = vmatpush1.bf16.msra.mxu0 %v5247_v8  ;;  %602 = vmatprep.mubr.bf16.mxu0 %v5553_v3  ;;  %v5265_v3 = vld [vmem:[%s7509_s1 + $0x220] ss:$8 sps:$4 sm:$0xff]  }
  0x5d   :  { %1055 = vmatprep.subr.bf16.mxu0 %v5255_v63  ;;  %814 = vmatpush2.bf16.msra.mxu1 %v5322_v28  ;;  %v5289_v8 = vld [vmem:[%s7509_s1 + $0x2e0] ss:$8 sps:$4 sm:$0xff]   ;;  %v5297_v63 = vld [vmem:[%s7509_s1 + $0x2d4] ss:$8 sps:$4 sm:$0xff]  }
  0x5e   :  { %1339 = vmatprep.subr.bf16.mxu1 %v6053_v16  ;;  %v5309_v28 = vld [vmem:[%s7509_s1 + $0x2b4] ss:$8 sps:$4 sm:$0xff]  }
  0x60   :  { %1056 = vmatpush1.bf16.msra.mxu0 %v5253_v1  ;;  %v5271_v1 = vld [vmem:[%s7509_s1 + $0x210] ss:$8 sps:$4 sm:$0xff]  }
  0x61   :  { %1057 = vmatprep.subr.bf16.mxu0 %v5261_v62  ;;  %v5301_v62 = vld [vmem:[%s7509_s1 + $0x2c0] ss:$8 sps:$4 sm:$0xff]  }
  0x63   :  { %603 = vmatmul.mubr.bf16.gmra.mxu0 %v5560_v4  ;;  %v5279_v4 = vld [vmem:[%s7509_s1 + $0x204] ss:$8 sps:$4 sm:$0xff]  }
  0x64   :  { %1058 = vmatpush1.bf16.msra.mxu0 %v5259_v31  ;;  %612 = vmatprep.mubr.bf16.mxu0 %v5539_v0  ;;  %v5277_v0 = vld [vmem:[%s7509_s1 + $0x200] ss:$8 sps:$4 sm:$0xff]   ;;  %v5307_v31 = vld [vmem:[%s7509_s1 + $0x2b0] ss:$8 sps:$4 sm:$0xff]  }
  0x65   :  { %1059 = vmatprep.subr.bf16.mxu0 %v5267_v59  ;;  %v5285_v59 = vld [vmem:[%s7509_s1 + $0x2f4] ss:$8 sps:$4 sm:$0xff]  }
  0x68   :  { %1060 = vmatpush1.bf16.msra.mxu0 %v5265_v3  ;;  %v5315_v3 = vld [vmem:[%s7509_s1 + $0x2a4] ss:$8 sps:$4 sm:$0xff]  }
  0x69   :  { %1061 = vmatprep.subr.bf16.mxu0 %v5273_v6  ;;  %v5313_v6 = vld [vmem:[%s7509_s1 + $0x2a0] ss:$8 sps:$4 sm:$0xff]  }
  0x6b   :  { %613 = vmatmul.mubr.bf16.gmra.mxu0 %v5546_v2  ;;  %v5291_v2 = vld [vmem:[%s7509_s1 + $0x2e4] ss:$8 sps:$4 sm:$0xff]  }
  0x6c   :  { %1062 = vmatpush1.bf16.msra.mxu0 %v5271_v1  ;;  %v5321_v1 = vld [vmem:[%s7509_s1 + $0x294] ss:$8 sps:$4 sm:$0xff]  }
  0x6d   :  { %1063 = vmatprep.subr.bf16.mxu0 %v5279_v4  ;;  %v5319_v4 = vld [vmem:[%s7509_s1 + $0x290] ss:$8 sps:$4 sm:$0xff]  }
  0x70   :  { %1064 = vmatpush1.bf16.msra.mxu0 %v5277_v0  ;;  %v5327_v0 = vld [vmem:[%s7509_s1 + $0x284] ss:$8 sps:$4 sm:$0xff]  }
  0x71   :  { %1065 = vmatprep.subr.bf16.mxu0 %v5285_v59  ;;  %v5325_v59 = vld [vmem:[%s7509_s1 + $0x280] ss:$8 sps:$4 sm:$0xff]  }
  0x74   :  { %1066 = vmatpush2.bf16.msra.mxu0 %v5283_v22 }
  0x75   :  { %1067 = vmatprep.subr.bf16.mxu0 %v5291_v2 }
  0x78   :  { %1068 = vmatpush2.bf16.msra.mxu0 %v5289_v8 }
  0x79   :  { %1069 = vmatprep.subr.bf16.mxu0 %v5297_v63 }
  0x7c   :  { %1070 = vmatpush2.bf16.msra.mxu0 %v5295_v5 }
  0x7d   :  { %1071 = vmatprep.subr.bf16.mxu0 %v5303_v10 }
  0x80   :  { %1072 = vmatpush2.bf16.msra.mxu0 %v5301_v62 }
  0x81   :  { %1073 = vmatprep.subr.bf16.mxu0 %v5309_v28 }
  0x84   :  { %1074 = vmatpush2.bf16.msra.mxu0 %v5307_v31 }
  0x85   :  { %1075 = vmatprep.subr.bf16.mxu0 %v5315_v3 }
  0x88   :  { %1076 = vmatpush2.bf16.msra.mxu0 %v5313_v6 }
  0x89   :  { %1077 = vmatprep.subr.bf16.mxu0 %v5321_v1  ;;  %v6112_v1 = vld [vmem:[%s7507_s0 + $0x70] ss:$8 sps:$4 sm:$0xff]  }
  0x8c   :  { %1078 = vmatpush2.bf16.msra.mxu0 %v5319_v4 }
  0x8d   :  { %1079 = vmatprep.subr.bf16.mxu0 %v5327_v0 }
  0x90   :  { %1080 = vmatpush2.bf16.msra.mxu0 %v5325_v59 }
  0x91   :  { %1757 = vmatprep.subr.bf16.mxu0 %v5601_v11  ;;  %v6117_v11 = vld [vmem:[%s7507_s0 + $0x64] ss:$8 sps:$4 sm:$0xff]  }
  0xd2   :  { %v156_v22 = vpop.f32.mrf.mxu0  ;;  %v278_v2 = vpop.f32.mrf.mxu1 }
  0xd4   :  { %v158_v8 = vpop.f32.mrf.mxu0  ;;  %v280_v63 = vpop.f32.mrf.mxu1 }
  0xd6   :  { %v160_v5 = vpop.f32.mrf.mxu0  ;;  %v282_v10 = vpop.f32.mrf.mxu1 }
  0xd7   :  { %v317_v28 = vpack.c.bf16 %v282_v10, %v278_v2  ;;  %v195_v4 = vpack.c.bf16 %v160_v5, %v156_v22  ;;  %v6130_v5 = vld [vmem:[%s7507_s0 + $0x54] ss:$8 sps:$4 sm:$0xff]  }
  0xd8   :  { %v162_v62 = vpop.f32.mrf.mxu0  ;;  %v284_v31 = vpop.f32.mrf.mxu1 }
  0xd9   :  { %v196_v3 = vpack.c.bf16 %v162_v62, %v158_v8  ;;  %v318_v6 = vpack.c.bf16 %v284_v31, %v280_v63  ;;  %v6123_v8 = vld [vmem:[%s7507_s0 + $0x60] ss:$8 sps:$4 sm:$0xff]  }
  0xda   :  { %v166_v0 = vpop.f32.mrf.mxu0  ;;  %v288_v59 = vpop.f32.mrf.mxu1 }
  0xdb   :  { %815 = vmatprep.mubr.bf16.mxu1 %v196_v3  ;;  %1081 = vmatprep.mubr.bf16.mxu0 %v318_v6 }
  0xdc   :  { %v168_v58 = vpop.f32.mrf.mxu0  ;;  %816 = vmatmul.mubr.bf16.vlgmr.msra.gmra.mxu1 %v195_v4  ;;  %v290_v2 = vpop.f32.mrf.mxu1  ;;  %1082 = vmatmul.mubr.bf16.vlgmr.msra.gmra.mxu0 %v317_v28 }
  0xdd   :  { %1340 = vmatpush1.bf16.msra.mxu1 %v6112_v1  ;;  %1758 = vmatpush1.bf16.msra.mxu0 %v5608_v12  ;;  %v6137_v12 = vld [vmem:[%s7507_s0 + $0x50] ss:$8 sps:$4 sm:$0xff]  }
  0xde   :  { %v170_v22 = vpop.f32.mrf.mxu0  ;;  %v292_v63 = vpop.f32.mrf.mxu1  ;;  %1341 = vmatprep.subr.bf16.mxu1 %v6117_v11  ;;  %1759 = vmatprep.subr.bf16.mxu0 %v5614_v13  ;;  %v6144_v13 = vld [vmem:[%s7507_s0 + $0x44] ss:$8 sps:$4 sm:$0xff]  }
  0xdf   :  { %v319_v62 = vpack.c.bf16 %v292_v63, %v288_v59  ;;  %v197_v6 = vpack.c.bf16 %v170_v22, %v166_v0 }
  0xe0   :  { %v172_v10 = vpop.f32.mrf.mxu0  ;;  %v294_v28 = vpop.f32.mrf.mxu1 }
  0xe1   :  { %v198_v31 = vpack.c.bf16 %v172_v10, %v168_v58  ;;  %v320_v3 = vpack.c.bf16 %v294_v28, %v290_v2  ;;  %1342 = vmatpush1.bf16.msra.mxu1 %v6123_v8  ;;  %1760 = vmatpush1.bf16.msra.mxu0 %v5624_v14  ;;  %v6151_v14 = vld [vmem:[%s7507_s0 + $0x40] ss:$8 sps:$4 sm:$0xff]  }
  0xe2   :  { %v176_v4 = vpop.f32.mrf.mxu0  ;;  %v298_v55 = vpop.f32.mrf.mxu1  ;;  %1343 = vmatprep.subr.bf16.mxu1 %v6130_v5  ;;  %1761 = vmatprep.subr.bf16.mxu0 %v5630_v15 }
  0xe3   :  { %825 = vmatprep.mubr.bf16.mxu1 %v198_v31  ;;  %1091 = vmatprep.mubr.bf16.mxu0 %v320_v3 }
  0xe4   :  { %v178_v58 = vpop.f32.mrf.mxu0  ;;  %826 = vmatmul.mubr.bf16.gmra.mxu1 %v197_v6  ;;  %v300_v59 = vpop.f32.mrf.mxu1  ;;  %1092 = vmatmul.mubr.bf16.gmra.mxu0 %v319_v62 }
  0xe5   :  { %1344 = vmatpush1.bf16.msra.mxu1 %v6137_v12  ;;  %1762 = vmatpush1.bf16.msra.mxu0 %v5642_v18 }
  0xe6   :  { %v180_v0 = vpop.f32.mrf.mxu0  ;;  %v302_v2 = vpop.f32.mrf.mxu1  ;;  %1345 = vmatprep.subr.bf16.mxu1 %v6144_v13  ;;  %1763 = vmatprep.subr.bf16.mxu0 %v5648_v19 }
  0xe7   :  { %v321_v22 = vpack.c.bf16 %v302_v2, %v298_v55  ;;  %v199_v28 = vpack.c.bf16 %v180_v0, %v176_v4  ;;  %v7555_v2 = vmov 0  }
  0xe8   :  { %v182_v15 = vpop.f32.mrf.mxu0  ;;  %v304_v63 = vpop.f32.mrf.mxu1 }
  0xe9   :  { %v200_v10 = vpack.c.bf16 %v182_v15, %v178_v58  ;;  %v322_v62 = vpack.c.bf16 %v304_v63, %v300_v59  ;;  %1346 = vmatpush1.bf16.msra.mxu1 %v6151_v14  ;;  %1764 = vmatpush1.bf16.msra.mxu0 %v5658_v20  ;;  %v5369_v15 = vld [vmem:[%s7509_s1 + $0x90] ss:$8 sps:$4 sm:$0xff]   ;;  %v5377_v63 = vld [vmem:[%s7509_s1 + $0x84] ss:$8 sps:$4 sm:$0xff]  }
  0xea   :  { %v186_v31 = vpop.f32.mrf.mxu0  ;;  %v308_v3 = vpop.f32.mrf.mxu1  ;;  %1460 = vmatprep.subr.bf16.mxu1 %v6053_v16  ;;  %1765 = vmatprep.subr.bf16.mxu0 %v5664_v21 }
  0xeb   :  { %835 = vmatprep.mubr.bf16.mxu1 %v200_v10  ;;  %1101 = vmatprep.mubr.bf16.mxu0 %v322_v62  ;;  %v5390_v10 = vld [vmem:[%s7509_s1 + $0x2c0] ss:$8 sps:$4 sm:$0xff]  }
  0xec   :  { %v188_v18 = vpop.f32.mrf.mxu0  ;;  %836 = vmatmul.mubr.bf16.gmra.mxu1 %v199_v28  ;;  %v310_v19 = vpop.f32.mrf.mxu1  ;;  %1102 = vmatmul.mubr.bf16.gmra.mxu0 %v321_v22  ;;  %v5392_v22 = vld [vmem:[%s7509_s1 + $0x2c4] ss:$8 sps:$4 sm:$0xff]   ;;  %v5375_v62 = vld [vmem:[%s7509_s1 + $0x80] ss:$8 sps:$4 sm:$0xff]   ;;  %v5395_v28 = vld [vmem:[%s7509_s1 + $0x2b4] ss:$8 sps:$4 sm:$0xff]  }
  0xed   :  { %1766 = vmatpush1.bf16.msra.mxu0 %v5676_v24  ;;  %v5340_v24 = vld [vmem:[%s7508_s2] sm:$0xff]  }
  0xee   :  { %v190_v55 = vpop.f32.mrf.mxu0  ;;  %v312_v6 = vpop.f32.mrf.mxu1  ;;  %1767 = vmatprep.subr.bf16.mxu0 %v5682_v25  ;;  %v5341_v25 = vld [vmem:[%s7508_s2 + $0x8] sm:$0xff]  }
  0xef   :  { %v323_v4 = vpack.c.bf16 %v312_v6, %v308_v3  ;;  %v201_v21 = vpack.c.bf16 %v190_v55, %v186_v31  ;;  %v5393_v31 = vld [vmem:[%s7509_s1 + $0x2b0] ss:$8 sps:$4 sm:$0xff]   ;;  %v5398_v3 = vld [vmem:[%s7509_s1 + $0x2a4] ss:$8 sps:$4 sm:$0xff]   ;;  %v5401_v55 = vld [vmem:[%s7509_s1 + $0x294] ss:$8 sps:$4 sm:$0xff]  }
  0xf0   :  { %v192_v20 = vpop.f32.mrf.mxu0  ;;  %v314_v58 = vpop.f32.mrf.mxu1  ;;  %v5399_v6 = vld [vmem:[%s7509_s1 + $0x290] ss:$8 sps:$4 sm:$0xff]  }
  0xf1   :  { %v202_v59 = vpack.c.bf16 %v192_v20, %v188_v18  ;;  %v324_v0 = vpack.c.bf16 %v314_v58, %v310_v19  ;;  %1768 = vmatpush1.bf16.msra.mxu0 %v5705_v29  ;;  %v5342_v29 = vld [vmem:[%s7508_s2 + $0x10] sm:$0xff]   ;;  %v5396_v18 = vld [vmem:[%s7509_s1 + $0x2a0] ss:$8 sps:$4 sm:$0xff]  }
  0xf2   :  { %1769 = vmatprep.subr.bf16.mxu0 %v5711_v30  ;;  %v5343_v30 = vld [vmem:[%s7508_s2 + $0x18] sm:$0xff]   ;;  %v5402_v58 = vld [vmem:[%s7509_s1 + $0x280] ss:$8 sps:$4 sm:$0xff]  }
  0xf3   :  { %845 = vmatprep.mubr.bf16.mxu1 %v202_v59  ;;  %1111 = vmatprep.mubr.bf16.mxu0 %v324_v0 }
  0xf4   :  { %846 = vmatmul.mubr.bf16.gmra.mxu1 %v201_v21  ;;  %1112 = vmatmul.mubr.bf16.gmra.mxu0 %v323_v4  ;;  %v5404_v4 = vld [vmem:[%s7509_s1 + $0x284] ss:$8 sps:$4 sm:$0xff]  }
  0xf5   :  { %1363 = vmatprep.mubr.bf16.mxu1 %v7555_v2  ;;  %1770 = vmatpush1.bf16.msra.mxu0 %v5726_v33  ;;  %v5345_v33 = vld [vmem:[%s7508_s2 + $0x28] sm:$0xff]  }
  0xf6   :  { %1771 = vmatprep.subr.bf16.mxu0 %v5737_v35  ;;  %1789 = vmatprep.mubr.bf16.mxu0 %v6144_v13  ;;  %v5353_v35 = vld [vmem:[%s7509_s1 + $0x264] ss:$8 sps:$4 sm:$0xff]  }
  0xf9   :  { %1772 = vmatpush1.bf16.msra.mxu0 %v5751_v37  ;;  %v5356_v37 = vld [vmem:[%s7509_s1 + $0x254] ss:$8 sps:$4 sm:$0xff]  }
  0xfa   :  { %1773 = vmatprep.subr.bf16.mxu0 %v5771_v40  ;;  %v5359_v40 = vld [vmem:[%s7509_s1 + $0x244] ss:$8 sps:$4 sm:$0xff]  }
  0xfc   :  { %4710 = vmatmul.mubr.msk.bf16.vlgmr.msra.gmra.mxu1 %vm109_vm0, %v5340_v24 }
  0xfd   :  { %1373 = vmatprep.mubr.bf16.mxu1 %v7555_v2  ;;  %1461 = vmatpush1.bf16.msra.mxu1 %v6112_v1 }
  0xfe   :  { %1462 = vmatprep.subr.bf16.mxu1 %v6117_v11  ;;  %1774 = vmatpush2.bf16.msra.mxu0 %v5776_v41  ;;  %v5357_v41 = vld [vmem:[%s7509_s1 + $0x240] ss:$8 sps:$4 sm:$0xff]  }
  0xff   :  { %1775 = vmatprep.subr.bf16.mxu0 %v5795_v44  ;;  %v5360_v44 = vld [vmem:[%s7509_s1 + $0x230] ss:$8 sps:$4 sm:$0xff]  }
 0x101   :  { %1463 = vmatpush1.bf16.msra.mxu1 %v6123_v8 }
 0x102   :  { %1464 = vmatprep.subr.bf16.mxu1 %v6130_v5  ;;  %1776 = vmatpush2.bf16.msra.mxu0 %v5800_v45  ;;  %v7557_v45 = vld [vmem:[#allocation4_spill] sm:$0xff] }
 0x103   :  { %1777 = vmatprep.subr.bf16.mxu0 %v5819_v48  ;;  %v5366_v48 = vld [vmem:[%s7509_s1 + $0x220] ss:$8 sps:$4 sm:$0xff]  }
 0x104   :  { %4711 = vmatmul.mubr.msk.bf16.gmra.mxu1 %vm109_vm0, %v5341_v25 }
 0x105   :  { %1383 = vmatprep.mubr.bf16.mxu1 %v7555_v2  ;;  %1465 = vmatpush1.bf16.msra.mxu1 %v6137_v12 }
 0x106   :  { %1466 = vmatprep.subr.bf16.mxu1 %v6144_v13  ;;  %1778 = vmatpush2.bf16.msra.mxu0 %v5824_v49  ;;  %v7559_v49 = vld [vmem:[#allocation6_spill] sm:$0xff] }
 0x107   :  { %1779 = vmatprep.subr.bf16.mxu0 %v5843_v52  ;;  %v5372_v52 = vld [vmem:[%s7509_s1 + $0x210] ss:$8 sps:$4 sm:$0xff]   ;;  %v5371_v13 = vld [vmem:[%s7509_s1 + $0x94] ss:$8 sps:$4 sm:$0xff]  }
 0x109   :  { %1467 = vmatpush1.bf16.msra.mxu1 %v6151_v14 }
 0x10a   :  { %1990 = vmatprep.subr.bf16.mxu1 %v5696_v27  ;;  %1780 = vmatpush2.bf16.msra.mxu0 %v5848_v53  ;;  %v5344_v27 = vld [vmem:[%s7508_s2 + $0x20] sm:$0xff]   ;;  %v7561_v53 = vld [vmem:[#allocation8_spill] sm:$0xff] }
 0x10b   :  { %1781 = vmatprep.subr.bf16.mxu0 %v5867_v56  ;;  %v7562_v56 = vld [vmem:[#allocation9_spill] sm:$0xff] }
 0x10c   :  { %4712 = vmatmul.mubr.msk.bf16.gmra.mxu1 %vm109_vm0, %v5342_v29 }
 0x10d   :  { %1393 = vmatprep.mubr.bf16.mxu1 %v7555_v2 }
 0x10e   :  { %1782 = vmatpush2.bf16.msra.mxu0 %v5872_v57  ;;  %v5378_v57 = vld [vmem:[%s7509_s1 + $0x200] ss:$8 sps:$4 sm:$0xff]  }
 0x10f   :  { %1783 = vmatprep.subr.bf16.mxu0 %v5891_v60  ;;  %v7563_v60 = vld [vmem:[#allocation10_spill] sm:$0xff] }
 0x112   :  { %1784 = vmatpush2.bf16.msra.mxu0 %v5896_v61  ;;  %v5383_v61 = vld [vmem:[%s7509_s1 + $0x2f4] ss:$8 sps:$4 sm:$0xff]  }
 0x113   :  { %1785 = vmatprep.subr.bf16.mxu0 %v5915_v7  ;;  %v7564_v7 = vld [vmem:[#allocation11_spill] sm:$0xff]  ;;  %v584_v19 = vpop.f32.mrf.mxu0 }
 0x114   :  { %4713 = vmatmul.mubr.msk.bf16.gmra.mxu1 %vm109_vm0, %v5343_v30 }
 0x115   :  { %1484 = vmatprep.mubr.bf16.mxu1 %v7555_v2  ;;  %v586_v20 = vpop.f32.mrf.mxu0 }
 0x116   :  { %1786 = vmatpush2.bf16.msra.mxu0 %v5920_v9  ;;  %v5381_v9 = vld [vmem:[%s7509_s1 + $0x2f0] ss:$8 sps:$4 sm:$0xff]  }
 0x117   :  { %1787 = vmatprep.subr.bf16.mxu0 %v5935_v17  ;;  %v7565_v17 = vld [vmem:[#allocation12_spill] sm:$0xff]  ;;  %v588_v59 = vpop.f32.mrf.mxu0 }
 0x119   :  { %v590_v0 = vpop.f32.mrf.mxu0 }
 0x11a   :  { %1788 = vmatpush2.bf16.msra.mxu0 %v5949_v23  ;;  %v5386_v23 = vld [vmem:[%s7509_s1 + $0x2e4] ss:$8 sps:$4 sm:$0xff]  }
 0x11b   :  { %v594_v21 = vpop.f32.mrf.mxu0 }
 0x11c   :  { %4726 = vmatmul.mubr.msk.bf16.vlgmr.msra.gmra.mxu1 %vm109_vm0, %v5344_v27 }
 0x11d   :  { %1494 = vmatprep.mubr.bf16.mxu1 %v7555_v2  ;;  %1991 = vmatpush1.bf16.msra.mxu1 %v5691_v26  ;;  %v5350_v26 = vld [vmem:[%s7509_s1 + $0x274] ss:$8 sps:$4 sm:$0xff]   ;;  %v596_v24 = vpop.f32.mrf.mxu0 }
 0x11e   :  { %1992 = vmatprep.subr.bf16.mxu1 %v5721_v32  ;;  %1790 = vmatmul.mubr.bf16.vlgmr.msra.gmra.mxu0 %v6151_v14  ;;  %v5348_v32 = vld [vmem:[%s7509_s1 + $0x270] ss:$8 sps:$4 sm:$0xff]  }
 0x11f   :  { %1799 = vmatprep.mubr.bf16.mxu0 %v6130_v5  ;;  %2255 = vmatprep.subr.bf16.mxu0 %v5350_v26  ;;  %v5363_v5 = vld [vmem:[%s7509_s1 + $0xa0] ss:$8 sps:$4 sm:$0xff]   ;;  %v5387_v14 = vld [vmem:[%s7509_s1 + $0x2d0] ss:$8 sps:$4 sm:$0xff]   ;;  %v598_v25 = vpop.f32.mrf.mxu0 }
 0x120   :  { %2256 = vmatpush1.bf16.msra.mxu0 %v5348_v32 }
 0x121   :  { %1993 = vmatpush1.bf16.msra.mxu1 %v5731_v34  ;;  %v5346_v34 = vld [vmem:[%s7508_s2 + $0x30] sm:$0xff]   ;;  %2257 = vmatprep.subr.bf16.mxu0 %v5353_v35  ;;  %v600_v29 = vpop.f32.mrf.mxu0 }
 0x122   :  { %1994 = vmatprep.subr.bf16.mxu1 %v5744_v36  ;;  %v5351_v36 = vld [vmem:[%s7509_s1 + $0x260] ss:$8 sps:$4 sm:$0xff]  }
 0x123   :  { %v6379_v30 = vpop.f32.mrf.mxu0 }
 0x124   :  { %4727 = vmatmul.mubr.msk.bf16.gmra.mxu1 %vm109_vm0, %v5345_v33  ;;  %2258 = vmatpush1.bf16.msra.mxu0 %v5351_v36 }
 0x125   :  { %1504 = vmatprep.mubr.bf16.mxu1 %v7555_v2  ;;  %1995 = vmatpush1.bf16.msra.mxu1 %v5758_v38  ;;  %v5354_v38 = vld [vmem:[%s7509_s1 + $0x250] ss:$8 sps:$4 sm:$0xff]   ;;  %v6381_v27 = vpop.f32.mrf.mxu0 }
 0x126   :  { %1996 = vmatprep.subr.bf16.mxu1 %v5765_v39  ;;  %1800 = vmatmul.mubr.bf16.gmra.mxu0 %v6137_v12  ;;  %v5347_v39 = vld [vmem:[%s7508_s2 + $0x38] sm:$0xff]  }
 0x127   :  { %1809 = vmatprep.mubr.bf16.mxu0 %v6117_v11  ;;  %2259 = vmatprep.subr.bf16.mxu0 %v5356_v37  ;;  %v5384_v11 = vld [vmem:[%s7509_s1 + $0x2e0] ss:$8 sps:$4 sm:$0xff]   ;;  %v5389_v12 = vld [vmem:[%s7509_s1 + $0x2d4] ss:$8 sps:$4 sm:$0xff]   ;;  %v6383_v33 = vpop.f32.mrf.mxu0 }
 0x128   :  { %2260 = vmatpush1.bf16.msra.mxu0 %v5354_v38 }
 0x129   :  { %1997 = vmatpush1.bf16.msra.mxu1 %v5782_v42  ;;  %2261 = vmatprep.subr.bf16.mxu0 %v5359_v40  ;;  %v5362_v42 = vld [vmem:[%s7509_s1 + $0x234] ss:$8 sps:$4 sm:$0xff]   ;;  %v6385_v26 = vpop.f32.mrf.mxu0 }
 0x12a   :  { %1998 = vmatprep.subr.bf16.mxu1 %v5789_v43  ;;  %v7556_v43 = vld [vmem:[#allocation3_spill] sm:$0xff] }
 0x12b   :  { %v6387_v32 = vpop.f32.mrf.mxu0 }
 0x12c   :  { %4728 = vmatmul.mubr.msk.bf16.gmra.mxu1 %vm109_vm0, %v5346_v34  ;;  %2262 = vmatpush1.bf16.msra.mxu0 %v5357_v41 }
 0x12d   :  { %1514 = vmatprep.mubr.bf16.mxu1 %v7555_v2  ;;  %1999 = vmatpush1.bf16.msra.mxu1 %v5806_v46  ;;  %v5368_v46 = vld [vmem:[%s7509_s1 + $0x224] ss:$8 sps:$4 sm:$0xff]   ;;  %v6389_v34 = vpop.f32.mrf.mxu0 }
 0x12e   :  { %2000 = vmatprep.subr.bf16.mxu1 %v5813_v47  ;;  %1810 = vmatmul.mubr.bf16.gmra.mxu0 %v6123_v8  ;;  %v7558_v47 = vld [vmem:[#allocation5_spill] sm:$0xff]  ;;  %v7567_v8 = vld [vmem:[#allocation14_spill] sm:$0xff] }
 0x12f   :  { %1819 = vmatprep.mubr.bf16.mxu0 %v6053_v16  ;;  %2263 = vmatprep.subr.bf16.mxu0 %v5362_v42  ;;  %v7566_v16 = vld [vmem:[#allocation13_spill] sm:$0xff]  ;;  %v6391_v35 = vpop.f32.mrf.mxu0 }
 0x130   :  { %2264 = vmatpush1.bf16.msra.mxu0 %v5360_v44 }
 0x131   :  { %2001 = vmatpush1.bf16.msra.mxu1 %v5830_v50  ;;  %2265 = vmatprep.subr.bf16.mxu0 %v5368_v46  ;;  %v5374_v50 = vld [vmem:[%s7509_s1 + $0x214] ss:$8 sps:$4 sm:$0xff]   ;;  %v6393_v36 = vpop.f32.mrf.mxu0 }
 0x132   :  { %2002 = vmatprep.subr.bf16.mxu1 %v5837_v51  ;;  %v7560_v51 = vld [vmem:[#allocation7_spill] sm:$0xff] }
 0x134   :  { %4729 = vmatmul.mubr.msk.bf16.gmra.mxu1 %vm109_vm0, %v5347_v39  ;;  %2266 = vmatpush1.bf16.msra.mxu0 %v5366_v48 }
 0x135   :  { %2003 = vmatpush1.bf16.msra.mxu1 %v5854_v54  ;;  %2267 = vmatprep.subr.bf16.mxu0 %v5374_v50  ;;  %v5380_v54 = vld [vmem:[%s7509_s1 + $0x204] ss:$8 sps:$4 sm:$0xff]  }
 0x136   :  { %2004 = vmatprep.subr.bf16.mxu1 %v7556_v43  ;;  %1820 = vmatmul.mubr.bf16.gmra.mxu0 %v6112_v1  ;;  %v5365_v1 = vld [vmem:[%s7509_s1 + $0xa4] ss:$8 sps:$4 sm:$0xff]  }
 0x138   :  { %2268 = vmatpush1.bf16.msra.mxu0 %v5372_v52 }
 0x139   :  { %2005 = vmatpush1.bf16.msra.mxu1 %v7557_v45  ;;  %2269 = vmatprep.subr.bf16.mxu0 %v5380_v54 }
 0x13a   :  { %2006 = vmatprep.subr.bf16.mxu1 %v7558_v47 }
 0x13c   :  { %2270 = vmatpush1.bf16.msra.mxu0 %v5378_v57 }
 0x13d   :  { %2007 = vmatpush2.bf16.msra.mxu1 %v7559_v49  ;;  %2271 = vmatprep.subr.bf16.mxu0 %v5383_v61 }
 0x13e   :  { %2008 = vmatprep.subr.bf16.mxu1 %v7560_v51 }
 0x140   :  { %2272 = vmatpush2.bf16.msra.mxu0 %v5381_v9 }
 0x141   :  { %2009 = vmatpush2.bf16.msra.mxu1 %v7561_v53  ;;  %2273 = vmatprep.subr.bf16.mxu0 %v5386_v23 }
 0x142   :  { %2010 = vmatprep.subr.bf16.mxu1 %v7562_v56 }
 0x144   :  { %2274 = vmatpush2.bf16.msra.mxu0 %v5384_v11 }
 0x145   :  { %2011 = vmatpush2.bf16.msra.mxu1 %v7563_v60  ;;  %2275 = vmatprep.subr.bf16.mxu0 %v5389_v12 }
 0x146   :  { %2012 = vmatprep.subr.bf16.mxu1 %v7564_v7 }
 0x148   :  { %2276 = vmatpush2.bf16.msra.mxu0 %v5387_v14 }
 0x149   :  { %2013 = vmatpush2.bf16.msra.mxu1 %v7565_v17  ;;  %2277 = vmatprep.subr.bf16.mxu0 %v5392_v22 }
 0x14a   :  { %2014 = vmatprep.subr.bf16.mxu1 %v7566_v16 }
 0x14c   :  { %2278 = vmatpush2.bf16.msra.mxu0 %v5390_v10 }
 0x14d   :  { %2015 = vmatpush2.bf16.msra.mxu1 %v7567_v8  ;;  %2279 = vmatprep.subr.bf16.mxu0 %v5395_v28 }
 0x14e   :  { %2016 = vmatprep.subr.bf16.mxu1 %v5365_v1 }
 0x150   :  { %2280 = vmatpush2.bf16.msra.mxu0 %v5393_v31 }
 0x151   :  { %2017 = vmatpush2.bf16.msra.mxu1 %v5363_v5  ;;  %2281 = vmatprep.subr.bf16.mxu0 %v5398_v3 }
 0x152   :  { %2018 = vmatprep.subr.bf16.mxu1 %v5371_v13 }
 0x154   :  { %2282 = vmatpush2.bf16.msra.mxu0 %v5396_v18 }
 0x155   :  { %2019 = vmatpush2.bf16.msra.mxu1 %v5369_v15  ;;  %2283 = vmatprep.subr.bf16.mxu0 %v5401_v55 }
 0x156   :  { %2020 = vmatprep.subr.bf16.mxu1 %v5377_v63 }
 0x158   :  { %2284 = vmatpush2.bf16.msra.mxu0 %v5399_v6 }
 0x159   :  { %2021 = vmatpush2.bf16.msra.mxu1 %v5375_v62  ;;  %2285 = vmatprep.subr.bf16.mxu0 %v5404_v4 }
 0x15c   :  { %2286 = vmatpush2.bf16.msra.mxu0 %v5402_v58 }
 0x15d   :  { %3234 = vmatprep.subr.bf16.mxu0 %v7555_v2 }
 0x19c   :  { %v817_v37 = vpop.f32.mrf.mxu1  ;;  %v1083_v38 = vpop.f32.mrf.mxu0 }
 0x19d   :  { %v818_v39 = vadd.f32 %v817_v37, %v584_v19 }
 0x19e   :  { %v819_v40 = vpop.f32.mrf.mxu1  ;;  %v1085_v41 = vpop.f32.mrf.mxu0 }
 0x19f   :  { %v820_v42 = vadd.f32 %v819_v40, %v586_v20  ;;  %v1122_v43 = vadd.f32 %v1083_v38, %v818_v39 }
 0x1a0   :  { %v821_v44 = vpop.f32.mrf.mxu1  ;;  %v1087_v45 = vpop.f32.mrf.mxu0 }
 0x1a1   :  { %1138 = vst [vmem:[#allocation2] sm:$0xff] %v1122_v43  ;;  %v822_v46 = vadd.f32 %v821_v44, %v588_v59  ;;  %v1123_v47 = vadd.f32 %v1085_v41, %v820_v42  ;;  %v1190_v54 = vmul.f32 %v1122_v43, %v1122_v43 }
 0x1a2   :  { %v823_v48 = vpop.f32.mrf.mxu1  ;;  %v1089_v49 = vpop.f32.mrf.mxu0 }
 0x1a3   :  { %1139 = vst.msk [vmem:[#allocation2 + $0x8] sm:$0xff] %vm109_vm0, %v1123_v47  ;;  %v824_v50 = vadd.f32 %v823_v48, %v590_v0  ;;  %v1124_v51 = vadd.f32 %v1087_v45, %v822_v46  ;;  %v1191_v61 = vmul.f32 %v1123_v47, %v1123_v47  ;;  %v1167_v11 = vsel %vm109_vm0, %v1123_v47, 0.0 }
 0x1a4   :  { %v827_v52 = vpop.f32.mrf.mxu1  ;;  %v1093_v53 = vpop.f32.mrf.mxu0 }
 0x1a5   :  { %1140 = vst [vmem:[#allocation2 + $0x10] sm:$0xff] %v1124_v51  ;;  %v1154_v56 = vadd.f32 %v1124_v51, %v1122_v43  ;;  %v1192_v57 = vmul.f32 %v1124_v51, %v1124_v51  ;;  %v828_v60 = vadd.f32 %v827_v52, %v594_v21  ;;  %v1125_v7 = vadd.f32 %v1089_v49, %v824_v50 }
 0x1a6   :  { %v829_v9 = vpop.f32.mrf.mxu1  ;;  %v1095_v17 = vpop.f32.mrf.mxu0  ;;  %v1219_v10 = vsel %vm109_vm0, %v1191_v61, 0.0 }
 0x1a7   :  { %v1206_v23 = vadd.f32 %v1192_v57, %v1190_v54  ;;  %v830_v16 = vadd.f32 %v829_v9, %v596_v24  ;;  %v1126_v1 = vadd.f32 %v1093_v53, %v828_v60  ;;  %1141 = vst.msk [vmem:[#allocation2 + $0x18] sm:$0xff] %vm109_vm0, %v1125_v7  ;;  %v1168_v8 = vsel %vm109_vm0, %v1125_v7, 0.0 }
 0x1a8   :  { %v1193_v5 = vmul.f32 %v1125_v7, %v1125_v7  ;;  %v831_v12 = vpop.f32.mrf.mxu1  ;;  %v1097_v13 = vpop.f32.mrf.mxu0  ;;  %v1169_v14 = vadd.f32 %v1168_v8, %v1167_v11 }
 0x1a9   :  { %1142 = vst [vmem:[#allocation2 + $0x20] sm:$0xff] %v1126_v1  ;;  %v1155_v15 = vadd.f32 %v1154_v56, %v1126_v1  ;;  %v1194_v22 = vmul.f32 %v1126_v1, %v1126_v1  ;;  %v832_v63 = vadd.f32 %v831_v12, %v598_v25  ;;  %v1127_v28 = vadd.f32 %v1095_v17, %v830_v16 }
 0x1aa   :  { %v1220_v62 = vsel %vm109_vm0, %v1193_v5, 0.0  ;;  %v833_v31 = vpop.f32.mrf.mxu1  ;;  %v1099_v3 = vpop.f32.mrf.mxu0 }
 0x1ab   :  { %v1221_v18 = vadd.f32 %v1220_v62, %v1219_v10  ;;  %v1207_v19 = vadd.f32 %v1206_v23, %v1194_v22  ;;  %v834_v55 = vadd.f32 %v833_v31, %v600_v29  ;;  %v1128_v6 = vadd.f32 %v1097_v13, %v832_v63  ;;  %1143 = vst.msk [vmem:[#allocation2 + $0x28] sm:$0xff] %vm109_vm0, %v1127_v28 }
 0x1ac   :  { %v1170_v20 = vsel %vm109_vm0, %v1127_v28, 0.0  ;;  %v1195_v4 = vmul.f32 %v1127_v28, %v1127_v28  ;;  %v837_v58 = vpop.f32.mrf.mxu1  ;;  %v1103_v59 = vpop.f32.mrf.mxu0 }
 0x1ad   :  { %v1171_v0 = vadd.f32 %v1170_v20, %v1169_v14  ;;  %1144 = vst [vmem:[#allocation2 + $0x30] sm:$0xff] %v1128_v6  ;;  %v1156_v21 = vadd.f32 %v1155_v15, %v1128_v6  ;;  %v1196_v24 = vmul.f32 %v1128_v6, %v1128_v6  ;;  %v838_v25 = vadd.f32 %v837_v58, %v6379_v30 }
 0x1ae   :  { %v1222_v37 = vsel %vm109_vm0, %v1195_v4, 0.0  ;;  %v1129_v38 = vadd.f32 %v1099_v3, %v834_v55  ;;  %v839_v39 = vpop.f32.mrf.mxu1  ;;  %v1105_v40 = vpop.f32.mrf.mxu0 }
 0x1af   :  { %v1223_v29 = vadd.f32 %v1222_v37, %v1221_v18  ;;  %v1208_v41 = vadd.f32 %v1207_v19, %v1196_v24  ;;  %v840_v42 = vadd.f32 %v839_v39, %v6381_v27  ;;  %v1130_v43 = vadd.f32 %v1103_v59, %v838_v25 }
 0x1b0   :  { %1145 = vst.msk [vmem:[#allocation2 + $0x38] sm:$0xff] %vm109_vm0, %v1129_v38  ;;  %v1172_v44 = vsel %vm109_vm0, %v1129_v38, 0.0  ;;  %v1197_v45 = vmul.f32 %v1129_v38, %v1129_v38  ;;  %v841_v46 = vpop.f32.mrf.mxu1  ;;  %v1107_v47 = vpop.f32.mrf.mxu0 }
 0x1b1   :  { %v1173_v48 = vadd.f32 %v1172_v44, %v1171_v0  ;;  %1146 = vst [vmem:[#allocation2 + $0x40] sm:$0xff] %v1130_v43  ;;  %v1157_v30 = vadd.f32 %v1156_v21, %v1130_v43  ;;  %v1198_v49 = vmul.f32 %v1130_v43, %v1130_v43  ;;  %v842_v50 = vadd.f32 %v841_v46, %v6383_v33 }
 0x1b2   :  { %v1224_v51 = vsel %vm109_vm0, %v1197_v45, 0.0  ;;  %v1131_v52 = vadd.f32 %v1105_v40, %v840_v42  ;;  %v843_v53 = vpop.f32.mrf.mxu1  ;;  %v1109_v54 = vpop.f32.mrf.mxu0 }
 0x1b3   :  { %v1225_v27 = vadd.f32 %v1224_v51, %v1223_v29  ;;  %v1209_v56 = vadd.f32 %v1208_v41, %v1198_v49  ;;  %v844_v57 = vadd.f32 %v843_v53, %v6385_v26  ;;  %v1132_v60 = vadd.f32 %v1107_v47, %v842_v50 }
 0x1b4   :  { %1147 = vst.msk [vmem:[#allocation2 + $0x48] sm:$0xff] %vm109_vm0, %v1131_v52  ;;  %v1174_v61 = vsel %vm109_vm0, %v1131_v52, 0.0  ;;  %v1199_v7 = vmul.f32 %v1131_v52, %v1131_v52  ;;  %v847_v9 = vpop.f32.mrf.mxu1  ;;  %v1113_v17 = vpop.f32.mrf.mxu0 }
 0x1b5   :  { %v1175_v23 = vadd.f32 %v1174_v61, %v1173_v48  ;;  %1148 = vst [vmem:[#allocation2 + $0x50] sm:$0xff] %v1132_v60  ;;  %v1158_v33 = vadd.f32 %v1157_v30, %v1132_v60  ;;  %v1200_v16 = vmul.f32 %v1132_v60, %v1132_v60  ;;  %v848_v1 = vadd.f32 %v847_v9, %v6387_v32 }
 0x1b6   :  { %v1226_v11 = vsel %vm109_vm0, %v1199_v7, 0.0  ;;  %v1133_v8 = vadd.f32 %v1109_v54, %v844_v57  ;;  %v849_v5 = vpop.f32.mrf.mxu1  ;;  %v1115_v12 = vpop.f32.mrf.mxu0 }
 0x1b7   :  { %v1227_v26 = vadd.f32 %v1226_v11, %v1225_v27  ;;  %v1210_v13 = vadd.f32 %v1209_v56, %v1200_v16  ;;  %v850_v14 = vadd.f32 %v849_v5, %v6389_v34  ;;  %v1134_v15 = vadd.f32 %v1113_v17, %v848_v1 }
 0x1b8   :  { %1149 = vst.msk [vmem:[#allocation2 + $0x58] sm:$0xff] %vm109_vm0, %v1133_v8  ;;  %v1176_v22 = vsel %vm109_vm0, %v1133_v8, 0.0  ;;  %v1201_v63 = vmul.f32 %v1133_v8, %v1133_v8  ;;  %v851_v10 = vpop.f32.mrf.mxu1  ;;  %v1117_v62 = vpop.f32.mrf.mxu0 }
 0x1b9   :  { %v1177_v28 = vadd.f32 %v1176_v22, %v1175_v23  ;;  %1150 = vst [vmem:[#allocation2 + $0x60] sm:$0xff] %v1134_v15  ;;  %v1159_v32 = vadd.f32 %v1158_v33, %v1134_v15  ;;  %v1202_v31 = vmul.f32 %v1134_v15, %v1134_v15  ;;  %v852_v3 = vadd.f32 %v851_v10, %v6391_v35 }
 0x1ba   :  { %v1228_v18 = vsel %vm109_vm0, %v1201_v63, 0.0  ;;  %v1135_v19 = vadd.f32 %v1115_v12, %v850_v14  ;;  %v853_v55 = vpop.f32.mrf.mxu1  ;;  %v1119_v6 = vpop.f32.mrf.mxu0 }
 0x1bb   :  { %v1229_v34 = vadd.f32 %v1228_v18, %v1227_v26  ;;  %v1211_v20 = vadd.f32 %v1210_v13, %v1202_v31  ;;  %v854_v4 = vadd.f32 %v853_v55, %v6393_v36  ;;  %v1136_v58 = vadd.f32 %v1117_v62, %v852_v3 }
 0x1bc   :  { %1151 = vst.msk [vmem:[#allocation2 + $0x68] sm:$0xff] %vm109_vm0, %v1135_v19  ;;  %v1178_v59 = vsel %vm109_vm0, %v1135_v19, 0.0  ;;  %v1203_v0 = vmul.f32 %v1135_v19, %v1135_v19  ;;  %v1365_v21 = vpop.f32.mrf.mxu1 }
 0x1bd   :  { %v1179_v24 = vadd.f32 %v1178_v59, %v1177_v28  ;;  %1152 = vst [vmem:[#allocation2 + $0x70] sm:$0xff] %v1136_v58  ;;  %v6423_v25 = vadd.f32 %v1159_v32, %v1136_v58  ;;  %v1204_v35 = vmul.f32 %v1136_v58, %v1136_v58  ;;  %v1137_v37 = vadd.f32 %v1119_v6, %v854_v4  ;;  %v6439_v59 = vld [vmem:[%s7510_s4 + $0x78] sm:$0xff] }
 0x1be   :  { %v1230_v38 = vsel %vm109_vm0, %v1203_v0, 0.0  ;;  %v1367_v39 = vpop.f32.mrf.mxu1  ;;  %v7531_v58 = vmov 0.0   ;;  %v6446_v0 = vld [vmem:[%s7510_s4 + $0x70] sm:$0xff] }
 0x1bf   :  { %v1231_v40 = vadd.f32 %v1230_v38, %v1229_v34  ;;  %v6426_v29 = vadd.f32 %v1211_v20, %v1204_v35  ;;  %1153 = vst.msk [vmem:[#allocation2 + $0x78] sm:$0xff] %vm109_vm0, %v1137_v37  ;;  %v1180_v36 = vsel %vm109_vm0, %v1137_v37, 0.0  ;;  %v1205_v42 = vmul.f32 %v1137_v37, %v1137_v37  ;;  %2476 = vmatprep.subr.mxu1 %v7531_v58  ;;  %v6467_v35 = vld [vmem:[%s7510_s4 + $0x58] sm:$0xff]  ;;  %v6474_v37 = vld [vmem:[%s7510_s4 + $0x50] sm:$0xff]  ;;  %v6481_v38 = vld [vmem:[%s7510_s4 + $0x48] sm:$0xff] }
 0x1c0   :  { %v6430_v41 = vadd.f32 %v1180_v36, %v1179_v24  ;;  %v1369_v43 = vpop.f32.mrf.mxu1  ;;  %v6460_v24 = vld [vmem:[%s7510_s4 + $0x60] sm:$0xff]  ;;  %v6502_v36 = vld [vmem:[%s7510_s4 + $0x30] sm:$0xff] }
 0x1c1   :  { %v1232_v44 = vsel %vm109_vm0, %v1205_v42, 0.0  ;;  %v1404_v48 = vpack.c.bf16 %v1369_v43, %v1365_v21  ;;  %v6453_v21 = vld [vmem:[%s7510_s4 + $0x68] sm:$0xff]  ;;  %v6516_v43 = vld [vmem:[%s7510_s4 + $0x20] sm:$0xff] }
 0x1c2   :  { %v1371_v45 = vpop.f32.mrf.mxu1  ;;  %v6433_v46 = vadd.f32 %v1232_v44, %v1231_v40  ;;  %v6495_v40 = vld [vmem:[%s7510_s4 + $0x38] sm:$0xff]  ;;  %v6509_v42 = vld [vmem:[%s7510_s4 + $0x28] sm:$0xff] }
 0x1c3   :  { %v1405_v47 = vpack.c.bf16 %v1371_v45, %v1367_v39  ;;  %v6488_v39 = vld [vmem:[%s7510_s4 + $0x40] sm:$0xff]  ;;  %v6523_v44 = vld [vmem:[%s7510_s4 + $0x18] sm:$0xff]  ;;  %v6530_v45 = vld [vmem:[%s7510_s4 + $0x10] sm:$0xff] }
 0x1c4   :  { %v1375_v30 = vpop.f32.mrf.mxu1 }
 0x1c5   :  { %2022 = vmatprep.mubr.bf16.mxu1 %v1405_v47  ;;  %v6537_v47 = vld [vmem:[%s7510_s4 + $0x8] sm:$0xff] }
 0x1c6   :  { %v1377_v49 = vpop.f32.mrf.mxu1  ;;  %2023 = vmatmul.mubr.bf16.vlgmr.msra.gmra.mxu1 %v1404_v48  ;;  %v6544_v48 = vld [vmem:[%s7510_s4] sm:$0xff] }
 0x1c7   :  { %2477 = vmatpush1.msra.mxu1 %v6439_v59 }
 0x1c8   :  { %v1379_v50 = vpop.f32.mrf.mxu1  ;;  %2478 = vmatprep.subr.mxu1 %v7531_v58 }
 0x1c9   :  { %v1406_v53 = vpack.c.bf16 %v1379_v50, %v1375_v30  ;;  %2479 = vmatpush1.msra.mxu1 %v6446_v0  ;;  %v6551_v30 = vld [vmem:[%s7510_s4 + $0xb8] sm:$0xff]  ;;  %v6565_v50 = vld [vmem:[%s7510_s4 + $0xa8] sm:$0xff] }
 0x1ca   :  { %v1381_v51 = vpop.f32.mrf.mxu1  ;;  %2480 = vmatprep.subr.mxu1 %v7531_v58  ;;  %7568 = vst [vmem:[#allocation3_spill] sm:$0xff] %v6551_v30  ;;  %7570 = vst [vmem:[#allocation5_spill] sm:$0xff] %v6565_v50 }
 0x1cb   :  { %v1407_v52 = vpack.c.bf16 %v1381_v51, %v1377_v49  ;;  %2481 = vmatpush1.msra.mxu1 %v6453_v21  ;;  %v6558_v49 = vld [vmem:[%s7510_s4 + $0xb0] sm:$0xff]  ;;  %v6572_v51 = vld [vmem:[%s7510_s4 + $0xa0] sm:$0xff] }
 0x1cc   :  { %v1385_v54 = vpop.f32.mrf.mxu1  ;;  %2482 = vmatprep.subr.mxu1 %v7531_v58  ;;  %7569 = vst [vmem:[#allocation4_spill] sm:$0xff] %v6558_v49  ;;  %7571 = vst [vmem:[#allocation6_spill] sm:$0xff] %v6572_v51 }
 0x1cd   :  { %2032 = vmatprep.mubr.bf16.mxu1 %v1407_v52  ;;  %2483 = vmatpush1.msra.mxu1 %v6460_v24  ;;  %v6579_v52 = vld [vmem:[%s7510_s4 + $0x98] sm:$0xff] }
 0x1ce   :  { %v1387_v27 = vpop.f32.mrf.mxu1  ;;  %2033 = vmatmul.mubr.bf16.gmra.mxu1 %v1406_v53  ;;  %2484 = vmatprep.subr.mxu1 %v7531_v58  ;;  %7572 = vst [vmem:[#allocation7_spill] sm:$0xff] %v6579_v52  ;;  %v6584_v53 = vld [vmem:[%s7510_s4 + $0x90] sm:$0xff] }
 0x1cf   :  { %2485 = vmatpush1.msra.mxu1 %v6467_v35  ;;  %7573 = vst [vmem:[#allocation8_spill] sm:$0xff] %v6584_v53 }
 0x1d0   :  { %v1389_v56 = vpop.f32.mrf.mxu1  ;;  %2486 = vmatprep.subr.mxu1 %v7531_v58 }
 0x1d1   :  { %v1408_v61 = vpack.c.bf16 %v1389_v56, %v1385_v54  ;;  %2487 = vmatpush1.msra.mxu1 %v6474_v37  ;;  %v6591_v54 = vld [vmem:[%s7510_s4 + $0x88] sm:$0xff] }
 0x1d2   :  { %v1391_v57 = vpop.f32.mrf.mxu1  ;;  %2488 = vmatprep.subr.mxu1 %v7531_v58  ;;  %7574 = vst [vmem:[#allocation9_spill] sm:$0xff] %v6591_v54 }
 0x1d3   :  { %v1409_v60 = vpack.c.bf16 %v1391_v57, %v1387_v27  ;;  %2489 = vmatpush1.msra.mxu1 %v6481_v38  ;;  %v6598_v27 = vld [vmem:[%s7510_s4 + $0x80] sm:$0xff] }
 0x1d4   :  { %v1395_v7 = vpop.f32.mrf.mxu1  ;;  %2490 = vmatprep.subr.mxu1 %v7531_v58  ;;  %7575 = vst [vmem:[#allocation10_spill] sm:$0xff] %v6598_v27 }
 0x1d5   :  { %2042 = vmatprep.mubr.bf16.mxu1 %v1409_v60  ;;  %2491 = vmatpush1.msra.mxu1 %v6488_v39 }
 0x1d6   :  { %v1397_v9 = vpop.f32.mrf.mxu1  ;;  %2043 = vmatmul.mubr.bf16.gmra.mxu1 %v1408_v61  ;;  %2492 = vmatprep.subr.mxu1 %v7531_v58 }
 0x1d7   :  { %2493 = vmatpush1.msra.mxu1 %v6495_v40 }
 0x1d8   :  { %v1399_v17 = vpop.f32.mrf.mxu1  ;;  %2494 = vmatprep.subr.mxu1 %v7531_v58 }
 0x1d9   :  { %v1410_v16 = vpack.c.bf16 %v1399_v17, %v1395_v7  ;;  %2495 = vmatpush1.msra.mxu1 %v6502_v36 }
 0x1da   :  { %v1401_v23 = vpop.f32.mrf.mxu1  ;;  %2496 = vmatprep.subr.mxu1 %v7531_v58 }
 0x1db   :  { %v1411_v33 = vpack.c.bf16 %v1401_v23, %v1397_v9  ;;  %2497 = vmatpush1.msra.mxu1 %v6509_v42 }
 0x1dc   :  { %v1486_v1 = vpop.f32.mrf.mxu1  ;;  %2498 = vmatprep.subr.mxu1 %v7531_v58 }
 0x1dd   :  { %2052 = vmatprep.mubr.bf16.mxu1 %v1411_v33  ;;  %2499 = vmatpush1.msra.mxu1 %v6516_v43 }
 0x1de   :  { %v1488_v11 = vpop.f32.mrf.mxu1  ;;  %2053 = vmatmul.mubr.bf16.gmra.mxu1 %v1410_v16  ;;  %2500 = vmatprep.subr.mxu1 %v7531_v58  ;;  %v1791_v56 = vpop.f32.mrf.mxu0 }
 0x1df   :  { %2501 = vmatpush1.msra.mxu1 %v6523_v44 }
 0x1e0   :  { %v1490_v8 = vpop.f32.mrf.mxu1  ;;  %2502 = vmatprep.subr.mxu1 %v7531_v58  ;;  %v1793_v57 = vpop.f32.mrf.mxu0 }
 0x1e1   :  { %v1525_v26 = vpack.c.bf16 %v1490_v8, %v1486_v1  ;;  %2503 = vmatpush1.msra.mxu1 %v6530_v45 }
 0x1e2   :  { %v1492_v5 = vpop.f32.mrf.mxu1  ;;  %2504 = vmatprep.subr.mxu1 %v7531_v58  ;;  %v1795_v60 = vpop.f32.mrf.mxu0 }
 0x1e3   :  { %v1526_v12 = vpack.c.bf16 %v1492_v5, %v1488_v11  ;;  %2505 = vmatpush1.msra.mxu1 %v6537_v47 }
 0x1e4   :  { %v1496_v13 = vpop.f32.mrf.mxu1  ;;  %2506 = vmatprep.subr.mxu1 %v7531_v58  ;;  %v1797_v61 = vpop.f32.mrf.mxu0 }
 0x1e5   :  { %2287 = vmatprep.mubr.bf16.mxu0 %v1526_v12  ;;  %2507 = vmatpush1.msra.mxu1 %v6544_v48 }
 0x1e6   :  { %v1498_v14 = vpop.f32.mrf.mxu1  ;;  %2288 = vmatmul.mubr.bf16.vlgmr.msra.gmra.mxu0 %v1525_v26  ;;  %2524 = vmatprep.subr.mxu1 %v7531_v58  ;;  %v1801_v7 = vpop.f32.mrf.mxu0 }
 0x1e7   :  { %2525 = vmatpush2.msra.mxu1 %v6551_v30 }
 0x1e8   :  { %v1500_v15 = vpop.f32.mrf.mxu1  ;;  %2526 = vmatprep.subr.mxu1 %v7531_v58  ;;  %v1803_v9 = vpop.f32.mrf.mxu0 }
 0x1e9   :  { %v1527_v10 = vpack.c.bf16 %v1500_v15, %v1496_v13  ;;  %2527 = vmatpush2.msra.mxu1 %v6558_v49 }
 0x1ea   :  { %v1502_v22 = vpop.f32.mrf.mxu1  ;;  %2528 = vmatprep.subr.mxu1 %v7531_v58  ;;  %v1805_v17 = vpop.f32.mrf.mxu0 }
 0x1eb   :  { %v1528_v63 = vpack.c.bf16 %v1502_v22, %v1498_v14  ;;  %2529 = vmatpush2.msra.mxu1 %v6565_v50 }
 0x1ec   :  { %v1506_v62 = vpop.f32.mrf.mxu1  ;;  %2530 = vmatprep.subr.mxu1 %v7531_v58  ;;  %v1807_v23 = vpop.f32.mrf.mxu0 }
 0x1ed   :  { %2297 = vmatprep.mubr.bf16.mxu0 %v1528_v63  ;;  %2531 = vmatpush2.msra.mxu1 %v6572_v51 }
 0x1ee   :  { %v1508_v28 = vpop.f32.mrf.mxu1  ;;  %2298 = vmatmul.mubr.bf16.gmra.mxu0 %v1527_v10  ;;  %2532 = vmatprep.subr.mxu1 %v7531_v58  ;;  %v1811_v1 = vpop.f32.mrf.mxu0 }
 0x1ef   :  { %2533 = vmatpush2.msra.mxu1 %v6579_v52 }
 0x1f0   :  { %v1510_v32 = vpop.f32.mrf.mxu1  ;;  %2534 = vmatprep.subr.mxu1 %v7531_v58  ;;  %v1813_v5 = vpop.f32.mrf.mxu0 }
 0x1f1   :  { %v1529_v18 = vpack.c.bf16 %v1510_v32, %v1506_v62  ;;  %2535 = vmatpush2.msra.mxu1 %v6584_v53 }
 0x1f2   :  { %v1512_v31 = vpop.f32.mrf.mxu1  ;;  %2536 = vmatprep.subr.mxu1 %v7531_v58  ;;  %v1815_v13 = vpop.f32.mrf.mxu0 }
 0x1f3   :  { %v1530_v3 = vpack.c.bf16 %v1512_v31, %v1508_v28  ;;  %2537 = vmatpush2.msra.mxu1 %v6591_v54 }
 0x1f4   :  { %v1516_v19 = vpop.f32.mrf.mxu1  ;;  %2538 = vmatprep.subr.mxu1 %v7531_v58  ;;  %v1817_v22 = vpop.f32.mrf.mxu0 }
 0x1f5   :  { %2307 = vmatprep.mubr.bf16.mxu0 %v1530_v3  ;;  %2539 = vmatpush2.msra.mxu1 %v6598_v27 }
 0x1f6   :  { %v1518_v55 = vpop.f32.mrf.mxu1  ;;  %2308 = vmatmul.mubr.bf16.gmra.mxu0 %v1529_v18  ;;  %2549 = vmatprep.subr.mxu1 %v7531_v58  ;;  %v1821_v10 = vpop.f32.mrf.mxu0 }
 0x1f8   :  { %v1520_v6 = vpop.f32.mrf.mxu1  ;;  %v1823_v28 = vpop.f32.mrf.mxu0 }
 0x1f9   :  { %v1531_v4 = vpack.c.bf16 %v1520_v6, %v1516_v19 }
 0x1fa   :  { %v1522_v34 = vpop.f32.mrf.mxu1  ;;  %v1825_v31 = vpop.f32.mrf.mxu0 }
 0x1fb   :  { %v1532_v20 = vpack.c.bf16 %v1522_v34, %v1518_v55 }
 0x1fc   :  { %v1827_v18 = vpop.f32.mrf.mxu0 }
 0x1fd   :  { %2317 = vmatprep.mubr.bf16.mxu0 %v1532_v20 }
 0x1fe   :  { %2318 = vmatmul.mubr.bf16.gmra.mxu0 %v1531_v4 }
 0x286   :  { %v2024_v33 = vpop.f32.mrf.mxu1 }
 0x287   :  { %v2025_v19 = vadd.f32 %v2024_v33, %v1791_v56  ;;  %v1161_v56 = vrot.slane %v6423_v25, 4 }
 0x288   :  { %v2026_v16 = vpop.f32.mrf.mxu1 }
 0x289   :  { %v2027_v6 = vadd.f32 %v2026_v16, %v1793_v57 }
 0x28a   :  { %v2028_v11 = vpop.f32.mrf.mxu1 }
 0x28b   :  { %v2029_v58 = vadd.f32 %v2028_v11, %v1795_v60  ;;  %v1213_v60 = vrot.slane %v6426_v29, 4 }
 0x28c   :  { %v2030_v8 = vpop.f32.mrf.mxu1 }
 0x28d   :  { %v2031_v54 = vadd.f32 %v2030_v8, %v1797_v61 }
 0x28e   :  { %v2034_v12 = vpop.f32.mrf.mxu1 }
 0x28f   :  { %v2035_v50 = vadd.f32 %v2034_v12, %v1801_v7 }
 0x290   :  { %v2036_v26 = vpop.f32.mrf.mxu1 }
 0x291   :  { %v2037_v57 = vadd.f32 %v2036_v26, %v1803_v9 }
 0x292   :  { %v2038_v14 = vpop.f32.mrf.mxu1 }
 0x293   :  { %v2039_v61 = vadd.f32 %v2038_v14, %v1805_v17 }
 0x294   :  { %v2040_v15 = vpop.f32.mrf.mxu1 }
 0x295   :  { %v2041_v7 = vadd.f32 %v2040_v15, %v1807_v23 }
 0x296   :  { %v2044_v63 = vpop.f32.mrf.mxu1 }
 0x297   :  { %v2045_v9 = vadd.f32 %v2044_v63, %v1811_v1 }
 0x298   :  { %v2046_v62 = vpop.f32.mrf.mxu1 }
 0x299   :  { %v2047_v26 = vadd.f32 %v2046_v62, %v1813_v5 }
 0x29a   :  { %v2048_v32 = vpop.f32.mrf.mxu1 }
 0x29b   :  { %v2049_v14 = vadd.f32 %v2048_v32, %v1815_v13 }
 0x29c   :  { %v2050_v3 = vpop.f32.mrf.mxu1 }
 0x29e   :  { %v2054_v20 = vpop.f32.mrf.mxu1 }
 0x29f   :  { %v2055_v23 = vadd.f32 %v2054_v20, %v1821_v10 }
 0x2a0   :  { %v2056_v52 = vpop.f32.mrf.mxu1 }
 0x2a2   :  { %v2058_v16 = vpop.f32.mrf.mxu1 }
 0x2a4   :  { %v2060_v12 = vpop.f32.mrf.mxu1 }
 0x2a6   :  { %v2289_v55 = vpop.f32.mrf.mxu0 }
 0x2a7   :  { %v2328_v34 = vadd.f32 %v2289_v55, %v2025_v19  ;;  %v2051_v55 = vadd.f32 %v2050_v3, %v1817_v22 }
 0x2a8   :  { %v2291_v4 = vpop.f32.mrf.mxu0 }
 0x2a9   :  { %2345 = vst [vmem:[#allocation2 + $0x80] sm:$0xff] %v2328_v34  ;;  %v2329_v2 = vadd.f32 %v2291_v4, %v2027_v6  ;;  %v2397_v63 = vmul.f32 %v2328_v34, %v2328_v34 }
 0x2aa   :  { %v2293_v27 = vpop.f32.mrf.mxu0 }
 0x2ab   :  { %2346 = vst.msk [vmem:[#allocation2 + $0x88] sm:$0xff] %vm109_vm0, %v2329_v2  ;;  %v2330_v53 = vadd.f32 %v2293_v27, %v2029_v58  ;;  %v6609_v27 = vadd.f32 %v1161_v56, %v6423_v25  ;;  %v2398_v15 = vmul.f32 %v2329_v2, %v2329_v2  ;;  %v2057_v56 = vadd.f32 %v2056_v52, %v1823_v28 }
 0x2ac   :  { %v2295_v51 = vpop.f32.mrf.mxu0  ;;  %v2374_v5 = vsel %vm109_vm0, %v2329_v2, 0.0 }
 0x2ad   :  { %2347 = vst [vmem:[#allocation2 + $0x90] sm:$0xff] %v2330_v53  ;;  %v2331_v49 = vadd.f32 %v2295_v51, %v2031_v54  ;;  %v6613_v54 = vadd.f32 %v1213_v60, %v6426_v29  ;;  %v2399_v6 = vmul.f32 %v2330_v53, %v2330_v53  ;;  %v6617_v29 = vadd.f32 %v2058_v16, %v1825_v31 }
 0x2ae   :  { %v2299_v30 = vpop.f32.mrf.mxu0  ;;  %v2361_v22 = vadd.f32 %v2330_v53, %v2328_v34  ;;  %v2426_v28 = vsel %vm109_vm0, %v2398_v15, 0.0 }
 0x2af   :  { %2348 = vst.msk [vmem:[#allocation2 + $0x98] sm:$0xff] %vm109_vm0, %v2331_v49  ;;  %v2332_v33 = vadd.f32 %v2299_v30, %v2035_v50  ;;  %v1182_v30 = vrot.slane %v6430_v41, 4  ;;  %v1234_v50 = vrot.slane %v6433_v46, 4  ;;  %v2400_v19 = vmul.f32 %v2331_v49, %v2331_v49 }
 0x2b0   :  { %v2301_v11 = vpop.f32.mrf.mxu0  ;;  %v2375_v13 = vsel %vm109_vm0, %v2331_v49, 0.0  ;;  %v2413_v31 = vadd.f32 %v2399_v6, %v2397_v63 }
 0x2b1   :  { %2349 = vst [vmem:[#allocation2 + $0xa0] sm:$0xff] %v2332_v33  ;;  %v2333_v8 = vadd.f32 %v2301_v11, %v2037_v57  ;;  %v6619_v57 = vadd.f32 %v2060_v12, %v1827_v18  ;;  %v2401_v62 = vmul.f32 %v2332_v33, %v2332_v33  ;;  %v2427_v10 = vsel %vm109_vm0, %v2400_v19, 0.0 }
 0x2b2   :  { %v2303_v58 = vpop.f32.mrf.mxu0  ;;  %v2376_v16 = vadd.f32 %v2375_v13, %v2374_v5  ;;  %v2362_v11 = vadd.f32 %v2361_v22, %v2332_v33 }
 0x2b3   :  { %2350 = vst.msk [vmem:[#allocation2 + $0xa8] sm:$0xff] %vm109_vm0, %v2333_v8  ;;  %v2334_v51 = vadd.f32 %v2303_v58, %v2039_v61  ;;  %v2402_v3 = vmul.f32 %v2333_v8, %v2333_v8  ;;  %v2377_v2 = vsel %vm109_vm0, %v2333_v8, 0.0  ;;  %v2428_v61 = vadd.f32 %v2427_v10, %v2426_v28 }
 0x2b4   :  { %v2305_v17 = vpop.f32.mrf.mxu0  ;;  %v2414_v53 = vadd.f32 %v2413_v31, %v2401_v62  ;;  %v2378_v19 = vadd.f32 %v2377_v2, %v2376_v16 }
 0x2b5   :  { %2351 = vst [vmem:[#allocation2 + $0xb0] sm:$0xff] %v2334_v51  ;;  %v2335_v25 = vadd.f32 %v2305_v17, %v2041_v7  ;;  %v2403_v18 = vmul.f32 %v2334_v51, %v2334_v51  ;;  %v2363_v12 = vadd.f32 %v2362_v11, %v2334_v51  ;;  %v1183_v11 = vadd.f32 %v1182_v30, %v6430_v41 }
 0x2b6   :  { %v2309_v4 = vpop.f32.mrf.mxu0 }
 0x2b7   :  { %2352 = vst.msk [vmem:[#allocation2 + $0xb8] sm:$0xff] %vm109_vm0, %v2335_v25  ;;  %v2336_v1 = vadd.f32 %v2309_v4, %v2045_v9  ;;  %v2404_v20 = vmul.f32 %v2335_v25, %v2335_v25  ;;  %v2429_v9 = vsel %vm109_vm0, %v2402_v3, 0.0  ;;  %v2379_v17 = vsel %vm109_vm0, %v2335_v25, 0.0 }
 0x2b8   :  { %v2311_v32 = vpop.f32.mrf.mxu0  ;;  %v2415_v15 = vadd.f32 %v2414_v53, %v2403_v18  ;;  %v2430_v13 = vadd.f32 %v2429_v9, %v2428_v61  ;;  %v2380_v62 = vadd.f32 %v2379_v17, %v2378_v19  ;;  %v1215_v9 = vrot.slane %v6613_v54, 2 }
 0x2b9   :  { %2353 = vst [vmem:[#allocation2 + $0xc0] sm:$0xff] %v2336_v1  ;;  %v2337_v52 = vadd.f32 %v2311_v32, %v2047_v26  ;;  %v2405_v34 = vmul.f32 %v2336_v1, %v2336_v1  ;;  %v2431_v33 = vsel %vm109_vm0, %v2404_v20, 0.0  ;;  %v2364_v4 = vadd.f32 %v2363_v12, %v2336_v1 }
 0x2ba   :  { %v2313_v60 = vpop.f32.mrf.mxu0  ;;  %v2432_v28 = vadd.f32 %v2431_v33, %v2430_v13 }
 0x2bb   :  { %2354 = vst.msk [vmem:[#allocation2 + $0xc8] sm:$0xff] %vm109_vm0, %v2337_v52  ;;  %v2338_v49 = vadd.f32 %v2313_v60, %v2049_v14  ;;  %v2406_v58 = vmul.f32 %v2337_v52, %v2337_v52  ;;  %v2381_v14 = vsel %vm109_vm0, %v2337_v52, 0.0  ;;  %v2416_v51 = vadd.f32 %v2415_v15, %v2405_v34 }
 0x2bc   :  { %v2315_v7 = vpop.f32.mrf.mxu0  ;;  %v2382_v1 = vadd.f32 %v2381_v14, %v2380_v62  ;;  %v1184_v15 = vrot.slane %v1183_v11, 2 }
 0x2bd   :  { %2355 = vst [vmem:[#allocation2 + $0xd0] sm:$0xff] %v2338_v49  ;;  %v2339_v26 = vadd.f32 %v2315_v7, %v2051_v55  ;;  %v2407_v8 = vmul.f32 %v2338_v49, %v2338_v49  ;;  %v2433_v25 = vsel %vm109_vm0, %v2406_v58, 0.0  ;;  %v2365_v55 = vadd.f32 %v2364_v4, %v2338_v49 }
 0x2be   :  { %v2319_v6 = vpop.f32.mrf.mxu0  ;;  %v2434_v2 = vadd.f32 %v2433_v25, %v2432_v28 }
 0x2bf   :  { %2356 = vst.msk [vmem:[#allocation2 + $0xd8] sm:$0xff] %vm109_vm0, %v2339_v26  ;;  %v2408_v63 = vmul.f32 %v2339_v26, %v2339_v26  ;;  %v2340_v5 = vadd.f32 %v2319_v6, %v2055_v23  ;;  %v2383_v22 = vsel %vm109_vm0, %v2339_v26, 0.0  ;;  %v2417_v31 = vadd.f32 %v2416_v51, %v2407_v8 }
 0x2c0   :  { %v2321_v32 = vpop.f32.mrf.mxu0  ;;  %v1185_v51 = vadd.f32 %v1184_v15, %v1183_v11  ;;  %v5433_v15 = vld [vmem:[%s7512_s8 + $0x20] ss:$12 sps:$4 sm:$0xff]  }
 0x2c1   :  { %2357 = vst [vmem:[#allocation2 + $0xe0] sm:$0xff] %v2340_v5  ;;  %v2409_v10 = vmul.f32 %v2340_v5, %v2340_v5  ;;  %v2341_v3 = vadd.f32 %v2321_v32, %v2057_v56  ;;  %v2435_v52 = vsel %vm109_vm0, %v2408_v63, 0.0  ;;  %v2366_v20 = vadd.f32 %v2365_v55, %v2340_v5 }
 0x2c2   :  { %v2323_v18 = vpop.f32.mrf.mxu0  ;;  %v2384_v56 = vadd.f32 %v2383_v22, %v2382_v1  ;;  %v2436_v12 = vadd.f32 %v2435_v52, %v2434_v2  ;;  %v1216_v5 = vadd.f32 %v1215_v9, %v6613_v54 }
 0x2c3   :  { %2358 = vst.msk [vmem:[#allocation2 + $0xe8] sm:$0xff] %vm109_vm0, %v2341_v3  ;;  %v2385_v23 = vsel %vm109_vm0, %v2341_v3, 0.0  ;;  %v2410_v60 = vmul.f32 %v2341_v3, %v2341_v3  ;;  %v2342_v16 = vadd.f32 %v2323_v18, %v6617_v29  ;;  %v2418_v49 = vadd.f32 %v2417_v31, %v2409_v10 }
 0x2c4   :  { %v2325_v61 = vpop.f32.mrf.mxu0  ;;  %v1235_v29 = vadd.f32 %v1234_v50, %v6433_v46  ;;  %v2386_v17 = vadd.f32 %v2385_v23, %v2384_v56  ;;  %v1217_v18 = vrot.slane %v1216_v5, 1 }
 0x2c5   :  { %v2437_v53 = vsel %vm109_vm0, %v2410_v60, 0.0  ;;  %2359 = vst [vmem:[#allocation2 + $0xf0] sm:$0xff] %v2342_v16  ;;  %v2367_v34 = vadd.f32 %v2366_v20, %v2342_v16  ;;  %v2411_v58 = vmul.f32 %v2342_v16, %v2342_v16  ;;  %v2343_v7 = vadd.f32 %v2325_v61, %v6619_v57 }
 0x2c6   :  { %v2438_v33 = vadd.f32 %v2437_v53, %v2436_v12  ;;  %v1163_v57 = vrot.slane %v6609_v27, 2  ;;  %v1236_v63 = vrot.slane %v1235_v29, 2  ;;  %v1186_v60 = vrot.slane %v1185_v51, 1 }
 0x2c7   :  { %v2368_v41 = vrot.slane %v2367_v34, 4  ;;  %v2419_v30 = vadd.f32 %v2418_v49, %v2411_v58  ;;  %2360 = vst.msk [vmem:[#allocation2 + $0xf8] sm:$0xff] %vm109_vm0, %v2343_v7  ;;  %v2387_v26 = vsel %vm109_vm0, %v2343_v7, 0.0  ;;  %v2412_v19 = vmul.f32 %v2343_v7, %v2343_v7 }
 0x2c8   :  { %v2388_v8 = vadd.f32 %v2387_v26, %v2386_v17  ;;  %v1164_v55 = vadd.f32 %v1163_v57, %v6609_v27  ;;  %v1237_v1 = vadd.f32 %v1236_v63, %v1235_v29  ;;  %v1218_v61 = vadd.f32 %v1217_v18, %v1216_v5  ;;  %v6788_v18 = vld [vmem:[%s7512_s8 + $0x64] ss:$12 sps:$4 sm:$0xff]  }
 0x2c9   :  { %v2369_v6 = vadd.f32 %v2368_v41, %v2367_v34  ;;  %v2420_v4 = vrot.slane %v2419_v30, 4  ;;  %v2439_v14 = vsel %vm109_vm0, %v2412_v19, 0.0  ;;  %v1187_v27 = vadd.f32 %v1186_v60, %v1185_v51  ;;  %v5429_v19 = vld [vmem:[%s7512_s8 + $0x38] ss:$12 sps:$4 sm:$0xff]   ;;  %v6806_v60 = vld [vmem:[%s7512_s8 + $0x48] ss:$12 sps:$4 sm:$0xff]  }
 0x2ca   :  { %v2389_v46 = vrot.slane %v2388_v8, 4  ;;  %v2440_v50 = vadd.f32 %v2439_v14, %v2438_v33  ;;  %v1165_v16 = vrot.slane %v1164_v55, 1  ;;  %v1238_v56 = vrot.slane %v1237_v1, 1  ;;  %v5437_v33 = vld [vmem:[%s7512_s8 + $0x8] ss:$12 sps:$4 sm:$0xff]  }
 0x2cb   :  { %v2370_v13 = vrot.slane %v2369_v6, 2  ;;  %v2421_v62 = vadd.f32 %v2420_v4, %v2419_v30  ;;  %v7576_v26 = vmov 0.0  }
 0x2cc   :  { %v2390_v25 = vadd.f32 %v2389_v46, %v2388_v8  ;;  %v2441_v32 = vrot.slane %v2440_v50, 4  ;;  %v1166_v7 = vadd.f32 %v1165_v16, %v1164_v55  ;;  %v1239_v12 = vadd.f32 %v1238_v56, %v1237_v1  ;;  %v2629_v55 = vld [vmem:[%s7514_s7] sm:$0x1]  ;;  %v6770_v1 = vld [vmem:[%s7512_s8 + $0x90] ss:$12 sps:$4 sm:$0xff]  }
 0x2cd   :  { %v2371_v22 = vadd.f32 %v2370_v13, %v2369_v6  ;;  %v2422_v10 = vrot.slane %v2421_v62, 2  ;;  %v6812_v16 = vld [vmem:[%s7512_s8 + $0x34] ss:$12 sps:$4 sm:$0xff]   ;;  %v6830_v56 = vld [vmem:[%s7512_s8 + $0x18] ss:$12 sps:$4 sm:$0xff]  }
 0x2ce   :  { %v2391_v3 = vrot.slane %v2390_v25, 2  ;;  %v2442_v28 = vadd.f32 %v2441_v32, %v2440_v50  ;;  %v6748_v32 = vld [vmem:[%s7512_s8 + $0xac] ss:$12 sps:$4 sm:$0xff]  }
 0x2cf   :  { %v2372_v31 = vrot.slane %v2371_v22, 1  ;;  %v2423_v52 = vadd.f32 %v2422_v10, %v2421_v62  ;;  %v2625_v62 = vld [vmem:[%s7513_s6] sm:$0x1]  ;;  %v6758_v10 = vld [vmem:[%s7512_s8 + $0xa8] ss:$12 sps:$4 sm:$0xff]  }
 0x2d0   :  { %v2392_v20 = vadd.f32 %v2391_v3, %v2390_v25  ;;  %v2443_v23 = vrot.slane %v2442_v28, 2 }
 0x2d1   :  { %v2424_v54 = vrot.slane %v2423_v52, 1  ;;  %v2373_v49 = vadd.f32 %v2372_v31, %v2371_v22  ;;  %v6776_v31 = vld [vmem:[%s7512_s8 + $0x7c] ss:$12 sps:$4 sm:$0xff]  }
 0x2d2   :  { %v2393_v2 = vrot.slane %v2392_v20, 1  ;;  %v2444_v11 = vadd.f32 %v2443_v23, %v2442_v28  ;;  %v6764_v28 = vld [vmem:[%s7512_s8 + $0x94] ss:$12 sps:$4 sm:$0xff]   ;;  %v6800_v23 = vld [vmem:[%s7512_s8 + $0x4c] ss:$12 sps:$4 sm:$0xff]  }
 0x2d3   :  { %v2425_v53 = vadd.f32 %v2424_v54, %v2423_v52  ;;  %v2395_v41 = vadd.f32 %v2373_v49, %v1166_v7  ;;  %v6782_v52 = vld [vmem:[%s7512_s8 + $0x78] ss:$12 sps:$4 sm:$0xff]   ;;  %v6818_v54 = vld [vmem:[%s7512_s8 + $0x30] ss:$12 sps:$4 sm:$0xff]   ;;  %v6842_v49 = vld [vmem:[%s7512_s8] ss:$12 sps:$4 sm:$0xff]  }
 0x2d4   :  { %v2394_v34 = vadd.f32 %v2393_v2, %v2392_v20  ;;  %v2445_v58 = vrot.slane %v2444_v11, 1  ;;  %v6794_v20 = vld [vmem:[%s7512_s8 + $0x60] ss:$12 sps:$4 sm:$0xff]   ;;  %v6824_v2 = vld [vmem:[%s7512_s8 + $0x1c] ss:$12 sps:$4 sm:$0xff]  }
 0x2d5   :  { %v2447_v9 = vadd.f32 %v2425_v53, %v1218_v61  ;;  %v6849_v61 = vld [vmem:[%s7512_s8 + $0x10c] ss:$12 sps:$4 sm:$0xff]   ;;  %v6854_v53 = vld [vmem:[%s7512_s8 + $0x108] ss:$12 sps:$4 sm:$0xff]  }
 0x2d6   :  { %v2396_v29 = vadd.f32 %v2394_v34, %v1187_v27  ;;  %v2446_v17 = vadd.f32 %v2445_v58, %v2444_v11  ;;  %v6836_v11 = vld [vmem:[%s7512_s8 + $0x4] ss:$12 sps:$4 sm:$0xff]   ;;  %v6864_v34 = vld [vmem:[%s7512_s8 + $0xf4] ss:$12 sps:$4 sm:$0xff]  }
 0x2d7   :  { %v5441_v27 = vld [vmem:[%s7512_s8 + $0x110] ss:$12 sps:$4 sm:$0xff]   ;;  %v5445_v7 = vld [vmem:[%s7512_s8 + $0xf8] ss:$12 sps:$4 sm:$0xff]  }
 0x2d8   :  { %4890 = vmatprep.mubr.msk.f32.mxu1 %vm109_vm0, %v2396_v29  ;;  %v2448_v30 = vadd.f32 %v2446_v17, %v1239_v12  ;;  %v6870_v58 = vld [vmem:[%s7512_s8 + $0xf0] ss:$12 sps:$4 sm:$0xff]   ;;  %v5449_v12 = vld [vmem:[%s7512_s8 + $0xe0] ss:$12 sps:$4 sm:$0xff]  }
 0x2d9   :  { %2541 = vmatmul.mubr.f32.vlgmr.msra.gmra.mxu1 %v2395_v41  ;;  %v6885_v29 = vld [vmem:[%s7512_s8 + $0xdc] ss:$12 sps:$4 sm:$0xff]   ;;  %v6894_v17 = vld [vmem:[%s7512_s8 + $0xc4] ss:$12 sps:$4 sm:$0xff]   ;;  %v6901_v41 = vld [vmem:[%s7512_s8 + $0xc0] ss:$12 sps:$4 sm:$0xff]  }
 0x2da   :  { %2550 = vmatpush1.msra.mxu1 %v6439_v59  ;;  %4891 = vmatprep.mubr.msk.f32.mxu1 %vm109_vm0, %v2448_v30  ;;  %v7577_v59 = vld [vmem:[#allocation3_spill] sm:$0xff]  ;;  %v5453_v30 = vld [vmem:[%s7512_s8 + $0xc8] ss:$12 sps:$4 sm:$0xff]  }
 0x2db   :  { %2551 = vmatprep.subr.mxu1 %v7576_v26 }
 0x2dc   :  { %2552 = vmatpush1.msra.mxu1 %v6446_v0  ;;  %v7578_v0 = vld [vmem:[#allocation4_spill] sm:$0xff] }
 0x2dd   :  { %2553 = vmatprep.subr.mxu1 %v7576_v26 }
 0x2de   :  { %2554 = vmatpush1.msra.mxu1 %v6453_v21  ;;  %v7579_v21 = vld [vmem:[#allocation5_spill] sm:$0xff] }
 0x2df   :  { %2555 = vmatprep.subr.mxu1 %v7576_v26 }
 0x2e0   :  { %2556 = vmatpush1.msra.mxu1 %v6460_v24  ;;  %v7580_v24 = vld [vmem:[#allocation6_spill] sm:$0xff] }
 0x2e1   :  { %2557 = vmatprep.subr.mxu1 %v7576_v26 }
 0x2e2   :  { %2558 = vmatpush1.msra.mxu1 %v6467_v35  ;;  %v7581_v35 = vld [vmem:[#allocation7_spill] sm:$0xff] }
 0x2e3   :  { %2559 = vmatprep.subr.mxu1 %v7576_v26 }
 0x2e4   :  { %2560 = vmatpush1.msra.mxu1 %v6474_v37  ;;  %v7582_v37 = vld [vmem:[#allocation8_spill] sm:$0xff] }
 0x2e5   :  { %2561 = vmatprep.subr.mxu1 %v7576_v26 }
 0x2e6   :  { %2562 = vmatpush1.msra.mxu1 %v6481_v38  ;;  %v7583_v38 = vld [vmem:[#allocation9_spill] sm:$0xff] }
 0x2e7   :  { %2563 = vmatprep.subr.mxu1 %v7576_v26 }
 0x2e8   :  { %2564 = vmatpush1.msra.mxu1 %v6488_v39  ;;  %v7584_v39 = vld [vmem:[#allocation10_spill] sm:$0xff] }
 0x2e9   :  { %2565 = vmatprep.subr.mxu1 %v7576_v26 }
 0x2ea   :  { %2566 = vmatpush1.msra.mxu1 %v6495_v40  ;;  %v2632_v40 = vld [vmem:[%s7511_s5] sm:$0x77] }
 0x2eb   :  { %2567 = vmatprep.subr.mxu1 %v7576_v26 }
 0x2ec   :  { %2568 = vmatpush1.msra.mxu1 %v6502_v36  ;;  %v2634_v36 = vcombine.high %v2632_v40, %v2632_v40 }
 0x2ed   :  { %2569 = vmatprep.subr.mxu1 %v7576_v26 }
 0x2ee   :  { %2570 = vmatpush1.msra.mxu1 %v6509_v42  ;;  %v5409_v42 = vld [vmem:[%s7512_s8 + $0xb0] ss:$12 sps:$4 sm:$0xff]  }
 0x2ef   :  { %2571 = vmatprep.subr.mxu1 %v7576_v26  ;;  %3235 = vmatpush1.bf16.msra.mxu0 %v5409_v42 }
 0x2f0   :  { %2572 = vmatpush1.msra.mxu1 %v6516_v43  ;;  %v5413_v43 = vld [vmem:[%s7512_s8 + $0x98] ss:$12 sps:$4 sm:$0xff]  }
 0x2f1   :  { %2573 = vmatprep.subr.mxu1 %v7576_v26 }
 0x2f2   :  { %2574 = vmatpush1.msra.mxu1 %v6523_v44  ;;  %v7585_v44 = vmov 0  }
 0x2f3   :  { %2575 = vmatprep.subr.mxu1 %v7576_v26  ;;  %3236 = vmatprep.subr.bf16.mxu0 %v7585_v44 }
 0x2f4   :  { %2576 = vmatpush1.msra.mxu1 %v6530_v45  ;;  %3237 = vmatpush1.bf16.msra.mxu0 %v5413_v43  ;;  %v5417_v45 = vld [vmem:[%s7512_s8 + $0x80] ss:$12 sps:$4 sm:$0xff]  }
 0x2f5   :  { %2577 = vmatprep.subr.mxu1 %v7576_v26  ;;  %3238 = vmatprep.subr.bf16.mxu0 %v7585_v44 }
 0x2f6   :  { %2578 = vmatpush1.msra.mxu1 %v6537_v47  ;;  %v5421_v47 = vld [vmem:[%s7512_s8 + $0x68] ss:$12 sps:$4 sm:$0xff]  }
 0x2f7   :  { %2579 = vmatprep.subr.mxu1 %v7576_v26 }
 0x2f8   :  { %2580 = vmatpush1.msra.mxu1 %v6544_v48  ;;  %3239 = vmatpush1.bf16.msra.mxu0 %v5417_v45  ;;  %v5425_v48 = vld [vmem:[%s7512_s8 + $0x50] ss:$12 sps:$4 sm:$0xff]  }
 0x2f9   :  { %2597 = vmatprep.subr.mxu1 %v7576_v26  ;;  %3240 = vmatprep.subr.bf16.mxu0 %v7585_v44 }
 0x2fa   :  { %2598 = vmatpush2.msra.mxu1 %v7577_v59 }
 0x2fb   :  { %2599 = vmatprep.subr.mxu1 %v7576_v26 }
 0x2fc   :  { %2600 = vmatpush2.msra.mxu1 %v7578_v0  ;;  %3241 = vmatpush1.bf16.msra.mxu0 %v5421_v47 }
 0x2fd   :  { %2601 = vmatprep.subr.mxu1 %v7576_v26  ;;  %3242 = vmatprep.subr.bf16.mxu0 %v7585_v44 }
 0x2fe   :  { %2602 = vmatpush2.msra.mxu1 %v7579_v21 }
 0x2ff   :  { %2603 = vmatprep.subr.mxu1 %v7576_v26 }
 0x300   :  { %2604 = vmatpush2.msra.mxu1 %v7580_v24  ;;  %3243 = vmatpush1.bf16.msra.mxu0 %v5425_v48  ;;  %v2797_v48 = vld [vmem:[#allocation2 + $0x40] sm:$0xff] }
 0x301   :  { %2605 = vmatprep.subr.mxu1 %v7576_v26  ;;  %3244 = vmatprep.subr.bf16.mxu0 %v7585_v44 }
 0x302   :  { %2606 = vmatpush2.msra.mxu1 %v7581_v35  ;;  %v2789_v35 = vld [vmem:[#allocation2] sm:$0xff] }
 0x303   :  { %2607 = vmatprep.subr.mxu1 %v7576_v26 }
 0x304   :  { %2608 = vmatpush2.msra.mxu1 %v7582_v37  ;;  %3245 = vmatpush1.bf16.msra.mxu0 %v5429_v19  ;;  %v2799_v19 = vld [vmem:[#allocation2 + $0x50] sm:$0xff] }
 0x305   :  { %2609 = vmatprep.subr.mxu1 %v7576_v26  ;;  %3246 = vmatprep.subr.bf16.mxu0 %v7585_v44 }
 0x306   :  { %2610 = vmatpush2.msra.mxu1 %v7583_v38  ;;  %v2790_v38 = vld [vmem:[#allocation2 + $0x8] sm:$0xff] }
 0x307   :  { %2611 = vmatprep.subr.mxu1 %v7576_v26 }
 0x308   :  { %2612 = vmatpush2.msra.mxu1 %v7584_v39  ;;  %3247 = vmatpush1.bf16.msra.mxu0 %v5433_v15  ;;  %v2791_v39 = vld [vmem:[#allocation2 + $0x10] sm:$0xff]  ;;  %v2801_v15 = vld [vmem:[#allocation2 + $0x60] sm:$0xff] }
 0x309   :  { %2614 = vmatmul.mubr.f32.vlgmr.msra.gmra.mxu1 %v2447_v9  ;;  %4892 = vmatprep.subr.msk.mxu1 %vm2639_vm1, %v2634_v36  ;;  %v6880_v9 = vld [vmem:[%s7512_s8 + $0xd8] ss:$12 sps:$4 sm:$0xff]  }
 0x30a   :  { %2708 = vmatprep.mubr.f32.mxu1 %v7576_v26  ;;  %4893 = vmatpush1.msk.msra.mxu1 %vm2639_vm1, %v2632_v40 }
 0x30b   :  { %4895 = vmatprep.subr.msk.mxu1 %vm2639_vm1, %v2634_v36  ;;  %3248 = vmatprep.subr.bf16.mxu0 %v7585_v44  ;;  %v2795_v36 = vld [vmem:[#allocation2 + $0x30] sm:$0xff] }
 0x30c   :  { %3249 = vmatpush1.bf16.msra.mxu0 %v5437_v33 }
 0x30d   :  { %3258 = vmatprep.subr.bf16.mxu0 %v7585_v44 }
 0x310   :  { %3259 = vmatpush2.bf16.msra.mxu0 %v5441_v27 }
 0x311   :  { %3260 = vmatprep.subr.bf16.mxu0 %v7585_v44 }
 0x314   :  { %3261 = vmatpush2.bf16.msra.mxu0 %v5445_v7 }
 0x315   :  { %3262 = vmatprep.subr.bf16.mxu0 %v7585_v44 }
 0x318   :  { %3263 = vmatpush2.bf16.msra.mxu0 %v5449_v12 }
 0x319   :  { %3264 = vmatprep.subr.bf16.mxu0 %v7585_v44 }
 0x31c   :  { %3265 = vmatpush2.bf16.msra.mxu0 %v5453_v30 }
 0x399   :  { %v2542_v8 = vpop.f32.mrf.mxu1 }
 0x39a   :  { %v2620_v6 = vmul.f32 0.00012207031, %v2542_v8  ;;  %v2792_v8 = vld [vmem:[#allocation2 + $0x18] sm:$0xff] }
 0x39b   :  { %v2544_v57 = vpop.f32.mrf.mxu1 }
 0x39c   :  { %v2622_v14 = vmul.f32 %v2620_v6, %v2620_v6  ;;  %v2794_v57 = vld [vmem:[#allocation2 + $0x28] sm:$0xff] }
 0x3c9   :  { %v2615_v4 = vpop.f32.mrf.mxu1 }
 0x3ca   :  { %v2621_v63 = vmul.f32 0.00012207031, %v2615_v4 }
 0x3cb   :  { %v2617_v46 = vpop.f32.mrf.mxu1 }
 0x3cc   :  { %v2623_v50 = vsub.f32 %v2621_v63, %v2622_v14 }
 0x3ce   :  { %v2624_v5 = vmax.f32 %v2623_v50, 0.0 }
 0x3d0   :  { %v2626_v13 = vadd.f32 1e-05, %v2624_v5 }
 0x3d2   :  { %5482 = vrsqrt.f32 %v2626_v13 }
 0x3df   :  { %v5483_v51 = vpop.eup %5482 }
 0x3e0   :  { %v2628_v25 = vmul.f32 %v5483_v51, %v2625_v62  ;;  %v2798_v51 = vld [vmem:[#allocation2 + $0x48] sm:$0xff] }
 0x3e2   :  { %4894 = vmatmul.mubr.msk.f32.vlgmr.msra.gmra.mxu1 %vm2635_vm2, %v2628_v25  ;;  %v2630_v22 = vmul.f32 %v2628_v25, %v2620_v6  ;;  %v2796_v6 = vld [vmem:[#allocation2 + $0x38] sm:$0xff] }
 0x3e3   :  { %4896 = vmatpush1.msk.msra.mxu1 %vm2639_vm1, %v2632_v40  ;;  %2782 = vmatprep.mubr.f32.mxu1 %v7576_v26  ;;  %v2805_v26 = vlaneseq  ;;  %v2793_v40 = vld [vmem:[#allocation2 + $0x20] sm:$0xff]  ;;  %v2800_v25 = vld [vmem:[#allocation2 + $0x58] sm:$0xff] }
 0x3e4   :  { %v2631_v3 = vsub.f32 %v2629_v55, %v2630_v22  ;;  %3161 = vmatprep.subr.bf16.mxu1 %v6748_v32  ;;  %v2802_v55 = vld [vmem:[#allocation2 + $0x68] sm:$0xff] }
 0x3e5   :  { %v2806_v59 = vshrl.u32 %v2805_v26, 7 }
 0x3e6   :  { %4897 = vmatmul.mubr.msk.f32.vlgmr.msra.gmra.mxu1 %vm2635_vm2, %v2631_v3 }
 0x3e7   :  { %3162 = vmatpush1.bf16.msra.mxu1 %v6758_v10  ;;  %v2807_v0 = vsub.s32 0, %v2806_v59 }
 0x3e8   :  { %3163 = vmatprep.subr.bf16.mxu1 %v6764_v28 }
 0x3eb   :  { %3164 = vmatpush1.bf16.msra.mxu1 %v6770_v1 }
 0x3ec   :  { %3165 = vmatprep.subr.bf16.mxu1 %v6776_v31 }
 0x3ef   :  { %3166 = vmatpush1.bf16.msra.mxu1 %v6782_v52 }
 0x3f0   :  { %3167 = vmatprep.subr.bf16.mxu1 %v6788_v18 }
 0x3f3   :  { %3168 = vmatpush1.bf16.msra.mxu1 %v6794_v20 }
 0x3f4   :  { %3169 = vmatprep.subr.bf16.mxu1 %v6800_v23 }
 0x3f7   :  { %3170 = vmatpush1.bf16.msra.mxu1 %v6806_v60 }
 0x3f8   :  { %3171 = vmatprep.subr.bf16.mxu1 %v6812_v16 }
 0x3fb   :  { %3172 = vmatpush1.bf16.msra.mxu1 %v6818_v54 }
 0x3fc   :  { %3173 = vmatprep.subr.bf16.mxu1 %v6824_v2 }
 0x3ff   :  { %3174 = vmatpush1.bf16.msra.mxu1 %v6830_v56 }
 0x400   :  { %3175 = vmatprep.subr.bf16.mxu1 %v6836_v11 }
 0x403   :  { %3176 = vmatpush1.bf16.msra.mxu1 %v6842_v49 }
 0x404   :  { %3185 = vmatprep.subr.bf16.mxu1 %v6849_v61 }
 0x407   :  { %3186 = vmatpush2.bf16.msra.mxu1 %v6854_v53 }
 0x408   :  { %3187 = vmatprep.subr.bf16.mxu1 %v6864_v34 }
 0x40b   :  { %3188 = vmatpush2.bf16.msra.mxu1 %v6870_v58 }
 0x40c   :  { %3189 = vmatprep.subr.bf16.mxu1 %v6885_v29 }
 0x40f   :  { %3190 = vmatpush2.bf16.msra.mxu1 %v6880_v9 }
 0x410   :  { %3191 = vmatprep.subr.bf16.mxu1 %v6894_v17 }
 0x413   :  { %3192 = vmatpush2.bf16.msra.mxu1 %v6901_v41 }
 0x4a2   :  { %v2710_v21 = vpop.f32.mrf.mxu1 }
 0x4a3   :  { %v6909_v24 = vrot.slane %v2710_v21, %v2807_v0 }
 0x4a4   :  { %v2712_v37 = vpop.f32.mrf.mxu1 }
 0x4a5   :  { %v6911_v42 = vrot.slane %v2712_v37, %v2807_v0  ;;  %v2813_v43 = vmul.f32 %v6909_v24, %v2789_v35  ;;  %v2815_v45 = vmul.f32 %v6909_v24, %v2791_v39  ;;  %v2817_v47 = vmul.f32 %v6909_v24, %v2793_v40  ;;  %v2804_v35 = vld [vmem:[#allocation2 + $0x78] sm:$0xff] }
 0x4a6   :  { %v2784_v33 = vpop.f32.mrf.mxu1  ;;  %v2819_v4 = vmul.f32 %v6909_v24, %v2795_v36  ;;  %v2821_v14 = vmul.f32 %v6909_v24, %v2797_v48  ;;  %v2823_v63 = vmul.f32 %v6909_v24, %v2799_v19  ;;  %v6920_v46 = vmul.f32 %v6909_v24, %v2801_v15 }
 0x4a7   :  { %v6922_v50 = vrot.slane %v2784_v33, %v2807_v0  ;;  %v2814_v5 = vmul.f32 %v6911_v42, %v2790_v38  ;;  %v2816_v13 = vmul.f32 %v6911_v42, %v2792_v8  ;;  %v2818_v62 = vmul.f32 %v6911_v42, %v2794_v57 }
 0x4a8   :  { %v2786_v22 = vpop.f32.mrf.mxu1  ;;  %v2820_v3 = vmul.f32 %v6911_v42, %v2796_v6  ;;  %v2822_v27 = vmul.f32 %v6911_v42, %v2798_v51  ;;  %v2824_v7 = vmul.f32 %v6911_v42, %v2800_v25  ;;  %v2826_v12 = vmul.f32 %v6911_v42, %v2802_v55 }
 0x4a9   :  { %v6931_v30 = vrot.slane %v2786_v22, %v2807_v0  ;;  %v2837_v26 = vadd.f32 %v6922_v50, %v2813_v43  ;;  %v2839_v59 = vadd.f32 %v6922_v50, %v2815_v45  ;;  %v2841_v21 = vadd.f32 %v6922_v50, %v2817_v47 }
 0x4aa   :  { %v2843_v37 = vadd.f32 %v6922_v50, %v2819_v4  ;;  %v2845_v38 = vadd.f32 %v6922_v50, %v2821_v14  ;;  %v2847_v39 = vadd.f32 %v6922_v50, %v2823_v63  ;;  %v2828_v40 = vmul.f32 %v6911_v42, %v2804_v35 }
 0x4ab   :  { %v2838_v36 = vadd.f32 %v6931_v30, %v2814_v5  ;;  %v2840_v0 = vadd.f32 %v6931_v30, %v2816_v13  ;;  %vm2853_vm3 = vcmp.gt.f32.partialorder %v2837_v26, 0.0  ;;  %vm2855_vm4 = vcmp.gt.f32.partialorder %v2839_v59, 0.0 }
 0x4ac   :  { %v2869_v43 = vmul.f32 0.2, %v2837_v26  ;;  %v2871_v48 = vmul.f32 0.2, %v2839_v59  ;;  %v2842_v45 = vadd.f32 %v6931_v30, %v2818_v62  ;;  %v2844_v47 = vadd.f32 %v6931_v30, %v2820_v3 }
 0x4ad   :  { %vm2854_vm5 = vcmp.gt.f32.partialorder %v2838_v36, 0.0  ;;  %vm2856_vm6 = vcmp.gt.f32.partialorder %v2840_v0, 0.0  ;;  %v2870_v19 = vmul.f32 0.2, %v2838_v36  ;;  %v2872_v15 = vmul.f32 0.2, %v2840_v0 }
 0x4ae   :  { %v2885_v33 = vsel %vm2853_vm3, %v2837_v26, %v2869_v43  ;;  %v2887_v8 = vsel %vm2855_vm4, %v2839_v59, %v2871_v48  ;;  %vm2858_vm7 = vcmp.gt.f32.partialorder %v2842_v45, 0.0  ;;  %vm2860_vm8 = vcmp.gt.f32.partialorder %v2844_v47, 0.0 }
 0x4af   :  { %v2886_v57 = vsel %vm2854_vm5, %v2838_v36, %v2870_v19  ;;  %v2888_v6 = vsel %vm2856_vm6, %v2840_v0, %v2872_v15  ;;  %v2901_v4 = vpack.c.bf16 %v2887_v8, %v2885_v33  ;;  %v2874_v14 = vmul.f32 0.2, %v2842_v45 }
 0x4b0   :  { %v2902_v63 = vpack.c.bf16 %v2888_v6, %v2886_v57  ;;  %v2876_v5 = vmul.f32 0.2, %v2844_v47  ;;  %vm2857_vm9 = vcmp.gt.f32.partialorder %v2841_v21, 0.0  ;;  %vm2859_vm10 = vcmp.gt.f32.partialorder %v2843_v37, 0.0 }
 0x4b1   :  { %v2890_v13 = vsel %vm2858_vm7, %v2842_v45, %v2874_v14  ;;  %v2873_v62 = vmul.f32 0.2, %v2841_v21  ;;  %v2875_v51 = vmul.f32 0.2, %v2843_v37  ;;  %v2846_v25 = vadd.f32 %v6931_v30, %v2822_v27  ;;  %v2803_v45 = vld [vmem:[#allocation2 + $0x70] sm:$0xff] }
 0x4b2   :  { %4934 = vmatprep.mubr.msk.bf16.mxu1 %vm109_vm0, %v2902_v63  ;;  %4938 = vmatprep.mubr.msk.bf16.mxu0 %vm109_vm0, %v2902_v63  ;;  %v2892_v55 = vsel %vm2860_vm8, %v2844_v47, %v2876_v5  ;;  %v2848_v22 = vadd.f32 %v6931_v30, %v2824_v7  ;;  %vm2861_vm11 = vcmp.gt.f32.partialorder %v2845_v38, 0.0  ;;  %vm2863_vm12 = vcmp.gt.f32.partialorder %v2847_v39, 0.0  ;;  %v3652_v63 = vld [vmem:[#allocation2 + $0x98] sm:$0xff] }
 0x4b3   :  { %3194 = vmatmul.mubr.bf16.vlgmr.msra.gmra.mxu1 %v2901_v4  ;;  %3267 = vmatmul.mubr.bf16.vlgmr.msra.gmra.mxu0 %v2901_v4  ;;  %v2904_v3 = vpack.c.bf16 %v2892_v55, %v2890_v13  ;;  %v2889_v26 = vsel %vm2857_vm9, %v2841_v21, %v2873_v62  ;;  %v2891_v59 = vsel %vm2859_vm10, %v2843_v37, %v2875_v51  ;;  %vm2862_vm13 = vcmp.gt.f32.partialorder %v2846_v25, 0.0  ;;  %v3650_v4 = vld [vmem:[#allocation2 + $0x88] sm:$0xff]  ;;  %v3649_v13 = vld [vmem:[#allocation2 + $0x80] sm:$0xff] }
 0x4b4   :  { %v2903_v35 = vpack.c.bf16 %v2891_v59, %v2889_v26  ;;  %vm2864_vm14 = vcmp.gt.f32.partialorder %v2848_v22, 0.0  ;;  %v2878_v36 = vmul.f32 0.2, %v2846_v25  ;;  %v2880_v0 = vmul.f32 0.2, %v2848_v22 }
 0x4b5   :  { %4935 = vmatprep.mubr.msk.bf16.mxu1 %vm109_vm0, %v2904_v3  ;;  %4939 = vmatprep.mubr.msk.bf16.mxu0 %vm109_vm0, %v2904_v3  ;;  %v2877_v27 = vmul.f32 0.2, %v2845_v38  ;;  %v2879_v43 = vmul.f32 0.2, %v2847_v39  ;;  %v2850_v7 = vadd.f32 %v6931_v30, %v2826_v12  ;;  %v2852_v48 = vadd.f32 %v6931_v30, %v2828_v40 }
 0x4b6   :  { %v2894_v47 = vsel %vm2862_vm13, %v2846_v25, %v2878_v36  ;;  %v2896_v19 = vsel %vm2864_vm14, %v2848_v22, %v2880_v0  ;;  %v2827_v21 = vmul.f32 %v6909_v24, %v2803_v45  ;;  %v2849_v37 = vadd.f32 %v6922_v50, %v6920_v46  ;;  %v3651_v22 = vld [vmem:[#allocation2 + $0x90] sm:$0xff]  ;;  %v3654_v36 = vld [vmem:[#allocation2 + $0xa8] sm:$0xff]  ;;  %v3656_v0 = vld [vmem:[#allocation2 + $0xb8] sm:$0xff] }
 0x4b7   :  { %v2906_v15 = vpack.c.bf16 %v2896_v19, %v2894_v47  ;;  %v2893_v33 = vsel %vm2861_vm11, %v2845_v38, %v2877_v27  ;;  %v2895_v8 = vsel %vm2863_vm12, %v2847_v39, %v2879_v43  ;;  %vm2866_vm15 = vcmp.gt.f32.partialorder %v2850_v7, 0.0 }
 0x4b8   :  { %v2905_v57 = vpack.c.bf16 %v2895_v8, %v2893_v33  ;;  %vm2868_vm1 = vcmp.gt.f32.partialorder %v2852_v48, 0.0  ;;  %v2882_v6 = vmul.f32 0.2, %v2850_v7  ;;  %v2884_v12 = vmul.f32 0.2, %v2852_v48 }
 0x4b9   :  { %v2851_v40 = vadd.f32 %v6922_v50, %v2827_v21  ;;  %vm2865_vm2 = vcmp.gt.f32.partialorder %v2849_v37, 0.0  ;;  %v2881_v14 = vmul.f32 0.2, %v2849_v37  ;;  %v3666_v5 = vmul.f32 %v3650_v4, %v6911_v42 }
 0x4ba   :  { %v2898_v46 = vsel %vm2866_vm15, %v2850_v7, %v2882_v6  ;;  %v2900_v62 = vsel %vm2868_vm1, %v2852_v48, %v2884_v12  ;;  %v3668_v38 = vmul.f32 %v3652_v63, %v6911_v42  ;;  %v3665_v39 = vmul.f32 %v3649_v13, %v6909_v24 }
 0x4bb   :  { %3204 = vmatmul.mubr.bf16.gmra.mxu1 %v2903_v35  ;;  %3275 = vmatmul.mubr.bf16.gmra.mxu0 %v2903_v35  ;;  %v2908_v51 = vpack.c.bf16 %v2900_v62, %v2898_v46  ;;  %vm2867_vm3 = vcmp.gt.f32.partialorder %v2851_v40, 0.0  ;;  %v2883_v25 = vmul.f32 0.2, %v2851_v40  ;;  %v2897_v55 = vsel %vm2865_vm2, %v2849_v37, %v2881_v14  ;;  %v3653_v37 = vld [vmem:[#allocation2 + $0xa0] sm:$0xff] }
 0x4bc   :  { %4936 = vmatprep.mubr.msk.bf16.mxu1 %vm109_vm0, %v2906_v15  ;;  %4940 = vmatprep.mubr.msk.bf16.mxu0 %vm109_vm0, %v2906_v15  ;;  %v3682_v3 = vadd.f32 %v3666_v5, %v6931_v30  ;;  %v3684_v26 = vadd.f32 %v3668_v38, %v6931_v30  ;;  %v3667_v59 = vmul.f32 %v3651_v22, %v6909_v24  ;;  %v3655_v5 = vld [vmem:[#allocation2 + $0xb0] sm:$0xff] }
 0x4bd   :  { %v2899_v27 = vsel %vm2867_vm3, %v2851_v40, %v2883_v25  ;;  %v3681_v35 = vadd.f32 %v3665_v39, %v6922_v50  ;;  %v3670_v43 = vmul.f32 %v3654_v36, %v6911_v42  ;;  %v3672_v7 = vmul.f32 %v3656_v0, %v6911_v42  ;;  %v3658_v39 = vld [vmem:[#allocation2 + $0xc8] sm:$0xff]  ;;  %v3657_v36 = vld [vmem:[#allocation2 + $0xc0] sm:$0xff] }
 0x4be   :  { %v6969_v48 = vpack.c.bf16 %v2899_v27, %v2897_v55  ;;  %vm3698_vm4 = vcmp.gt.f32.partialorder %v3682_v3, 0.0  ;;  %vm3700_vm5 = vcmp.gt.f32.partialorder %v3684_v26, 0.0  ;;  %v3714_v45 = vmul.f32 0.2, %v3682_v3 }
 0x4bf   :  { %v3716_v47 = vmul.f32 0.2, %v3684_v26  ;;  %v3683_v19 = vadd.f32 %v3667_v59, %v6922_v50  ;;  %vm3697_vm6 = vcmp.gt.f32.partialorder %v3681_v35, 0.0  ;;  %v3713_v21 = vmul.f32 0.2, %v3681_v35  ;;  %v3660_v59 = vld [vmem:[#allocation2 + $0xd8] sm:$0xff] }
 0x4c0   :  { %v3730_v15 = vsel %vm3698_vm4, %v3682_v3, %v3714_v45  ;;  %v3686_v33 = vadd.f32 %v3670_v43, %v6931_v30  ;;  %v3688_v8 = vadd.f32 %v3672_v7, %v6931_v30  ;;  %v3669_v6 = vmul.f32 %v3653_v37, %v6909_v24  ;;  %v3659_v43 = vld [vmem:[#allocation2 + $0xd0] sm:$0xff] }
 0x4c1   :  { %v3732_v12 = vsel %vm3700_vm5, %v3684_v26, %v3716_v47  ;;  %vm3699_vm7 = vcmp.gt.f32.partialorder %v3683_v19, 0.0  ;;  %v3715_v4 = vmul.f32 0.2, %v3683_v19  ;;  %v3729_v40 = vsel %vm3697_vm6, %v3681_v35, %v3713_v21 }
 0x4c2   :  { %v6975_v14 = vpack.c.bf16 %v3732_v12, %v3730_v15  ;;  %vm3702_vm8 = vcmp.gt.f32.partialorder %v3686_v33, 0.0  ;;  %vm3704_vm9 = vcmp.gt.f32.partialorder %v3688_v8, 0.0  ;;  %v3718_v63 = vmul.f32 0.2, %v3686_v33  ;;  %v3662_v15 = vld [vmem:[#allocation2 + $0xe8] sm:$0xff] }
 0x4c3   :  { %3214 = vmatmul.mubr.bf16.gmra.mxu1 %v2905_v57  ;;  %3283 = vmatmul.mubr.bf16.gmra.mxu0 %v2905_v57  ;;  %v3731_v13 = vsel %vm3699_vm7, %v3683_v19, %v3715_v4  ;;  %v3720_v46 = vmul.f32 0.2, %v3688_v8  ;;  %v3671_v62 = vmul.f32 %v3655_v5, %v6909_v24  ;;  %v3685_v38 = vadd.f32 %v3669_v6, %v6922_v50 }
 0x4c4   :  { %4937 = vmatprep.mubr.msk.bf16.mxu1 %vm109_vm0, %v2908_v51  ;;  %4941 = vmatprep.mubr.msk.bf16.mxu0 %vm109_vm0, %v2908_v51  ;;  %v6981_v25 = vpack.c.bf16 %v3731_v13, %v3729_v40  ;;  %v3734_v55 = vsel %vm3702_vm8, %v3686_v33, %v3718_v63  ;;  %v3674_v22 = vmul.f32 %v3658_v39, %v6911_v42  ;;  %v3664_v33 = vld [vmem:[#allocation2 + $0xf8] sm:$0xff]  ;;  %v3661_v39 = vld [vmem:[#allocation2 + $0xe0] sm:$0xff] }
 0x4c5   :  { %v3736_v3 = vsel %vm3704_vm9, %v3688_v8, %v3720_v46  ;;  %v3687_v26 = vadd.f32 %v3671_v62, %v6922_v50  ;;  %vm3701_vm10 = vcmp.gt.f32.partialorder %v3685_v38, 0.0  ;;  %v3717_v57 = vmul.f32 0.2, %v3685_v38 }
 0x4c6   :  { %v6985_v0 = vpack.c.bf16 %v3736_v3, %v3734_v55  ;;  %v3676_v27 = vmul.f32 %v3660_v59, %v6911_v42  ;;  %v3690_v35 = vadd.f32 %v3674_v22, %v6931_v30  ;;  %v3673_v51 = vmul.f32 %v3657_v36, %v6909_v24  ;;  %v3663_v59 = vld [vmem:[#allocation2 + $0xf0] sm:$0xff] }
 0x4c7   :  { %vm3703_vm11 = vcmp.gt.f32.partialorder %v3687_v26, 0.0  ;;  %v3719_v7 = vmul.f32 0.2, %v3687_v26  ;;  %v3733_v45 = vsel %vm3701_vm10, %v3685_v38, %v3717_v57  ;;  %v3675_v47 = vmul.f32 %v3659_v43, %v6909_v24 }
 0x4c8   :  { %v3692_v19 = vadd.f32 %v3676_v27, %v6931_v30  ;;  %vm3706_vm12 = vcmp.gt.f32.partialorder %v3690_v35, 0.0  ;;  %v3722_v21 = vmul.f32 0.2, %v3690_v35  ;;  %v3689_v37 = vadd.f32 %v3673_v51, %v6922_v50 }
 0x4c9   :  { %v3735_v8 = vsel %vm3703_vm11, %v3687_v26, %v3719_v7  ;;  %v3691_v6 = vadd.f32 %v3675_v47, %v6922_v50  ;;  %v3678_v12 = vmul.f32 %v3662_v15, %v6911_v42  ;;  %v3680_v4 = vmul.f32 %v3664_v33, %v6911_v42 }
 0x4ca   :  { %v6996_v40 = vpack.c.bf16 %v3735_v8, %v3733_v45  ;;  %vm3708_vm13 = vcmp.gt.f32.partialorder %v3692_v19, 0.0  ;;  %v3724_v63 = vmul.f32 0.2, %v3692_v19  ;;  %v3738_v5 = vsel %vm3706_vm12, %v3690_v35, %v3722_v21 }
 0x4cb   :  { %3224 = vmatmul.mubr.bf16.gmra.mxu1 %v6969_v48  ;;  %3291 = vmatmul.mubr.bf16.gmra.mxu0 %v6969_v48  ;;  %vm3705_vm14 = vcmp.gt.f32.partialorder %v3689_v37, 0.0  ;;  %vm3707_vm15 = vcmp.gt.f32.partialorder %v3691_v6, 0.0  ;;  %v3721_v13 = vmul.f32 0.2, %v3689_v37  ;;  %v3723_v46 = vmul.f32 0.2, %v3691_v6 }
 0x4cc   :  { %3423 = vmatprep.mubr.bf16.mxu0 %v7585_v44  ;;  %3443 = vmatprep.mubr.bf16.mxu1 %v7585_v44  ;;  %v3740_v62 = vsel %vm3708_vm13, %v3692_v19, %v3724_v63  ;;  %v3694_v42 = vadd.f32 %v3678_v12, %v6931_v30  ;;  %v3696_v38 = vadd.f32 %v3680_v4, %v6931_v30 }
 0x4cd   :  { %v7004_v55 = vpack.c.bf16 %v3740_v62, %v3738_v5  ;;  %v3737_v22 = vsel %vm3705_vm14, %v3689_v37, %v3721_v13  ;;  %v3739_v3 = vsel %vm3707_vm15, %v3691_v6, %v3723_v46  ;;  %v3677_v48 = vmul.f32 %v3661_v39, %v6909_v24 }
 0x4ce   :  { %v7007_v26 = vpack.c.bf16 %v3739_v3, %v3737_v22  ;;  %vm3710_vm1 = vcmp.gt.f32.partialorder %v3694_v42, 0.0  ;;  %vm3712_vm2 = vcmp.gt.f32.partialorder %v3696_v38, 0.0  ;;  %v3726_v57 = vmul.f32 0.2, %v3694_v42 }
 0x4cf   :  { %v3728_v36 = vmul.f32 0.2, %v3696_v38  ;;  %v3679_v27 = vmul.f32 %v3663_v59, %v6909_v24  ;;  %v3693_v35 = vadd.f32 %v3677_v48, %v6922_v50 }
 0x4d0   :  { %v3742_v43 = vsel %vm3710_vm1, %v3694_v42, %v3726_v57 }
 0x4d1   :  { %v3744_v30 = vsel %vm3712_vm2, %v3696_v38, %v3728_v36  ;;  %v3695_v51 = vadd.f32 %v3679_v27, %v6922_v50  ;;  %vm3709_vm3 = vcmp.gt.f32.partialorder %v3693_v35, 0.0  ;;  %v3725_v7 = vmul.f32 0.2, %v3693_v35 }
 0x4d2   :  { %v7012_v45 = vpack.c.bf16 %v3744_v30, %v3742_v43 }
 0x4d3   :  { %vm3711_vm4 = vcmp.gt.f32.partialorder %v3695_v51, 0.0  ;;  %v3727_v47 = vmul.f32 0.2, %v3695_v51  ;;  %v3741_v19 = vsel %vm3709_vm3, %v3693_v35, %v3725_v7 }
 0x4d5   :  { %v3743_v21 = vsel %vm3711_vm4, %v3695_v51, %v3727_v47 }
 0x4d6   :  { %v7014_v37 = vpack.c.bf16 %v3743_v21, %v3741_v19 }
 0x4d8   :  { %7586 = vst [vmem:[#allocation11_spill] sm:$0xff] %v7014_v37 }
 0x573   :  { %v3195_v15 = vpop.f32.mrf.mxu1  ;;  %v7016_v33 = vpop.f32.mrf.mxu0 }
 0x575   :  { %v3197_v24 = vpop.f32.mrf.mxu1  ;;  %v3270_v8 = vpop.f32.mrf.mxu0 }
 0x577   :  { %v3199_v6 = vpop.f32.mrf.mxu1  ;;  %v7018_v12 = vpop.f32.mrf.mxu0 }
 0x579   :  { %v3201_v4 = vpop.f32.mrf.mxu1  ;;  %v3273_v50 = vpop.f32.mrf.mxu0 }
 0x57b   :  { %v3205_v63 = vpop.f32.mrf.mxu1  ;;  %v7020_v5 = vpop.f32.mrf.mxu0 }
 0x57d   :  { %v3207_v13 = vpop.f32.mrf.mxu1  ;;  %v3278_v46 = vpop.f32.mrf.mxu0 }
 0x57f   :  { %v3209_v62 = vpop.f32.mrf.mxu1  ;;  %v3279_v42 = vpop.f32.mrf.mxu0 }
 0x581   :  { %v3211_v38 = vpop.f32.mrf.mxu1  ;;  %v3281_v39 = vpop.f32.mrf.mxu0 }
 0x583   :  { %v3215_v22 = vpop.f32.mrf.mxu1  ;;  %v3284_v3 = vpop.f32.mrf.mxu0 }
 0x585   :  { %v3217_v48 = vpop.f32.mrf.mxu1  ;;  %v3286_v57 = vpop.f32.mrf.mxu0 }
 0x586   :  { %v3303_v57 = vpack.c.bf16 %v3211_v38, %v3207_v13  ;;  %v5459_v13 = vld [vmem:[%s7515_s3 + $0x18] sm:$0xff]  }
 0x587   :  { %v3219_v59 = vpop.f32.mrf.mxu1  ;;  %v3287_v36 = vpop.f32.mrf.mxu0  ;;  %v5464_v38 = vld [vmem:[%s7512_s8 + $0x38] ss:$12 sps:$4 sm:$0xff]  }
 0x588   :  { %v3305_v39 = vpack.c.bf16 %v3219_v59, %v3215_v22 }
 0x589   :  { %v3221_v27 = vpop.f32.mrf.mxu1  ;;  %v3289_v35 = vpop.f32.mrf.mxu0 }
 0x58a   :  { %v3306_v37 = vpack.c.bf16 %v3221_v27, %v3217_v48  ;;  %v3302_v35 = vpack.c.bf16 %v3209_v62, %v3205_v63  ;;  %v5454_v27 = vld [vmem:[%s7515_s3] sm:$0xff]   ;;  %v5458_v63 = vld [vmem:[%s7515_s3 + $0x8] sm:$0xff]  }
 0x58b   :  { %v3225_v43 = vpop.f32.mrf.mxu1  ;;  %v3292_v30 = vpop.f32.mrf.mxu0  ;;  %v5460_v62 = vld [vmem:[%s7512_s8 + $0x80] ss:$12 sps:$4 sm:$0xff]  }
 0x58d   :  { %v3227_v51 = vpop.f32.mrf.mxu1  ;;  %v3294_v7 = vpop.f32.mrf.mxu0 }
 0x58e   :  { %v3300_v7 = vpack.c.bf16 %v3201_v4, %v3197_v24  ;;  %v5456_v24 = vld [vmem:[%s7512_s8 + $0xb0] ss:$12 sps:$4 sm:$0xff]   ;;  %v3307_v4 = vpack.c.bf16 %v3287_v36, %v3284_v3 }
 0x58f   :  { %v3229_v47 = vpop.f32.mrf.mxu1  ;;  %v3295_v19 = vpop.f32.mrf.mxu0 }
 0x590   :  { %v3308_v46 = vpack.c.bf16 %v3229_v47, %v3225_v43  ;;  %v3299_v43 = vpack.c.bf16 %v3199_v6, %v3195_v15  ;;  %v3310_v48 = vpack.c.bf16 %v3295_v19, %v3292_v30  ;;  %v5457_v15 = vld [vmem:[%s7512_s8 + $0x98] ss:$12 sps:$4 sm:$0xff]   ;;  %v3304_v6 = vpack.c.bf16 %v3279_v42, %v7020_v5  ;;  %v5461_v42 = vld [vmem:[%s7512_s8 + $0x68] ss:$12 sps:$4 sm:$0xff]  }
 0x591   :  { %v3231_v21 = vpop.f32.mrf.mxu1  ;;  %v3297_v8 = vpop.f32.mrf.mxu0  ;;  %v3301_v5 = vpack.c.bf16 %v7018_v12, %v7016_v33  ;;  %v5462_v33 = vld [vmem:[%s7515_s3 + $0x20] sm:$0xff]   ;;  %v5463_v12 = vld [vmem:[%s7512_s8 + $0x50] ss:$12 sps:$4 sm:$0xff]  }
 0x592   :  { %v3309_v50 = vpack.c.bf16 %v3231_v21, %v3227_v51 }
 0x594   :  { %3399 = vmatprep.subr.bf16.mxu0 %v3309_v50  ;;  %5154 = vmatprep.subr.bf16.mxu1 %v3309_v50 }
 0x595   :  { %3400 = vmatpush1.bf16.msra.mxu0 %v3308_v46  ;;  %5158 = vmatpush1.bf16.msra.mxu1 %v3308_v46 }
 0x596   :  { %3401 = vmatprep.subr.bf16.mxu0 %v3306_v37  ;;  %5155 = vmatprep.subr.bf16.mxu1 %v3306_v37  ;;  %v5455_v37 = vld [vmem:[%s7515_s3 + $0x10] sm:$0xff]  }
 0x599   :  { %3402 = vmatpush1.bf16.msra.mxu0 %v3305_v39  ;;  %5159 = vmatpush1.bf16.msra.mxu1 %v3305_v39 }
 0x59a   :  { %3403 = vmatprep.subr.bf16.mxu0 %v3303_v57  ;;  %5156 = vmatprep.subr.bf16.mxu1 %v3303_v57 }
 0x59d   :  { %3404 = vmatpush1.bf16.msra.mxu0 %v3302_v35  ;;  %5160 = vmatpush1.bf16.msra.mxu1 %v3302_v35 }
 0x59e   :  { %3405 = vmatprep.subr.bf16.mxu0 %v3300_v7  ;;  %5157 = vmatprep.subr.bf16.mxu1 %v3300_v7 }
 0x5a1   :  { %3406 = vmatpush1.bf16.msra.mxu0 %v3299_v43  ;;  %5161 = vmatpush1.bf16.msra.mxu1 %v3299_v43 }
 0x5a2   :  { %5106 = vmatprep.subr.bf16.mxu0 %v3310_v48  ;;  %4078 = vmatprep.subr.bf16.mxu1 %v7585_v44 }
 0x5a4   :  { %4950 = vmatmul.mubr.msk.bf16.vlgmr.msra.gmra.mxu0 %vm109_vm0, %v5454_v27  ;;  %4952 = vmatmul.mubr.msk.bf16.vlgmr.msra.gmra.mxu1 %vm109_vm0, %v5455_v37 }
 0x5a5   :  { %5107 = vmatpush3.bf16.msra.mxu0 %v3310_v48  ;;  %4079 = vmatpush1.bf16.msra.mxu1 %v5456_v24 }
 0x5a6   :  { %5108 = vmatprep.subr.bf16.mxu0 %v3307_v4  ;;  %4080 = vmatprep.subr.bf16.mxu1 %v7585_v44 }
 0x5a7   :  { %3433 = vmatprep.mubr.bf16.mxu0 %v7585_v44  ;;  %3453 = vmatprep.mubr.bf16.mxu1 %v7585_v44 }
 0x5a9   :  { %5109 = vmatpush3.bf16.msra.mxu0 %v3307_v4  ;;  %4081 = vmatpush1.bf16.msra.mxu1 %v5457_v15 }
 0x5aa   :  { %5110 = vmatprep.subr.bf16.mxu0 %v3304_v6  ;;  %4082 = vmatprep.subr.bf16.mxu1 %v7585_v44 }
 0x5ac   :  { %4951 = vmatmul.mubr.msk.bf16.gmra.mxu0 %vm109_vm0, %v5458_v63  ;;  %4953 = vmatmul.mubr.msk.bf16.gmra.mxu1 %vm109_vm0, %v5459_v13 }
 0x5ad   :  { %5111 = vmatpush3.bf16.msra.mxu0 %v3304_v6  ;;  %4083 = vmatpush1.bf16.msra.mxu1 %v5460_v62 }
 0x5ae   :  { %5112 = vmatprep.subr.bf16.mxu0 %v3301_v5  ;;  %4084 = vmatprep.subr.bf16.mxu1 %v7585_v44 }
 0x5af   :  { %3463 = vmatprep.mubr.bf16.mxu1 %v7585_v44  ;;  %5114 = vmatprep.mubr.msk.bf16.mxu0 %vm109_vm0, %v5454_v27 }
 0x5b1   :  { %5113 = vmatpush3.bf16.msra.mxu0 %v3301_v5  ;;  %4085 = vmatpush1.bf16.msra.mxu1 %v5461_v42 }
 0x5b2   :  { %4005 = vmatprep.subr.bf16.mxu0 %v6748_v32  ;;  %4086 = vmatprep.subr.bf16.mxu1 %v7585_v44  ;;  %v5465_v32 = vld [vmem:[%s7515_s3 + $0x28] sm:$0xff]  }
 0x5b4   :  { %4954 = vmatmul.mubr.msk.bf16.gmra.mxu1 %vm109_vm0, %v5462_v33  ;;  %5115 = vmatmul.mubr.msk.bf16.vlgmr.msra.gmra.mxu0 %vm109_vm0, %v5458_v63 }
 0x5b5   :  { %4006 = vmatpush1.bf16.msra.mxu0 %v6758_v10  ;;  %4087 = vmatpush1.bf16.msra.mxu1 %v5463_v12  ;;  %v5466_v10 = vld [vmem:[%s7512_s8 + $0x20] ss:$12 sps:$4 sm:$0xff]  }
 0x5b6   :  { %4007 = vmatprep.subr.bf16.mxu0 %v6764_v28  ;;  %4088 = vmatprep.subr.bf16.mxu1 %v7585_v44  ;;  %v5467_v28 = vld [vmem:[%s7512_s8 + $0x8] ss:$12 sps:$4 sm:$0xff]  }
 0x5b7   :  { %3473 = vmatprep.mubr.bf16.mxu1 %v7585_v44  ;;  %5118 = vmatprep.mubr.msk.bf16.mxu0 %vm109_vm0, %v5455_v37 }
 0x5b9   :  { %4008 = vmatpush1.bf16.msra.mxu0 %v6770_v1  ;;  %4089 = vmatpush1.bf16.msra.mxu1 %v5464_v38  ;;  %v5468_v1 = vld [vmem:[%s7515_s3 + $0x30] sm:$0xff]  }
 0x5ba   :  { %4009 = vmatprep.subr.bf16.mxu0 %v6776_v31  ;;  %4090 = vmatprep.subr.bf16.mxu1 %v7585_v44  ;;  %v5469_v31 = vld [vmem:[%s7512_s8 + $0x110] ss:$12 sps:$4 sm:$0xff]  }
 0x5bc   :  { %4955 = vmatmul.mubr.msk.bf16.gmra.mxu1 %vm109_vm0, %v5465_v32  ;;  %5119 = vmatmul.mubr.msk.bf16.gmra.mxu0 %vm109_vm0, %v5459_v13 }
 0x5bd   :  { %4010 = vmatpush1.bf16.msra.mxu0 %v6782_v52  ;;  %4091 = vmatpush1.bf16.msra.mxu1 %v5466_v10  ;;  %v5470_v52 = vld [vmem:[%s7512_s8 + $0xf8] ss:$12 sps:$4 sm:$0xff]  }
 0x5be   :  { %4011 = vmatprep.subr.bf16.mxu0 %v6788_v18  ;;  %4092 = vmatprep.subr.bf16.mxu1 %v7585_v44  ;;  %v5471_v18 = vld [vmem:[%s7515_s3 + $0x38] sm:$0xff]  }
 0x5bf   :  { %3483 = vmatprep.mubr.bf16.mxu1 %v7585_v44  ;;  %5122 = vmatprep.mubr.msk.bf16.mxu0 %vm109_vm0, %v5462_v33 }
 0x5c1   :  { %4012 = vmatpush1.bf16.msra.mxu0 %v6794_v20  ;;  %4093 = vmatpush1.bf16.msra.mxu1 %v5467_v28  ;;  %v5472_v20 = vld [vmem:[%s7512_s8 + $0xe0] ss:$12 sps:$4 sm:$0xff]  }
 0x5c2   :  { %4013 = vmatprep.subr.bf16.mxu0 %v6800_v23  ;;  %4102 = vmatprep.subr.bf16.mxu1 %v7585_v44  ;;  %v5473_v23 = vld [vmem:[%s7512_s8 + $0xc8] ss:$12 sps:$4 sm:$0xff]  }
 0x5c4   :  { %4956 = vmatmul.mubr.msk.bf16.gmra.mxu1 %vm109_vm0, %v5468_v1  ;;  %5123 = vmatmul.mubr.msk.bf16.gmra.mxu0 %vm109_vm0, %v5465_v32 }
 0x5c5   :  { %4014 = vmatpush1.bf16.msra.mxu0 %v6806_v60  ;;  %4103 = vmatpush2.bf16.msra.mxu1 %v5469_v31  ;;  %v7587_v60 = vld [vmem:[#allocation11_spill] sm:$0xff] }
 0x5c6   :  { %4015 = vmatprep.subr.bf16.mxu0 %v6812_v16  ;;  %4104 = vmatprep.subr.bf16.mxu1 %v7585_v44  ;;  %v7171_v16 = vld [vmem:[%s7515_s3] sm:$0xff]  }
 0x5c7   :  { %3493 = vmatprep.mubr.bf16.mxu1 %v7585_v44  ;;  %5126 = vmatprep.mubr.msk.bf16.mxu0 %vm109_vm0, %v5468_v1 }
 0x5c9   :  { %4016 = vmatpush1.bf16.msra.mxu0 %v6818_v54  ;;  %4105 = vmatpush2.bf16.msra.mxu1 %v5470_v52 }
 0x5ca   :  { %4017 = vmatprep.subr.bf16.mxu0 %v6824_v2  ;;  %4106 = vmatprep.subr.bf16.mxu1 %v7585_v44 }
 0x5cc   :  { %4957 = vmatmul.mubr.msk.bf16.gmra.mxu1 %vm109_vm0, %v5471_v18  ;;  %5127 = vmatmul.mubr.msk.bf16.gmra.mxu0 %vm109_vm0, %v5471_v18 }
 0x5cd   :  { %4018 = vmatpush1.bf16.msra.mxu0 %v6830_v56  ;;  %5002 = vmatprep.mubr.msk.bf16.mxu0 %vm109_vm0, %v6975_v14 }
 0x5ce   :  { %4107 = vmatpush2.bf16.msra.mxu1 %v5472_v20  ;;  %5006 = vmatprep.mubr.msk.bf16.mxu1 %vm109_vm0, %v6975_v14 }
 0x5cf   :  { %4019 = vmatprep.subr.bf16.mxu0 %v6836_v11  ;;  %4108 = vmatprep.subr.bf16.mxu1 %v7585_v44 }
 0x5d1   :  { %4020 = vmatpush1.bf16.msra.mxu0 %v6842_v49 }
 0x5d2   :  { %4109 = vmatpush2.bf16.msra.mxu1 %v5473_v23  ;;  %4029 = vmatprep.subr.bf16.mxu0 %v6849_v61 }
 0x5d5   :  { %4111 = vmatmul.mubr.bf16.vlgmr.msra.gmra.mxu1 %v6981_v25  ;;  %4030 = vmatpush2.bf16.msra.mxu0 %v6854_v53 }
 0x5d6   :  { %5007 = vmatprep.mubr.msk.bf16.mxu1 %vm109_vm0, %v6985_v0  ;;  %4031 = vmatprep.subr.bf16.mxu0 %v6864_v34 }
 0x5d9   :  { %4032 = vmatpush2.bf16.msra.mxu0 %v6870_v58 }
 0x5da   :  { %4033 = vmatprep.subr.bf16.mxu0 %v6885_v29 }
 0x5dd   :  { %4119 = vmatmul.mubr.bf16.gmra.mxu1 %v6996_v40  ;;  %4034 = vmatpush2.bf16.msra.mxu0 %v6880_v9 }
 0x5de   :  { %5008 = vmatprep.mubr.msk.bf16.mxu1 %vm109_vm0, %v7004_v55  ;;  %4035 = vmatprep.subr.bf16.mxu0 %v6894_v17 }
 0x5e1   :  { %4036 = vmatpush2.bf16.msra.mxu0 %v6901_v41 }
 0x5e4   :  { %4038 = vmatmul.mubr.bf16.vlgmr.msra.gmra.mxu0 %v6981_v25 }
 0x5e5   :  { %4127 = vmatmul.mubr.bf16.gmra.mxu1 %v7007_v26  ;;  %5003 = vmatprep.mubr.msk.bf16.mxu0 %vm109_vm0, %v6985_v0 }
 0x5e6   :  { %5009 = vmatprep.mubr.msk.bf16.mxu1 %vm109_vm0, %v7012_v45 }
 0x5ec   :  { %4048 = vmatmul.mubr.bf16.gmra.mxu0 %v6996_v40 }
 0x5ed   :  { %4135 = vmatmul.mubr.bf16.gmra.mxu1 %v7587_v60  ;;  %5004 = vmatprep.mubr.msk.bf16.mxu0 %vm109_vm0, %v7004_v55 }
 0x5ee   :  { %5138 = vmatprep.mubr.msk.bf16.mxu1 %vm109_vm0, %v7171_v16 }
 0x5f4   :  { %4058 = vmatmul.mubr.bf16.gmra.mxu0 %v7007_v26 }
 0x5f5   :  { %5005 = vmatprep.mubr.msk.bf16.mxu0 %vm109_vm0, %v7012_v45 }
 0x5fc   :  { %4068 = vmatmul.mubr.bf16.gmra.mxu0 %v7587_v60 }
 0x5fd   :  { %4267 = vmatprep.mubr.bf16.mxu0 %v7585_v44 }
 0x664   :  { %v3425_v54 = vpop.f32.mrf.mxu0  ;;  %v3445_v2 = vpop.f32.mrf.mxu1 }
 0x665   :  { %3601 = vst [vmem:[%s7516_s9] sm:$0xff] %v3425_v54  ;;  %3613 = vst [vmem:[%s7516_s9 + $0x60] sm:$0xff] %v3445_v2 }
 0x666   :  { %v3427_v56 = vpop.f32.mrf.mxu0  ;;  %v3447_v11 = vpop.f32.mrf.mxu1 }
 0x667   :  { %3602 = vst [vmem:[%s7516_s9 + $0x8] sm:$0xff] %v3427_v56  ;;  %3614 = vst [vmem:[%s7516_s9 + $0x68] sm:$0xff] %v3447_v11 }
 0x668   :  { %v3429_v49 = vpop.f32.mrf.mxu0  ;;  %v3449_v61 = vpop.f32.mrf.mxu1 }
 0x669   :  { %3604 = vst [vmem:[%s7516_s9 + $0x18] sm:$0xff] %v3429_v49  ;;  %3616 = vst [vmem:[%s7516_s9 + $0x78] sm:$0xff] %v3449_v61 }
 0x66a   :  { %v3431_v53 = vpop.f32.mrf.mxu0  ;;  %v3451_v34 = vpop.f32.mrf.mxu1 }
 0x66b   :  { %3605 = vst [vmem:[%s7516_s9 + $0x20] sm:$0xff] %v3431_v53  ;;  %3617 = vst [vmem:[%s7516_s9 + $0x80] sm:$0xff] %v3451_v34 }
 0x66c   :  { %v3435_v58 = vpop.f32.mrf.mxu0  ;;  %v3455_v9 = vpop.f32.mrf.mxu1 }
 0x66d   :  { %3607 = vst [vmem:[%s7516_s9 + $0x30] sm:$0xff] %v3435_v58  ;;  %3619 = vst [vmem:[%s7516_s9 + $0x90] sm:$0xff] %v3455_v9 }
 0x66e   :  { %v3437_v29 = vpop.f32.mrf.mxu0  ;;  %v3457_v17 = vpop.f32.mrf.mxu1 }
 0x66f   :  { %3608 = vst [vmem:[%s7516_s9 + $0x38] sm:$0xff] %v3437_v29  ;;  %3620 = vst [vmem:[%s7516_s9 + $0x98] sm:$0xff] %v3457_v17 }
 0x670   :  { %v3439_v41 = vpop.f32.mrf.mxu0  ;;  %v3459_v14 = vpop.f32.mrf.mxu1 }
 0x671   :  { %3610 = vst [vmem:[%s7516_s9 + $0x48] sm:$0xff] %v3439_v41  ;;  %3622 = vst [vmem:[%s7516_s9 + $0xa8] sm:$0xff] %v3459_v14 }
 0x672   :  { %v3441_v25 = vpop.f32.mrf.mxu0  ;;  %v3461_v0 = vpop.f32.mrf.mxu1 }
 0x673   :  { %3611 = vst [vmem:[%s7516_s9 + $0x50] sm:$0xff] %v3441_v25  ;;  %3623 = vst [vmem:[%s7516_s9 + $0xb0] sm:$0xff] %v3461_v0 }
 0x674   :  { %v3465_v40 = vpop.f32.mrf.mxu1  ;;  %v5116_v55 = vpop.f32.mrf.mxu0 }
 0x675   :  { %3625 = vst [vmem:[%s7516_s9 + $0xc0] sm:$0xff] %v3465_v40  ;;  %3609 = vst [vmem:[%s7516_s9 + $0x40] sm:$0xff] %v5116_v55 }
 0x676   :  { %v3467_v26 = vpop.f32.mrf.mxu1  ;;  %v3538_v45 = vpop.f32.mrf.mxu0 }
 0x677   :  { %3626 = vst [vmem:[%s7516_s9 + $0xc8] sm:$0xff] %v3467_v26  ;;  %3603 = vst [vmem:[%s7516_s9 + $0x10] sm:$0xff] %v3538_v45 }
 0x678   :  { %v3469_v22 = vpop.f32.mrf.mxu1  ;;  %v5117_v3 = vpop.f32.mrf.mxu0 }
 0x679   :  { %3628 = vst [vmem:[%s7516_s9 + $0xd8] sm:$0xff] %v3469_v22  ;;  %3612 = vst [vmem:[%s7516_s9 + $0x58] sm:$0xff] %v5117_v3 }
 0x67a   :  { %v3471_v59 = vpop.f32.mrf.mxu1  ;;  %v3541_v36 = vpop.f32.mrf.mxu0 }
 0x67b   :  { %3629 = vst [vmem:[%s7516_s9 + $0xe0] sm:$0xff] %v3471_v59  ;;  %3606 = vst [vmem:[%s7516_s9 + $0x28] sm:$0xff] %v3541_v36  ;;  %v5475_v59 = vld [vmem:[%s7515_s3 + $0x8] sm:$0xff]  }
 0x67c   :  { %v3475_v30 = vpop.f32.mrf.mxu1  ;;  %v5120_v51 = vpop.f32.mrf.mxu0 }
 0x67d   :  { %3631 = vst [vmem:[%s7516_s9 + $0xf0] sm:$0xff] %v3475_v30  ;;  %3621 = vst [vmem:[%s7516_s9 + $0xa0] sm:$0xff] %v5120_v51  ;;  %v5476_v30 = vld [vmem:[%s7515_s3 + $0x10] sm:$0xff]  }
 0x67e   :  { %v3477_v47 = vpop.f32.mrf.mxu1  ;;  %v3554_v19 = vpop.f32.mrf.mxu0 }
 0x67f   :  { %3632 = vst [vmem:[%s7516_s9 + $0xf8] sm:$0xff] %v3477_v47  ;;  %3615 = vst [vmem:[%s7516_s9 + $0x70] sm:$0xff] %v3554_v19 }
 0x680   :  { %v3479_v21 = vpop.f32.mrf.mxu1  ;;  %v5121_v8 = vpop.f32.mrf.mxu0 }
 0x681   :  { %3634 = vst [vmem:[%s7516_s9 + $0x108] sm:$0xff] %v3479_v21  ;;  %3624 = vst [vmem:[%s7516_s9 + $0xb8] sm:$0xff] %v5121_v8  ;;  %v5477_v8 = vld [vmem:[%s7515_s3 + $0x18] sm:$0xff]  }
 0x682   :  { %v3481_v50 = vpop.f32.mrf.mxu1  ;;  %v3557_v46 = vpop.f32.mrf.mxu0 }
 0x683   :  { %3635 = vst [vmem:[%s7516_s9 + $0x110] sm:$0xff] %v3481_v50  ;;  %3618 = vst [vmem:[%s7516_s9 + $0x88] sm:$0xff] %v3557_v46  ;;  %v5478_v50 = vld [vmem:[%s7515_s3 + $0x20] sm:$0xff]  }
 0x684   :  { %v3485_v39 = vpop.f32.mrf.mxu1  ;;  %v5124_v57 = vpop.f32.mrf.mxu0 }
 0x685   :  { %3637 = vst [vmem:[%s7516_s9 + $0x120] sm:$0xff] %v3485_v39  ;;  %3633 = vst [vmem:[%s7516_s9 + $0x100] sm:$0xff] %v5124_v57 }
 0x686   :  { %v3487_v35 = vpop.f32.mrf.mxu1  ;;  %v3570_v7 = vpop.f32.mrf.mxu0 }
 0x687   :  { %3638 = vst [vmem:[%s7516_s9 + $0x128] sm:$0xff] %v3487_v35  ;;  %3627 = vst [vmem:[%s7516_s9 + $0xd0] sm:$0xff] %v3570_v7  ;;  %v5480_v35 = vld [vmem:[%s7515_s3 + $0x30] sm:$0xff]   ;;  %v5479_v7 = vld [vmem:[%s7515_s3 + $0x28] sm:$0xff]  }
 0x688   :  { %v3489_v43 = vpop.f32.mrf.mxu1  ;;  %v5125_v48 = vpop.f32.mrf.mxu0 }
 0x689   :  { %3640 = vst [vmem:[%s7516_s9 + $0x138] sm:$0xff] %v3489_v43  ;;  %3636 = vst [vmem:[%s7516_s9 + $0x118] sm:$0xff] %v5125_v48  ;;  %v5481_v43 = vld [vmem:[%s7515_s3 + $0x38] sm:$0xff]  }
 0x68a   :  { %v3491_v27 = vpop.f32.mrf.mxu1  ;;  %v3573_v37 = vpop.f32.mrf.mxu0 }
 0x68b   :  { %3641 = vst [vmem:[%s7516_s9 + $0x140] sm:$0xff] %v3491_v27  ;;  %3630 = vst [vmem:[%s7516_s9 + $0xe8] sm:$0xff] %v3573_v37 }
 0x68c   :  { %v3495_v24 = vpop.f32.mrf.mxu1  ;;  %v5128_v4 = vpop.f32.mrf.mxu0 }
 0x68d   :  { %3643 = vst [vmem:[%s7516_s9 + $0x150] sm:$0xff] %v3495_v24  ;;  %3645 = vst [vmem:[%s7516_s9 + $0x160] sm:$0xff] %v5128_v4 }
 0x68e   :  { %v3497_v15 = vpop.f32.mrf.mxu1  ;;  %v3586_v6 = vpop.f32.mrf.mxu0 }
 0x68f   :  { %3644 = vst [vmem:[%s7516_s9 + $0x158] sm:$0xff] %v3497_v15  ;;  %3639 = vst [vmem:[%s7516_s9 + $0x130] sm:$0xff] %v3586_v6 }
 0x690   :  { %v3499_v63 = vpop.f32.mrf.mxu1  ;;  %v5129_v13 = vpop.f32.mrf.mxu0 }
 0x691   :  { %3646 = vst [vmem:[%s7516_s9 + $0x168] sm:$0xff] %v3499_v63  ;;  %3648 = vst [vmem:[%s7516_s9 + $0x178] sm:$0xff] %v5129_v13 }
 0x692   :  { %v3501_v62 = vpop.f32.mrf.mxu1  ;;  %v3589_v5 = vpop.f32.mrf.mxu0 }
 0x693   :  { %3647 = vst [vmem:[%s7516_s9 + $0x170] sm:$0xff] %v3501_v62  ;;  %3642 = vst [vmem:[%s7516_s9 + $0x148] sm:$0xff] %v3589_v5 }
 0x695   :  { %v4112_v42 = vpop.f32.mrf.mxu1 }
 0x697   :  { %v4114_v33 = vpop.f32.mrf.mxu1 }
 0x699   :  { %v4115_v12 = vpop.f32.mrf.mxu1 }
 0x69a   :  { %v4145_v55 = vpack.c.bf16 %v4115_v12, %v4112_v42 }
 0x69b   :  { %v4117_v38 = vpop.f32.mrf.mxu1 }
 0x69d   :  { %v4120_v32 = vpop.f32.mrf.mxu1 }
 0x69f   :  { %v4122_v10 = vpop.f32.mrf.mxu1 }
 0x6a1   :  { %v4123_v28 = vpop.f32.mrf.mxu1 }
 0x6a2   :  { %v4148_v25 = vpack.c.bf16 %v4123_v28, %v4120_v32 }
 0x6a3   :  { %v4125_v1 = vpop.f32.mrf.mxu1 }
 0x6a4   :  { %v4039_v31 = vpop.f32.mrf.mxu0 }
 0x6a5   :  { %v4128_v52 = vpop.f32.mrf.mxu1 }
 0x6a6   :  { %v4041_v18 = vpop.f32.mrf.mxu0 }
 0x6a7   :  { %v4130_v20 = vpop.f32.mrf.mxu1 }
 0x6a8   :  { %v4043_v23 = vpop.f32.mrf.mxu0 }
 0x6a9   :  { %v4131_v60 = vpop.f32.mrf.mxu1  ;;  %v4143_v57 = vpack.c.bf16 %v4043_v23, %v4039_v31 }
 0x6aa   :  { %v4045_v54 = vpop.f32.mrf.mxu0  ;;  %v4151_v17 = vpack.c.bf16 %v4131_v60, %v4128_v52 }
 0x6ab   :  { %v4133_v2 = vpop.f32.mrf.mxu1  ;;  %v4144_v39 = vpack.c.bf16 %v4045_v54, %v4041_v18 }
 0x6ac   :  { %v4049_v56 = vpop.f32.mrf.mxu0 }
 0x6ad   :  { %v4136_v11 = vpop.f32.mrf.mxu1 }
 0x6ae   :  { %v4051_v49 = vpop.f32.mrf.mxu0 }
 0x6af   :  { %v4138_v61 = vpop.f32.mrf.mxu1 }
 0x6b0   :  { %v4053_v53 = vpop.f32.mrf.mxu0 }
 0x6b1   :  { %v4139_v34 = vpop.f32.mrf.mxu1  ;;  %v4146_v46 = vpack.c.bf16 %v4053_v53, %v4049_v56 }
 0x6b2   :  { %v4154_v58 = vpack.c.bf16 %v4139_v34, %v4136_v11  ;;  %v4055_v9 = vpop.f32.mrf.mxu0 }
 0x6b3   :  { %v4141_v29 = vpop.f32.mrf.mxu1  ;;  %v4147_v21 = vpack.c.bf16 %v4055_v9, %v4051_v49 }
 0x6b4   :  { %5130 = vmatprep.subr.bf16.mxu1 %v4154_v58  ;;  %v4059_v41 = vpop.f32.mrf.mxu0 }
 0x6b5   :  { %5131 = vmatpush3.bf16.msra.mxu1 %v4154_v58 }
 0x6b6   :  { %5132 = vmatprep.subr.bf16.mxu1 %v4151_v17  ;;  %v4061_v14 = vpop.f32.mrf.mxu0 }
 0x6b8   :  { %v4063_v0 = vpop.f32.mrf.mxu0 }
 0x6b9   :  { %5133 = vmatpush3.bf16.msra.mxu1 %v4151_v17  ;;  %v4149_v19 = vpack.c.bf16 %v4063_v0, %v4059_v41 }
 0x6ba   :  { %5134 = vmatprep.subr.bf16.mxu1 %v4148_v25  ;;  %v4065_v40 = vpop.f32.mrf.mxu0 }
 0x6bb   :  { %v4150_v47 = vpack.c.bf16 %v4065_v40, %v4061_v14 }
 0x6bc   :  { %v4069_v26 = vpop.f32.mrf.mxu0 }
 0x6bd   :  { %5135 = vmatpush3.bf16.msra.mxu1 %v4148_v25 }
 0x6be   :  { %5136 = vmatprep.subr.bf16.mxu1 %v4145_v55  ;;  %v4071_v45 = vpop.f32.mrf.mxu0 }
 0x6c0   :  { %v4073_v22 = vpop.f32.mrf.mxu0 }
 0x6c1   :  { %5137 = vmatpush3.bf16.msra.mxu1 %v4145_v55  ;;  %v4152_v51 = vpack.c.bf16 %v4073_v22, %v4069_v26 }
 0x6c2   :  { %v4075_v3 = vpop.f32.mrf.mxu0 }
 0x6c3   :  { %v4153_v36 = vpack.c.bf16 %v4075_v3, %v4071_v45 }
 0x6c4   :  { %5139 = vmatmul.mubr.msk.bf16.vlgmr.msra.gmra.mxu1 %vm109_vm0, %v5475_v59 }
 0x6c5   :  { %4243 = vmatprep.subr.bf16.mxu0 %v4153_v36  ;;  %5142 = vmatprep.mubr.msk.bf16.mxu1 %vm109_vm0, %v5476_v30 }
 0x6c6   :  { %4244 = vmatpush1.bf16.msra.mxu0 %v4152_v51 }
 0x6c7   :  { %4245 = vmatprep.subr.bf16.mxu0 %v4150_v47 }
 0x6ca   :  { %4246 = vmatpush1.bf16.msra.mxu0 %v4149_v19 }
 0x6cb   :  { %4247 = vmatprep.subr.bf16.mxu0 %v4147_v21 }
 0x6cc   :  { %5143 = vmatmul.mubr.msk.bf16.gmra.mxu1 %vm109_vm0, %v5477_v8 }
 0x6cd   :  { %5146 = vmatprep.mubr.msk.bf16.mxu1 %vm109_vm0, %v5478_v50 }
 0x6ce   :  { %4248 = vmatpush1.bf16.msra.mxu0 %v4146_v46 }
 0x6cf   :  { %4249 = vmatprep.subr.bf16.mxu0 %v4144_v39 }
 0x6d2   :  { %4250 = vmatpush1.bf16.msra.mxu0 %v4143_v57 }
 0x6d4   :  { %5147 = vmatmul.mubr.msk.bf16.gmra.mxu1 %vm109_vm0, %v5479_v7 }
 0x6d5   :  { %5018 = vmatmul.mubr.msk.bf16.vlgmr.msra.gmra.mxu0 %vm109_vm0, %v7171_v16  ;;  %5150 = vmatprep.mubr.msk.bf16.mxu1 %vm109_vm0, %v5480_v35 }
 0x6d6   :  { %4277 = vmatprep.mubr.bf16.mxu0 %v7585_v44 }
 0x6dc   :  { %5151 = vmatmul.mubr.msk.bf16.gmra.mxu1 %vm109_vm0, %v5481_v43 }
 0x6dd   :  { %5019 = vmatmul.mubr.msk.bf16.gmra.mxu0 %vm109_vm0, %v5475_v59 }
 0x6de   :  { %4287 = vmatprep.mubr.bf16.mxu0 %v7585_v44 }
 0x6e5   :  { %5020 = vmatmul.mubr.msk.bf16.gmra.mxu0 %vm109_vm0, %v5476_v30 }
 0x6e6   :  { %4297 = vmatprep.mubr.bf16.mxu0 %v7585_v44 }
 0x6ed   :  { %5021 = vmatmul.mubr.msk.bf16.gmra.mxu0 %vm109_vm0, %v5477_v8 }
 0x6ee   :  { %4307 = vmatprep.mubr.bf16.mxu0 %v7585_v44 }
 0x6f5   :  { %5022 = vmatmul.mubr.msk.bf16.gmra.mxu0 %vm109_vm0, %v5478_v50 }
 0x6f6   :  { %4317 = vmatprep.mubr.bf16.mxu0 %v7585_v44 }
 0x6fd   :  { %5023 = vmatmul.mubr.msk.bf16.gmra.mxu0 %vm109_vm0, %v5479_v7 }
 0x6fe   :  { %4327 = vmatprep.mubr.bf16.mxu0 %v7585_v44 }
 0x705   :  { %5024 = vmatmul.mubr.msk.bf16.gmra.mxu0 %vm109_vm0, %v5480_v35 }
 0x706   :  { %4337 = vmatprep.mubr.bf16.mxu0 %v7585_v44 }
 0x70d   :  { %5025 = vmatmul.mubr.msk.bf16.gmra.mxu0 %vm109_vm0, %v5481_v43 }
 0x784   :  { %v5140_v16 = vpop.f32.mrf.mxu1 }
 0x785   :  { %5042 = vst [vmem:[%s7516_s9 + $0x1c0] sm:$0xff] %v5140_v16 }
 0x786   :  { %v4382_v48 = vpop.f32.mrf.mxu1 }
 0x787   :  { %5036 = vst [vmem:[%s7516_s9 + $0x190] sm:$0xff] %v4382_v48 }
 0x788   :  { %v5141_v27 = vpop.f32.mrf.mxu1 }
 0x789   :  { %5045 = vst [vmem:[%s7516_s9 + $0x1d8] sm:$0xff] %v5141_v27 }
 0x78a   :  { %v4385_v37 = vpop.f32.mrf.mxu1 }
 0x78b   :  { %5039 = vst [vmem:[%s7516_s9 + $0x1a8] sm:$0xff] %v4385_v37 }
 0x78c   :  { %v5144_v44 = vpop.f32.mrf.mxu1 }
 0x78d   :  { %5054 = vst [vmem:[%s7516_s9 + $0x220] sm:$0xff] %v5144_v44 }
 0x78e   :  { %v4398_v24 = vpop.f32.mrf.mxu1 }
 0x78f   :  { %5048 = vst [vmem:[%s7516_s9 + $0x1f0] sm:$0xff] %v4398_v24 }
 0x790   :  { %v5145_v4 = vpop.f32.mrf.mxu1 }
 0x791   :  { %5057 = vst [vmem:[%s7516_s9 + $0x238] sm:$0xff] %v5145_v4 }
 0x792   :  { %v4401_v15 = vpop.f32.mrf.mxu1 }
 0x793   :  { %5051 = vst [vmem:[%s7516_s9 + $0x208] sm:$0xff] %v4401_v15 }
 0x794   :  { %v5148_v6 = vpop.f32.mrf.mxu1 }
 0x795   :  { %v4269_v63 = vpop.f32.mrf.mxu0  ;;  %5066 = vst [vmem:[%s7516_s9 + $0x280] sm:$0xff] %v5148_v6 }
 0x796   :  { %5034 = vst [vmem:[%s7516_s9 + $0x180] sm:$0xff] %v4269_v63  ;;  %v4414_v13 = vpop.f32.mrf.mxu1 }
 0x797   :  { %v4271_v62 = vpop.f32.mrf.mxu0  ;;  %5060 = vst [vmem:[%s7516_s9 + $0x250] sm:$0xff] %v4414_v13 }
 0x798   :  { %5035 = vst [vmem:[%s7516_s9 + $0x188] sm:$0xff] %v4271_v62  ;;  %v5149_v5 = vpop.f32.mrf.mxu1 }
 0x799   :  { %v4273_v42 = vpop.f32.mrf.mxu0  ;;  %5069 = vst [vmem:[%s7516_s9 + $0x298] sm:$0xff] %v5149_v5 }
 0x79a   :  { %5037 = vst [vmem:[%s7516_s9 + $0x198] sm:$0xff] %v4273_v42  ;;  %v4417_v33 = vpop.f32.mrf.mxu1 }
 0x79b   :  { %v4275_v12 = vpop.f32.mrf.mxu0  ;;  %5063 = vst [vmem:[%s7516_s9 + $0x268] sm:$0xff] %v4417_v33 }
 0x79c   :  { %5038 = vst [vmem:[%s7516_s9 + $0x1a0] sm:$0xff] %v4275_v12  ;;  %v5152_v38 = vpop.f32.mrf.mxu1 }
 0x79d   :  { %v4279_v32 = vpop.f32.mrf.mxu0  ;;  %5078 = vst [vmem:[%s7516_s9 + $0x2e0] sm:$0xff] %v5152_v38 }
 0x79e   :  { %5040 = vst [vmem:[%s7516_s9 + $0x1b0] sm:$0xff] %v4279_v32  ;;  %v4430_v10 = vpop.f32.mrf.mxu1 }
 0x79f   :  { %v4281_v28 = vpop.f32.mrf.mxu0  ;;  %5072 = vst [vmem:[%s7516_s9 + $0x2b0] sm:$0xff] %v4430_v10 }
 0x7a0   :  { %5041 = vst [vmem:[%s7516_s9 + $0x1b8] sm:$0xff] %v4281_v28  ;;  %v5153_v1 = vpop.f32.mrf.mxu1 }
 0x7a1   :  { %v4283_v31 = vpop.f32.mrf.mxu0  ;;  %5081 = vst [vmem:[%s7516_s9 + $0x2f8] sm:$0xff] %v5153_v1 }
 0x7a2   :  { %5043 = vst [vmem:[%s7516_s9 + $0x1c8] sm:$0xff] %v4283_v31  ;;  %v4433_v52 = vpop.f32.mrf.mxu1 }
 0x7a3   :  { %v4285_v18 = vpop.f32.mrf.mxu0  ;;  %5075 = vst [vmem:[%s7516_s9 + $0x2c8] sm:$0xff] %v4433_v52 }
 0x7a4   :  { %5044 = vst [vmem:[%s7516_s9 + $0x1d0] sm:$0xff] %v4285_v18 }
 0x7a5   :  { %v4289_v20 = vpop.f32.mrf.mxu0 }
 0x7a6   :  { %5046 = vst [vmem:[%s7516_s9 + $0x1e0] sm:$0xff] %v4289_v20 }
 0x7a7   :  { %v4291_v23 = vpop.f32.mrf.mxu0 }
 0x7a8   :  { %5047 = vst [vmem:[%s7516_s9 + $0x1e8] sm:$0xff] %v4291_v23 }
 0x7a9   :  { %v4293_v60 = vpop.f32.mrf.mxu0 }
 0x7aa   :  { %5049 = vst [vmem:[%s7516_s9 + $0x1f8] sm:$0xff] %v4293_v60 }
 0x7ab   :  { %v4295_v54 = vpop.f32.mrf.mxu0 }
 0x7ac   :  { %5050 = vst [vmem:[%s7516_s9 + $0x200] sm:$0xff] %v4295_v54 }
 0x7ad   :  { %v4299_v2 = vpop.f32.mrf.mxu0 }
 0x7ae   :  { %5052 = vst [vmem:[%s7516_s9 + $0x210] sm:$0xff] %v4299_v2 }
 0x7af   :  { %v4301_v56 = vpop.f32.mrf.mxu0 }
 0x7b0   :  { %5053 = vst [vmem:[%s7516_s9 + $0x218] sm:$0xff] %v4301_v56 }
 0x7b1   :  { %v4303_v11 = vpop.f32.mrf.mxu0 }
 0x7b2   :  { %5055 = vst [vmem:[%s7516_s9 + $0x228] sm:$0xff] %v4303_v11 }
 0x7b3   :  { %v4305_v49 = vpop.f32.mrf.mxu0 }
 0x7b4   :  { %5056 = vst [vmem:[%s7516_s9 + $0x230] sm:$0xff] %v4305_v49 }
 0x7b5   :  { %v4309_v61 = vpop.f32.mrf.mxu0 }
 0x7b6   :  { %5058 = vst [vmem:[%s7516_s9 + $0x240] sm:$0xff] %v4309_v61 }
 0x7b7   :  { %v4311_v53 = vpop.f32.mrf.mxu0 }
 0x7b8   :  { %5059 = vst [vmem:[%s7516_s9 + $0x248] sm:$0xff] %v4311_v53 }
 0x7b9   :  { %v4313_v34 = vpop.f32.mrf.mxu0 }
 0x7ba   :  { %5061 = vst [vmem:[%s7516_s9 + $0x258] sm:$0xff] %v4313_v34 }
 0x7bb   :  { %v4315_v58 = vpop.f32.mrf.mxu0 }
 0x7bc   :  { %5062 = vst [vmem:[%s7516_s9 + $0x260] sm:$0xff] %v4315_v58 }
 0x7bd   :  { %v4319_v9 = vpop.f32.mrf.mxu0 }
 0x7be   :  { %5064 = vst [vmem:[%s7516_s9 + $0x270] sm:$0xff] %v4319_v9 }
 0x7bf   :  { %v4321_v29 = vpop.f32.mrf.mxu0 }
 0x7c0   :  { %5065 = vst [vmem:[%s7516_s9 + $0x278] sm:$0xff] %v4321_v29 }
 0x7c1   :  { %v4323_v17 = vpop.f32.mrf.mxu0 }
 0x7c2   :  { %5067 = vst [vmem:[%s7516_s9 + $0x288] sm:$0xff] %v4323_v17 }
 0x7c3   :  { %v4325_v41 = vpop.f32.mrf.mxu0 }
 0x7c4   :  { %5068 = vst [vmem:[%s7516_s9 + $0x290] sm:$0xff] %v4325_v41 }
 0x7c5   :  { %v4329_v14 = vpop.f32.mrf.mxu0 }
 0x7c6   :  { %5070 = vst [vmem:[%s7516_s9 + $0x2a0] sm:$0xff] %v4329_v14 }
 0x7c7   :  { %v4331_v25 = vpop.f32.mrf.mxu0 }
 0x7c8   :  { %5071 = vst [vmem:[%s7516_s9 + $0x2a8] sm:$0xff] %v4331_v25 }
 0x7c9   :  { %v4333_v0 = vpop.f32.mrf.mxu0 }
 0x7ca   :  { %5073 = vst [vmem:[%s7516_s9 + $0x2b8] sm:$0xff] %v4333_v0 }
 0x7cb   :  { %v4335_v40 = vpop.f32.mrf.mxu0 }
 0x7cc   :  { %5074 = vst [vmem:[%s7516_s9 + $0x2c0] sm:$0xff] %v4335_v40 }
 0x7cd   :  { %v4339_v55 = vpop.f32.mrf.mxu0 }
 0x7ce   :  { %5076 = vst [vmem:[%s7516_s9 + $0x2d0] sm:$0xff] %v4339_v55 }
 0x7cf   :  { %v4341_v26 = vpop.f32.mrf.mxu0 }
 0x7d0   :  { %5077 = vst [vmem:[%s7516_s9 + $0x2d8] sm:$0xff] %v4341_v26 }
 0x7d1   :  { %v4343_v45 = vpop.f32.mrf.mxu0 }
 0x7d2   :  { %5079 = vst [vmem:[%s7516_s9 + $0x2e8] sm:$0xff] %v4343_v45 }
 0x7d3   :  { %v4345_v22 = vpop.f32.mrf.mxu0 }
 0x7d4   :  { %5080 = vst [vmem:[%s7516_s9 + $0x2f0] sm:$0xff] %v4345_v22 }

</bundles_post_ra>
